<compile_context>
chip_gen: v7x
topology: tpu7x:2x2x1
jax: 0.10.0
libtpu: 0.0.40
codegen_flags: <defaults>
</compile_context>

<pallas_src>
import math

import numpy as np
import jax
import jax.numpy as jnp
from jax.experimental import pallas as pl
from jax.experimental.pallas import tpu as pltpu

F32 = jnp.float32
BF16 = jnp.bfloat16

# ----------------------------- config ---------------------------------------
N_CLS = 4
N_CTX = 2
CTX_DIM = 32          # text transformer width (stands in for 512)
TEXT_HEADS = 2
TEXT_LAYERS = 2
N_ATT1 = 1
N_ATT2 = 1
TEXT_SEQ = 16
CTX_START = 1 + N_ATT1 + 1 + N_ATT2 + 1                      # = 5
SUFFIX_LEN = TEXT_SEQ - (CTX_START + N_CTX)                  # = 9
PROMPT_DEPTH = 2

VIS_WIDTH = 64        # vision transformer width (stands in for 768)
VIS_HEADS = 2
VIS_LAYERS = 2
IMG = 16
PATCH = 8
GRID = IMG // PATCH
NUM_PATCHES = GRID * GRID
IN_CH = 3
PATCH_DIM = IN_CH * PATCH * PATCH                            # 192
EMBED_DIM = 32
BATCH = 2
S_V = 1 + NUM_PATCHES + N_CTX                                # real length = 7
S_VP = 8                                                     # padded (dummy at row 7)
VIS_PROMPT_START = 1 + NUM_PATCHES                           # rows 5..6


# ----------------------------- host-side slab packer -------------------------
def _ceil_to(x, a):
    return (x + a - 1) // a * a


class _Packer:
    """Packs many small tensors into one (rows, width) slab, recording static
    (row_offset, shape) so the kernel can slice them back out of the VMEM ref."""

    def __init__(self, width, dtype, row_align):
        self.width, self.dtype, self.row_align = width, dtype, row_align
        self.blocks, self.index, self.off = [], {}, 0

    def add(self, name, arr):
        a = np.asarray(jax.device_get(arr), np.float32)
        if a.ndim == 1:
            a = a.reshape(1, -1)
        shape = tuple(int(d) for d in a.shape)
        a2 = a.reshape(-1, shape[-1])
        r, c = a2.shape
        assert c <= self.width, (name, c, self.width)
        rp = _ceil_to(r, self.row_align)
        block = np.zeros((rp, self.width), np.float32)
        block[:r, :c] = a2
        self.blocks.append(block)
        self.index[name] = (self.off, shape)
        self.off += rp

    def finish(self):
        return jnp.asarray(np.concatenate(self.blocks, axis=0)).astype(self.dtype)


# ----------------------------- fused Pallas kernel ---------------------------
def _make_kernel(idx):
    tw_idx, vw_idx, tf_idx, vf_idx = idx["tw"], idx["vw"], idx["tf"], idx["vf"]

    def _get(ref, index, name):
        off, shape = index[name]
        rows, cols = math.prod(shape[:-1]), shape[-1]
        v = ref[pl.ds(off, rows), pl.ds(0, cols)]     # static, sublane-aligned slice
        return v if len(shape) == 2 else v.reshape(shape)

    def kernel(tw_ref, vw_ref, tf_ref, vf_ref, patches_ref, scale_ref, out_ref):
        TW = lambda n: _get(tw_ref, tw_idx, n)        # bf16 text weights
        VW = lambda n: _get(vw_ref, vw_idx, n)        # bf16 vision weights
        TF = lambda n: _get(tf_ref, tf_idx, n)        # f32 text small tensors
        VF = lambda n: _get(vf_ref, vf_idx, n)        # f32 vision small tensors

        def ln(x, g, b):
            mu = jnp.mean(x, axis=-1, keepdims=True)
            xc = x - mu
            var = jnp.mean(xc * xc, axis=-1, keepdims=True)
            return xc * jax.lax.rsqrt(var + 1e-5) * g + b

        def block(x, S, D, H, l, Wg, Fg, pfx, attn_bias):
            """One residual transformer block (pre-LN, fused QKV, fused out-proj)."""
            dh = D // H
            scl = 1.0 / math.sqrt(dh)
            B = x.shape[0]
            # ---- attention ----
            h = ln(x, Fg(f"{pfx}{l}_ln1_g"), Fg(f"{pfx}{l}_ln1_b"))
            hb = h.reshape(B * S, D).astype(BF16)                      # one cast / layer
            qkv = jnp.dot(hb, Wg(f"{pfx}{l}_wqkv"),
                          preferred_element_type=F32) + Fg(f"{pfx}{l}_bqkv")
            qkv = qkv.reshape(B, S, 3 * D).astype(BF16)                # one cast / layer
            heads = []
            for hd in range(H):                                        # static unroll
                q = qkv[:, :, hd * dh:(hd + 1) * dh]
                k = qkv[:, :, D + hd * dh:D + (hd + 1) * dh]
                v = qkv[:, :, 2 * D + hd * dh:2 * D + (hd + 1) * dh]
                s = jnp.einsum("bqd,bkd->bqk", q, k,
                               preferred_element_type=F32) * scl + attn_bias
                s = s - jnp.max(s, axis=-1, keepdims=True)
                p = jnp.exp(s)                                         # f32 EUP
                p = p * pl.reciprocal(jnp.sum(p, axis=-1, keepdims=True), approx=True)
                heads.append(jnp.einsum("bqk,bkd->bqd", p.astype(BF16), v,
                                        preferred_element_type=F32))
            o = jnp.concatenate(heads, axis=-1).reshape(B * S, D).astype(BF16)
            attn = jnp.dot(o, Wg(f"{pfx}{l}_wo"),
                           preferred_element_type=F32) + Fg(f"{pfx}{l}_bo")
            x = x + attn.reshape(B, S, D)
            # ---- MLP (QuickGELU fused in epilogue) ----
            h = ln(x, Fg(f"{pfx}{l}_ln2_g"), Fg(f"{pfx}{l}_ln2_b"))
            y = jnp.dot(h.reshape(B * S, D).astype(BF16), Wg(f"{pfx}{l}_w1"),
                        preferred_element_type=F32) + Fg(f"{pfx}{l}_b1")
            y = y * jax.nn.sigmoid(1.702 * y)                          # f32 (v5e guard)
            y = jnp.dot(y.astype(BF16), Wg(f"{pfx}{l}_w2"),
                        preferred_element_type=F32) + Fg(f"{pfx}{l}_b2")
            return x + y.reshape(B, S, D)

        # ============================ text encoder ===========================
        x = TF("prompts_pos")                                    # (n_cls, S, D)
        rows = jax.lax.broadcasted_iota(jnp.int32, (TEXT_SEQ, TEXT_SEQ), 0)
        cols = jax.lax.broadcasted_iota(jnp.int32, (TEXT_SEQ, TEXT_SEQ), 1)
        causal_bias = jnp.where(rows >= cols, 0.0, -1e30).astype(F32)
        trow = jax.lax.broadcasted_iota(jnp.int32, (TEXT_SEQ, 1), 0)
        t_keep = jnp.where((trow >= CTX_START) & (trow < CTX_START + N_CTX),
                           0.0, 1.0).astype(F32)
        for l in range(TEXT_LAYERS):
            if 1 <= l < PROMPT_DEPTH:        # MaPLe deep text prompt: one select
                x = x * t_keep + TF(f"tinj{l - 1}")
            x = block(x, TEXT_SEQ, CTX_DIM, TEXT_HEADS, l, TW, TF, "t", causal_bias)
        x = ln(x, TF("ln_final_g"), TF("ln_final_b"))
        x_eot = jnp.sum(x * TF("eot_sel")[:, :, None], axis=1)   # EOT gather
        text_feat = jnp.dot(x_eot.astype(BF16), TW("text_proj"),
                            preferred_element_type=F32)          # (n_cls, embed)

        # ============================ image encoder ==========================
        pp = patches_ref[...]                                    # (B, S_VP, 192)
        B = pp.shape[0]
        pe = jnp.dot(pp.reshape(B * S_VP, PATCH_DIM).astype(BF16), VW("patch_w"),
                     preferred_element_type=F32).reshape(B, S_VP, VIS_WIDTH)
        # vis_static already holds cls+pos rows, shared_ctx at the prompt rows,
        # and zeros at the padding row; prompt/pad rows of pe are zero.
        v = pe + VF("vis_static")
        v = ln(v, VF("ln_pre_g"), VF("ln_pre_b"))
        vcols = jax.lax.broadcasted_iota(jnp.int32, (S_VP, S_VP), 1)
        vis_bias = jnp.where(vcols >= S_V, -1e30, 0.0).astype(F32)   # mask pad key
        vrow = jax.lax.broadcasted_iota(jnp.int32, (S_VP, 1), 0)
        v_keep = jnp.where((vrow >= VIS_PROMPT_START) & (vrow < VIS_PROMPT_START + N_CTX),
                           0.0, 1.0).astype(F32)
        for l in range(VIS_LAYERS):
            if 1 <= l < PROMPT_DEPTH:        # MaPLe deep visual prompt: one select
                v = v * v_keep + VF(f"vinj{l - 1}")
            v = block(v, S_VP, VIS_WIDTH, VIS_HEADS, l, VW, VF, "v", vis_bias)
        cls_tok = ln(v[:, 0, :], VF("ln_post_g"), VF("ln_post_b"))
        img_feat = jnp.dot(cls_tok.astype(BF16), VW("vis_proj"),
                           preferred_element_type=F32)           # (B, embed)

        # ====================== CLIP normalized logits =======================
        sc = scale_ref[0, 0]
        img_n = img_feat * jax.lax.rsqrt(
            jnp.sum(img_feat * img_feat, axis=-1, keepdims=True) + 1e-12)
        txt_n = text_feat * jax.lax.rsqrt(
            jnp.sum(text_feat * text_feat, axis=-1, keepdims=True) + 1e-12)
        out_ref[...] = sc * jax.lax.dot_general(
            img_n, txt_n, (((1,), (1,)), ((), ())), preferred_element_type=F32)

    return kernel


# ----------------------------- parameter init --------------------------------
def init_params(key):
    keys = iter(jax.random.split(key, 128))

    def nrm(shape, std=0.02):
        return jax.random.normal(next(keys), shape, F32) * std

    def blocks(prefix, L, D):
        hid = 4 * D
        return {
            f"{prefix}ln1_g": jnp.ones((L, D), F32),
            f"{prefix}ln1_b": jnp.zeros((L, D), F32),
            f"{prefix}wqkv": nrm((L, D, 3 * D), D ** -0.5),
            f"{prefix}bqkv": jnp.zeros((L, 3 * D), F32),
            f"{prefix}wo": nrm((L, D, D), D ** -0.5),
            f"{prefix}bo": jnp.zeros((L, D), F32),
            f"{prefix}ln2_g": jnp.ones((L, D), F32),
            f"{prefix}ln2_b": jnp.zeros((L, D), F32),
            f"{prefix}w1": nrm((L, D, hid), D ** -0.5),
            f"{prefix}b1": jnp.zeros((L, hid), F32),
            f"{prefix}w2": nrm((L, hid, D), hid ** -0.5),
            f"{prefix}b2": jnp.zeros((L, D), F32),
        }

    p = {}
    # --- MultiModalPromptLearner ---
    p["ctx"] = nrm((N_CTX, CTX_DIM))
    p["ctx_att1"] = nrm((N_ATT1, CTX_DIM), 0.01)
    p["ctx_att2"] = nrm((N_ATT2, CTX_DIM), 0.01)
    p["proj_w"] = nrm((CTX_DIM, VIS_WIDTH))
    p["proj_b"] = jnp.zeros((VIS_WIDTH,), F32)
    p["deep_text"] = nrm((PROMPT_DEPTH - 1, N_CTX, CTX_DIM))
    p["comp_proj_w"] = nrm((PROMPT_DEPTH - 1, CTX_DIM, VIS_WIDTH))
    p["comp_proj_b"] = jnp.zeros((PROMPT_DEPTH - 1, VIS_WIDTH), F32)
    # frozen token-embedding buffers (stand-ins for clip.token_embedding slices)
    p["token_prefix"] = nrm((N_CLS, 1, CTX_DIM))
    p["token_middle1"] = nrm((N_CLS, 1, CTX_DIM))
    p["token_middle2"] = nrm((N_CLS, 1, CTX_DIM))
    p["token_suffix"] = nrm((N_CLS, SUFFIX_LEN, CTX_DIM))
    # --- TextEncoder ---
    p["text_pos"] = nrm((TEXT_SEQ, CTX_DIM), 0.01)
    p.update(blocks("t_", TEXT_LAYERS, CTX_DIM))
    p["ln_final_g"] = jnp.ones((CTX_DIM,), F32)
    p["ln_final_b"] = jnp.zeros((CTX_DIM,), F32)
    p["text_proj"] = nrm((CTX_DIM, EMBED_DIM), CTX_DIM ** -0.5)
    # --- image encoder (ViT with MaPLe visual prompts) ---
    p["patch_w"] = nrm((PATCH_DIM, VIS_WIDTH))        # patch conv, bias=False
    p["cls_token"] = nrm((1, VIS_WIDTH))
    p["vis_pos"] = nrm((1 + NUM_PATCHES, VIS_WIDTH), 0.01)
    p["ln_pre_g"] = jnp.ones((VIS_WIDTH,), F32)
    p["ln_pre_b"] = jnp.zeros((VIS_WIDTH,), F32)
    p.update(blocks("v_", VIS_LAYERS, VIS_WIDTH))
    p["ln_post_g"] = jnp.ones((VIS_WIDTH,), F32)
    p["ln_post_b"] = jnp.zeros((VIS_WIDTH,), F32)
    p["vis_proj"] = nrm((VIS_WIDTH, EMBED_DIM), VIS_WIDTH ** -0.5)
    # --- CLIP ---
    p["logit_scale"] = jnp.array(math.log(1.0 / 0.07), F32)
    return p


# ------------------------ one-time packing (param-only, eager) ---------------
def pack_all(params, tokenized_prompts):
    # ---- MultiModalPromptLearner.forward() equivalents (image-independent) ----
    ctx = params["ctx"]
    ctx_b = jnp.broadcast_to(ctx[None], (N_CLS, N_CTX, CTX_DIM))
    a1 = jnp.broadcast_to(params["ctx_att1"][None], (N_CLS, N_ATT1, CTX_DIM))
    a2 = jnp.broadcast_to(params["ctx_att2"][None], (N_CLS, N_ATT2, CTX_DIM))
    prompts = jnp.concatenate(
        [params["token_prefix"], a1, params["token_middle1"],
         a2, params["token_middle2"], ctx_b, params["token_suffix"]], axis=1)
    prompts_pos = prompts + params["text_pos"][None]

    eot = jnp.argmax(tokenized_prompts, axis=-1)
    eot_sel = jax.nn.one_hot(eot, TEXT_SEQ, dtype=F32)            # (n_cls, S)

    shared_ctx = ctx @ params["proj_w"] + params["proj_b"]        # (n_ctx, W)
    deep_vis = [params["deep_text"][i] @ params["comp_proj_w"][i] + params["comp_proj_b"][i]
                for i in range(PROMPT_DEPTH - 1)]

    vis_static = jnp.zeros((S_VP, VIS_WIDTH), F32)
    vis_static = vis_static.at[:1 + NUM_PATCHES].set(params["vis_pos"])
    vis_static = vis_static.at[0].add(params["cls_token"][0])
    vis_static = vis_static.at[VIS_PROMPT_START:VIS_PROMPT_START + N_CTX].set(shared_ctx)

    tinjs, vinjs = [], []
    for i in range(PROMPT_DEPTH - 1):
        t = jnp.zeros((TEXT_SEQ, CTX_DIM), F32)
        tinjs.append(t.at[CTX_START:CTX_START + N_CTX].set(params["deep_text"][i]))
        v = jnp.zeros((S_VP, VIS_WIDTH), F32)
        vinjs.append(v.at[VIS_PROMPT_START:VIS_PROMPT_START + N_CTX].set(deep_vis[i]))

    # ---- slabs ----
    tw = _Packer(128, BF16, 16)
    for l in range(TEXT_LAYERS):
        for k in ("wqkv", "wo", "w1", "w2"):
            tw.add(f"t{l}_{k}", params[f"t_{k}"][l])
    tw.add("text_proj", params["text_proj"])

    vw = _Packer(256, BF16, 16)
    vw.add("patch_w", params["patch_w"])
    for l in range(VIS_LAYERS):
        for k in ("wqkv", "wo", "w1", "w2"):
            vw.add(f"v{l}_{k}", params[f"v_{k}"][l])
    vw.add("vis_proj", params["vis_proj"])

    tf = _Packer(128, F32, 8)
    tf.add("prompts_pos", prompts_pos)
    tf.add("eot_sel", eot_sel)
    for i in range(PROMPT_DEPTH - 1):
        tf.add(f"tinj{i}", tinjs[i])
    for l in range(TEXT_LAYERS):
        for k in ("ln1_g", "ln1_b", "bqkv", "bo", "ln2_g", "ln2_b", "b1", "b2"):
            tf.add(f"t{l}_{k}", params[f"t_{k}"][l])
    tf.add("ln_final_g", params["ln_final_g"])
    tf.add("ln_final_b", params["ln_final_b"])

    vf = _Packer(256, F32, 8)
    vf.add("vis_static", vis_static)
    for i in range(PROMPT_DEPTH - 1):
        vf.add(f"vinj{i}", vinjs[i])
    vf.add("ln_pre_g", params["ln_pre_g"])
    vf.add("ln_pre_b", params["ln_pre_b"])
    for l in range(VIS_LAYERS):
        for k in ("ln1_g", "ln1_b", "bqkv", "bo", "ln2_g", "ln2_b", "b1", "b2"):
            vf.add(f"v{l}_{k}", params[f"v_{k}"][l])
    vf.add("ln_post_g", params["ln_post_g"])
    vf.add("ln_post_b", params["ln_post_b"])

    packed = dict(tw=tw.finish(), vw=vw.finish(), tf=tf.finish(), vf=vf.finish(),
                  logit_scale=jnp.exp(params["logit_scale"]).reshape(1, 1))
    idx = dict(tw=tw.index, vw=vw.index, tf=tf.index, vf=vf.index)
    return packed, idx


# ----------------------------- forward (glue + one pallas_call) --------------
def make_forward(idx):
    kernel = _make_kernel(idx)

    def forward(packed, image):
        B = image.shape[0]
        # image (NCHW) -> zero-padded patch rows; rows 0 (cls), 5..6 (visual
        # prompts) and 7 (pad) stay zero so the in-kernel patch matmul leaves
        # them zero and `+ vis_static` injects cls/pos/shared_ctx directly.
        patches = image.astype(F32).reshape(B, IN_CH, GRID, PATCH, GRID, PATCH)
        patches = patches.transpose(0, 2, 4, 1, 3, 5).reshape(B, NUM_PATCHES, PATCH_DIM)
        patches_pad = jnp.zeros((B, S_VP, PATCH_DIM), F32)
        patches_pad = patches_pad.at[:, 1:1 + NUM_PATCHES, :].set(patches)

        vmem = pl.BlockSpec(memory_space=pltpu.MemorySpace.VMEM)
        smem = pl.BlockSpec(memory_space=pltpu.MemorySpace.SMEM)
        return pl.pallas_call(
            kernel,
            out_shape=jax.ShapeDtypeStruct((B, N_CLS), F32),
            in_specs=[vmem, vmem, vmem, vmem, vmem, smem],
            out_specs=vmem,
        )(packed["tw"], packed["vw"], packed["tf"], packed["vf"],
          patches_pad, packed["logit_scale"])

    return forward


# ----------------------------- main -------------------------------------------
if __name__ == "__main__":
    key = jax.random.PRNGKey(0)
    k_param, k_img = jax.random.split(key)
    params = init_params(k_param)

    image = jax.random.normal(k_img, (BATCH, IN_CH, IMG, IMG), F32)  # NCHW

    # synthetic tokenized prompts: SOT at 0, EOT (max token id) per class
    tokenized = jnp.tile(jnp.arange(TEXT_SEQ, dtype=jnp.int32)[None], (N_CLS, 1))
    tokenized = tokenized.at[:, 0].set(49406)
    eot_pos = jnp.array([9, 10, 11, 12], dtype=jnp.int32)
    tokenized = tokenized.at[jnp.arange(N_CLS), eot_pos].set(49407)

    packed, idx = pack_all(params, tokenized)      # eager, once (weights are static)
    fwd = jax.jit(make_forward(idx))
    logits = jax.block_until_ready(fwd(packed, image))

    assert logits.shape == (BATCH, N_CLS), logits.shape
    assert bool(jnp.all(jnp.isfinite(logits)))
    print("KERNEL_OK")
</pallas_src>

<mosaic_0001>
module attributes {stable_mosaic.version = 11 : i64} {
  func.func @kernel(%arg0: memref<480x128xbf16, #tpu.memory_space<vmem>>, %arg1: memref<1152x256xbf16, #tpu.memory_space<vmem>>, %arg2: memref<232x128xf32, #tpu.memory_space<vmem>>, %arg3: memref<176x256xf32, #tpu.memory_space<vmem>>, %arg4: memref<2x8x192xf32, #tpu.memory_space<vmem>>, %arg5: memref<1x1xf32, #tpu.memory_space<smem>>, %arg6: memref<2x4xf32, #tpu.memory_space<vmem>>) attributes {dimension_semantics = [], scalar_prefetch = 0 : i64, scratch_operands = 0 : i64, tpu.core_type = #tpu.core_type<tc>} {
    %c0 = arith.constant 0 : index
    %c0_0 = arith.constant 0 : index
    %0 = vector.load %arg2[%c0, %c0_0] : memref<232x128xf32, #tpu.memory_space<vmem>>, vector<64x32xf32>
    %1 = vector.shape_cast %0 : vector<64x32xf32> to vector<4x16x32xf32>
    %2 = tpu.iota {dimensions = array<i32: 0>} : vector<16x16xi32>
    %3 = tpu.iota {dimensions = array<i32: 1>} : vector<16x16xi32>
    %4 = arith.cmpi sge, %2, %3 : vector<16x16xi32>
    %cst = arith.constant 0.000000e+00 : f32
    %cst_1 = arith.constant -1.000000e+30 : f32
    %5 = vector.broadcast %cst : f32 to vector<16x16xf32>
    %6 = vector.broadcast %cst_1 : f32 to vector<16x16xf32>
    %7 = arith.select %4, %5, %6 : vector<16x16xi1>, vector<16x16xf32>
    %8 = tpu.iota {dimensions = array<i32: 0>} : vector<16x1xi32>
    %c5_i32 = arith.constant 5 : i32
    %9 = vector.broadcast %c5_i32 : i32 to vector<16x1xi32>
    %10 = arith.cmpi sge, %8, %9 : vector<16x1xi32>
    %c7_i32 = arith.constant 7 : i32
    %11 = vector.broadcast %c7_i32 : i32 to vector<16x1xi32>
    %12 = arith.cmpi slt, %8, %11 : vector<16x1xi32>
    %13 = arith.andi %10, %12 : vector<16x1xi1>
    %cst_2 = arith.constant 0.000000e+00 : f32
    %cst_3 = arith.constant 1.000000e+00 : f32
    %14 = vector.broadcast %cst_2 : f32 to vector<16x1xf32>
    %15 = vector.broadcast %cst_3 : f32 to vector<16x1xf32>
    %16 = arith.select %13, %14, %15 : vector<16x1xi1>, vector<16x1xf32>
    %c88 = arith.constant 88 : index
    %c0_4 = arith.constant 0 : index
    %17 = vector.load %arg2[%c88, %c0_4] : memref<232x128xf32, #tpu.memory_space<vmem>>, vector<1x32xf32>
    %c96 = arith.constant 96 : index
    %c0_5 = arith.constant 0 : index
    %18 = vector.load %arg2[%c96, %c0_5] : memref<232x128xf32, #tpu.memory_space<vmem>>, vector<1x32xf32>
    %cst_6 = arith.constant dense<0.000000e+00> : vector<4x16xf32>
    %19 = vector.multi_reduction <add>, %1, %cst_6 [2] : vector<4x16x32xf32> to vector<4x16xf32>
    %20 = vector.shape_cast %19 : vector<4x16xf32> to vector<4x16x1xf32>
    %cst_7 = arith.constant 3.200000e+01 : f32
    %21 = vector.broadcast %cst_7 : f32 to vector<4x16x1xf32>
    %22 = arith.divf %20, %21 : vector<4x16x1xf32>
    %23 = vector.broadcast %22 : vector<4x16x1xf32> to vector<4x16x32xf32>
    %24 = arith.subf %1, %23 : vector<4x16x32xf32>
    %25 = arith.mulf %24, %24 : vector<4x16x32xf32>
    %cst_8 = arith.constant dense<0.000000e+00> : vector<4x16xf32>
    %26 = vector.multi_reduction <add>, %25, %cst_8 [2] : vector<4x16x32xf32> to vector<4x16xf32>
    %27 = vector.shape_cast %26 : vector<4x16xf32> to vector<4x16x1xf32>
    %cst_9 = arith.constant 3.200000e+01 : f32
    %28 = vector.broadcast %cst_9 : f32 to vector<4x16x1xf32>
    %29 = arith.divf %27, %28 : vector<4x16x1xf32>
    %cst_10 = arith.constant 9.99999974E-6 : f32
    %30 = vector.broadcast %cst_10 : f32 to vector<4x16x1xf32>
    %31 = arith.addf %29, %30 : vector<4x16x1xf32>
    %32 = math.rsqrt %31 : vector<4x16x1xf32>
    %33 = vector.broadcast %32 : vector<4x16x1xf32> to vector<4x16x32xf32>
    %34 = arith.mulf %24, %33 : vector<4x16x32xf32>
    %35 = vector.shape_cast %17 : vector<1x32xf32> to vector<1x1x32xf32>
    %36 = vector.broadcast %35 : vector<1x1x32xf32> to vector<4x16x32xf32>
    %37 = arith.mulf %34, %36 : vector<4x16x32xf32>
    %38 = vector.shape_cast %18 : vector<1x32xf32> to vector<1x1x32xf32>
    %39 = vector.broadcast %38 : vector<1x1x32xf32> to vector<4x16x32xf32>
    %40 = arith.addf %37, %39 : vector<4x16x32xf32>
    %41 = vector.shape_cast %40 : vector<4x16x32xf32> to vector<64x32xf32>
    %42 = arith.truncf %41 : vector<64x32xf32> to vector<64x32xbf16>
    %c0_11 = arith.constant 0 : index
    %c0_12 = arith.constant 0 : index
    %43 = vector.load %arg0[%c0_11, %c0_12] : memref<480x128xbf16, #tpu.memory_space<vmem>>, vector<32x96xbf16>
    %cst_13 = arith.constant dense<0.000000e+00> : vector<64x96xf32>
    %44 = tpu.matmul %42, %43, %cst_13 {dimension_numbers = #tpu.dot_dimension_numbers<[1], [0], [0], [1], [0, 0, 1, 1], [], []>} : vector<64x32xbf16>, vector<32x96xbf16>, vector<64x96xf32> -> vector<64x96xf32>
    %c104 = arith.constant 104 : index
    %c0_14 = arith.constant 0 : index
    %45 = vector.load %arg2[%c104, %c0_14] : memref<232x128xf32, #tpu.memory_space<vmem>>, vector<1x96xf32>
    %46 = vector.broadcast %45 : vector<1x96xf32> to vector<64x96xf32>
    %47 = arith.addf %44, %46 : vector<64x96xf32>
    %48 = vector.shape_cast %47 : vector<64x96xf32> to vector<4x16x96xf32>
    %49 = arith.truncf %48 : vector<4x16x96xf32> to vector<4x16x96xbf16>
    %50 = vector.extract_strided_slice %49 {offsets = [0, 0, 0], sizes = [4, 16, 16], strides = [1, 1, 1]} : vector<4x16x96xbf16> to vector<4x16x16xbf16>
    %51 = vector.extract_strided_slice %49 {offsets = [0, 0, 32], sizes = [4, 16, 16], strides = [1, 1, 1]} : vector<4x16x96xbf16> to vector<4x16x16xbf16>
    %52 = vector.extract_strided_slice %49 {offsets = [0, 0, 64], sizes = [4, 16, 16], strides = [1, 1, 1]} : vector<4x16x96xbf16> to vector<4x16x16xbf16>
    "tpu.trace_start"() <{level = 10 : i32, message = "bqd,bkd->bqk"}> : () -> ()
    %cst_15 = arith.constant dense<0.000000e+00> : vector<4x16x16xf32>
    %53 = tpu.matmul %50, %51, %cst_15 {dimension_numbers = #tpu.dot_dimension_numbers<[2], [2], [1], [1], [0, 0, 0, 1, 1, 1], [0], [0]>} : vector<4x16x16xbf16>, vector<4x16x16xbf16>, vector<4x16x16xf32> -> vector<4x16x16xf32>
    "tpu.trace_stop"() : () -> ()
    %cst_16 = arith.constant 2.500000e-01 : f32
    %54 = vector.broadcast %cst_16 : f32 to vector<4x16x16xf32>
    %55 = arith.mulf %53, %54 : vector<4x16x16xf32>
    %56 = vector.shape_cast %7 : vector<16x16xf32> to vector<1x16x16xf32>
    %57 = vector.broadcast %56 : vector<1x16x16xf32> to vector<4x16x16xf32>
    %58 = arith.addf %55, %57 : vector<4x16x16xf32>
    %cst_17 = arith.constant dense<0xFF800000> : vector<4x16xf32>
    %59 = vector.multi_reduction <maximumf>, %58, %cst_17 [2] : vector<4x16x16xf32> to vector<4x16xf32>
    %60 = vector.shape_cast %59 : vector<4x16xf32> to vector<4x16x1xf32>
    %61 = vector.broadcast %60 : vector<4x16x1xf32> to vector<4x16x16xf32>
    %62 = arith.subf %58, %61 : vector<4x16x16xf32>
    %63 = math.exp %62 : vector<4x16x16xf32>
    %cst_18 = arith.constant dense<0.000000e+00> : vector<4x16xf32>
    %64 = vector.multi_reduction <add>, %63, %cst_18 [2] : vector<4x16x16xf32> to vector<4x16xf32>
    %65 = vector.shape_cast %64 : vector<4x16xf32> to vector<4x16x1xf32>
    %66 = tpu.reciprocal %65 {approx = true} : vector<4x16x1xf32> -> vector<4x16x1xf32>
    %67 = vector.broadcast %66 : vector<4x16x1xf32> to vector<4x16x16xf32>
    %68 = arith.mulf %63, %67 : vector<4x16x16xf32>
    %69 = arith.truncf %68 : vector<4x16x16xf32> to vector<4x16x16xbf16>
    "tpu.trace_start"() <{level = 10 : i32, message = "bqk,bkd->bqd"}> : () -> ()
    %cst_19 = arith.constant dense<0.000000e+00> : vector<4x16x16xf32>
    %70 = tpu.matmul %69, %52, %cst_19 {dimension_numbers = #tpu.dot_dimension_numbers<[2], [1], [1], [2], [0, 0, 0, 1, 1, 2], [0], [0]>} : vector<4x16x16xbf16>, vector<4x16x16xbf16>, vector<4x16x16xf32> -> vector<4x16x16xf32>
    "tpu.trace_stop"() : () -> ()
    %71 = vector.extract_strided_slice %49 {offsets = [0, 0, 16], sizes = [4, 16, 16], strides = [1, 1, 1]} : vector<4x16x96xbf16> to vector<4x16x16xbf16>
    %72 = vector.extract_strided_slice %49 {offsets = [0, 0, 48], sizes = [4, 16, 16], strides = [1, 1, 1]} : vector<4x16x96xbf16> to vector<4x16x16xbf16>
    %73 = vector.extract_strided_slice %49 {offsets = [0, 0, 80], sizes = [4, 16, 16], strides = [1, 1, 1]} : vector<4x16x96xbf16> to vector<4x16x16xbf16>
    "tpu.trace_start"() <{level = 10 : i32, message = "bqd,bkd->bqk"}> : () -> ()
    %cst_20 = arith.constant dense<0.000000e+00> : vector<4x16x16xf32>
    %74 = tpu.matmul %71, %72, %cst_20 {dimension_numbers = #tpu.dot_dimension_numbers<[2], [2], [1], [1], [0, 0, 0, 1, 1, 1], [0], [0]>} : vector<4x16x16xbf16>, vector<4x16x16xbf16>, vector<4x16x16xf32> -> vector<4x16x16xf32>
    "tpu.trace_stop"() : () -> ()
    %cst_21 = arith.constant 2.500000e-01 : f32
    %75 = vector.broadcast %cst_21 : f32 to vector<4x16x16xf32>
    %76 = arith.mulf %74, %75 : vector<4x16x16xf32>
    %77 = vector.shape_cast %7 : vector<16x16xf32> to vector<1x16x16xf32>
    %78 = vector.broadcast %77 : vector<1x16x16xf32> to vector<4x16x16xf32>
    %79 = arith.addf %76, %78 : vector<4x16x16xf32>
    %cst_22 = arith.constant dense<0xFF800000> : vector<4x16xf32>
    %80 = vector.multi_reduction <maximumf>, %79, %cst_22 [2] : vector<4x16x16xf32> to vector<4x16xf32>
    %81 = vector.shape_cast %80 : vector<4x16xf32> to vector<4x16x1xf32>
    %82 = vector.broadcast %81 : vector<4x16x1xf32> to vector<4x16x16xf32>
    %83 = arith.subf %79, %82 : vector<4x16x16xf32>
    %84 = math.exp %83 : vector<4x16x16xf32>
    %cst_23 = arith.constant dense<0.000000e+00> : vector<4x16xf32>
    %85 = vector.multi_reduction <add>, %84, %cst_23 [2] : vector<4x16x16xf32> to vector<4x16xf32>
    %86 = vector.shape_cast %85 : vector<4x16xf32> to vector<4x16x1xf32>
    %87 = tpu.reciprocal %86 {approx = true} : vector<4x16x1xf32> -> vector<4x16x1xf32>
    %88 = vector.broadcast %87 : vector<4x16x1xf32> to vector<4x16x16xf32>
    %89 = arith.mulf %84, %88 : vector<4x16x16xf32>
    %90 = arith.truncf %89 : vector<4x16x16xf32> to vector<4x16x16xbf16>
    "tpu.trace_start"() <{level = 10 : i32, message = "bqk,bkd->bqd"}> : () -> ()
    %cst_24 = arith.constant dense<0.000000e+00> : vector<4x16x16xf32>
    %91 = tpu.matmul %90, %73, %cst_24 {dimension_numbers = #tpu.dot_dimension_numbers<[2], [1], [1], [2], [0, 0, 0, 1, 1, 2], [0], [0]>} : vector<4x16x16xbf16>, vector<4x16x16xbf16>, vector<4x16x16xf32> -> vector<4x16x16xf32>
    "tpu.trace_stop"() : () -> ()
    %92 = tpu.concatenate %70, %91 in 2 : vector<4x16x16xf32>, vector<4x16x16xf32> -> vector<4x16x32xf32>
    %93 = vector.shape_cast %92 : vector<4x16x32xf32> to vector<64x32xf32>
    %94 = arith.truncf %93 : vector<64x32xf32> to vector<64x32xbf16>
    %c32 = arith.constant 32 : index
    %c0_25 = arith.constant 0 : index
    %95 = vector.load %arg0[%c32, %c0_25] : memref<480x128xbf16, #tpu.memory_space<vmem>>, vector<32x32xbf16>
    %cst_26 = arith.constant dense<0.000000e+00> : vector<64x32xf32>
    %96 = tpu.matmul %94, %95, %cst_26 {dimension_numbers = #tpu.dot_dimension_numbers<[1], [0], [0], [1], [0, 0, 1, 1], [], []>} : vector<64x32xbf16>, vector<32x32xbf16>, vector<64x32xf32> -> vector<64x32xf32>
    %c112 = arith.constant 112 : index
    %c0_27 = arith.constant 0 : index
    %97 = vector.load %arg2[%c112, %c0_27] : memref<232x128xf32, #tpu.memory_space<vmem>>, vector<1x32xf32>
    %98 = vector.broadcast %97 : vector<1x32xf32> to vector<64x32xf32>
    %99 = arith.addf %96, %98 : vector<64x32xf32>
    %100 = vector.shape_cast %99 : vector<64x32xf32> to vector<4x16x32xf32>
    %101 = arith.addf %1, %100 : vector<4x16x32xf32>
    %c120 = arith.constant 120 : index
    %c0_28 = arith.constant 0 : index
    %102 = vector.load %arg2[%c120, %c0_28] : memref<232x128xf32, #tpu.memory_space<vmem>>, vector<1x32xf32>
    %c128 = arith.constant 128 : index
    %c0_29 = arith.constant 0 : index
    %103 = vector.load %arg2[%c128, %c0_29] : memref<232x128xf32, #tpu.memory_space<vmem>>, vector<1x32xf32>
    %cst_30 = arith.constant dense<0.000000e+00> : vector<4x16xf32>
    %104 = vector.multi_reduction <add>, %101, %cst_30 [2] : vector<4x16x32xf32> to vector<4x16xf32>
    %105 = vector.shape_cast %104 : vector<4x16xf32> to vector<4x16x1xf32>
    %cst_31 = arith.constant 3.200000e+01 : f32
    %106 = vector.broadcast %cst_31 : f32 to vector<4x16x1xf32>
    %107 = arith.divf %105, %106 : vector<4x16x1xf32>
    %108 = vector.broadcast %107 : vector<4x16x1xf32> to vector<4x16x32xf32>
    %109 = arith.subf %101, %108 : vector<4x16x32xf32>
    %110 = arith.mulf %109, %109 : vector<4x16x32xf32>
    %cst_32 = arith.constant dense<0.000000e+00> : vector<4x16xf32>
    %111 = vector.multi_reduction <add>, %110, %cst_32 [2] : vector<4x16x32xf32> to vector<4x16xf32>
    %112 = vector.shape_cast %111 : vector<4x16xf32> to vector<4x16x1xf32>
    %cst_33 = arith.constant 3.200000e+01 : f32
    %113 = vector.broadcast %cst_33 : f32 to vector<4x16x1xf32>
    %114 = arith.divf %112, %113 : vector<4x16x1xf32>
    %cst_34 = arith.constant 9.99999974E-6 : f32
    %115 = vector.broadcast %cst_34 : f32 to vector<4x16x1xf32>
    %116 = arith.addf %114, %115 : vector<4x16x1xf32>
    %117 = math.rsqrt %116 : vector<4x16x1xf32>
    %118 = vector.broadcast %117 : vector<4x16x1xf32> to vector<4x16x32xf32>
    %119 = arith.mulf %109, %118 : vector<4x16x32xf32>
    %120 = vector.shape_cast %102 : vector<1x32xf32> to vector<1x1x32xf32>
    %121 = vector.broadcast %120 : vector<1x1x32xf32> to vector<4x16x32xf32>
    %122 = arith.mulf %119, %121 : vector<4x16x32xf32>
    %123 = vector.shape_cast %103 : vector<1x32xf32> to vector<1x1x32xf32>
    %124 = vector.broadcast %123 : vector<1x1x32xf32> to vector<4x16x32xf32>
    %125 = arith.addf %122, %124 : vector<4x16x32xf32>
    %126 = vector.shape_cast %125 : vector<4x16x32xf32> to vector<64x32xf32>
    %127 = arith.truncf %126 : vector<64x32xf32> to vector<64x32xbf16>
    %c64 = arith.constant 64 : index
    %c0_35 = arith.constant 0 : index
    %128 = vector.load %arg0[%c64, %c0_35] : memref<480x128xbf16, #tpu.memory_space<vmem>>, vector<32x128xbf16>
    %cst_36 = arith.constant dense<0.000000e+00> : vector<64x128xf32>
    %129 = tpu.matmul %127, %128, %cst_36 {dimension_numbers = #tpu.dot_dimension_numbers<[1], [0], [0], [1], [0, 0, 1, 1], [], []>} : vector<64x32xbf16>, vector<32x128xbf16>, vector<64x128xf32> -> vector<64x128xf32>
    %c136 = arith.constant 136 : index
    %c0_37 = arith.constant 0 : index
    %130 = vector.load %arg2[%c136, %c0_37] : memref<232x128xf32, #tpu.memory_space<vmem>>, vector<1x128xf32>
    %131 = vector.broadcast %130 : vector<1x128xf32> to vector<64x128xf32>
    %132 = arith.addf %129, %131 : vector<64x128xf32>
    %cst_38 = arith.constant 1.702000e+00 : f32
    %133 = vector.broadcast %cst_38 : f32 to vector<64x128xf32>
    %134 = arith.mulf %133, %132 : vector<64x128xf32>
    %135 = arith.negf %134 : vector<64x128xf32>
    %136 = math.exp %135 : vector<64x128xf32>
    %cst_39 = arith.constant 1.000000e+00 : f32
    %137 = vector.broadcast %cst_39 : f32 to vector<64x128xf32>
    %138 = arith.addf %137, %136 : vector<64x128xf32>
    %139 = arith.divf %137, %138 : vector<64x128xf32>
    %140 = arith.mulf %132, %139 : vector<64x128xf32>
    %141 = arith.truncf %140 : vector<64x128xf32> to vector<64x128xbf16>
    %c96_40 = arith.constant 96 : index
    %c0_41 = arith.constant 0 : index
    %142 = vector.load %arg0[%c96_40, %c0_41] : memref<480x128xbf16, #tpu.memory_space<vmem>>, vector<128x32xbf16>
    %cst_42 = arith.constant dense<0.000000e+00> : vector<64x32xf32>
    %143 = tpu.matmul %141, %142, %cst_42 {dimension_numbers = #tpu.dot_dimension_numbers<[1], [0], [0], [1], [0, 0, 1, 1], [], []>} : vector<64x128xbf16>, vector<128x32xbf16>, vector<64x32xf32> -> vector<64x32xf32>
    %c144 = arith.constant 144 : index
    %c0_43 = arith.constant 0 : index
    %144 = vector.load %arg2[%c144, %c0_43] : memref<232x128xf32, #tpu.memory_space<vmem>>, vector<1x32xf32>
    %145 = vector.broadcast %144 : vector<1x32xf32> to vector<64x32xf32>
    %146 = arith.addf %143, %145 : vector<64x32xf32>
    %147 = vector.shape_cast %146 : vector<64x32xf32> to vector<4x16x32xf32>
    %148 = arith.addf %101, %147 : vector<4x16x32xf32>
    %149 = vector.shape_cast %16 : vector<16x1xf32> to vector<1x16x1xf32>
    %150 = vector.broadcast %149 : vector<1x16x1xf32> to vector<4x16x32xf32>
    %151 = arith.mulf %148, %150 : vector<4x16x32xf32>
    %c72 = arith.constant 72 : index
    %c0_44 = arith.constant 0 : index
    %152 = vector.load %arg2[%c72, %c0_44] : memref<232x128xf32, #tpu.memory_space<vmem>>, vector<16x32xf32>
    %153 = vector.shape_cast %152 : vector<16x32xf32> to vector<1x16x32xf32>
    %154 = vector.broadcast %153 : vector<1x16x32xf32> to vector<4x16x32xf32>
    %155 = arith.addf %151, %154 : vector<4x16x32xf32>
    %c152 = arith.constant 152 : index
    %c0_45 = arith.constant 0 : index
    %156 = vector.load %arg2[%c152, %c0_45] : memref<232x128xf32, #tpu.memory_space<vmem>>, vector<1x32xf32>
    %c160 = arith.constant 160 : index
    %c0_46 = arith.constant 0 : index
    %157 = vector.load %arg2[%c160, %c0_46] : memref<232x128xf32, #tpu.memory_space<vmem>>, vector<1x32xf32>
    %cst_47 = arith.constant dense<0.000000e+00> : vector<4x16xf32>
    %158 = vector.multi_reduction <add>, %155, %cst_47 [2] : vector<4x16x32xf32> to vector<4x16xf32>
    %159 = vector.shape_cast %158 : vector<4x16xf32> to vector<4x16x1xf32>
    %cst_48 = arith.constant 3.200000e+01 : f32
    %160 = vector.broadcast %cst_48 : f32 to vector<4x16x1xf32>
    %161 = arith.divf %159, %160 : vector<4x16x1xf32>
    %162 = vector.broadcast %161 : vector<4x16x1xf32> to vector<4x16x32xf32>
    %163 = arith.subf %155, %162 : vector<4x16x32xf32>
    %164 = arith.mulf %163, %163 : vector<4x16x32xf32>
    %cst_49 = arith.constant dense<0.000000e+00> : vector<4x16xf32>
    %165 = vector.multi_reduction <add>, %164, %cst_49 [2] : vector<4x16x32xf32> to vector<4x16xf32>
    %166 = vector.shape_cast %165 : vector<4x16xf32> to vector<4x16x1xf32>
    %cst_50 = arith.constant 3.200000e+01 : f32
    %167 = vector.broadcast %cst_50 : f32 to vector<4x16x1xf32>
    %168 = arith.divf %166, %167 : vector<4x16x1xf32>
    %cst_51 = arith.constant 9.99999974E-6 : f32
    %169 = vector.broadcast %cst_51 : f32 to vector<4x16x1xf32>
    %170 = arith.addf %168, %169 : vector<4x16x1xf32>
    %171 = math.rsqrt %170 : vector<4x16x1xf32>
    %172 = vector.broadcast %171 : vector<4x16x1xf32> to vector<4x16x32xf32>
    %173 = arith.mulf %163, %172 : vector<4x16x32xf32>
    %174 = vector.shape_cast %156 : vector<1x32xf32> to vector<1x1x32xf32>
    %175 = vector.broadcast %174 : vector<1x1x32xf32> to vector<4x16x32xf32>
    %176 = arith.mulf %173, %175 : vector<4x16x32xf32>
    %177 = vector.shape_cast %157 : vector<1x32xf32> to vector<1x1x32xf32>
    %178 = vector.broadcast %177 : vector<1x1x32xf32> to vector<4x16x32xf32>
    %179 = arith.addf %176, %178 : vector<4x16x32xf32>
    %180 = vector.shape_cast %179 : vector<4x16x32xf32> to vector<64x32xf32>
    %181 = arith.truncf %180 : vector<64x32xf32> to vector<64x32xbf16>
    %c224 = arith.constant 224 : index
    %c0_52 = arith.constant 0 : index
    %182 = vector.load %arg0[%c224, %c0_52] : memref<480x128xbf16, #tpu.memory_space<vmem>>, vector<32x96xbf16>
    %cst_53 = arith.constant dense<0.000000e+00> : vector<64x96xf32>
    %183 = tpu.matmul %181, %182, %cst_53 {dimension_numbers = #tpu.dot_dimension_numbers<[1], [0], [0], [1], [0, 0, 1, 1], [], []>} : vector<64x32xbf16>, vector<32x96xbf16>, vector<64x96xf32> -> vector<64x96xf32>
    %c168 = arith.constant 168 : index
    %c0_54 = arith.constant 0 : index
    %184 = vector.load %arg2[%c168, %c0_54] : memref<232x128xf32, #tpu.memory_space<vmem>>, vector<1x96xf32>
    %185 = vector.broadcast %184 : vector<1x96xf32> to vector<64x96xf32>
    %186 = arith.addf %183, %185 : vector<64x96xf32>
    %187 = vector.shape_cast %186 : vector<64x96xf32> to vector<4x16x96xf32>
    %188 = arith.truncf %187 : vector<4x16x96xf32> to vector<4x16x96xbf16>
    %189 = vector.extract_strided_slice %188 {offsets = [0, 0, 0], sizes = [4, 16, 16], strides = [1, 1, 1]} : vector<4x16x96xbf16> to vector<4x16x16xbf16>
    %190 = vector.extract_strided_slice %188 {offsets = [0, 0, 32], sizes = [4, 16, 16], strides = [1, 1, 1]} : vector<4x16x96xbf16> to vector<4x16x16xbf16>
    %191 = vector.extract_strided_slice %188 {offsets = [0, 0, 64], sizes = [4, 16, 16], strides = [1, 1, 1]} : vector<4x16x96xbf16> to vector<4x16x16xbf16>
    "tpu.trace_start"() <{level = 10 : i32, message = "bqd,bkd->bqk"}> : () -> ()
    %cst_55 = arith.constant dense<0.000000e+00> : vector<4x16x16xf32>
    %192 = tpu.matmul %189, %190, %cst_55 {dimension_numbers = #tpu.dot_dimension_numbers<[2], [2], [1], [1], [0, 0, 0, 1, 1, 1], [0], [0]>} : vector<4x16x16xbf16>, vector<4x16x16xbf16>, vector<4x16x16xf32> -> vector<4x16x16xf32>
    "tpu.trace_stop"() : () -> ()
    %cst_56 = arith.constant 2.500000e-01 : f32
    %193 = vector.broadcast %cst_56 : f32 to vector<4x16x16xf32>
    %194 = arith.mulf %192, %193 : vector<4x16x16xf32>
    %195 = vector.shape_cast %7 : vector<16x16xf32> to vector<1x16x16xf32>
    %196 = vector.broadcast %195 : vector<1x16x16xf32> to vector<4x16x16xf32>
    %197 = arith.addf %194, %196 : vector<4x16x16xf32>
    %cst_57 = arith.constant dense<0xFF800000> : vector<4x16xf32>
    %198 = vector.multi_reduction <maximumf>, %197, %cst_57 [2] : vector<4x16x16xf32> to vector<4x16xf32>
    %199 = vector.shape_cast %198 : vector<4x16xf32> to vector<4x16x1xf32>
    %200 = vector.broadcast %199 : vector<4x16x1xf32> to vector<4x16x16xf32>
    %201 = arith.subf %197, %200 : vector<4x16x16xf32>
    %202 = math.exp %201 : vector<4x16x16xf32>
    %cst_58 = arith.constant dense<0.000000e+00> : vector<4x16xf32>
    %203 = vector.multi_reduction <add>, %202, %cst_58 [2] : vector<4x16x16xf32> to vector<4x16xf32>
    %204 = vector.shape_cast %203 : vector<4x16xf32> to vector<4x16x1xf32>
    %205 = tpu.reciprocal %204 {approx = true} : vector<4x16x1xf32> -> vector<4x16x1xf32>
    %206 = vector.broadcast %205 : vector<4x16x1xf32> to vector<4x16x16xf32>
    %207 = arith.mulf %202, %206 : vector<4x16x16xf32>
    %208 = arith.truncf %207 : vector<4x16x16xf32> to vector<4x16x16xbf16>
    "tpu.trace_start"() <{level = 10 : i32, message = "bqk,bkd->bqd"}> : () -> ()
    %cst_59 = arith.constant dense<0.000000e+00> : vector<4x16x16xf32>
    %209 = tpu.matmul %208, %191, %cst_59 {dimension_numbers = #tpu.dot_dimension_numbers<[2], [1], [1], [2], [0, 0, 0, 1, 1, 2], [0], [0]>} : vector<4x16x16xbf16>, vector<4x16x16xbf16>, vector<4x16x16xf32> -> vector<4x16x16xf32>
    "tpu.trace_stop"() : () -> ()
    %210 = vector.extract_strided_slice %188 {offsets = [0, 0, 16], sizes = [4, 16, 16], strides = [1, 1, 1]} : vector<4x16x96xbf16> to vector<4x16x16xbf16>
    %211 = vector.extract_strided_slice %188 {offsets = [0, 0, 48], sizes = [4, 16, 16], strides = [1, 1, 1]} : vector<4x16x96xbf16> to vector<4x16x16xbf16>
    %212 = vector.extract_strided_slice %188 {offsets = [0, 0, 80], sizes = [4, 16, 16], strides = [1, 1, 1]} : vector<4x16x96xbf16> to vector<4x16x16xbf16>
    "tpu.trace_start"() <{level = 10 : i32, message = "bqd,bkd->bqk"}> : () -> ()
    %cst_60 = arith.constant dense<0.000000e+00> : vector<4x16x16xf32>
    %213 = tpu.matmul %210, %211, %cst_60 {dimension_numbers = #tpu.dot_dimension_numbers<[2], [2], [1], [1], [0, 0, 0, 1, 1, 1], [0], [0]>} : vector<4x16x16xbf16>, vector<4x16x16xbf16>, vector<4x16x16xf32> -> vector<4x16x16xf32>
    "tpu.trace_stop"() : () -> ()
    %cst_61 = arith.constant 2.500000e-01 : f32
    %214 = vector.broadcast %cst_61 : f32 to vector<4x16x16xf32>
    %215 = arith.mulf %213, %214 : vector<4x16x16xf32>
    %216 = vector.shape_cast %7 : vector<16x16xf32> to vector<1x16x16xf32>
    %217 = vector.broadcast %216 : vector<1x16x16xf32> to vector<4x16x16xf32>
    %218 = arith.addf %215, %217 : vector<4x16x16xf32>
    %cst_62 = arith.constant dense<0xFF800000> : vector<4x16xf32>
    %219 = vector.multi_reduction <maximumf>, %218, %cst_62 [2] : vector<4x16x16xf32> to vector<4x16xf32>
    %220 = vector.shape_cast %219 : vector<4x16xf32> to vector<4x16x1xf32>
    %221 = vector.broadcast %220 : vector<4x16x1xf32> to vector<4x16x16xf32>
    %222 = arith.subf %218, %221 : vector<4x16x16xf32>
    %223 = math.exp %222 : vector<4x16x16xf32>
    %cst_63 = arith.constant dense<0.000000e+00> : vector<4x16xf32>
    %224 = vector.multi_reduction <add>, %223, %cst_63 [2] : vector<4x16x16xf32> to vector<4x16xf32>
    %225 = vector.shape_cast %224 : vector<4x16xf32> to vector<4x16x1xf32>
    %226 = tpu.reciprocal %225 {approx = true} : vector<4x16x1xf32> -> vector<4x16x1xf32>
    %227 = vector.broadcast %226 : vector<4x16x1xf32> to vector<4x16x16xf32>
    %228 = arith.mulf %223, %227 : vector<4x16x16xf32>
    %229 = arith.truncf %228 : vector<4x16x16xf32> to vector<4x16x16xbf16>
    "tpu.trace_start"() <{level = 10 : i32, message = "bqk,bkd->bqd"}> : () -> ()
    %cst_64 = arith.constant dense<0.000000e+00> : vector<4x16x16xf32>
    %230 = tpu.matmul %229, %212, %cst_64 {dimension_numbers = #tpu.dot_dimension_numbers<[2], [1], [1], [2], [0, 0, 0, 1, 1, 2], [0], [0]>} : vector<4x16x16xbf16>, vector<4x16x16xbf16>, vector<4x16x16xf32> -> vector<4x16x16xf32>
    "tpu.trace_stop"() : () -> ()
    %231 = tpu.concatenate %209, %230 in 2 : vector<4x16x16xf32>, vector<4x16x16xf32> -> vector<4x16x32xf32>
    %232 = vector.shape_cast %231 : vector<4x16x32xf32> to vector<64x32xf32>
    %233 = arith.truncf %232 : vector<64x32xf32> to vector<64x32xbf16>
    %c256 = arith.constant 256 : index
    %c0_65 = arith.constant 0 : index
    %234 = vector.load %arg0[%c256, %c0_65] : memref<480x128xbf16, #tpu.memory_space<vmem>>, vector<32x32xbf16>
    %cst_66 = arith.constant dense<0.000000e+00> : vector<64x32xf32>
    %235 = tpu.matmul %233, %234, %cst_66 {dimension_numbers = #tpu.dot_dimension_numbers<[1], [0], [0], [1], [0, 0, 1, 1], [], []>} : vector<64x32xbf16>, vector<32x32xbf16>, vector<64x32xf32> -> vector<64x32xf32>
    %c176 = arith.constant 176 : index
    %c0_67 = arith.constant 0 : index
    %236 = vector.load %arg2[%c176, %c0_67] : memref<232x128xf32, #tpu.memory_space<vmem>>, vector<1x32xf32>
    %237 = vector.broadcast %236 : vector<1x32xf32> to vector<64x32xf32>
    %238 = arith.addf %235, %237 : vector<64x32xf32>
    %239 = vector.shape_cast %238 : vector<64x32xf32> to vector<4x16x32xf32>
    %240 = arith.addf %155, %239 : vector<4x16x32xf32>
    %c184 = arith.constant 184 : index
    %c0_68 = arith.constant 0 : index
    %241 = vector.load %arg2[%c184, %c0_68] : memref<232x128xf32, #tpu.memory_space<vmem>>, vector<1x32xf32>
    %c192 = arith.constant 192 : index
    %c0_69 = arith.constant 0 : index
    %242 = vector.load %arg2[%c192, %c0_69] : memref<232x128xf32, #tpu.memory_space<vmem>>, vector<1x32xf32>
    %cst_70 = arith.constant dense<0.000000e+00> : vector<4x16xf32>
    %243 = vector.multi_reduction <add>, %240, %cst_70 [2] : vector<4x16x32xf32> to vector<4x16xf32>
    %244 = vector.shape_cast %243 : vector<4x16xf32> to vector<4x16x1xf32>
    %cst_71 = arith.constant 3.200000e+01 : f32
    %245 = vector.broadcast %cst_71 : f32 to vector<4x16x1xf32>
    %246 = arith.divf %244, %245 : vector<4x16x1xf32>
    %247 = vector.broadcast %246 : vector<4x16x1xf32> to vector<4x16x32xf32>
    %248 = arith.subf %240, %247 : vector<4x16x32xf32>
    %249 = arith.mulf %248, %248 : vector<4x16x32xf32>
    %cst_72 = arith.constant dense<0.000000e+00> : vector<4x16xf32>
    %250 = vector.multi_reduction <add>, %249, %cst_72 [2] : vector<4x16x32xf32> to vector<4x16xf32>
    %251 = vector.shape_cast %250 : vector<4x16xf32> to vector<4x16x1xf32>
    %cst_73 = arith.constant 3.200000e+01 : f32
    %252 = vector.broadcast %cst_73 : f32 to vector<4x16x1xf32>
    %253 = arith.divf %251, %252 : vector<4x16x1xf32>
    %cst_74 = arith.constant 9.99999974E-6 : f32
    %254 = vector.broadcast %cst_74 : f32 to vector<4x16x1xf32>
    %255 = arith.addf %253, %254 : vector<4x16x1xf32>
    %256 = math.rsqrt %255 : vector<4x16x1xf32>
    %257 = vector.broadcast %256 : vector<4x16x1xf32> to vector<4x16x32xf32>
    %258 = arith.mulf %248, %257 : vector<4x16x32xf32>
    %259 = vector.shape_cast %241 : vector<1x32xf32> to vector<1x1x32xf32>
    %260 = vector.broadcast %259 : vector<1x1x32xf32> to vector<4x16x32xf32>
    %261 = arith.mulf %258, %260 : vector<4x16x32xf32>
    %262 = vector.shape_cast %242 : vector<1x32xf32> to vector<1x1x32xf32>
    %263 = vector.broadcast %262 : vector<1x1x32xf32> to vector<4x16x32xf32>
    %264 = arith.addf %261, %263 : vector<4x16x32xf32>
    %265 = vector.shape_cast %264 : vector<4x16x32xf32> to vector<64x32xf32>
    %266 = arith.truncf %265 : vector<64x32xf32> to vector<64x32xbf16>
    %c288 = arith.constant 288 : index
    %c0_75 = arith.constant 0 : index
    %267 = vector.load %arg0[%c288, %c0_75] : memref<480x128xbf16, #tpu.memory_space<vmem>>, vector<32x128xbf16>
    %cst_76 = arith.constant dense<0.000000e+00> : vector<64x128xf32>
    %268 = tpu.matmul %266, %267, %cst_76 {dimension_numbers = #tpu.dot_dimension_numbers<[1], [0], [0], [1], [0, 0, 1, 1], [], []>} : vector<64x32xbf16>, vector<32x128xbf16>, vector<64x128xf32> -> vector<64x128xf32>
    %c200 = arith.constant 200 : index
    %c0_77 = arith.constant 0 : index
    %269 = vector.load %arg2[%c200, %c0_77] : memref<232x128xf32, #tpu.memory_space<vmem>>, vector<1x128xf32>
    %270 = vector.broadcast %269 : vector<1x128xf32> to vector<64x128xf32>
    %271 = arith.addf %268, %270 : vector<64x128xf32>
    %cst_78 = arith.constant 1.702000e+00 : f32
    %272 = vector.broadcast %cst_78 : f32 to vector<64x128xf32>
    %273 = arith.mulf %272, %271 : vector<64x128xf32>
    %274 = arith.negf %273 : vector<64x128xf32>
    %275 = math.exp %274 : vector<64x128xf32>
    %cst_79 = arith.constant 1.000000e+00 : f32
    %276 = vector.broadcast %cst_79 : f32 to vector<64x128xf32>
    %277 = arith.addf %276, %275 : vector<64x128xf32>
    %278 = arith.divf %276, %277 : vector<64x128xf32>
    %279 = arith.mulf %271, %278 : vector<64x128xf32>
    %280 = arith.truncf %279 : vector<64x128xf32> to vector<64x128xbf16>
    %c320 = arith.constant 320 : index
    %c0_80 = arith.constant 0 : index
    %281 = vector.load %arg0[%c320, %c0_80] : memref<480x128xbf16, #tpu.memory_space<vmem>>, vector<128x32xbf16>
    %cst_81 = arith.constant dense<0.000000e+00> : vector<64x32xf32>
    %282 = tpu.matmul %280, %281, %cst_81 {dimension_numbers = #tpu.dot_dimension_numbers<[1], [0], [0], [1], [0, 0, 1, 1], [], []>} : vector<64x128xbf16>, vector<128x32xbf16>, vector<64x32xf32> -> vector<64x32xf32>
    %c208 = arith.constant 208 : index
    %c0_82 = arith.constant 0 : index
    %283 = vector.load %arg2[%c208, %c0_82] : memref<232x128xf32, #tpu.memory_space<vmem>>, vector<1x32xf32>
    %284 = vector.broadcast %283 : vector<1x32xf32> to vector<64x32xf32>
    %285 = arith.addf %282, %284 : vector<64x32xf32>
    %286 = vector.shape_cast %285 : vector<64x32xf32> to vector<4x16x32xf32>
    %287 = arith.addf %240, %286 : vector<4x16x32xf32>
    %c216 = arith.constant 216 : index
    %c0_83 = arith.constant 0 : index
    %288 = vector.load %arg2[%c216, %c0_83] : memref<232x128xf32, #tpu.memory_space<vmem>>, vector<1x32xf32>
    %c224_84 = arith.constant 224 : index
    %c0_85 = arith.constant 0 : index
    %289 = vector.load %arg2[%c224_84, %c0_85] : memref<232x128xf32, #tpu.memory_space<vmem>>, vector<1x32xf32>
    %cst_86 = arith.constant dense<0.000000e+00> : vector<4x16xf32>
    %290 = vector.multi_reduction <add>, %287, %cst_86 [2] : vector<4x16x32xf32> to vector<4x16xf32>
    %291 = vector.shape_cast %290 : vector<4x16xf32> to vector<4x16x1xf32>
    %cst_87 = arith.constant 3.200000e+01 : f32
    %292 = vector.broadcast %cst_87 : f32 to vector<4x16x1xf32>
    %293 = arith.divf %291, %292 : vector<4x16x1xf32>
    %294 = vector.broadcast %293 : vector<4x16x1xf32> to vector<4x16x32xf32>
    %295 = arith.subf %287, %294 : vector<4x16x32xf32>
    %296 = arith.mulf %295, %295 : vector<4x16x32xf32>
    %cst_88 = arith.constant dense<0.000000e+00> : vector<4x16xf32>
    %297 = vector.multi_reduction <add>, %296, %cst_88 [2] : vector<4x16x32xf32> to vector<4x16xf32>
    %298 = vector.shape_cast %297 : vector<4x16xf32> to vector<4x16x1xf32>
    %cst_89 = arith.constant 3.200000e+01 : f32
    %299 = vector.broadcast %cst_89 : f32 to vector<4x16x1xf32>
    %300 = arith.divf %298, %299 : vector<4x16x1xf32>
    %cst_90 = arith.constant 9.99999974E-6 : f32
    %301 = vector.broadcast %cst_90 : f32 to vector<4x16x1xf32>
    %302 = arith.addf %300, %301 : vector<4x16x1xf32>
    %303 = math.rsqrt %302 : vector<4x16x1xf32>
    %304 = vector.broadcast %303 : vector<4x16x1xf32> to vector<4x16x32xf32>
    %305 = arith.mulf %295, %304 : vector<4x16x32xf32>
    %306 = vector.shape_cast %288 : vector<1x32xf32> to vector<1x1x32xf32>
    %307 = vector.broadcast %306 : vector<1x1x32xf32> to vector<4x16x32xf32>
    %308 = arith.mulf %305, %307 : vector<4x16x32xf32>
    %309 = vector.shape_cast %289 : vector<1x32xf32> to vector<1x1x32xf32>
    %310 = vector.broadcast %309 : vector<1x1x32xf32> to vector<4x16x32xf32>
    %311 = arith.addf %308, %310 : vector<4x16x32xf32>
    %c64_91 = arith.constant 64 : index
    %c0_92 = arith.constant 0 : index
    %312 = vector.load %arg2[%c64_91, %c0_92] : memref<232x128xf32, #tpu.memory_space<vmem>>, vector<4x16xf32>
    %313 = vector.shape_cast %312 : vector<4x16xf32> to vector<4x16x1xf32>
    %314 = vector.broadcast %313 : vector<4x16x1xf32> to vector<4x16x32xf32>
    %315 = arith.mulf %311, %314 : vector<4x16x32xf32>
    %cst_93 = arith.constant dense<0.000000e+00> : vector<4x32xf32>
    %316 = vector.multi_reduction <add>, %315, %cst_93 [1] : vector<4x16x32xf32> to vector<4x32xf32>
    %317 = arith.truncf %316 : vector<4x32xf32> to vector<4x32xbf16>
    %c448 = arith.constant 448 : index
    %c0_94 = arith.constant 0 : index
    %318 = vector.load %arg0[%c448, %c0_94] : memref<480x128xbf16, #tpu.memory_space<vmem>>, vector<32x32xbf16>
    %cst_95 = arith.constant dense<0.000000e+00> : vector<4x32xf32>
    %319 = tpu.matmul %317, %318, %cst_95 {dimension_numbers = #tpu.dot_dimension_numbers<[1], [0], [0], [1], [0, 0, 1, 1], [], []>} : vector<4x32xbf16>, vector<32x32xbf16>, vector<4x32xf32> -> vector<4x32xf32>
    %c0_96 = arith.constant 0 : index
    %c0_97 = arith.constant 0 : index
    %c0_98 = arith.constant 0 : index
    %320 = vector.load %arg4[%c0_96, %c0_97, %c0_98] : memref<2x8x192xf32, #tpu.memory_space<vmem>>, vector<2x8x192xf32>
    %321 = vector.shape_cast %320 : vector<2x8x192xf32> to vector<16x192xf32>
    %322 = arith.truncf %321 : vector<16x192xf32> to vector<16x192xbf16>
    %c0_99 = arith.constant 0 : index
    %c0_100 = arith.constant 0 : index
    %323 = vector.load %arg1[%c0_99, %c0_100] : memref<1152x256xbf16, #tpu.memory_space<vmem>>, vector<192x64xbf16>
    %cst_101 = arith.constant dense<0.000000e+00> : vector<16x64xf32>
    %324 = tpu.matmul %322, %323, %cst_101 {dimension_numbers = #tpu.dot_dimension_numbers<[1], [0], [0], [1], [0, 0, 1, 1], [], []>} : vector<16x192xbf16>, vector<192x64xbf16>, vector<16x64xf32> -> vector<16x64xf32>
    %325 = vector.shape_cast %324 : vector<16x64xf32> to vector<2x8x64xf32>
    %c0_102 = arith.constant 0 : index
    %c0_103 = arith.constant 0 : index
    %326 = vector.load %arg3[%c0_102, %c0_103] : memref<176x256xf32, #tpu.memory_space<vmem>>, vector<8x64xf32>
    %327 = vector.shape_cast %326 : vector<8x64xf32> to vector<1x8x64xf32>
    %328 = vector.broadcast %327 : vector<1x8x64xf32> to vector<2x8x64xf32>
    %329 = arith.addf %325, %328 : vector<2x8x64xf32>
    %c16 = arith.constant 16 : index
    %c0_104 = arith.constant 0 : index
    %330 = vector.load %arg3[%c16, %c0_104] : memref<176x256xf32, #tpu.memory_space<vmem>>, vector<1x64xf32>
    %c24 = arith.constant 24 : index
    %c0_105 = arith.constant 0 : index
    %331 = vector.load %arg3[%c24, %c0_105] : memref<176x256xf32, #tpu.memory_space<vmem>>, vector<1x64xf32>
    %cst_106 = arith.constant dense<0.000000e+00> : vector<2x8xf32>
    %332 = vector.multi_reduction <add>, %329, %cst_106 [2] : vector<2x8x64xf32> to vector<2x8xf32>
    %333 = vector.shape_cast %332 : vector<2x8xf32> to vector<2x8x1xf32>
    %cst_107 = arith.constant 6.400000e+01 : f32
    %334 = vector.broadcast %cst_107 : f32 to vector<2x8x1xf32>
    %335 = arith.divf %333, %334 : vector<2x8x1xf32>
    %336 = vector.broadcast %335 : vector<2x8x1xf32> to vector<2x8x64xf32>
    %337 = arith.subf %329, %336 : vector<2x8x64xf32>
    %338 = arith.mulf %337, %337 : vector<2x8x64xf32>
    %cst_108 = arith.constant dense<0.000000e+00> : vector<2x8xf32>
    %339 = vector.multi_reduction <add>, %338, %cst_108 [2] : vector<2x8x64xf32> to vector<2x8xf32>
    %340 = vector.shape_cast %339 : vector<2x8xf32> to vector<2x8x1xf32>
    %cst_109 = arith.constant 6.400000e+01 : f32
    %341 = vector.broadcast %cst_109 : f32 to vector<2x8x1xf32>
    %342 = arith.divf %340, %341 : vector<2x8x1xf32>
    %cst_110 = arith.constant 9.99999974E-6 : f32
    %343 = vector.broadcast %cst_110 : f32 to vector<2x8x1xf32>
    %344 = arith.addf %342, %343 : vector<2x8x1xf32>
    %345 = math.rsqrt %344 : vector<2x8x1xf32>
    %346 = vector.broadcast %345 : vector<2x8x1xf32> to vector<2x8x64xf32>
    %347 = arith.mulf %337, %346 : vector<2x8x64xf32>
    %348 = vector.shape_cast %330 : vector<1x64xf32> to vector<1x1x64xf32>
    %349 = vector.broadcast %348 : vector<1x1x64xf32> to vector<2x8x64xf32>
    %350 = arith.mulf %347, %349 : vector<2x8x64xf32>
    %351 = vector.shape_cast %331 : vector<1x64xf32> to vector<1x1x64xf32>
    %352 = vector.broadcast %351 : vector<1x1x64xf32> to vector<2x8x64xf32>
    %353 = arith.addf %350, %352 : vector<2x8x64xf32>
    %354 = tpu.iota {dimensions = array<i32: 1>} : vector<8x8xi32>
    %c7_i32_111 = arith.constant 7 : i32
    %355 = vector.broadcast %c7_i32_111 : i32 to vector<8x8xi32>
    %356 = arith.cmpi sge, %354, %355 : vector<8x8xi32>
    %cst_112 = arith.constant -1.000000e+30 : f32
    %cst_113 = arith.constant 0.000000e+00 : f32
    %357 = vector.broadcast %cst_112 : f32 to vector<8x8xf32>
    %358 = vector.broadcast %cst_113 : f32 to vector<8x8xf32>
    %359 = arith.select %356, %357, %358 : vector<8x8xi1>, vector<8x8xf32>
    %360 = tpu.iota {dimensions = array<i32: 0>} : vector<8x1xi32>
    %c5_i32_114 = arith.constant 5 : i32
    %361 = vector.broadcast %c5_i32_114 : i32 to vector<8x1xi32>
    %362 = arith.cmpi sge, %360, %361 : vector<8x1xi32>
    %c7_i32_115 = arith.constant 7 : i32
    %363 = vector.broadcast %c7_i32_115 : i32 to vector<8x1xi32>
    %364 = arith.cmpi slt, %360, %363 : vector<8x1xi32>
    %365 = arith.andi %362, %364 : vector<8x1xi1>
    %cst_116 = arith.constant 0.000000e+00 : f32
    %cst_117 = arith.constant 1.000000e+00 : f32
    %366 = vector.broadcast %cst_116 : f32 to vector<8x1xf32>
    %367 = vector.broadcast %cst_117 : f32 to vector<8x1xf32>
    %368 = arith.select %365, %366, %367 : vector<8x1xi1>, vector<8x1xf32>
    %c32_118 = arith.constant 32 : index
    %c0_119 = arith.constant 0 : index
    %369 = vector.load %arg3[%c32_118, %c0_119] : memref<176x256xf32, #tpu.memory_space<vmem>>, vector<1x64xf32>
    %c40 = arith.constant 40 : index
    %c0_120 = arith.constant 0 : index
    %370 = vector.load %arg3[%c40, %c0_120] : memref<176x256xf32, #tpu.memory_space<vmem>>, vector<1x64xf32>
    %cst_121 = arith.constant dense<0.000000e+00> : vector<2x8xf32>
    %371 = vector.multi_reduction <add>, %353, %cst_121 [2] : vector<2x8x64xf32> to vector<2x8xf32>
    %372 = vector.shape_cast %371 : vector<2x8xf32> to vector<2x8x1xf32>
    %cst_122 = arith.constant 6.400000e+01 : f32
    %373 = vector.broadcast %cst_122 : f32 to vector<2x8x1xf32>
    %374 = arith.divf %372, %373 : vector<2x8x1xf32>
    %375 = vector.broadcast %374 : vector<2x8x1xf32> to vector<2x8x64xf32>
    %376 = arith.subf %353, %375 : vector<2x8x64xf32>
    %377 = arith.mulf %376, %376 : vector<2x8x64xf32>
    %cst_123 = arith.constant dense<0.000000e+00> : vector<2x8xf32>
    %378 = vector.multi_reduction <add>, %377, %cst_123 [2] : vector<2x8x64xf32> to vector<2x8xf32>
    %379 = vector.shape_cast %378 : vector<2x8xf32> to vector<2x8x1xf32>
    %cst_124 = arith.constant 6.400000e+01 : f32
    %380 = vector.broadcast %cst_124 : f32 to vector<2x8x1xf32>
    %381 = arith.divf %379, %380 : vector<2x8x1xf32>
    %cst_125 = arith.constant 9.99999974E-6 : f32
    %382 = vector.broadcast %cst_125 : f32 to vector<2x8x1xf32>
    %383 = arith.addf %381, %382 : vector<2x8x1xf32>
    %384 = math.rsqrt %383 : vector<2x8x1xf32>
    %385 = vector.broadcast %384 : vector<2x8x1xf32> to vector<2x8x64xf32>
    %386 = arith.mulf %376, %385 : vector<2x8x64xf32>
    %387 = vector.shape_cast %369 : vector<1x64xf32> to vector<1x1x64xf32>
    %388 = vector.broadcast %387 : vector<1x1x64xf32> to vector<2x8x64xf32>
    %389 = arith.mulf %386, %388 : vector<2x8x64xf32>
    %390 = vector.shape_cast %370 : vector<1x64xf32> to vector<1x1x64xf32>
    %391 = vector.broadcast %390 : vector<1x1x64xf32> to vector<2x8x64xf32>
    %392 = arith.addf %389, %391 : vector<2x8x64xf32>
    %393 = vector.shape_cast %392 : vector<2x8x64xf32> to vector<16x64xf32>
    %394 = arith.truncf %393 : vector<16x64xf32> to vector<16x64xbf16>
    %c192_126 = arith.constant 192 : index
    %c0_127 = arith.constant 0 : index
    %395 = vector.load %arg1[%c192_126, %c0_127] : memref<1152x256xbf16, #tpu.memory_space<vmem>>, vector<64x192xbf16>
    %cst_128 = arith.constant dense<0.000000e+00> : vector<16x192xf32>
    %396 = tpu.matmul %394, %395, %cst_128 {dimension_numbers = #tpu.dot_dimension_numbers<[1], [0], [0], [1], [0, 0, 1, 1], [], []>} : vector<16x64xbf16>, vector<64x192xbf16>, vector<16x192xf32> -> vector<16x192xf32>
    %c48 = arith.constant 48 : index
    %c0_129 = arith.constant 0 : index
    %397 = vector.load %arg3[%c48, %c0_129] : memref<176x256xf32, #tpu.memory_space<vmem>>, vector<1x192xf32>
    %398 = vector.broadcast %397 : vector<1x192xf32> to vector<16x192xf32>
    %399 = arith.addf %396, %398 : vector<16x192xf32>
    %400 = vector.shape_cast %399 : vector<16x192xf32> to vector<2x8x192xf32>
    %401 = arith.truncf %400 : vector<2x8x192xf32> to vector<2x8x192xbf16>
    %402 = vector.extract_strided_slice %401 {offsets = [0, 0, 0], sizes = [2, 8, 32], strides = [1, 1, 1]} : vector<2x8x192xbf16> to vector<2x8x32xbf16>
    %403 = vector.extract_strided_slice %401 {offsets = [0, 0, 64], sizes = [2, 8, 32], strides = [1, 1, 1]} : vector<2x8x192xbf16> to vector<2x8x32xbf16>
    %404 = vector.extract_strided_slice %401 {offsets = [0, 0, 128], sizes = [2, 8, 32], strides = [1, 1, 1]} : vector<2x8x192xbf16> to vector<2x8x32xbf16>
    "tpu.trace_start"() <{level = 10 : i32, message = "bqd,bkd->bqk"}> : () -> ()
    %cst_130 = arith.constant dense<0.000000e+00> : vector<2x8x8xf32>
    %405 = tpu.matmul %402, %403, %cst_130 {dimension_numbers = #tpu.dot_dimension_numbers<[2], [2], [1], [1], [0, 0, 0, 1, 1, 1], [0], [0]>} : vector<2x8x32xbf16>, vector<2x8x32xbf16>, vector<2x8x8xf32> -> vector<2x8x8xf32>
    "tpu.trace_stop"() : () -> ()
    %cst_131 = arith.constant 0.176776692 : f32
    %406 = vector.broadcast %cst_131 : f32 to vector<2x8x8xf32>
    %407 = arith.mulf %405, %406 : vector<2x8x8xf32>
    %408 = vector.shape_cast %359 : vector<8x8xf32> to vector<1x8x8xf32>
    %409 = vector.broadcast %408 : vector<1x8x8xf32> to vector<2x8x8xf32>
    %410 = arith.addf %407, %409 : vector<2x8x8xf32>
    %cst_132 = arith.constant dense<0xFF800000> : vector<2x8xf32>
    %411 = vector.multi_reduction <maximumf>, %410, %cst_132 [2] : vector<2x8x8xf32> to vector<2x8xf32>
    %412 = vector.shape_cast %411 : vector<2x8xf32> to vector<2x8x1xf32>
    %413 = vector.broadcast %412 : vector<2x8x1xf32> to vector<2x8x8xf32>
    %414 = arith.subf %410, %413 : vector<2x8x8xf32>
    %415 = math.exp %414 : vector<2x8x8xf32>
    %cst_133 = arith.constant dense<0.000000e+00> : vector<2x8xf32>
    %416 = vector.multi_reduction <add>, %415, %cst_133 [2] : vector<2x8x8xf32> to vector<2x8xf32>
    %417 = vector.shape_cast %416 : vector<2x8xf32> to vector<2x8x1xf32>
    %418 = tpu.reciprocal %417 {approx = true} : vector<2x8x1xf32> -> vector<2x8x1xf32>
    %419 = vector.broadcast %418 : vector<2x8x1xf32> to vector<2x8x8xf32>
    %420 = arith.mulf %415, %419 : vector<2x8x8xf32>
    %421 = arith.truncf %420 : vector<2x8x8xf32> to vector<2x8x8xbf16>
    "tpu.trace_start"() <{level = 10 : i32, message = "bqk,bkd->bqd"}> : () -> ()
    %cst_134 = arith.constant dense<0.000000e+00> : vector<2x8x32xf32>
    %422 = tpu.matmul %421, %404, %cst_134 {dimension_numbers = #tpu.dot_dimension_numbers<[2], [1], [1], [2], [0, 0, 0, 1, 1, 2], [0], [0]>} : vector<2x8x8xbf16>, vector<2x8x32xbf16>, vector<2x8x32xf32> -> vector<2x8x32xf32>
    "tpu.trace_stop"() : () -> ()
    %423 = vector.extract_strided_slice %401 {offsets = [0, 0, 32], sizes = [2, 8, 32], strides = [1, 1, 1]} : vector<2x8x192xbf16> to vector<2x8x32xbf16>
    %424 = vector.extract_strided_slice %401 {offsets = [0, 0, 96], sizes = [2, 8, 32], strides = [1, 1, 1]} : vector<2x8x192xbf16> to vector<2x8x32xbf16>
    %425 = vector.extract_strided_slice %401 {offsets = [0, 0, 160], sizes = [2, 8, 32], strides = [1, 1, 1]} : vector<2x8x192xbf16> to vector<2x8x32xbf16>
    "tpu.trace_start"() <{level = 10 : i32, message = "bqd,bkd->bqk"}> : () -> ()
    %cst_135 = arith.constant dense<0.000000e+00> : vector<2x8x8xf32>
    %426 = tpu.matmul %423, %424, %cst_135 {dimension_numbers = #tpu.dot_dimension_numbers<[2], [2], [1], [1], [0, 0, 0, 1, 1, 1], [0], [0]>} : vector<2x8x32xbf16>, vector<2x8x32xbf16>, vector<2x8x8xf32> -> vector<2x8x8xf32>
    "tpu.trace_stop"() : () -> ()
    %cst_136 = arith.constant 0.176776692 : f32
    %427 = vector.broadcast %cst_136 : f32 to vector<2x8x8xf32>
    %428 = arith.mulf %426, %427 : vector<2x8x8xf32>
    %429 = vector.shape_cast %359 : vector<8x8xf32> to vector<1x8x8xf32>
    %430 = vector.broadcast %429 : vector<1x8x8xf32> to vector<2x8x8xf32>
    %431 = arith.addf %428, %430 : vector<2x8x8xf32>
    %cst_137 = arith.constant dense<0xFF800000> : vector<2x8xf32>
    %432 = vector.multi_reduction <maximumf>, %431, %cst_137 [2] : vector<2x8x8xf32> to vector<2x8xf32>
    %433 = vector.shape_cast %432 : vector<2x8xf32> to vector<2x8x1xf32>
    %434 = vector.broadcast %433 : vector<2x8x1xf32> to vector<2x8x8xf32>
    %435 = arith.subf %431, %434 : vector<2x8x8xf32>
    %436 = math.exp %435 : vector<2x8x8xf32>
    %cst_138 = arith.constant dense<0.000000e+00> : vector<2x8xf32>
    %437 = vector.multi_reduction <add>, %436, %cst_138 [2] : vector<2x8x8xf32> to vector<2x8xf32>
    %438 = vector.shape_cast %437 : vector<2x8xf32> to vector<2x8x1xf32>
    %439 = tpu.reciprocal %438 {approx = true} : vector<2x8x1xf32> -> vector<2x8x1xf32>
    %440 = vector.broadcast %439 : vector<2x8x1xf32> to vector<2x8x8xf32>
    %441 = arith.mulf %436, %440 : vector<2x8x8xf32>
    %442 = arith.truncf %441 : vector<2x8x8xf32> to vector<2x8x8xbf16>
    "tpu.trace_start"() <{level = 10 : i32, message = "bqk,bkd->bqd"}> : () -> ()
    %cst_139 = arith.constant dense<0.000000e+00> : vector<2x8x32xf32>
    %443 = tpu.matmul %442, %425, %cst_139 {dimension_numbers = #tpu.dot_dimension_numbers<[2], [1], [1], [2], [0, 0, 0, 1, 1, 2], [0], [0]>} : vector<2x8x8xbf16>, vector<2x8x32xbf16>, vector<2x8x32xf32> -> vector<2x8x32xf32>
    "tpu.trace_stop"() : () -> ()
    %444 = tpu.concatenate %422, %443 in 2 : vector<2x8x32xf32>, vector<2x8x32xf32> -> vector<2x8x64xf32>
    %445 = vector.shape_cast %444 : vector<2x8x64xf32> to vector<16x64xf32>
    %446 = arith.truncf %445 : vector<16x64xf32> to vector<16x64xbf16>
    %c256_140 = arith.constant 256 : index
    %c0_141 = arith.constant 0 : index
    %447 = vector.load %arg1[%c256_140, %c0_141] : memref<1152x256xbf16, #tpu.memory_space<vmem>>, vector<64x64xbf16>
    %cst_142 = arith.constant dense<0.000000e+00> : vector<16x64xf32>
    %448 = tpu.matmul %446, %447, %cst_142 {dimension_numbers = #tpu.dot_dimension_numbers<[1], [0], [0], [1], [0, 0, 1, 1], [], []>} : vector<16x64xbf16>, vector<64x64xbf16>, vector<16x64xf32> -> vector<16x64xf32>
    %c56 = arith.constant 56 : index
    %c0_143 = arith.constant 0 : index
    %449 = vector.load %arg3[%c56, %c0_143] : memref<176x256xf32, #tpu.memory_space<vmem>>, vector<1x64xf32>
    %450 = vector.broadcast %449 : vector<1x64xf32> to vector<16x64xf32>
    %451 = arith.addf %448, %450 : vector<16x64xf32>
    %452 = vector.shape_cast %451 : vector<16x64xf32> to vector<2x8x64xf32>
    %453 = arith.addf %353, %452 : vector<2x8x64xf32>
    %c64_144 = arith.constant 64 : index
    %c0_145 = arith.constant 0 : index
    %454 = vector.load %arg3[%c64_144, %c0_145] : memref<176x256xf32, #tpu.memory_space<vmem>>, vector<1x64xf32>
    %c72_146 = arith.constant 72 : index
    %c0_147 = arith.constant 0 : index
    %455 = vector.load %arg3[%c72_146, %c0_147] : memref<176x256xf32, #tpu.memory_space<vmem>>, vector<1x64xf32>
    %cst_148 = arith.constant dense<0.000000e+00> : vector<2x8xf32>
    %456 = vector.multi_reduction <add>, %453, %cst_148 [2] : vector<2x8x64xf32> to vector<2x8xf32>
    %457 = vector.shape_cast %456 : vector<2x8xf32> to vector<2x8x1xf32>
    %cst_149 = arith.constant 6.400000e+01 : f32
    %458 = vector.broadcast %cst_149 : f32 to vector<2x8x1xf32>
    %459 = arith.divf %457, %458 : vector<2x8x1xf32>
    %460 = vector.broadcast %459 : vector<2x8x1xf32> to vector<2x8x64xf32>
    %461 = arith.subf %453, %460 : vector<2x8x64xf32>
    %462 = arith.mulf %461, %461 : vector<2x8x64xf32>
    %cst_150 = arith.constant dense<0.000000e+00> : vector<2x8xf32>
    %463 = vector.multi_reduction <add>, %462, %cst_150 [2] : vector<2x8x64xf32> to vector<2x8xf32>
    %464 = vector.shape_cast %463 : vector<2x8xf32> to vector<2x8x1xf32>
    %cst_151 = arith.constant 6.400000e+01 : f32
    %465 = vector.broadcast %cst_151 : f32 to vector<2x8x1xf32>
    %466 = arith.divf %464, %465 : vector<2x8x1xf32>
    %cst_152 = arith.constant 9.99999974E-6 : f32
    %467 = vector.broadcast %cst_152 : f32 to vector<2x8x1xf32>
    %468 = arith.addf %466, %467 : vector<2x8x1xf32>
    %469 = math.rsqrt %468 : vector<2x8x1xf32>
    %470 = vector.broadcast %469 : vector<2x8x1xf32> to vector<2x8x64xf32>
    %471 = arith.mulf %461, %470 : vector<2x8x64xf32>
    %472 = vector.shape_cast %454 : vector<1x64xf32> to vector<1x1x64xf32>
    %473 = vector.broadcast %472 : vector<1x1x64xf32> to vector<2x8x64xf32>
    %474 = arith.mulf %471, %473 : vector<2x8x64xf32>
    %475 = vector.shape_cast %455 : vector<1x64xf32> to vector<1x1x64xf32>
    %476 = vector.broadcast %475 : vector<1x1x64xf32> to vector<2x8x64xf32>
    %477 = arith.addf %474, %476 : vector<2x8x64xf32>
    %478 = vector.shape_cast %477 : vector<2x8x64xf32> to vector<16x64xf32>
    %479 = arith.truncf %478 : vector<16x64xf32> to vector<16x64xbf16>
    %c320_153 = arith.constant 320 : index
    %c0_154 = arith.constant 0 : index
    %480 = vector.load %arg1[%c320_153, %c0_154] : memref<1152x256xbf16, #tpu.memory_space<vmem>>, vector<64x256xbf16>
    %cst_155 = arith.constant dense<0.000000e+00> : vector<16x256xf32>
    %481 = tpu.matmul %479, %480, %cst_155 {dimension_numbers = #tpu.dot_dimension_numbers<[1], [0], [0], [1], [0, 0, 1, 1], [], []>} : vector<16x64xbf16>, vector<64x256xbf16>, vector<16x256xf32> -> vector<16x256xf32>
    %c80 = arith.constant 80 : index
    %c0_156 = arith.constant 0 : index
    %482 = vector.load %arg3[%c80, %c0_156] : memref<176x256xf32, #tpu.memory_space<vmem>>, vector<1x256xf32>
    %483 = vector.broadcast %482 : vector<1x256xf32> to vector<16x256xf32>
    %484 = arith.addf %481, %483 : vector<16x256xf32>
    %cst_157 = arith.constant 1.702000e+00 : f32
    %485 = vector.broadcast %cst_157 : f32 to vector<16x256xf32>
    %486 = arith.mulf %485, %484 : vector<16x256xf32>
    %487 = arith.negf %486 : vector<16x256xf32>
    %488 = math.exp %487 : vector<16x256xf32>
    %cst_158 = arith.constant 1.000000e+00 : f32
    %489 = vector.broadcast %cst_158 : f32 to vector<16x256xf32>
    %490 = arith.addf %489, %488 : vector<16x256xf32>
    %491 = arith.divf %489, %490 : vector<16x256xf32>
    %492 = arith.mulf %484, %491 : vector<16x256xf32>
    %493 = arith.truncf %492 : vector<16x256xf32> to vector<16x256xbf16>
    %c384 = arith.constant 384 : index
    %c0_159 = arith.constant 0 : index
    %494 = vector.load %arg1[%c384, %c0_159] : memref<1152x256xbf16, #tpu.memory_space<vmem>>, vector<256x64xbf16>
    %cst_160 = arith.constant dense<0.000000e+00> : vector<16x64xf32>
    %495 = tpu.matmul %493, %494, %cst_160 {dimension_numbers = #tpu.dot_dimension_numbers<[1], [0], [0], [1], [0, 0, 1, 1], [], []>} : vector<16x256xbf16>, vector<256x64xbf16>, vector<16x64xf32> -> vector<16x64xf32>
    %c88_161 = arith.constant 88 : index
    %c0_162 = arith.constant 0 : index
    %496 = vector.load %arg3[%c88_161, %c0_162] : memref<176x256xf32, #tpu.memory_space<vmem>>, vector<1x64xf32>
    %497 = vector.broadcast %496 : vector<1x64xf32> to vector<16x64xf32>
    %498 = arith.addf %495, %497 : vector<16x64xf32>
    %499 = vector.shape_cast %498 : vector<16x64xf32> to vector<2x8x64xf32>
    %500 = arith.addf %453, %499 : vector<2x8x64xf32>
    %501 = vector.shape_cast %368 : vector<8x1xf32> to vector<1x8x1xf32>
    %502 = vector.broadcast %501 : vector<1x8x1xf32> to vector<2x8x64xf32>
    %503 = arith.mulf %500, %502 : vector<2x8x64xf32>
    %c8 = arith.constant 8 : index
    %c0_163 = arith.constant 0 : index
    %504 = vector.load %arg3[%c8, %c0_163] : memref<176x256xf32, #tpu.memory_space<vmem>>, vector<8x64xf32>
    %505 = vector.shape_cast %504 : vector<8x64xf32> to vector<1x8x64xf32>
    %506 = vector.broadcast %505 : vector<1x8x64xf32> to vector<2x8x64xf32>
    %507 = arith.addf %503, %506 : vector<2x8x64xf32>
    %c96_164 = arith.constant 96 : index
    %c0_165 = arith.constant 0 : index
    %508 = vector.load %arg3[%c96_164, %c0_165] : memref<176x256xf32, #tpu.memory_space<vmem>>, vector<1x64xf32>
    %c104_166 = arith.constant 104 : index
    %c0_167 = arith.constant 0 : index
    %509 = vector.load %arg3[%c104_166, %c0_167] : memref<176x256xf32, #tpu.memory_space<vmem>>, vector<1x64xf32>
    %cst_168 = arith.constant dense<0.000000e+00> : vector<2x8xf32>
    %510 = vector.multi_reduction <add>, %507, %cst_168 [2] : vector<2x8x64xf32> to vector<2x8xf32>
    %511 = vector.shape_cast %510 : vector<2x8xf32> to vector<2x8x1xf32>
    %cst_169 = arith.constant 6.400000e+01 : f32
    %512 = vector.broadcast %cst_169 : f32 to vector<2x8x1xf32>
    %513 = arith.divf %511, %512 : vector<2x8x1xf32>
    %514 = vector.broadcast %513 : vector<2x8x1xf32> to vector<2x8x64xf32>
    %515 = arith.subf %507, %514 : vector<2x8x64xf32>
    %516 = arith.mulf %515, %515 : vector<2x8x64xf32>
    %cst_170 = arith.constant dense<0.000000e+00> : vector<2x8xf32>
    %517 = vector.multi_reduction <add>, %516, %cst_170 [2] : vector<2x8x64xf32> to vector<2x8xf32>
    %518 = vector.shape_cast %517 : vector<2x8xf32> to vector<2x8x1xf32>
    %cst_171 = arith.constant 6.400000e+01 : f32
    %519 = vector.broadcast %cst_171 : f32 to vector<2x8x1xf32>
    %520 = arith.divf %518, %519 : vector<2x8x1xf32>
    %cst_172 = arith.constant 9.99999974E-6 : f32
    %521 = vector.broadcast %cst_172 : f32 to vector<2x8x1xf32>
    %522 = arith.addf %520, %521 : vector<2x8x1xf32>
    %523 = math.rsqrt %522 : vector<2x8x1xf32>
    %524 = vector.broadcast %523 : vector<2x8x1xf32> to vector<2x8x64xf32>
    %525 = arith.mulf %515, %524 : vector<2x8x64xf32>
    %526 = vector.shape_cast %508 : vector<1x64xf32> to vector<1x1x64xf32>
    %527 = vector.broadcast %526 : vector<1x1x64xf32> to vector<2x8x64xf32>
    %528 = arith.mulf %525, %527 : vector<2x8x64xf32>
    %529 = vector.shape_cast %509 : vector<1x64xf32> to vector<1x1x64xf32>
    %530 = vector.broadcast %529 : vector<1x1x64xf32> to vector<2x8x64xf32>
    %531 = arith.addf %528, %530 : vector<2x8x64xf32>
    %532 = vector.shape_cast %531 : vector<2x8x64xf32> to vector<16x64xf32>
    %533 = arith.truncf %532 : vector<16x64xf32> to vector<16x64xbf16>
    %c640 = arith.constant 640 : index
    %c0_173 = arith.constant 0 : index
    %534 = vector.load %arg1[%c640, %c0_173] : memref<1152x256xbf16, #tpu.memory_space<vmem>>, vector<64x192xbf16>
    %cst_174 = arith.constant dense<0.000000e+00> : vector<16x192xf32>
    %535 = tpu.matmul %533, %534, %cst_174 {dimension_numbers = #tpu.dot_dimension_numbers<[1], [0], [0], [1], [0, 0, 1, 1], [], []>} : vector<16x64xbf16>, vector<64x192xbf16>, vector<16x192xf32> -> vector<16x192xf32>
    %c112_175 = arith.constant 112 : index
    %c0_176 = arith.constant 0 : index
    %536 = vector.load %arg3[%c112_175, %c0_176] : memref<176x256xf32, #tpu.memory_space<vmem>>, vector<1x192xf32>
    %537 = vector.broadcast %536 : vector<1x192xf32> to vector<16x192xf32>
    %538 = arith.addf %535, %537 : vector<16x192xf32>
    %539 = vector.shape_cast %538 : vector<16x192xf32> to vector<2x8x192xf32>
    %540 = arith.truncf %539 : vector<2x8x192xf32> to vector<2x8x192xbf16>
    %541 = vector.extract_strided_slice %540 {offsets = [0, 0, 0], sizes = [2, 8, 32], strides = [1, 1, 1]} : vector<2x8x192xbf16> to vector<2x8x32xbf16>
    %542 = vector.extract_strided_slice %540 {offsets = [0, 0, 64], sizes = [2, 8, 32], strides = [1, 1, 1]} : vector<2x8x192xbf16> to vector<2x8x32xbf16>
    %543 = vector.extract_strided_slice %540 {offsets = [0, 0, 128], sizes = [2, 8, 32], strides = [1, 1, 1]} : vector<2x8x192xbf16> to vector<2x8x32xbf16>
    "tpu.trace_start"() <{level = 10 : i32, message = "bqd,bkd->bqk"}> : () -> ()
    %cst_177 = arith.constant dense<0.000000e+00> : vector<2x8x8xf32>
    %544 = tpu.matmul %541, %542, %cst_177 {dimension_numbers = #tpu.dot_dimension_numbers<[2], [2], [1], [1], [0, 0, 0, 1, 1, 1], [0], [0]>} : vector<2x8x32xbf16>, vector<2x8x32xbf16>, vector<2x8x8xf32> -> vector<2x8x8xf32>
    "tpu.trace_stop"() : () -> ()
    %cst_178 = arith.constant 0.176776692 : f32
    %545 = vector.broadcast %cst_178 : f32 to vector<2x8x8xf32>
    %546 = arith.mulf %544, %545 : vector<2x8x8xf32>
    %547 = vector.shape_cast %359 : vector<8x8xf32> to vector<1x8x8xf32>
    %548 = vector.broadcast %547 : vector<1x8x8xf32> to vector<2x8x8xf32>
    %549 = arith.addf %546, %548 : vector<2x8x8xf32>
    %cst_179 = arith.constant dense<0xFF800000> : vector<2x8xf32>
    %550 = vector.multi_reduction <maximumf>, %549, %cst_179 [2] : vector<2x8x8xf32> to vector<2x8xf32>
    %551 = vector.shape_cast %550 : vector<2x8xf32> to vector<2x8x1xf32>
    %552 = vector.broadcast %551 : vector<2x8x1xf32> to vector<2x8x8xf32>
    %553 = arith.subf %549, %552 : vector<2x8x8xf32>
    %554 = math.exp %553 : vector<2x8x8xf32>
    %cst_180 = arith.constant dense<0.000000e+00> : vector<2x8xf32>
    %555 = vector.multi_reduction <add>, %554, %cst_180 [2] : vector<2x8x8xf32> to vector<2x8xf32>
    %556 = vector.shape_cast %555 : vector<2x8xf32> to vector<2x8x1xf32>
    %557 = tpu.reciprocal %556 {approx = true} : vector<2x8x1xf32> -> vector<2x8x1xf32>
    %558 = vector.broadcast %557 : vector<2x8x1xf32> to vector<2x8x8xf32>
    %559 = arith.mulf %554, %558 : vector<2x8x8xf32>
    %560 = arith.truncf %559 : vector<2x8x8xf32> to vector<2x8x8xbf16>
    "tpu.trace_start"() <{level = 10 : i32, message = "bqk,bkd->bqd"}> : () -> ()
    %cst_181 = arith.constant dense<0.000000e+00> : vector<2x8x32xf32>
    %561 = tpu.matmul %560, %543, %cst_181 {dimension_numbers = #tpu.dot_dimension_numbers<[2], [1], [1], [2], [0, 0, 0, 1, 1, 2], [0], [0]>} : vector<2x8x8xbf16>, vector<2x8x32xbf16>, vector<2x8x32xf32> -> vector<2x8x32xf32>
    "tpu.trace_stop"() : () -> ()
    %562 = vector.extract_strided_slice %540 {offsets = [0, 0, 32], sizes = [2, 8, 32], strides = [1, 1, 1]} : vector<2x8x192xbf16> to vector<2x8x32xbf16>
    %563 = vector.extract_strided_slice %540 {offsets = [0, 0, 96], sizes = [2, 8, 32], strides = [1, 1, 1]} : vector<2x8x192xbf16> to vector<2x8x32xbf16>
    %564 = vector.extract_strided_slice %540 {offsets = [0, 0, 160], sizes = [2, 8, 32], strides = [1, 1, 1]} : vector<2x8x192xbf16> to vector<2x8x32xbf16>
    "tpu.trace_start"() <{level = 10 : i32, message = "bqd,bkd->bqk"}> : () -> ()
    %cst_182 = arith.constant dense<0.000000e+00> : vector<2x8x8xf32>
    %565 = tpu.matmul %562, %563, %cst_182 {dimension_numbers = #tpu.dot_dimension_numbers<[2], [2], [1], [1], [0, 0, 0, 1, 1, 1], [0], [0]>} : vector<2x8x32xbf16>, vector<2x8x32xbf16>, vector<2x8x8xf32> -> vector<2x8x8xf32>
    "tpu.trace_stop"() : () -> ()
    %cst_183 = arith.constant 0.176776692 : f32
    %566 = vector.broadcast %cst_183 : f32 to vector<2x8x8xf32>
    %567 = arith.mulf %565, %566 : vector<2x8x8xf32>
    %568 = vector.shape_cast %359 : vector<8x8xf32> to vector<1x8x8xf32>
    %569 = vector.broadcast %568 : vector<1x8x8xf32> to vector<2x8x8xf32>
    %570 = arith.addf %567, %569 : vector<2x8x8xf32>
    %cst_184 = arith.constant dense<0xFF800000> : vector<2x8xf32>
    %571 = vector.multi_reduction <maximumf>, %570, %cst_184 [2] : vector<2x8x8xf32> to vector<2x8xf32>
    %572 = vector.shape_cast %571 : vector<2x8xf32> to vector<2x8x1xf32>
    %573 = vector.broadcast %572 : vector<2x8x1xf32> to vector<2x8x8xf32>
    %574 = arith.subf %570, %573 : vector<2x8x8xf32>
    %575 = math.exp %574 : vector<2x8x8xf32>
    %cst_185 = arith.constant dense<0.000000e+00> : vector<2x8xf32>
    %576 = vector.multi_reduction <add>, %575, %cst_185 [2] : vector<2x8x8xf32> to vector<2x8xf32>
    %577 = vector.shape_cast %576 : vector<2x8xf32> to vector<2x8x1xf32>
    %578 = tpu.reciprocal %577 {approx = true} : vector<2x8x1xf32> -> vector<2x8x1xf32>
    %579 = vector.broadcast %578 : vector<2x8x1xf32> to vector<2x8x8xf32>
    %580 = arith.mulf %575, %579 : vector<2x8x8xf32>
    %581 = arith.truncf %580 : vector<2x8x8xf32> to vector<2x8x8xbf16>
    "tpu.trace_start"() <{level = 10 : i32, message = "bqk,bkd->bqd"}> : () -> ()
    %cst_186 = arith.constant dense<0.000000e+00> : vector<2x8x32xf32>
    %582 = tpu.matmul %581, %564, %cst_186 {dimension_numbers = #tpu.dot_dimension_numbers<[2], [1], [1], [2], [0, 0, 0, 1, 1, 2], [0], [0]>} : vector<2x8x8xbf16>, vector<2x8x32xbf16>, vector<2x8x32xf32> -> vector<2x8x32xf32>
    "tpu.trace_stop"() : () -> ()
    %583 = tpu.concatenate %561, %582 in 2 : vector<2x8x32xf32>, vector<2x8x32xf32> -> vector<2x8x64xf32>
    %584 = vector.shape_cast %583 : vector<2x8x64xf32> to vector<16x64xf32>
    %585 = arith.truncf %584 : vector<16x64xf32> to vector<16x64xbf16>
    %c704 = arith.constant 704 : index
    %c0_187 = arith.constant 0 : index
    %586 = vector.load %arg1[%c704, %c0_187] : memref<1152x256xbf16, #tpu.memory_space<vmem>>, vector<64x64xbf16>
    %cst_188 = arith.constant dense<0.000000e+00> : vector<16x64xf32>
    %587 = tpu.matmul %585, %586, %cst_188 {dimension_numbers = #tpu.dot_dimension_numbers<[1], [0], [0], [1], [0, 0, 1, 1], [], []>} : vector<16x64xbf16>, vector<64x64xbf16>, vector<16x64xf32> -> vector<16x64xf32>
    %c120_189 = arith.constant 120 : index
    %c0_190 = arith.constant 0 : index
    %588 = vector.load %arg3[%c120_189, %c0_190] : memref<176x256xf32, #tpu.memory_space<vmem>>, vector<1x64xf32>
    %589 = vector.broadcast %588 : vector<1x64xf32> to vector<16x64xf32>
    %590 = arith.addf %587, %589 : vector<16x64xf32>
    %591 = vector.shape_cast %590 : vector<16x64xf32> to vector<2x8x64xf32>
    %592 = arith.addf %507, %591 : vector<2x8x64xf32>
    %c128_191 = arith.constant 128 : index
    %c0_192 = arith.constant 0 : index
    %593 = vector.load %arg3[%c128_191, %c0_192] : memref<176x256xf32, #tpu.memory_space<vmem>>, vector<1x64xf32>
    %c136_193 = arith.constant 136 : index
    %c0_194 = arith.constant 0 : index
    %594 = vector.load %arg3[%c136_193, %c0_194] : memref<176x256xf32, #tpu.memory_space<vmem>>, vector<1x64xf32>
    %cst_195 = arith.constant dense<0.000000e+00> : vector<2x8xf32>
    %595 = vector.multi_reduction <add>, %592, %cst_195 [2] : vector<2x8x64xf32> to vector<2x8xf32>
    %596 = vector.shape_cast %595 : vector<2x8xf32> to vector<2x8x1xf32>
    %cst_196 = arith.constant 6.400000e+01 : f32
    %597 = vector.broadcast %cst_196 : f32 to vector<2x8x1xf32>
    %598 = arith.divf %596, %597 : vector<2x8x1xf32>
    %599 = vector.broadcast %598 : vector<2x8x1xf32> to vector<2x8x64xf32>
    %600 = arith.subf %592, %599 : vector<2x8x64xf32>
    %601 = arith.mulf %600, %600 : vector<2x8x64xf32>
    %cst_197 = arith.constant dense<0.000000e+00> : vector<2x8xf32>
    %602 = vector.multi_reduction <add>, %601, %cst_197 [2] : vector<2x8x64xf32> to vector<2x8xf32>
    %603 = vector.shape_cast %602 : vector<2x8xf32> to vector<2x8x1xf32>
    %cst_198 = arith.constant 6.400000e+01 : f32
    %604 = vector.broadcast %cst_198 : f32 to vector<2x8x1xf32>
    %605 = arith.divf %603, %604 : vector<2x8x1xf32>
    %cst_199 = arith.constant 9.99999974E-6 : f32
    %606 = vector.broadcast %cst_199 : f32 to vector<2x8x1xf32>
    %607 = arith.addf %605, %606 : vector<2x8x1xf32>
    %608 = math.rsqrt %607 : vector<2x8x1xf32>
    %609 = vector.broadcast %608 : vector<2x8x1xf32> to vector<2x8x64xf32>
    %610 = arith.mulf %600, %609 : vector<2x8x64xf32>
    %611 = vector.shape_cast %593 : vector<1x64xf32> to vector<1x1x64xf32>
    %612 = vector.broadcast %611 : vector<1x1x64xf32> to vector<2x8x64xf32>
    %613 = arith.mulf %610, %612 : vector<2x8x64xf32>
    %614 = vector.shape_cast %594 : vector<1x64xf32> to vector<1x1x64xf32>
    %615 = vector.broadcast %614 : vector<1x1x64xf32> to vector<2x8x64xf32>
    %616 = arith.addf %613, %615 : vector<2x8x64xf32>
    %617 = vector.shape_cast %616 : vector<2x8x64xf32> to vector<16x64xf32>
    %618 = arith.truncf %617 : vector<16x64xf32> to vector<16x64xbf16>
    %c768 = arith.constant 768 : index
    %c0_200 = arith.constant 0 : index
    %619 = vector.load %arg1[%c768, %c0_200] : memref<1152x256xbf16, #tpu.memory_space<vmem>>, vector<64x256xbf16>
    %cst_201 = arith.constant dense<0.000000e+00> : vector<16x256xf32>
    %620 = tpu.matmul %618, %619, %cst_201 {dimension_numbers = #tpu.dot_dimension_numbers<[1], [0], [0], [1], [0, 0, 1, 1], [], []>} : vector<16x64xbf16>, vector<64x256xbf16>, vector<16x256xf32> -> vector<16x256xf32>
    %c144_202 = arith.constant 144 : index
    %c0_203 = arith.constant 0 : index
    %621 = vector.load %arg3[%c144_202, %c0_203] : memref<176x256xf32, #tpu.memory_space<vmem>>, vector<1x256xf32>
    %622 = vector.broadcast %621 : vector<1x256xf32> to vector<16x256xf32>
    %623 = arith.addf %620, %622 : vector<16x256xf32>
    %cst_204 = arith.constant 1.702000e+00 : f32
    %624 = vector.broadcast %cst_204 : f32 to vector<16x256xf32>
    %625 = arith.mulf %624, %623 : vector<16x256xf32>
    %626 = arith.negf %625 : vector<16x256xf32>
    %627 = math.exp %626 : vector<16x256xf32>
    %cst_205 = arith.constant 1.000000e+00 : f32
    %628 = vector.broadcast %cst_205 : f32 to vector<16x256xf32>
    %629 = arith.addf %628, %627 : vector<16x256xf32>
    %630 = arith.divf %628, %629 : vector<16x256xf32>
    %631 = arith.mulf %623, %630 : vector<16x256xf32>
    %632 = arith.truncf %631 : vector<16x256xf32> to vector<16x256xbf16>
    %c832 = arith.constant 832 : index
    %c0_206 = arith.constant 0 : index
    %633 = vector.load %arg1[%c832, %c0_206] : memref<1152x256xbf16, #tpu.memory_space<vmem>>, vector<256x64xbf16>
    %cst_207 = arith.constant dense<0.000000e+00> : vector<16x64xf32>
    %634 = tpu.matmul %632, %633, %cst_207 {dimension_numbers = #tpu.dot_dimension_numbers<[1], [0], [0], [1], [0, 0, 1, 1], [], []>} : vector<16x256xbf16>, vector<256x64xbf16>, vector<16x64xf32> -> vector<16x64xf32>
    %c152_208 = arith.constant 152 : index
    %c0_209 = arith.constant 0 : index
    %635 = vector.load %arg3[%c152_208, %c0_209] : memref<176x256xf32, #tpu.memory_space<vmem>>, vector<1x64xf32>
    %636 = vector.broadcast %635 : vector<1x64xf32> to vector<16x64xf32>
    %637 = arith.addf %634, %636 : vector<16x64xf32>
    %638 = vector.shape_cast %637 : vector<16x64xf32> to vector<2x8x64xf32>
    %639 = arith.addf %592, %638 : vector<2x8x64xf32>
    %640 = vector.extract_strided_slice %639 {offsets = [0, 0, 0], sizes = [2, 1, 64], strides = [1, 1, 1]} : vector<2x8x64xf32> to vector<2x1x64xf32>
    %641 = vector.shape_cast %640 : vector<2x1x64xf32> to vector<2x64xf32>
    %c160_210 = arith.constant 160 : index
    %c0_211 = arith.constant 0 : index
    %642 = vector.load %arg3[%c160_210, %c0_211] : memref<176x256xf32, #tpu.memory_space<vmem>>, vector<1x64xf32>
    %c168_212 = arith.constant 168 : index
    %c0_213 = arith.constant 0 : index
    %643 = vector.load %arg3[%c168_212, %c0_213] : memref<176x256xf32, #tpu.memory_space<vmem>>, vector<1x64xf32>
    %cst_214 = arith.constant dense<0.000000e+00> : vector<2xf32>
    %644 = vector.multi_reduction <add>, %641, %cst_214 [1] : vector<2x64xf32> to vector<2xf32>
    %645 = vector.shape_cast %644 : vector<2xf32> to vector<2x1xf32>
    %cst_215 = arith.constant 6.400000e+01 : f32
    %646 = vector.broadcast %cst_215 : f32 to vector<2x1xf32>
    %647 = arith.divf %645, %646 : vector<2x1xf32>
    %648 = vector.broadcast %647 : vector<2x1xf32> to vector<2x64xf32>
    %649 = arith.subf %641, %648 : vector<2x64xf32>
    %650 = arith.mulf %649, %649 : vector<2x64xf32>
    %cst_216 = arith.constant dense<0.000000e+00> : vector<2xf32>
    %651 = vector.multi_reduction <add>, %650, %cst_216 [1] : vector<2x64xf32> to vector<2xf32>
    %652 = vector.shape_cast %651 : vector<2xf32> to vector<2x1xf32>
    %cst_217 = arith.constant 6.400000e+01 : f32
    %653 = vector.broadcast %cst_217 : f32 to vector<2x1xf32>
    %654 = arith.divf %652, %653 : vector<2x1xf32>
    %cst_218 = arith.constant 9.99999974E-6 : f32
    %655 = vector.broadcast %cst_218 : f32 to vector<2x1xf32>
    %656 = arith.addf %654, %655 : vector<2x1xf32>
    %657 = math.rsqrt %656 : vector<2x1xf32>
    %658 = vector.broadcast %657 : vector<2x1xf32> to vector<2x64xf32>
    %659 = arith.mulf %649, %658 : vector<2x64xf32>
    %660 = vector.broadcast %642 : vector<1x64xf32> to vector<2x64xf32>
    %661 = arith.mulf %659, %660 : vector<2x64xf32>
    %662 = vector.broadcast %643 : vector<1x64xf32> to vector<2x64xf32>
    %663 = arith.addf %661, %662 : vector<2x64xf32>
    %664 = arith.truncf %663 : vector<2x64xf32> to vector<2x64xbf16>
    %c1088 = arith.constant 1088 : index
    %c0_219 = arith.constant 0 : index
    %665 = vector.load %arg1[%c1088, %c0_219] : memref<1152x256xbf16, #tpu.memory_space<vmem>>, vector<64x32xbf16>
    %cst_220 = arith.constant dense<0.000000e+00> : vector<2x32xf32>
    %666 = tpu.matmul %664, %665, %cst_220 {dimension_numbers = #tpu.dot_dimension_numbers<[1], [0], [0], [1], [0, 0, 1, 1], [], []>} : vector<2x64xbf16>, vector<64x32xbf16>, vector<2x32xf32> -> vector<2x32xf32>
    %c0_221 = arith.constant 0 : index
    %c0_222 = arith.constant 0 : index
    %667 = memref.load %arg5[%c0_221, %c0_222] : memref<1x1xf32, #tpu.memory_space<smem>>
    %668 = arith.mulf %666, %666 : vector<2x32xf32>
    %cst_223 = arith.constant dense<0.000000e+00> : vector<2xf32>
    %669 = vector.multi_reduction <add>, %668, %cst_223 [1] : vector<2x32xf32> to vector<2xf32>
    %670 = vector.shape_cast %669 : vector<2xf32> to vector<2x1xf32>
    %cst_224 = arith.constant 9.99999996E-13 : f32
    %671 = vector.broadcast %cst_224 : f32 to vector<2x1xf32>
    %672 = arith.addf %670, %671 : vector<2x1xf32>
    %673 = math.rsqrt %672 : vector<2x1xf32>
    %674 = vector.broadcast %673 : vector<2x1xf32> to vector<2x32xf32>
    %675 = arith.mulf %666, %674 : vector<2x32xf32>
    %676 = arith.mulf %319, %319 : vector<4x32xf32>
    %cst_225 = arith.constant dense<0.000000e+00> : vector<4xf32>
    %677 = vector.multi_reduction <add>, %676, %cst_225 [1] : vector<4x32xf32> to vector<4xf32>
    %678 = vector.shape_cast %677 : vector<4xf32> to vector<4x1xf32>
    %cst_226 = arith.constant 9.99999996E-13 : f32
    %679 = vector.broadcast %cst_226 : f32 to vector<4x1xf32>
    %680 = arith.addf %678, %679 : vector<4x1xf32>
    %681 = math.rsqrt %680 : vector<4x1xf32>
    %682 = vector.broadcast %681 : vector<4x1xf32> to vector<4x32xf32>
    %683 = arith.mulf %319, %682 : vector<4x32xf32>
    %cst_227 = arith.constant dense<0.000000e+00> : vector<2x4xf32>
    %684 = tpu.matmul %675, %683, %cst_227 {dimension_numbers = #tpu.dot_dimension_numbers<[1], [1], [0], [0], [0, 0, 1, 0], [], []>} : vector<2x32xf32>, vector<4x32xf32>, vector<2x4xf32> -> vector<2x4xf32>
    %685 = vector.broadcast %667 : f32 to vector<2x4xf32>
    %686 = arith.mulf %685, %684 : vector<2x4xf32>
    %c0_228 = arith.constant 0 : index
    %c0_229 = arith.constant 0 : index
    %687 = vector.load %arg6[%c0_228, %c0_229] : memref<2x4xf32, #tpu.memory_space<vmem>>, vector<2x4xf32>
    tpu.vector_store %arg6[%c0_228, %c0_229], %686 {strides = array<i32>} : memref<2x4xf32, #tpu.memory_space<vmem>>, vector<2x4xf32>,
    return
  }
}

</mosaic_0001>

<bundles_post_ra>
// kernel: forward.1
= control target key start
LH: loop header
LB: loop body
LE: loop exit
PB: predicated region body
PF: predicated region fallthrough
CT: control target
= control target key end

     0   :  { %12 = vsyncpa [#allocation4], 0  ;;  %s9669_s0 = inlined_call_operand.vmem [shape: bf16[480,128], index: 0, kind: input, shape index: {}]   ;;  %s9670_s1 = inlined_call_operand.hbm [shape: bf16[1152,256], index: 1, kind: input, shape index: {}]   ;;  %s9671_s2 = inlined_call_operand.vmem [shape: f32[232,128], index: 2, kind: input, shape index: {}]   ;;  %s9672_s3 = inlined_call_operand.vmem [shape: f32[176,256], index: 3, kind: input, shape index: {}]   ;;  %s9673_s4 = inlined_call_operand.vmem [shape: f32[2,8,192], index: 4, kind: input, shape index: {}]   ;;  %s9674_s5 = inlined_call_operand.<no memory space> [shape: f32[1,1], index: 5, kind: input, shape index: {}]   ;;  %s9675_s6 = inlined_call_operand.hbm [shape: f32[2,4], index: 6, kind: output, shape index: {}]  }
   0x1   :  { %13 = vsyncpa [#allocation5], 0  ;;  %s8054_s21 = smov [#allocation3]   ;;  %s8006_s25 = scalar_lea.hbm %s9670_s1, 18432 }
   0x2   :  { %s21_s22 = sshll.u32 %s8054_s21, 4  ;;  %p8007_p0 = scmp.ne.s32.totalorder %s9670_s1, %s8006_s25  ;;  %s22_s22 = int_to_ptr.vmem [resolvable:$true] %s21_s22 }
   0x3   :  { %p8010_p1 = scmp.lt.u32.totalorder %s8006_s25, %s9670_s1 }
   0x5   :  { %p8012_p2 = pnand %p8010_p1, %p8007_p0 }
   0x7   :  { %8015 = shalt.err (!%p8012_p2)
}
   0x8   :  { %s8016_s30 = scalar_lea.vmem %s22_s22, 18432  ;;  %p8021_p4 = scmp.lt.s32.totalorder %s22_s22, %s22_s22 }
   0x9   :  { %p8017_p3 = scmp.ne.s32.totalorder %s22_s22, %s8016_s30  ;;  %p8022_p5 = scmp.lt.s32.totalorder %s8016_s30, %s8016_s30 }
   0xb   :  { %p8023_p6 = por %p8022_p5, %p8021_p4 }
   0xd   :  { %p8024_p7 = pnand %p8023_p6, %p8017_p3 }
   0xf   :  { %8027 = shalt.err (!%p8024_p7)
}
  0x10   :  { %s8055_s7 = smov 128   ;;  %s8056_s8 = smov 8  }
  0x11   :  { %27 = dma.hbm_to_vmem [thread:$0]  %s9670_s1, 18432, %s22_s22, [#allocation4], %s8055_s7, %s8055_s7, %s8056_s8  }
  0x12   :  { %8050 = dma.done.wait [#allocation4], 18432  }
  0x13   :  { %8051 = vsyncadd [#allocation4], 4294948864  ;;  %vm67_vm0 = vcmask 261120   ;;  %v40_v0 = vld [vmem:[%s9671_s2] sm:$0xff]  ;;  %v42_v1 = vld [vmem:[%s9671_s2 + $0x10] sm:$0xff]  ;;  %vm8058_vm1 = vmmov 0  }
  0x14   :  { %v41_v2 = vld [vmem:[%s9671_s2 + $0x8] sm:$0xff]  ;;  %v68_v3 = vsel %vm67_vm0, %v40_v0, 0.0  ;;  %v74_v4 = vsel %vm67_vm0, %v42_v1, 0.0  ;;  %v43_v6 = vld [vmem:[%s9671_s2 + $0x18] sm:$0xff]  ;;  %v44_v7 = vld [vmem:[%s9671_s2 + $0x20] sm:$0xff]  ;;  %s8059_s12 = smov 96  }
  0x15   :  { %v71_v5 = vsel %vm67_vm0, %v41_v2, 0.0  ;;  %v45_v8 = vld [vmem:[%s9671_s2 + $0x28] sm:$0xff]  ;;  %69 = vadd.xlane.f32.xlu0 %v68_v3  ;;  %75 = vadd.xlane.f32.xlu1 %v74_v4  ;;  %v77_v9 = vsel %vm67_vm0, %v43_v6, 0.0  ;;  %v80_v10 = vsel %vm67_vm0, %v44_v7, 0.0  ;;  %v46_v12 = vld [vmem:[%s9671_s2 + $0x30] sm:$0xff]  ;;  %v47_v13 = vld [vmem:[%s9671_s2 + $0x38] sm:$0xff] }
  0x16   :  { %v83_v11 = vsel %vm67_vm0, %v45_v8, 0.0  ;;  %v86_v14 = vsel %vm67_vm0, %v46_v12, 0.0  ;;  %v89_v15 = vsel %vm67_vm0, %v47_v13, 0.0  ;;  %v7502_v56 = vld [vmem:[%s9669_s0] sm:$0xff]   ;;  %v7503_v57 = vld [vmem:[%s9669_s0 + $0x8] sm:$0xff]   ;;  %vm306_vm2 = vcmask 130048  }
  0x17   :  { %6975 = vmatprep.subr.bf16.mxu0 %v7502_v56  ;;  %7432 = vmatprep.subr.bf16.mxu1 %v7502_v56  ;;  %s8061_s13 = smov 64   ;;  %s8062_s14 = smov 80   ;;  %vm3969_vm8 = vcmask 1041409   ;;  %vm3971_vm9 = vcmask 1042434   ;;  %vm3973_vm10 = vcmask 1043459   ;;  %vm4133_vm11 = vcmask 523264  }
  0x18   :  { %6976 = vmatpush3.bf16.msra.mxu0 %v7502_v56  ;;  %7434 = vmatpush3.bf16.msra.mxu1 %v7502_v56  ;;  %s8063_s15 = smov 112   ;;  %s8064_s16 = smov 48   ;;  %vm4490_vm12 = vcmask 1043456   ;;  %vm4462_vm14 = vcmask 64512   ;;  %vm6278_vm15 = vcmask 517120  }
  0x19   :  { %72 = vadd.xlane.f32.xlu0 %v71_v5  ;;  %78 = vadd.xlane.f32.xlu1 %v77_v9  ;;  %s8065_s20 = smov 16   ;;  %s8068_s11 = smov 32  }
  0x1a   :  { %6977 = vmatprep.subr.bf16.mxu0 %v7503_v57  ;;  %7433 = vmatprep.subr.bf16.mxu1 %v7503_v57 }
  0x1c   :  { %6978 = vmatpush3.bf16.msra.mxu0 %v7503_v57  ;;  %7435 = vmatpush3.bf16.msra.mxu1 %v7503_v57 }
  0x1d   :  { %81 = vadd.xlane.f32.xlu0 %v80_v10  ;;  %84 = vadd.xlane.f32.xlu1 %v83_v11 }
  0x21   :  { %87 = vadd.xlane.f32.xlu0 %v86_v14  ;;  %90 = vadd.xlane.f32.xlu1 %v89_v15 }
  0xa2   :  { %v70_v16 = vpop.xlane.xlu0 %69  ;;  %v76_v17 = vpop.xlane.xlu1 %75 }
  0xa3   :  { %v93_v18 = vmul.f32 0.03125, %v70_v16  ;;  %v95_v19 = vmul.f32 0.03125, %v76_v17 }
  0xa5   :  { %v8149_v20 = vsub.f32 %v40_v0, %v93_v18  ;;  %v8151_v21 = vsub.f32 %v42_v1, %v95_v19  ;;  %v6508_v19 = vld [vmem:[%s9671_s2 + $0x58] ss:$0 sm:$0xff] }
  0xa6   :  { %v73_v22 = vpop.xlane.xlu0 %72  ;;  %v79_v23 = vpop.xlane.xlu1 %78 }
  0xa7   :  { %v94_v24 = vmul.f32 0.03125, %v73_v22  ;;  %v96_v25 = vmul.f32 0.03125, %v79_v23  ;;  %v109_v26 = vmul.f32 %v8149_v20, %v8149_v20  ;;  %v111_v27 = vmul.f32 %v8151_v21, %v8151_v21 }
  0xa9   :  { %v8157_v28 = vsub.f32 %v41_v2, %v94_v24  ;;  %v8159_v29 = vsub.f32 %v43_v6, %v96_v25  ;;  %v117_v30 = vsel %vm67_vm0, %v109_v26, 0.0  ;;  %v123_v33 = vsel %vm67_vm0, %v111_v27, 0.0  ;;  %v6509_v27 = vld [vmem:[%s9671_s2 + $0x60] ss:$0 sm:$0xff] }
  0xaa   :  { %118 = vadd.xlane.f32.xlu0 %v117_v30  ;;  %v82_v31 = vpop.xlane.xlu0 %81  ;;  %v85_v32 = vpop.xlane.xlu1 %84 }
  0xab   :  { %v97_v34 = vmul.f32 0.03125, %v82_v31  ;;  %v98_v35 = vmul.f32 0.03125, %v85_v32  ;;  %v110_v36 = vmul.f32 %v8157_v28, %v8157_v28  ;;  %v112_v37 = vmul.f32 %v8159_v29, %v8159_v29 }
  0xad   :  { %v8167_v38 = vsub.f32 %v44_v7, %v97_v34  ;;  %v8169_v39 = vsub.f32 %v45_v8, %v98_v35  ;;  %v120_v40 = vsel %vm67_vm0, %v110_v36, 0.0  ;;  %v126_v43 = vsel %vm67_vm0, %v112_v37, 0.0 }
  0xae   :  { %124 = vadd.xlane.f32.xlu0 %v123_v33  ;;  %121 = vadd.xlane.f32.xlu1 %v120_v40  ;;  %v88_v41 = vpop.xlane.xlu0 %87  ;;  %v91_v42 = vpop.xlane.xlu1 %90 }
  0xaf   :  { %v99_v44 = vmul.f32 0.03125, %v88_v41  ;;  %v100_v45 = vmul.f32 0.03125, %v91_v42  ;;  %v113_v46 = vmul.f32 %v8167_v38, %v8167_v38  ;;  %v114_v47 = vmul.f32 %v8169_v39, %v8169_v39 }
  0xb1   :  { %v8177_v48 = vsub.f32 %v46_v12, %v99_v44  ;;  %v8179_v49 = vsub.f32 %v47_v13, %v100_v45  ;;  %v129_v50 = vsel %vm67_vm0, %v113_v46, 0.0  ;;  %v132_v51 = vsel %vm67_vm0, %v114_v47, 0.0 }
  0xb2   :  { %127 = vadd.xlane.f32.xlu1 %v126_v43  ;;  %130 = vadd.xlane.f32.xlu0 %v129_v50 }
  0xb3   :  { %v115_v52 = vmul.f32 %v8177_v48, %v8177_v48  ;;  %v116_v53 = vmul.f32 %v8179_v49, %v8179_v49 }
  0xb5   :  { %v135_v54 = vsel %vm67_vm0, %v115_v52, 0.0  ;;  %v138_v55 = vsel %vm67_vm0, %v116_v53, 0.0 }
  0xb6   :  { %133 = vadd.xlane.f32.xlu1 %v132_v51  ;;  %136 = vadd.xlane.f32.xlu0 %v135_v54 }
  0xba   :  { %139 = vadd.xlane.f32.xlu1 %v138_v55 }
 0x137   :  { %v119_v58 = vpop.xlane.xlu0 %118 }
 0x138   :  { %v141_v59 = vmul.f32 0.03125, %v119_v58  ;;  %v6510_v58 = vld [vmem:[%s9671_s2 + $0x68] ss:$0 sm:$0xff] }
 0x13a   :  { %v149_v60 = vadd.f32 1e-05, %v141_v59 }
 0x13b   :  { %v122_v61 = vpop.xlane.xlu1 %121  ;;  %v125_v62 = vpop.xlane.xlu0 %124 }
 0x13c   :  { %7636 = vrsqrt.f32 %v149_v60  ;;  %v142_v63 = vmul.f32 0.03125, %v122_v61  ;;  %v143_v0 = vmul.f32 0.03125, %v125_v62 }
 0x13e   :  { %v150_v1 = vadd.f32 1e-05, %v142_v63  ;;  %v151_v2 = vadd.f32 1e-05, %v143_v0 }
 0x13f   :  { %v128_v3 = vpop.xlane.xlu1 %127  ;;  %v131_v4 = vpop.xlane.xlu0 %130 }
 0x140   :  { %7638 = vrsqrt.f32 %v150_v1  ;;  %v144_v5 = vmul.f32 0.03125, %v128_v3  ;;  %v145_v6 = vmul.f32 0.03125, %v131_v4 }
 0x141   :  { %7640 = vrsqrt.f32 %v151_v2 }
 0x142   :  { %v152_v7 = vadd.f32 1e-05, %v144_v5  ;;  %v153_v8 = vadd.f32 1e-05, %v145_v6 }
 0x143   :  { %v134_v9 = vpop.xlane.xlu1 %133  ;;  %v137_v10 = vpop.xlane.xlu0 %136 }
 0x144   :  { %7642 = vrsqrt.f32 %v152_v7  ;;  %v146_v11 = vmul.f32 0.03125, %v134_v9  ;;  %v147_v12 = vmul.f32 0.03125, %v137_v10 }
 0x145   :  { %7644 = vrsqrt.f32 %v153_v8 }
 0x146   :  { %v7637_v13 = vpop.eup %7636  ;;  %v154_v14 = vadd.f32 1e-05, %v146_v11  ;;  %v155_v15 = vadd.f32 1e-05, %v147_v12 }
 0x147   :  { %v140_v16 = vpop.xlane.xlu1 %139  ;;  %v165_v17 = vmul.f32 %v7637_v13, %v8149_v20 }
 0x148   :  { %7646 = vrsqrt.f32 %v154_v14  ;;  %v148_v18 = vmul.f32 0.03125, %v140_v16 }
 0x149   :  { %7648 = vrsqrt.f32 %v155_v15  ;;  %v177_v26 = vmul.f32 %v6508_v19, %v165_v17 }
 0x14a   :  { %v7639_v22 = vpop.eup %7638  ;;  %v156_v23 = vadd.f32 1e-05, %v148_v18 }
 0x14b   :  { %v7641_v24 = vpop.eup %7640  ;;  %v166_v25 = vmul.f32 %v7639_v22, %v8157_v28  ;;  %v189_v33 = vadd.f32 %v6509_v27, %v177_v26 }
 0x14c   :  { %7650 = vrsqrt.f32 %v156_v23  ;;  %v167_v20 = vmul.f32 %v7641_v24, %v8151_v21  ;;  %v48_v24 = vlaneseq }
 0x14d   :  { %v178_v30 = vmul.f32 %v6508_v19, %v166_v25 }
 0x14e   :  { %v7643_v31 = vpop.eup %7642  ;;  %v179_v36 = vmul.f32 %v6508_v19, %v167_v20  ;;  %v8262_v25 = vshrl.u32 %v48_v24, 7  ;;  %v8264_v26 = vand.u32 127, %v48_v24 }
 0x14f   :  { %v7645_v32 = vpop.eup %7644  ;;  %v190_v34 = vadd.f32 %v6509_v27, %v178_v30  ;;  %v168_v35 = vmul.f32 %v7643_v31, %v8159_v29  ;;  %v8060_v30 = vmov -1e+30  }
 0x150   :  { %v169_v37 = vmul.f32 %v7645_v32, %v8167_v38  ;;  %v191_v43 = vadd.f32 %v6509_v27, %v179_v36  ;;  %vm53_vm3 = vcmp.ge.s32.totalorder %v8262_v25, %v8264_v26  ;;  %vm57_vm5 = vcmp.ge.s32.totalorder %v8262_v25, 5 }
 0x151   :  { %v197_v40 = vpack.c.bf16 %v190_v34, %v189_v33  ;;  %v180_v28 = vmul.f32 %v6508_v19, %v168_v35  ;;  %v8270_v31 = vsel %vm53_vm3, 0.0, %v8060_v30  ;;  %vm59_vm6 = vcmp.lt.s32.totalorder %v8262_v25, 7 }
 0x152   :  { %v7647_v41 = vpop.eup %7646  ;;  %v181_v45 = vmul.f32 %v6508_v19, %v169_v37  ;;  %vm61_vm7 = vmand %vm57_vm5, %vm59_vm6  ;;  %vm4214_vm13 = vcmp.ge.s32.totalorder %v8264_v26, 7  ;;  %vm6398_vm3 = vcmask 254976  }
 0x153   :  { %v7649_v42 = vpop.eup %7648  ;;  %6979 = vmatprep.mubr.msk.bf16.mxu0 %vm67_vm0, %v197_v40  ;;  %v192_v44 = vadd.f32 %v6509_v27, %v180_v28  ;;  %v170_v21 = vmul.f32 %v7647_v41, %v8169_v39 }
 0x154   :  { %v171_v46 = vmul.f32 %v7649_v42, %v8177_v48  ;;  %v193_v29 = vadd.f32 %v6509_v27, %v181_v45  ;;  %v8057_v48 = vmov 0.0  }
 0x155   :  { %v198_v47 = vpack.c.bf16 %v192_v44, %v191_v43  ;;  %v182_v50 = vmul.f32 %v6508_v19, %v170_v21  ;;  %6987 = vmatprep.subr.bf16.mxu1 %v8057_v48  ;;  %6999 = vmatprep.subr.bf16.mxu0 %v8057_v48 }
 0x156   :  { %v7651_v51 = vpop.eup %7650  ;;  %v183_v53 = vmul.f32 %v6508_v19, %v171_v46 }
 0x157   :  { %6980 = vmatmul.mubr.msk.bf16.vlgmr.msra.gmra.mrb[0].mxu0 %vm67_vm0, %v198_v47  ;;  %v194_v38 = vadd.f32 %v6509_v27, %v182_v50  ;;  %v172_v52 = vmul.f32 %v7651_v51, %v8179_v49 }
 0x158   :  { %v195_v56 = vadd.f32 %v6509_v27, %v183_v53  ;;  %7001 = vmatprep.mubr.msk.bf16.mxu0 %vm8058_vm1, %v8057_v48 }
 0x159   :  { %v199_v54 = vpack.c.bf16 %v194_v38, %v193_v29  ;;  %v184_v55 = vmul.f32 %v6508_v19, %v172_v52 }
 0x15b   :  { %6983 = vmatprep.mubr.msk.bf16.mxu1 %vm67_vm0, %v199_v54  ;;  %v196_v57 = vadd.f32 %v6509_v27, %v184_v55  ;;  %v50_v27 = vadd.s32 8, %v8262_v25 }
 0x15d   :  { %v200_v39 = vpack.c.bf16 %v196_v57, %v195_v56  ;;  %vm54_vm4 = vcmp.ge.s32.totalorder %v50_v27, %v8264_v26 }
 0x15e   :  { %v8272_v35 = vsel %vm54_vm4, 0.0, %v8060_v30 }
 0x15f   :  { %6984 = vmatmul.mubr.msk.bf16.vlgmr.msra.gmra.mrb[0].mxu1 %vm67_vm0, %v200_v39 }
 0x160   :  { %6989 = vmatprep.mubr.msk.bf16.mxu1 %vm8058_vm1, %v8057_v48 }
 0x22a   :  { %v6981_v49 = vpop.f32.mrb[0].mxu0 }
 0x22b   :  { %v268_v59 = vpop.f32.mrb[1].mxu0  ;;  %v277_v61 = vadd.f32 %v6981_v49, %v6510_v58 }
 0x22c   :  { %v6982_v60 = vpop.f32.mrb[2].mxu0  ;;  %v269_v0 = vadd.f32 %v6510_v58, %v268_v59 }
 0x22d   :  { %v280_v62 = vadd.f32 %v6982_v60, %v6510_v58  ;;  %v271_v63 = vpop.f32.mrb[3].mxu0 }
 0x22e   :  { %v272_v1 = vadd.f32 %v6510_v58, %v271_v63 }
 0x22f   :  { %v8222_v2 = vpack.c.bf16 %v280_v62, %v277_v61 }
 0x230   :  { %v8224_v3 = vpack.c.bf16 %v272_v1, %v269_v0 }
 0x231   :  { %355 = vrot.lane.b32.xlu1 %v8222_v2, %s8059_s12 }
 0x232   :  { %304 = vrot.lane.b32.xlu0 %v8224_v3, %s8059_s12  ;;  %v6985_v4 = vpop.f32.mrb[0].mxu1 }
 0x233   :  { %v284_v5 = vpop.f32.mrb[1].mxu1  ;;  %v293_v7 = vadd.f32 %v6985_v4, %v6510_v58 }
 0x234   :  { %v6986_v6 = vpop.f32.mrb[2].mxu1  ;;  %v285_v10 = vadd.f32 %v6510_v58, %v284_v5 }
 0x235   :  { %v296_v8 = vadd.f32 %v6986_v6, %v6510_v58  ;;  %v287_v9 = vpop.f32.mrb[3].mxu1 }
 0x236   :  { %v288_v11 = vadd.f32 %v6510_v58, %v287_v9 }
 0x237   :  { %v8230_v12 = vpack.c.bf16 %v296_v8, %v293_v7 }
 0x238   :  { %v8232_v13 = vpack.c.bf16 %v288_v11, %v285_v10 }
 0x23a   :  { %405 = vrot.lane.b32.xlu1 %v8232_v13, %s8059_s12 }
 0x23e   :  { %455 = vrot.lane.b32.xlu1 %v8230_v12, %s8059_s12 }
 0x2a3   :  { %v356_v16 = vpop.permute.xlu1 %355 }
 0x2a4   :  { %v305_v14 = vpop.permute.xlu0 %304  ;;  %v361_v18 = vsel %vm306_vm2, %v356_v16, 0 }
 0x2a5   :  { %v311_v15 = vsel %vm306_vm2, %v305_v14, 0 }
 0x2a6   :  { %6988 = vmatpush3.bf16.xpose.msra.mxu1 %v311_v15 }
 0x2a7   :  { %6993 = vmatprep.subr.bf16.mxu1 %v8057_v48 }
 0x2ac   :  { %v406_v17 = vpop.permute.xlu1 %405 }
 0x2ad   :  { %v411_v19 = vsel %vm306_vm2, %v406_v17, 0  ;;  %6990 = vmatmul.mubr.msk.bf16.vlgmr.msra.gmra.mrb[4].mxu1 %vm306_vm2, %v8224_v3 }
 0x2ae   :  { %6994 = vmatpush3.bf16.xpose.msra.mxu1 %v361_v18  ;;  %7000 = vmatpush3.bf16.xpose.msra.mxu0 %v411_v19 }
 0x2af   :  { %6995 = vmatprep.mubr.msk.bf16.mxu1 %vm8058_vm1, %v8057_v48  ;;  %7005 = vmatprep.subr.bf16.mxu1 %v8057_v48 }
 0x2b0   :  { %7011 = vmatprep.subr.bf16.mxu0 %v8057_v48  ;;  %v456_v22 = vpop.permute.xlu1 %455 }
 0x2b1   :  { %v461_v23 = vsel %vm306_vm2, %v456_v22, 0 }
 0x2b5   :  { %6996 = vmatmul.mubr.msk.bf16.vlgmr.msra.gmra.mrb[8].mxu1 %vm306_vm2, %v8222_v2  ;;  %7002 = vmatmul.mubr.msk.bf16.vlgmr.msra.gmra.mrb[4].mxu0 %vm306_vm2, %v8232_v13 }
 0x2b6   :  { %7006 = vmatpush3.bf16.xpose.msra.mxu1 %v461_v23  ;;  %7007 = vmatprep.mubr.msk.bf16.mxu1 %vm8058_vm1, %v8057_v48 }
 0x2b7   :  { %7017 = vmatprep.subr.bf16.mxu1 %v8057_v48  ;;  %7013 = vmatprep.mubr.msk.bf16.mxu0 %vm8058_vm1, %v8057_v48 }
 0x2bd   :  { %7008 = vmatmul.mubr.msk.bf16.vlgmr.msra.gmra.mrb[12].mxu1 %vm306_vm2, %v8230_v12 }
 0x2be   :  { %7019 = vmatprep.mubr.msk.bf16.mxu1 %vm8058_vm1, %v8057_v48 }
 0x380   :  { %v347_v20 = vpop.f32.mrb[4].mxu1 }
 0x381   :  { %v504_v32 = vmul.f32 0.25, %v347_v20  ;;  %v6991_v33 = vpop.f32.mrb[5].mxu1 }
 0x382   :  { %v350_v34 = vpop.f32.mrb[6].mxu1 }
 0x383   :  { %v505_v36 = vmul.f32 0.25, %v350_v34  ;;  %v6992_v37 = vpop.f32.mrb[7].mxu1  ;;  %v512_v40 = vadd.f32 %v504_v32, %v8270_v31 }
 0x385   :  { %v520_v28 = vsel %vm306_vm2, %v512_v40, -inf  ;;  %v513_v41 = vadd.f32 %v505_v36, %v8272_v35 }
 0x386   :  { %521 = vmax.xlane.f32.xlu0 %v520_v28 }
 0x387   :  { %v523_v42 = vsel %vm306_vm2, %v513_v41, -inf }
 0x388   :  { %v447_v43 = vpop.f32.mrb[4].mxu0  ;;  %524 = vmax.xlane.f32.xlu1 %v523_v42  ;;  %v397_v44 = vpop.f32.mrb[8].mxu1 }
 0x389   :  { %v506_v21 = vmul.f32 0.25, %v397_v44  ;;  %v6997_v45 = vpop.f32.mrb[9].mxu1  ;;  %v7003_v46 = vpop.f32.mrb[5].mxu0  ;;  %v508_v54 = vmul.f32 0.25, %v447_v43 }
 0x38a   :  { %v400_v47 = vpop.f32.mrb[10].mxu1  ;;  %v450_v50 = vpop.f32.mrb[6].mxu0 }
 0x38b   :  { %v507_v51 = vmul.f32 0.25, %v400_v47  ;;  %v509_v29 = vmul.f32 0.25, %v450_v50  ;;  %v6998_v38 = vpop.f32.mrb[11].mxu1  ;;  %v7004_v52 = vpop.f32.mrb[7].mxu0  ;;  %v514_v53 = vadd.f32 %v506_v21, %v8270_v31  ;;  %v516_v61 = vadd.f32 %v508_v54, %v8270_v31 }
 0x38d   :  { %v526_v55 = vsel %vm306_vm2, %v514_v53, -inf  ;;  %v517_v56 = vadd.f32 %v509_v29, %v8272_v35  ;;  %v8282_v57 = vadd.f32 %v507_v51, %v8272_v35  ;;  %v532_v1 = vsel %vm306_vm2, %v516_v61, -inf }
 0x38e   :  { %527 = vmax.xlane.f32.xlu0 %v526_v55 }
 0x38f   :  { %v535_v39 = vsel %vm306_vm2, %v517_v56, -inf  ;;  %v529_v60 = vsel %vm306_vm2, %v8282_v57, -inf }
 0x390   :  { %536 = vmax.xlane.f32.xlu1 %v535_v39  ;;  %v497_v49 = vpop.f32.mrb[12].mxu1 }
 0x391   :  { %v510_v58 = vmul.f32 0.25, %v497_v49  ;;  %v7009_v59 = vpop.f32.mrb[13].mxu1 }
 0x392   :  { %530 = vmax.xlane.f32.xlu0 %v529_v60  ;;  %v500_v62 = vpop.f32.mrb[14].mxu1 }
 0x393   :  { %v511_v63 = vmul.f32 0.25, %v500_v62  ;;  %v7010_v0 = vpop.f32.mrb[15].mxu1  ;;  %v518_v5 = vadd.f32 %v510_v58, %v8270_v31 }
 0x395   :  { %v519_v4 = vadd.f32 %v511_v63, %v8272_v35  ;;  %v538_v7 = vsel %vm306_vm2, %v518_v5, -inf }
 0x396   :  { %533 = vmax.xlane.f32.xlu0 %v532_v1 }
 0x397   :  { %v541_v6 = vsel %vm306_vm2, %v519_v4, -inf }
 0x398   :  { %542 = vmax.xlane.f32.xlu1 %v541_v6 }
 0x39a   :  { %539 = vmax.xlane.f32.xlu0 %v538_v7 }
 0x413   :  { %v522_v8 = vpop.xlane.xlu0 %521 }
 0x414   :  { %v544_v9 = vsub.f32 %v512_v40, %v522_v8 }
 0x415   :  { %v525_v10 = vpop.xlane.xlu1 %524 }
 0x416   :  { %v552_v11 = vmul.f32 1.442695, %v544_v9  ;;  %v545_v14 = vsub.f32 %v513_v41, %v525_v10 }
 0x418   :  { %7652 = vpow2.f32 %v552_v11  ;;  %v554_v15 = vmul.f32 1.442695, %v545_v14 }
 0x41a   :  { %7654 = vpow2.f32 %v554_v15 }
 0x41b   :  { %v528_v16 = vpop.xlane.xlu0 %527 }
 0x41c   :  { %v546_v24 = vsub.f32 %v514_v53, %v528_v16 }
 0x41d   :  { %v537_v17 = vpop.xlane.xlu1 %536 }
 0x41e   :  { %v549_v18 = vsub.f32 %v517_v56, %v537_v17  ;;  %v556_v34 = vmul.f32 1.442695, %v546_v24 }
 0x41f   :  { %v531_v19 = vpop.xlane.xlu0 %530 }
 0x420   :  { %v562_v22 = vmul.f32 1.442695, %v549_v18  ;;  %v547_v21 = vsub.f32 %v8282_v57, %v531_v19 }
 0x422   :  { %v8293_v23 = vpop.eup %7652  ;;  %7656 = vpow2.f32 %v562_v22  ;;  %v558_v47 = vmul.f32 1.442695, %v547_v21 }
 0x423   :  { %v534_v27 = vpop.xlane.xlu0 %533  ;;  %v568_v20 = vsel %vm306_vm2, %v8293_v23, 0.0 }
 0x424   :  { %v8297_v30 = vpop.eup %7654  ;;  %v548_v32 = vsub.f32 %v516_v61, %v534_v27  ;;  %569 = vadd.xlane.f32.xlu0 %v568_v20 }
 0x425   :  { %v571_v33 = vsel %vm306_vm2, %v8297_v30, 0.0  ;;  %v543_v45 = vpop.xlane.xlu1 %542 }
 0x426   :  { %v560_v36 = vmul.f32 1.442695, %v548_v32  ;;  %572 = vadd.xlane.f32.xlu1 %v571_v33  ;;  %v551_v50 = vsub.f32 %v519_v4, %v543_v45 }
 0x427   :  { %v540_v44 = vpop.xlane.xlu0 %539 }
 0x428   :  { %7658 = vpow2.f32 %v560_v36  ;;  %v550_v46 = vsub.f32 %v518_v5, %v540_v44  ;;  %v566_v29 = vmul.f32 1.442695, %v551_v50 }
 0x429   :  { %7660 = vpow2.f32 %v556_v34 }
 0x42a   :  { %v564_v51 = vmul.f32 1.442695, %v550_v46  ;;  %7662 = vpow2.f32 %v558_v47 }
 0x42c   :  { %v8301_v37 = vpop.eup %7656  ;;  %7664 = vpow2.f32 %v564_v51 }
 0x42d   :  { %v583_v40 = vsel %vm306_vm2, %v8301_v37, 0.0  ;;  %7666 = vpow2.f32 %v566_v29 }
 0x42e   :  { %584 = vadd.xlane.f32.xlu1 %v583_v40 }
 0x432   :  { %v8305_v28 = vpop.eup %7658 }
 0x433   :  { %v580_v41 = vsel %vm306_vm2, %v8305_v28, 0.0  ;;  %v8309_v42 = vpop.eup %7660 }
 0x434   :  { %581 = vadd.xlane.f32.xlu0 %v580_v41  ;;  %v574_v43 = vsel %vm306_vm2, %v8309_v42, 0.0  ;;  %v8322_v38 = vpop.eup %7662 }
 0x435   :  { %v577_v53 = vsel %vm306_vm2, %v8322_v38, 0.0 }
 0x436   :  { %v8324_v52 = vpop.eup %7664 }
 0x437   :  { %v8328_v54 = vpop.eup %7666  ;;  %v586_v55 = vsel %vm306_vm2, %v8324_v52, 0.0 }
 0x438   :  { %575 = vadd.xlane.f32.xlu0 %v574_v43  ;;  %v589_v56 = vsel %vm306_vm2, %v8328_v54, 0.0 }
 0x43f   :  { %659 = vrot.lane.b32.xlu1 %v8222_v2, %s8061_s13 }
 0x443   :  { %706 = vrot.lane.b32.xlu1 %v8232_v13, %s8061_s13 }
 0x447   :  { %753 = vrot.lane.b32.xlu1 %v8230_v12, %s8061_s13 }
 0x44e   :  { %612 = vrot.lane.b32.xlu0 %v8224_v3, %s8061_s13 }
 0x46b   :  { %578 = vadd.xlane.f32.xlu1 %v577_v53 }
 0x46d   :  { %587 = vadd.xlane.f32.xlu0 %v586_v55 }
 0x46f   :  { %590 = vadd.xlane.f32.xlu1 %v589_v56 }
 0x480   :  { %853 = vrot.lane.b32.xlu1 %v8222_v2, %s8062_s14 }
 0x483   :  { %802 = vrot.lane.b32.xlu0 %v8224_v3, %s8062_s14 }
 0x484   :  { %851 = vrot.lane.b32.xlu1 %v8222_v2, %s8063_s15 }
 0x487   :  { %800 = vrot.lane.b32.xlu0 %v8224_v3, %s8063_s15 }
 0x488   :  { %955 = vrot.lane.b32.xlu1 %v8230_v12, %s8062_s14 }
 0x48b   :  { %904 = vrot.lane.b32.xlu0 %v8232_v13, %s8062_s14 }
 0x48c   :  { %953 = vrot.lane.b32.xlu1 %v8230_v12, %s8063_s15 }
 0x48f   :  { %902 = vrot.lane.b32.xlu0 %v8232_v13, %s8063_s15 }
 0x4b1   :  { %v570_v39 = vpop.xlane.xlu0 %569 }
 0x4b3   :  { %v573_v57 = vpop.xlane.xlu1 %572 }
 0x4b4   :  { %7668 = vrcp.f32 %v573_v57 }
 0x4b5   :  { %7670 = vrcp.f32 %v570_v39 }
 0x4bb   :  { %v585_v49 = vpop.xlane.xlu1 %584 }
 0x4be   :  { %v7669_v60 = vpop.eup %7668 }
 0x4bf   :  { %v660_v58 = vpop.permute.xlu1 %659  ;;  %v7671_v62 = vpop.eup %7670  ;;  %v601_v63 = vmul.f32 %v7669_v60, %v8297_v30 }
 0x4c0   :  { %7018 = vmatpush3.bf16.msra.mxu1 %v660_v58  ;;  %v600_v0 = vmul.f32 %v7671_v62, %v8293_v23 }
 0x4c1   :  { %v582_v59 = vpop.xlane.xlu0 %581  ;;  %7029 = vmatprep.subr.bf16.mxu1 %v8057_v48 }
 0x4c2   :  { %7672 = vrcp.f32 %v582_v59  ;;  %v608_v4 = vpack.c.bf16 %v601_v63, %v600_v0 }
 0x4c3   :  { %7674 = vrcp.f32 %v585_v49  ;;  %v707_v6 = vpop.permute.xlu1 %706 }
 0x4c5   :  { %v576_v61 = vpop.xlane.xlu0 %575 }
 0x4c6   :  { %7676 = vrcp.f32 %v576_v61 }
 0x4c7   :  { %v754_v11 = vpop.permute.xlu1 %753 }
 0x4c9   :  { %v613_v1 = vpop.permute.xlu0 %612 }
 0x4ca   :  { %7012 = vmatpush3.bf16.msra.mxu0 %v613_v1 }
 0x4cb   :  { %7023 = vmatprep.subr.bf16.mxu0 %v8057_v48 }
 0x4cc   :  { %v7673_v5 = vpop.eup %7672 }
 0x4cd   :  { %7014 = vmatmul.mubr.msk.bf16.vlgmr.msra.gmra.mrb[8].mxu0 %vm306_vm2, %v608_v4  ;;  %v7675_v7 = vpop.eup %7674  ;;  %v604_v8 = vmul.f32 %v7673_v5, %v8305_v28 }
 0x4ce   :  { %7024 = vmatpush3.bf16.msra.mxu0 %v707_v6  ;;  %7025 = vmatprep.mubr.msk.bf16.mxu0 %vm8058_vm1, %v8057_v48  ;;  %v605_v9 = vmul.f32 %v7675_v7, %v8301_v37 }
 0x4cf   :  { %7035 = vmatprep.subr.bf16.mxu0 %v8057_v48 }
 0x4d0   :  { %v610_v10 = vpack.c.bf16 %v605_v9, %v604_v8  ;;  %v7677_v19 = vpop.eup %7676 }
 0x4d1   :  { %v602_v24 = vmul.f32 %v7677_v19, %v8309_v42 }
 0x4d5   :  { %7026 = vmatmul.mubr.msk.bf16.vlgmr.msra.gmra.mrb[12].mxu0 %vm306_vm2, %v610_v10 }
 0x4d6   :  { %7037 = vmatprep.mubr.msk.bf16.mxu0 %vm8058_vm1, %v8057_v48 }
 0x4f8   :  { %v579_v14 = vpop.xlane.xlu1 %578 }
 0x4f9   :  { %7678 = vrcp.f32 %v579_v14 }
 0x4fa   :  { %v588_v15 = vpop.xlane.xlu0 %587 }
 0x4fc   :  { %v591_v16 = vpop.xlane.xlu1 %590 }
 0x4fd   :  { %7680 = vrcp.f32 %v591_v16 }
 0x4fe   :  { %v803_v17 = vpop.permute.xlu0 %802  ;;  %7682 = vrcp.f32 %v588_v15 }
 0x4ff   :  { %v808_v18 = vsel %vm306_vm2, %v803_v17, 0 }
 0x500   :  { %7036 = vmatpush3.bf16.xpose.msra.mxu0 %v808_v18  ;;  %v854_v37 = vpop.permute.xlu1 %853 }
 0x501   :  { %7047 = vmatprep.subr.bf16.mxu0 %v8057_v48  ;;  %v859_v43 = vsel %vm306_vm2, %v854_v37, 0 }
 0x502   :  { %v801_v22 = vpop.permute.xlu0 %800 }
 0x503   :  { %v7679_v23 = vpop.eup %7678 }
 0x504   :  { %v603_v27 = vmul.f32 %v7679_v23, %v8322_v38  ;;  %v852_v42 = vpop.permute.xlu1 %851 }
 0x506   :  { %v905_v20 = vpop.permute.xlu0 %904  ;;  %v609_v30 = vpack.c.bf16 %v603_v27, %v602_v24 }
 0x507   :  { %v7681_v32 = vpop.eup %7680  ;;  %v910_v33 = vsel %vm306_vm2, %v905_v20, 0  ;;  %7038 = vmatmul.mubr.msk.bf16.vlgmr.msra.gmra.mrb[16].mxu0 %vm306_vm2, %v801_v22 }
 0x508   :  { %7020 = vmatmul.mubr.msk.bf16.vlgmr.msra.gmra.mrb[16].mxu1 %vm306_vm2, %v609_v30  ;;  %7048 = vmatpush3.bf16.xpose.msra.mxu0 %v910_v33  ;;  %v7683_v34 = vpop.eup %7682  ;;  %v607_v36 = vmul.f32 %v7681_v32, %v8328_v54  ;;  %v956_v44 = vpop.permute.xlu1 %955 }
 0x509   :  { %7030 = vmatpush3.bf16.msra.mxu1 %v754_v11  ;;  %7049 = vmatprep.mubr.msk.bf16.mxu0 %vm8058_vm1, %v8057_v48  ;;  %v606_v40 = vmul.f32 %v7683_v34, %v8324_v52  ;;  %v961_v21 = vsel %vm306_vm2, %v956_v44, 0 }
 0x50a   :  { %7031 = vmatprep.mubr.msk.bf16.mxu1 %vm8058_vm1, %v8057_v48  ;;  %7041 = vmatprep.subr.bf16.mxu1 %v8057_v48  ;;  %v903_v28 = vpop.permute.xlu0 %902 }
 0x50b   :  { %7059 = vmatprep.subr.bf16.mxu0 %v8057_v48  ;;  %v611_v41 = vpack.c.bf16 %v607_v36, %v606_v40 }
 0x50c   :  { %v954_v45 = vpop.permute.xlu1 %953 }
 0x50f   :  { %7050 = vmatmul.mubr.msk.bf16.vlgmr.msra.gmra.mrb[20].mxu0 %vm306_vm2, %v903_v28 }
 0x510   :  { %7032 = vmatmul.mubr.msk.bf16.vlgmr.msra.gmra.mrb[20].mxu1 %vm306_vm2, %v611_v41  ;;  %7061 = vmatprep.mubr.msk.bf16.mxu0 %vm8058_vm1, %v8057_v48 }
 0x511   :  { %7043 = vmatprep.mubr.msk.bf16.mxu1 %vm8058_vm1, %v8057_v48 }
 0x512   :  { %7042 = vmatpush3.bf16.xpose.msra.mxu1 %v859_v43 }
 0x513   :  { %7053 = vmatprep.subr.bf16.mxu1 %v8057_v48 }
 0x519   :  { %7044 = vmatmul.mubr.msk.bf16.vlgmr.msra.gmra.mrb[24].mxu1 %vm306_vm2, %v852_v42 }
 0x51a   :  { %7054 = vmatpush3.bf16.xpose.msra.mxu1 %v961_v21  ;;  %7055 = vmatprep.mubr.msk.bf16.mxu1 %vm8058_vm1, %v8057_v48 }
 0x51b   :  { %7065 = vmatprep.subr.bf16.mxu1 %v8057_v48 }
 0x521   :  { %7056 = vmatmul.mubr.msk.bf16.vlgmr.msra.gmra.mrb[28].mxu1 %vm306_vm2, %v954_v45 }
 0x522   :  { %7067 = vmatprep.mubr.msk.bf16.mxu1 %vm8058_vm1, %v8057_v48 }
 0x5a0   :  { %v8394_v46 = vpop.f32.mrb[8].mxu0 }
 0x5a1   :  { %v7015_v47 = vpop.f32.mrb[9].mxu0 }
 0x5a2   :  { %v8396_v50 = vpop.f32.mrb[10].mxu0 }
 0x5a3   :  { %v7016_v51 = vpop.f32.mrb[11].mxu0 }
 0x5a8   :  { %v8398_v29 = vpop.f32.mrb[12].mxu0 }
 0x5a9   :  { %v7027_v38 = vpop.f32.mrb[13].mxu0 }
 0x5aa   :  { %v8400_v52 = vpop.f32.mrb[14].mxu0 }
 0x5ab   :  { %v7028_v53 = vpop.f32.mrb[15].mxu0 }
 0x5da   :  { %v844_v54 = vpop.f32.mrb[16].mxu0 }
 0x5db   :  { %v1004_v55 = vmul.f32 0.25, %v844_v54  ;;  %v8402_v56 = vpop.f32.mrb[16].mxu1  ;;  %v7039_v57 = vpop.f32.mrb[17].mxu0 }
 0x5dc   :  { %v7021_v39 = vpop.f32.mrb[17].mxu1  ;;  %v847_v49 = vpop.f32.mrb[18].mxu0 }
 0x5dd   :  { %v1005_v58 = vmul.f32 0.25, %v847_v49  ;;  %v8404_v59 = vpop.f32.mrb[18].mxu1  ;;  %v7040_v60 = vpop.f32.mrb[19].mxu0  ;;  %v1012_v61 = vadd.f32 %v1004_v55, %v8270_v31 }
 0x5de   :  { %v7022_v62 = vpop.f32.mrb[19].mxu1 }
 0x5df   :  { %v1020_v63 = vsel %vm306_vm2, %v1012_v61, -inf  ;;  %v1013_v0 = vadd.f32 %v1005_v58, %v8272_v35 }
 0x5e0   :  { %1021 = vmax.xlane.f32.xlu0 %v1020_v63 }
 0x5e1   :  { %v1023_v1 = vsel %vm306_vm2, %v1013_v0, -inf }
 0x5e2   :  { %1024 = vmax.xlane.f32.xlu1 %v1023_v1  ;;  %v946_v4 = vpop.f32.mrb[20].mxu0 }
 0x5e3   :  { %v8410_v5 = vpop.f32.mrb[20].mxu1  ;;  %v7051_v6 = vpop.f32.mrb[21].mxu0  ;;  %v1008_v20 = vmul.f32 0.25, %v946_v4 }
 0x5e4   :  { %v7033_v7 = vpop.f32.mrb[21].mxu1  ;;  %v949_v8 = vpop.f32.mrb[22].mxu0 }
 0x5e5   :  { %v1009_v9 = vmul.f32 0.25, %v949_v8  ;;  %v8412_v10 = vpop.f32.mrb[22].mxu1  ;;  %v7052_v11 = vpop.f32.mrb[23].mxu0  ;;  %v1016_v40 = vadd.f32 %v1008_v20, %v8270_v31 }
 0x5e6   :  { %v7034_v14 = vpop.f32.mrb[23].mxu1 }
 0x5e7   :  { %v1017_v15 = vadd.f32 %v1009_v9, %v8272_v35  ;;  %v1032_v43 = vsel %vm306_vm2, %v1016_v40, -inf }
 0x5e9   :  { %v1035_v16 = vsel %vm306_vm2, %v1017_v15, -inf }
 0x5ea   :  { %1036 = vmax.xlane.f32.xlu1 %v1035_v16 }
 0x5ec   :  { %v895_v17 = vpop.f32.mrb[24].mxu1 }
 0x5ed   :  { %v1006_v18 = vmul.f32 0.25, %v895_v17  ;;  %v7045_v19 = vpop.f32.mrb[25].mxu1 }
 0x5ee   :  { %v898_v22 = vpop.f32.mrb[26].mxu1 }
 0x5ef   :  { %v1007_v23 = vmul.f32 0.25, %v898_v22  ;;  %v7046_v24 = vpop.f32.mrb[27].mxu1  ;;  %v1014_v27 = vadd.f32 %v1006_v18, %v8270_v31 }
 0x5f1   :  { %v1026_v30 = vsel %vm306_vm2, %v1014_v27, -inf  ;;  %v1015_v32 = vadd.f32 %v1007_v23, %v8272_v35 }
 0x5f2   :  { %1027 = vmax.xlane.f32.xlu0 %v1026_v30 }
 0x5f3   :  { %v1029_v37 = vsel %vm306_vm2, %v1015_v32, -inf }
 0x5f4   :  { %v997_v33 = vpop.f32.mrb[28].mxu1 }
 0x5f5   :  { %v1010_v34 = vmul.f32 0.25, %v997_v33  ;;  %v7057_v36 = vpop.f32.mrb[29].mxu1 }
 0x5f6   :  { %1030 = vmax.xlane.f32.xlu0 %v1029_v37  ;;  %v1000_v28 = vpop.f32.mrb[30].mxu1 }
 0x5f7   :  { %v1011_v41 = vmul.f32 0.25, %v1000_v28  ;;  %v7058_v42 = vpop.f32.mrb[31].mxu1  ;;  %v1018_v21 = vadd.f32 %v1010_v34, %v8270_v31 }
 0x5f9   :  { %v1019_v44 = vadd.f32 %v1011_v41, %v8272_v35  ;;  %v1038_v47 = vsel %vm306_vm2, %v1018_v21, -inf }
 0x5fa   :  { %1033 = vmax.xlane.f32.xlu0 %v1032_v43 }
 0x5fb   :  { %v1041_v45 = vsel %vm306_vm2, %v1019_v44, -inf }
 0x5fc   :  { %1042 = vmax.xlane.f32.xlu1 %v1041_v45 }
 0x5fe   :  { %1039 = vmax.xlane.f32.xlu0 %v1038_v47 }
 0x66d   :  { %v1022_v51 = vpop.xlane.xlu0 %1021 }
 0x66e   :  { %v1044_v38 = vsub.f32 %v1012_v61, %v1022_v51 }
 0x66f   :  { %v1025_v53 = vpop.xlane.xlu1 %1024 }
 0x670   :  { %v1052_v54 = vmul.f32 1.442695, %v1044_v38  ;;  %v1045_v55 = vsub.f32 %v1013_v0, %v1025_v53 }
 0x672   :  { %7684 = vpow2.f32 %v1052_v54  ;;  %v1054_v57 = vmul.f32 1.442695, %v1045_v55 }
 0x674   :  { %7686 = vpow2.f32 %v1054_v57 }
 0x677   :  { %v1037_v60 = vpop.xlane.xlu1 %1036 }
 0x678   :  { %v1049_v1 = vsub.f32 %v1017_v15, %v1037_v60 }
 0x67a   :  { %v1062_v7 = vmul.f32 1.442695, %v1049_v1 }
 0x67c   :  { %v8426_v39 = vpop.eup %7684 }
 0x67d   :  { %v1068_v49 = vsel %vm306_vm2, %v8426_v39, 0.0 }
 0x67e   :  { %v8430_v58 = vpop.eup %7686  ;;  %1069 = vadd.xlane.f32.xlu0 %v1068_v49 }
 0x67f   :  { %v1028_v62 = vpop.xlane.xlu0 %1027  ;;  %v1071_v63 = vsel %vm306_vm2, %v8430_v58, 0.0 }
 0x680   :  { %v1046_v61 = vsub.f32 %v1014_v27, %v1028_v62  ;;  %1072 = vadd.xlane.f32.xlu1 %v1071_v63 }
 0x682   :  { %v1056_v0 = vmul.f32 1.442695, %v1046_v61 }
 0x683   :  { %v1031_v4 = vpop.xlane.xlu0 %1030 }
 0x684   :  { %7688 = vpow2.f32 %v1056_v0  ;;  %v1047_v6 = vsub.f32 %v1015_v32, %v1031_v4 }
 0x686   :  { %v1058_v8 = vmul.f32 1.442695, %v1047_v6 }
 0x687   :  { %v1034_v9 = vpop.xlane.xlu0 %1033 }
 0x688   :  { %7690 = vpow2.f32 %v1058_v8  ;;  %v1048_v11 = vsub.f32 %v1016_v40, %v1034_v9 }
 0x689   :  { %7692 = vpow2.f32 %v1062_v7  ;;  %v1043_v34 = vpop.xlane.xlu1 %1042 }
 0x68a   :  { %v1060_v14 = vmul.f32 1.442695, %v1048_v11  ;;  %v1051_v36 = vsub.f32 %v1019_v44, %v1043_v34 }
 0x68b   :  { %v1040_v16 = vpop.xlane.xlu0 %1039 }
 0x68c   :  { %7694 = vpow2.f32 %v1060_v14  ;;  %v1050_v17 = vsub.f32 %v1018_v21, %v1040_v16  ;;  %v1066_v37 = vmul.f32 1.442695, %v1051_v36  ;;  %v7504_v14 = vld [vmem:[%s9669_s0 + $0x10] sm:$0xff]   ;;  %v7505_v16 = vld [vmem:[%s9669_s0 + $0x18] sm:$0xff]  }
 0x68e   :  { %v7689_v18 = vpop.eup %7688  ;;  %v1064_v19 = vmul.f32 1.442695, %v1050_v17 }
 0x68f   :  { %v1074_v22 = vsel %vm306_vm2, %v7689_v18, 0.0 }
 0x690   :  { %7696 = vpow2.f32 %v1064_v19  ;;  %1075 = vadd.xlane.f32.xlu0 %v1074_v22 }
 0x691   :  { %7698 = vpow2.f32 %v1066_v37 }
 0x692   :  { %v7691_v15 = vpop.eup %7690 }
 0x693   :  { %v1077_v23 = vsel %vm306_vm2, %v7691_v15, 0.0  ;;  %v7693_v24 = vpop.eup %7692 }
 0x694   :  { %1078 = vadd.xlane.f32.xlu1 %v1077_v23  ;;  %v1083_v30 = vsel %vm306_vm2, %v7693_v24, 0.0 }
 0x696   :  { %v7695_v27 = vpop.eup %7694 }
 0x697   :  { %v1080_v20 = vsel %vm306_vm2, %v7695_v27, 0.0 }
 0x698   :  { %1081 = vadd.xlane.f32.xlu0 %v1080_v20  ;;  %1084 = vadd.xlane.f32.xlu1 %v1083_v30 }
 0x69a   :  { %v8438_v32 = vpop.eup %7696 }
 0x69b   :  { %v1086_v33 = vsel %vm306_vm2, %v8438_v32, 0.0  ;;  %v7699_v40 = vpop.eup %7698 }
 0x69c   :  { %1087 = vadd.xlane.f32.xlu0 %v1086_v33  ;;  %v1089_v28 = vsel %vm306_vm2, %v7699_v40, 0.0 }
 0x6a9   :  { %1159 = vrot.lane.b32.xlu1 %v8222_v2, %s8064_s16 }
 0x6ad   :  { %1206 = vrot.lane.b32.xlu1 %v8232_v13, %s8064_s16 }
 0x6b2   :  { %1112 = vrot.lane.b32.xlu0 %v8224_v3, %s8064_s16 }
 0x6d1   :  { %1090 = vadd.xlane.f32.xlu1 %v1089_v28 }
 0x6e2   :  { %1253 = vrot.lane.b32.xlu1 %v8230_v12, %s8064_s16 }
 0x70b   :  { %v1070_v41 = vpop.xlane.xlu0 %1069 }
 0x70d   :  { %v1073_v42 = vpop.xlane.xlu1 %1072 }
 0x70e   :  { %7700 = vrcp.f32 %v1073_v42 }
 0x70f   :  { %7702 = vrcp.f32 %v1070_v41 }
 0x718   :  { %v7701_v44 = vpop.eup %7700 }
 0x719   :  { %v7703_v21 = vpop.eup %7702  ;;  %v1101_v12 = vmul.f32 %v7701_v44, %v8430_v58 }
 0x71a   :  { %v1100_v53 = vmul.f32 %v7703_v21, %v8426_v39 }
 0x71c   :  { %v1108_v49 = vpack.c.bf16 %v1101_v12, %v1100_v53 }
 0x71d   :  { %v1076_v2 = vpop.xlane.xlu0 %1075 }
 0x71e   :  { %7704 = vrcp.f32 %v1076_v2 }
 0x721   :  { %v1079_v13 = vpop.xlane.xlu1 %1078 }
 0x722   :  { %7706 = vrcp.f32 %v1079_v13 }
 0x725   :  { %v1082_v3 = vpop.xlane.xlu0 %1081  ;;  %v1085_v43 = vpop.xlane.xlu1 %1084 }
 0x726   :  { %7708 = vrcp.f32 %v1082_v3 }
 0x727   :  { %7710 = vrcp.f32 %v1085_v43 }
 0x728   :  { %v7705_v51 = vpop.eup %7704 }
 0x729   :  { %v1088_v45 = vpop.xlane.xlu0 %1087  ;;  %v1160_v47 = vpop.permute.xlu1 %1159  ;;  %v1102_v54 = vmul.f32 %v7705_v51, %v7689_v18 }
 0x72a   :  { %7066 = vmatpush3.bf16.msra.mxu1 %v1160_v47  ;;  %7712 = vrcp.f32 %v1088_v45 }
 0x72b   :  { %7077 = vmatprep.subr.bf16.mxu1 %v8057_v48 }
 0x72c   :  { %v7707_v38 = vpop.eup %7706 }
 0x72d   :  { %v1103_v55 = vmul.f32 %v7707_v38, %v7691_v15  ;;  %v1113_v57 = vpop.permute.xlu0 %1112  ;;  %v1207_v61 = vpop.permute.xlu1 %1206 }
 0x72e   :  { %7060 = vmatpush3.bf16.msra.mxu0 %v1113_v57 }
 0x72f   :  { %v1109_v60 = vpack.c.bf16 %v1103_v55, %v1102_v54  ;;  %7071 = vmatprep.subr.bf16.mxu0 %v8057_v48 }
 0x730   :  { %v7709_v62 = vpop.eup %7708 }
 0x731   :  { %v7711_v63 = vpop.eup %7710  ;;  %7062 = vmatmul.mubr.msk.bf16.vlgmr.msra.gmra.mrb[24].mxu0 %vm306_vm2, %v1108_v49  ;;  %7068 = vmatmul.mubr.msk.bf16.vlgmr.msra.gmra.mrb[32].mxu1 %vm306_vm2, %v1109_v60  ;;  %v1104_v39 = vmul.f32 %v7709_v62, %v7695_v27 }
 0x732   :  { %7072 = vmatpush3.bf16.msra.mxu0 %v1207_v61  ;;  %7073 = vmatprep.mubr.msk.bf16.mxu0 %vm8058_vm1, %v8057_v48  ;;  %v1105_v58 = vmul.f32 %v7711_v63, %v7693_v24 }
 0x733   :  { %7079 = vmatprep.mubr.msk.bf16.mxu1 %vm8058_vm1, %v8057_v48  ;;  %7083 = vmatprep.subr.bf16.mxu0 %v7504_v14 }
 0x734   :  { %v1110_v1 = vpack.c.bf16 %v1105_v58, %v1104_v39  ;;  %v7713_v6 = vpop.eup %7712 }
 0x735   :  { %v1106_v8 = vmul.f32 %v7713_v6, %v8438_v32 }
 0x739   :  { %7074 = vmatmul.mubr.msk.bf16.vlgmr.msra.gmra.mrb[28].mxu0 %vm306_vm2, %v1110_v1 }
 0x73a   :  { %7084 = vmatpush3.bf16.msra.mxu0 %v7504_v14  ;;  %v8000_v14 = vld [vmem:[%s9671_s2 + $0x8] sm:$0xff] }
 0x73b   :  { %7085 = vmatprep.subr.bf16.mxu0 %v7505_v16 }
 0x73e   :  { %7086 = vmatpush3.bf16.msra.mxu0 %v7505_v16 }
 0x75e   :  { %v1091_v0 = vpop.xlane.xlu1 %1090 }
 0x75f   :  { %7714 = vrcp.f32 %v1091_v0 }
 0x762   :  { %v1254_v4 = vpop.permute.xlu1 %1253 }
 0x763   :  { %7078 = vmatpush3.bf16.msra.mxu1 %v1254_v4 }
 0x769   :  { %v7715_v7 = vpop.eup %7714 }
 0x76a   :  { %v1107_v9 = vmul.f32 %v7715_v7, %v7699_v40 }
 0x76c   :  { %v1111_v11 = vpack.c.bf16 %v1107_v9, %v1106_v8  ;;  %v7999_v8 = vld [vmem:[%s9671_s2 + $0x10] sm:$0xff] }
 0x76e   :  { %7080 = vmatmul.mubr.msk.bf16.vlgmr.msra.gmra.mrb[36].mxu1 %vm306_vm2, %v1111_v11 }
 0x804   :  { %v1152_v17 = vpop.f32.mrb[24].mxu0  ;;  %v1199_v18 = vpop.f32.mrb[32].mxu1 }
 0x805   :  { %v7063_v19 = vpop.f32.mrb[25].mxu0  ;;  %v7069_v22 = vpop.f32.mrb[33].mxu1 }
 0x806   :  { %v1155_v15 = vpop.f32.mrb[26].mxu0  ;;  %v1202_v23 = vpop.f32.mrb[34].mxu1  ;;  %v8001_v19 = vld [vmem:[%s9671_s2 + $0x18] sm:$0xff] }
 0x807   :  { %v7452_v24 = vpack.i.bf16 %v1155_v15, %v1152_v17  ;;  %v7457_v27 = vpack.i.bf16 %v1202_v23, %v1199_v18  ;;  %v7064_v20 = vpop.f32.mrb[27].mxu0  ;;  %v7070_v30 = vpop.f32.mrb[35].mxu1 }
 0x809   :  { %7453 = vrot.lane.b32.xlu0 %v7452_v24, %s8065_s20  ;;  %7458 = vrot.lane.b32.xlu1 %v7457_v27, %s8065_s20 }
 0x80c   :  { %v1246_v32 = vpop.f32.mrb[28].mxu0 }
 0x80d   :  { %v7075_v33 = vpop.f32.mrb[29].mxu0 }
 0x80e   :  { %v1249_v34 = vpop.f32.mrb[30].mxu0 }
 0x80f   :  { %v7462_v36 = vpack.i.bf16 %v1249_v34, %v1246_v32  ;;  %v7076_v37 = vpop.f32.mrb[31].mxu0 }
 0x811   :  { %7463 = vrot.lane.b32.xlu0 %v7462_v36, %s8065_s20  ;;  %v8002_v36 = vld [vmem:[%s9671_s2 + $0x20] sm:$0xff] }
 0x841   :  { %v1293_v40 = vpop.f32.mrb[36].mxu1 }
 0x842   :  { %v7081_v28 = vpop.f32.mrb[37].mxu1 }
 0x843   :  { %v1296_v41 = vpop.f32.mrb[38].mxu1  ;;  %v8003_v28 = vld [vmem:[%s9671_s2 + $0x30] sm:$0xff] }
 0x844   :  { %v7467_v42 = vpack.i.bf16 %v1296_v41, %v1293_v40  ;;  %v7082_v2 = vpop.f32.mrb[39].mxu1 }
 0x846   :  { %7468 = vrot.lane.b32.xlu1 %v7467_v42, %s8065_s20  ;;  %v8004_v42 = vld [vmem:[%s9671_s2 + $0x28] sm:$0xff] }
 0x87b   :  { %v7454_v13 = vpop.permute.xlu0 %7453  ;;  %v7459_v3 = vpop.permute.xlu1 %7458 }
 0x87c   :  { %v7456_v43 = vunpack.i.h.bf16 %v7454_v13  ;;  %v7455_v44 = vunpack.i.l.bf16 %v7454_v13  ;;  %v7461_v21 = vunpack.i.h.bf16 %v7459_v3  ;;  %v7460_v45 = vunpack.i.l.bf16 %v7459_v3  ;;  %v8005_v3 = vld [vmem:[%s9671_s2 + $0x38] sm:$0xff] }
 0x87e   :  { %v1333_v47 = vsel %vm306_vm2, %v8396_v50, %v7456_v43  ;;  %v1332_v51 = vsel %vm306_vm2, %v8394_v46, %v7455_v44  ;;  %v1335_v12 = vsel %vm306_vm2, %v8404_v59, %v7461_v21  ;;  %v1334_v38 = vsel %vm306_vm2, %v8402_v56, %v7460_v45 }
 0x87f   :  { %v1341_v53 = vpack.c.bf16 %v1335_v12, %v1334_v38  ;;  %v1340_v54 = vpack.c.bf16 %v1333_v47, %v1332_v51 }
 0x881   :  { %7087 = vmatprep.mubr.msk.bf16.mxu0 %vm67_vm0, %v1340_v54 }
 0x882   :  { %7088 = vmatmul.mubr.msk.bf16.vlgmr.msra.gmra.mrb[32].mxu0 %vm67_vm0, %v1341_v53 }
 0x883   :  { %v7464_v55 = vpop.permute.xlu0 %7463 }
 0x884   :  { %v7466_v57 = vunpack.i.h.bf16 %v7464_v55  ;;  %v7465_v49 = vunpack.i.l.bf16 %v7464_v55 }
 0x886   :  { %v1337_v50 = vsel %vm306_vm2, %v8400_v52, %v7466_v57  ;;  %v1336_v46 = vsel %vm306_vm2, %v8398_v29, %v7465_v49  ;;  %v6533_v52 = vld [vmem:[%s9671_s2 + $0x70] ss:$0 sm:$0xff] }
 0x887   :  { %v1342_v60 = vpack.c.bf16 %v1337_v50, %v1336_v46 }
 0x889   :  { %7091 = vmatprep.mubr.msk.bf16.mxu0 %vm67_vm0, %v1342_v60 }
 0x8b8   :  { %v7469_v59 = vpop.permute.xlu1 %7468 }
 0x8b9   :  { %v7471_v56 = vunpack.i.h.bf16 %v7469_v59  ;;  %v7470_v62 = vunpack.i.l.bf16 %v7469_v59 }
 0x8bb   :  { %v1339_v63 = vsel %vm306_vm2, %v8412_v10, %v7471_v56  ;;  %v1338_v61 = vsel %vm306_vm2, %v8410_v5, %v7470_v62  ;;  %v7998_v10 = vld [vmem:[%s9671_s2] sm:$0xff] }
 0x8bc   :  { %v1343_v39 = vpack.c.bf16 %v1339_v63, %v1338_v61 }
 0x8be   :  { %7092 = vmatmul.mubr.msk.bf16.gmra.mrb[36].mxu0 %vm67_vm0, %v1343_v39 }
 0x955   :  { %v7089_v29 = vpop.f32.mrb[32].mxu0 }
 0x956   :  { %v1411_v58 = vpop.f32.mrb[33].mxu0  ;;  %v1420_v1 = vadd.f32 %v7089_v29, %v6533_v52 }
 0x957   :  { %v1412_v0 = vadd.f32 %v6533_v52, %v1411_v58  ;;  %v7090_v4 = vpop.f32.mrb[34].mxu0  ;;  %v7506_v58 = vld [vmem:[%s9669_s0 + $0x20] sm:$0xff]  }
 0x958   :  { %v1414_v6 = vpop.f32.mrb[35].mxu0  ;;  %v8505_v9 = vadd.f32 %v7999_v8, %v1420_v1  ;;  %v1423_v11 = vadd.f32 %v7090_v4, %v6533_v52  ;;  %7095 = vmatprep.subr.bf16.mxu1 %v7506_v58  ;;  %v7507_v1 = vld [vmem:[%s9669_s0 + $0x28] sm:$0xff]  }
 0x959   :  { %v8500_v7 = vadd.f32 %v7998_v10, %v1412_v0  ;;  %v1415_v5 = vadd.f32 %v6533_v52, %v1414_v6  ;;  %7096 = vmatpush3.bf16.msra.mxu1 %v7506_v58 }
 0x95a   :  { %v8519_v22 = vadd.f32 %v8001_v19, %v1423_v11  ;;  %v1458_v15 = vsel %vm67_vm0, %v8505_v9, 0.0  ;;  %7097 = vmatprep.subr.bf16.mxu1 %v7507_v1 }
 0x95b   :  { %v8510_v16 = vadd.f32 %v8000_v14, %v1415_v5  ;;  %v1452_v17 = vsel %vm67_vm0, %v8500_v7, 0.0 }
 0x95c   :  { %1453 = vadd.xlane.f32.xlu0 %v1452_v17  ;;  %v1461_v23 = vsel %vm67_vm0, %v8519_v22, 0.0 }
 0x95d   :  { %v1455_v18 = vsel %vm67_vm0, %v8510_v16, 0.0  ;;  %7098 = vmatpush3.bf16.msra.mxu1 %v7507_v1 }
 0x95e   :  { %1456 = vadd.xlane.f32.xlu1 %v1455_v18 }
 0x960   :  { %1459 = vadd.xlane.f32.xlu0 %v1458_v15 }
 0x964   :  { %1462 = vadd.xlane.f32.xlu0 %v1461_v23 }
 0x991   :  { %v7093_v24 = vpop.f32.mrb[36].mxu0 }
 0x992   :  { %v1436_v27 = vadd.f32 %v7093_v24, %v6533_v52  ;;  %v1427_v20 = vpop.f32.mrb[37].mxu0 }
 0x993   :  { %v1428_v30 = vadd.f32 %v6533_v52, %v1427_v20  ;;  %v7094_v32 = vpop.f32.mrb[38].mxu0 }
 0x994   :  { %v1439_v33 = vadd.f32 %v7094_v32, %v6533_v52  ;;  %v1430_v34 = vpop.f32.mrb[39].mxu0  ;;  %v8533_v41 = vadd.f32 %v8003_v28, %v1436_v27 }
 0x995   :  { %v8528_v37 = vadd.f32 %v8002_v36, %v1428_v30  ;;  %v1431_v40 = vadd.f32 %v6533_v52, %v1430_v34 }
 0x996   :  { %v8545_v43 = vadd.f32 %v8005_v3, %v1439_v33  ;;  %v1470_v21 = vsel %vm67_vm0, %v8533_v41, 0.0 }
 0x997   :  { %v8538_v2 = vadd.f32 %v8004_v42, %v1431_v40  ;;  %v1464_v13 = vsel %vm67_vm0, %v8528_v37, 0.0 }
 0x998   :  { %1465 = vadd.xlane.f32.xlu0 %v1464_v13  ;;  %v1473_v45 = vsel %vm67_vm0, %v8545_v43, 0.0 }
 0x999   :  { %v1467_v44 = vsel %vm67_vm0, %v8538_v2, 0.0 }
 0x99a   :  { %1468 = vadd.xlane.f32.xlu1 %v1467_v44 }
 0x99c   :  { %1471 = vadd.xlane.f32.xlu0 %v1470_v21 }
 0x99e   :  { %1474 = vadd.xlane.f32.xlu1 %v1473_v45 }
 0x9e9   :  { %v1454_v47 = vpop.xlane.xlu0 %1453 }
 0x9ea   :  { %v1476_v51 = vmul.f32 0.03125, %v1454_v47 }
 0x9eb   :  { %v1457_v12 = vpop.xlane.xlu1 %1456 }
 0x9ec   :  { %v8554_v38 = vsub.f32 %v8500_v7, %v1476_v51  ;;  %v1477_v53 = vmul.f32 0.03125, %v1457_v12 }
 0x9ed   :  { %v1460_v54 = vpop.xlane.xlu0 %1459 }
 0x9ee   :  { %v8557_v55 = vsub.f32 %v8510_v16, %v1477_v53  ;;  %v1478_v57 = vmul.f32 0.03125, %v1460_v54  ;;  %v1492_v49 = vmul.f32 %v8554_v38, %v8554_v38  ;;  %v6540_v54 = vld [vmem:[%s9671_s2 + $0x78] ss:$0 sm:$0xff] }
 0x9f0   :  { %v8562_v50 = vsub.f32 %v8505_v9, %v1478_v57  ;;  %v1500_v46 = vsel %vm67_vm0, %v1492_v49, 0.0  ;;  %v1493_v60 = vmul.f32 %v8557_v55, %v8557_v55 }
 0x9f1   :  { %v1463_v59 = vpop.xlane.xlu0 %1462  ;;  %1501 = vadd.xlane.f32.xlu0 %v1500_v46 }
 0x9f2   :  { %v1479_v56 = vmul.f32 0.03125, %v1463_v59  ;;  %v1503_v62 = vsel %vm67_vm0, %v1493_v60, 0.0  ;;  %v1494_v63 = vmul.f32 %v8562_v50, %v8562_v50 }
 0x9f3   :  { %1504 = vadd.xlane.f32.xlu1 %v1503_v62 }
 0x9f4   :  { %v8571_v61 = vsub.f32 %v8519_v22, %v1479_v56  ;;  %v1506_v39 = vsel %vm67_vm0, %v1494_v63, 0.0  ;;  %v6541_v56 = vld [vmem:[%s9671_s2 + $0x80] ss:$0 sm:$0xff] }
 0x9f5   :  { %1507 = vadd.xlane.f32.xlu0 %v1506_v39 }
 0x9f6   :  { %v1495_v52 = vmul.f32 %v8571_v61, %v8571_v61 }
 0x9f8   :  { %v1509_v29 = vsel %vm67_vm0, %v1495_v52, 0.0 }
 0x9f9   :  { %1510 = vadd.xlane.f32.xlu1 %v1509_v29 }
 0xa25   :  { %v1466_v0 = vpop.xlane.xlu0 %1465 }
 0xa26   :  { %v1480_v4 = vmul.f32 0.03125, %v1466_v0 }
 0xa27   :  { %v1469_v6 = vpop.xlane.xlu1 %1468 }
 0xa28   :  { %v8584_v10 = vsub.f32 %v8528_v37, %v1480_v4  ;;  %v1481_v5 = vmul.f32 0.03125, %v1469_v6 }
 0xa29   :  { %v1472_v8 = vpop.xlane.xlu0 %1471 }
 0xa2a   :  { %v8587_v11 = vsub.f32 %v8538_v2, %v1481_v5  ;;  %v1482_v14 = vmul.f32 0.03125, %v1472_v8  ;;  %v1496_v17 = vmul.f32 %v8584_v10, %v8584_v10 }
 0xa2b   :  { %v1475_v18 = vpop.xlane.xlu1 %1474 }
 0xa2c   :  { %v8592_v19 = vsub.f32 %v8533_v41, %v1482_v14  ;;  %v1483_v15 = vmul.f32 0.03125, %v1475_v18  ;;  %v1512_v23 = vsel %vm67_vm0, %v1496_v17, 0.0  ;;  %v1497_v24 = vmul.f32 %v8587_v11, %v8587_v11 }
 0xa2d   :  { %1513 = vadd.xlane.f32.xlu0 %v1512_v23 }
 0xa2e   :  { %v8598_v27 = vsub.f32 %v8545_v43, %v1483_v15  ;;  %v1515_v20 = vsel %vm67_vm0, %v1497_v24, 0.0  ;;  %v1498_v30 = vmul.f32 %v8592_v19, %v8592_v19 }
 0xa2f   :  { %1516 = vadd.xlane.f32.xlu1 %v1515_v20 }
 0xa30   :  { %v1518_v32 = vsel %vm67_vm0, %v1498_v30, 0.0  ;;  %v1499_v33 = vmul.f32 %v8598_v27, %v8598_v27 }
 0xa31   :  { %1519 = vadd.xlane.f32.xlu0 %v1518_v32 }
 0xa32   :  { %v1521_v34 = vsel %vm67_vm0, %v1499_v33, 0.0 }
 0xa33   :  { %1522 = vadd.xlane.f32.xlu1 %v1521_v34 }
 0xa7e   :  { %v1502_v36 = vpop.xlane.xlu0 %1501 }
 0xa7f   :  { %v1524_v40 = vmul.f32 0.03125, %v1502_v36 }
 0xa80   :  { %v1505_v28 = vpop.xlane.xlu1 %1504 }
 0xa81   :  { %v1532_v42 = vadd.f32 1e-05, %v1524_v40  ;;  %v1525_v13 = vmul.f32 0.03125, %v1505_v28 }
 0xa82   :  { %v1508_v3 = vpop.xlane.xlu0 %1507 }
 0xa83   :  { %7716 = vrsqrt.f32 %v1532_v42  ;;  %v1533_v44 = vadd.f32 1e-05, %v1525_v13  ;;  %v1526_v21 = vmul.f32 0.03125, %v1508_v3 }
 0xa85   :  { %7718 = vrsqrt.f32 %v1533_v44  ;;  %v1534_v45 = vadd.f32 1e-05, %v1526_v21 }
 0xa86   :  { %v1511_v47 = vpop.xlane.xlu1 %1510 }
 0xa87   :  { %7720 = vrsqrt.f32 %v1534_v45  ;;  %v1527_v51 = vmul.f32 0.03125, %v1511_v47 }
 0xa89   :  { %v1535_v12 = vadd.f32 1e-05, %v1527_v51 }
 0xa8b   :  { %7722 = vrsqrt.f32 %v1535_v12 }
 0xa8d   :  { %v7717_v53 = vpop.eup %7716 }
 0xa8e   :  { %v1548_v57 = vmul.f32 %v7717_v53, %v8554_v38 }
 0xa8f   :  { %v7719_v49 = vpop.eup %7718 }
 0xa90   :  { %v1549_v46 = vmul.f32 %v7719_v49, %v8557_v55  ;;  %v1560_v60 = vmul.f32 %v6540_v54, %v1548_v57  ;;  %v7512_v49 = vld [vmem:[%s9669_s0 + $0x50] sm:$0xff]  }
 0xa91   :  { %v7721_v59 = vpop.eup %7720 }
 0xa92   :  { %v1550_v62 = vmul.f32 %v7721_v59, %v8562_v50  ;;  %v1561_v63 = vmul.f32 %v6540_v54, %v1549_v46  ;;  %v1572_v39 = vadd.f32 %v6541_v56, %v1560_v60  ;;  %v7513_v46 = vld [vmem:[%s9669_s0 + $0x58] sm:$0xff]   ;;  %v7514_v60 = vld [vmem:[%s9669_s0 + $0x60] sm:$0xff]   ;;  %v7515_v59 = vld [vmem:[%s9669_s0 + $0x68] sm:$0xff]  }
 0xa94   :  { %v1573_v52 = vadd.f32 %v6541_v56, %v1561_v63  ;;  %v1562_v58 = vmul.f32 %v6540_v54, %v1550_v62 }
 0xa95   :  { %v7723_v29 = vpop.eup %7722 }
 0xa96   :  { %v1551_v1 = vmul.f32 %v7723_v29, %v8571_v61  ;;  %v1580_v0 = vpack.c.bf16 %v1573_v52, %v1572_v39  ;;  %v1574_v55 = vadd.f32 %v6541_v56, %v1562_v58 }
 0xa98   :  { %v1563_v38 = vmul.f32 %v6540_v54, %v1551_v1  ;;  %7099 = vmatprep.mubr.msk.bf16.mxu1 %vm67_vm0, %v1580_v0 }
 0xa9a   :  { %v1575_v4 = vadd.f32 %v6541_v56, %v1563_v38 }
 0xa9c   :  { %v1581_v6 = vpack.c.bf16 %v1575_v4, %v1574_v55 }
 0xa9e   :  { %7100 = vmatmul.mubr.msk.bf16.vlgmr.msra.gmra.mrb[40].mxu1 %vm67_vm0, %v1581_v6 }
 0xaba   :  { %v1514_v5 = vpop.xlane.xlu0 %1513 }
 0xabb   :  { %v1528_v8 = vmul.f32 0.03125, %v1514_v5 }
 0xabc   :  { %v1517_v14 = vpop.xlane.xlu1 %1516 }
 0xabd   :  { %v1536_v50 = vadd.f32 1e-05, %v1528_v8  ;;  %v1529_v17 = vmul.f32 0.03125, %v1517_v14 }
 0xabe   :  { %v1520_v18 = vpop.xlane.xlu0 %1519 }
 0xabf   :  { %7724 = vrsqrt.f32 %v1536_v50  ;;  %v1537_v15 = vadd.f32 1e-05, %v1529_v17  ;;  %v1530_v23 = vmul.f32 0.03125, %v1520_v18 }
 0xac0   :  { %v1523_v24 = vpop.xlane.xlu1 %1522 }
 0xac1   :  { %7726 = vrsqrt.f32 %v1537_v15  ;;  %v1538_v61 = vadd.f32 1e-05, %v1530_v23  ;;  %v1531_v20 = vmul.f32 0.03125, %v1523_v24 }
 0xac3   :  { %7728 = vrsqrt.f32 %v1538_v61  ;;  %v1539_v30 = vadd.f32 1e-05, %v1531_v20 }
 0xac5   :  { %7730 = vrsqrt.f32 %v1539_v30 }
 0xac9   :  { %v7725_v32 = vpop.eup %7724 }
 0xaca   :  { %v1552_v33 = vmul.f32 %v7725_v32, %v8584_v10 }
 0xacb   :  { %v7727_v34 = vpop.eup %7726 }
 0xacc   :  { %v1553_v36 = vmul.f32 %v7727_v34, %v8587_v11  ;;  %v1564_v40 = vmul.f32 %v6540_v54, %v1552_v33  ;;  %v7508_v11 = vld [vmem:[%s9669_s0 + $0x30] sm:$0xff]  }
 0xacd   :  { %v7729_v28 = vpop.eup %7728  ;;  %7107 = vmatprep.subr.bf16.mxu0 %v7508_v11 }
 0xace   :  { %v1565_v42 = vmul.f32 %v6540_v54, %v1553_v36  ;;  %v1554_v13 = vmul.f32 %v7729_v28, %v8592_v19  ;;  %v1576_v44 = vadd.f32 %v6541_v56, %v1564_v40  ;;  %7108 = vmatpush3.bf16.msra.mxu0 %v7508_v11  ;;  %v7509_v19 = vld [vmem:[%s9669_s0 + $0x38] sm:$0xff]  }
 0xacf   :  { %v7731_v3 = vpop.eup %7730  ;;  %7109 = vmatprep.subr.bf16.mxu0 %v7509_v19 }
 0xad0   :  { %v1577_v21 = vadd.f32 %v6541_v56, %v1565_v42  ;;  %v1555_v45 = vmul.f32 %v7731_v3, %v8598_v27  ;;  %v1566_v47 = vmul.f32 %v6540_v54, %v1554_v13  ;;  %v7510_v27 = vld [vmem:[%s9669_s0 + $0x40] sm:$0xff]  }
 0xad2   :  { %v1582_v51 = vpack.c.bf16 %v1577_v21, %v1576_v44  ;;  %v1567_v12 = vmul.f32 %v6540_v54, %v1555_v45  ;;  %v1578_v53 = vadd.f32 %v6541_v56, %v1566_v47  ;;  %7110 = vmatpush3.bf16.msra.mxu0 %v7509_v19  ;;  %v7511_v54 = vld [vmem:[%s9669_s0 + $0x48] sm:$0xff]  }
 0xad3   :  { %7111 = vmatprep.subr.bf16.mxu0 %v7510_v27 }
 0xad4   :  { %7103 = vmatprep.mubr.msk.bf16.mxu1 %vm67_vm0, %v1582_v51  ;;  %v1579_v10 = vadd.f32 %v6541_v56, %v1567_v12  ;;  %v6542_v56 = vld [vmem:[%s9671_s2 + $0x88] ss:$0 sm:$0xff] }
 0xad6   :  { %v1583_v57 = vpack.c.bf16 %v1579_v10, %v1578_v53  ;;  %7112 = vmatpush3.bf16.msra.mxu0 %v7510_v27 }
 0xad7   :  { %7113 = vmatprep.subr.bf16.mxu0 %v7511_v54 }
 0xad8   :  { %7104 = vmatmul.mubr.msk.bf16.gmra.mrb[44].mxu1 %vm67_vm0, %v1583_v57 }
 0xada   :  { %7114 = vmatpush3.bf16.msra.mxu0 %v7511_v54 }
 0xadb   :  { %7115 = vmatprep.subr.bf16.mxu0 %v7512_v49 }
 0xade   :  { %7116 = vmatpush3.bf16.msra.mxu0 %v7512_v49 }
 0xadf   :  { %7117 = vmatprep.subr.bf16.mxu0 %v7513_v46 }
 0xae2   :  { %7118 = vmatpush3.bf16.msra.mxu0 %v7513_v46 }
 0xae3   :  { %7119 = vmatprep.subr.bf16.mxu0 %v7514_v60 }
 0xae6   :  { %7120 = vmatpush3.bf16.msra.mxu0 %v7514_v60 }
 0xae7   :  { %7121 = vmatprep.subr.bf16.mxu0 %v7515_v59 }
 0xaea   :  { %7122 = vmatpush3.bf16.msra.mxu0 %v7515_v59 }
 0xaeb   :  { %7155 = vmatprep.subr.bf16.mxu0 %v8057_v48 }
 0xb71   :  { %v7101_v62 = vpop.f32.mrb[40].mxu1 }
 0xb72   :  { %v1660_v63 = vadd.f32 %v7101_v62, %v6542_v56  ;;  %v1651_v39 = vpop.f32.mrb[41].mxu1 }
 0xb73   :  { %v1652_v52 = vadd.f32 %v6542_v56, %v1651_v39  ;;  %v7102_v29 = vpop.f32.mrb[42].mxu1 }
 0xb74   :  { %v6551_v58 = vmul.f32 -1.702, %v1660_v63  ;;  %v1663_v1 = vadd.f32 %v7102_v29, %v6542_v56  ;;  %v1654_v0 = vpop.f32.mrb[43].mxu1 }
 0xb75   :  { %v6549_v38 = vmul.f32 -1.702, %v1652_v52  ;;  %v1655_v55 = vadd.f32 %v6542_v56, %v1654_v0 }
 0xb76   :  { %v1702_v4 = vmul.f32 1.442695, %v6551_v58  ;;  %v6552_v6 = vmul.f32 -1.702, %v1663_v1 }
 0xb77   :  { %v1698_v5 = vmul.f32 1.442695, %v6549_v38  ;;  %v6550_v8 = vmul.f32 -1.702, %v1655_v55 }
 0xb78   :  { %7732 = vpow2.f32 %v1702_v4  ;;  %v1704_v14 = vmul.f32 1.442695, %v6552_v6 }
 0xb79   :  { %7734 = vpow2.f32 %v1698_v5  ;;  %v1700_v50 = vmul.f32 1.442695, %v6550_v8 }
 0xb7a   :  { %7736 = vpow2.f32 %v1704_v14 }
 0xb7b   :  { %7738 = vpow2.f32 %v1700_v50 }
 0xb82   :  { %v7733_v17 = vpop.eup %7732 }
 0xb83   :  { %v7735_v18 = vpop.eup %7734  ;;  %v1716_v15 = vadd.f32 1.0, %v7733_v17 }
 0xb84   :  { %v7737_v23 = vpop.eup %7736  ;;  %v1714_v24 = vadd.f32 1.0, %v7735_v18  ;;  %v6557_v18 = vld [vmem:[%s9671_s2 + $0x90] ss:$0 sm:$0xff] }
 0xb85   :  { %v7739_v61 = vpop.eup %7738  ;;  %7740 = vrcp.f32 %v1716_v15  ;;  %v1717_v20 = vadd.f32 1.0, %v7737_v23 }
 0xb86   :  { %7742 = vrcp.f32 %v1714_v24  ;;  %v1715_v30 = vadd.f32 1.0, %v7739_v61 }
 0xb87   :  { %7744 = vrcp.f32 %v1717_v20 }
 0xb88   :  { %7746 = vrcp.f32 %v1715_v30  ;;  %v8066_v30 = vmov 1.0  }
 0xb8f   :  { %v7741_v32 = vpop.eup %7740 }
 0xb90   :  { %v7743_v33 = vpop.eup %7742  ;;  %v1740_v40 = vmul.f32 %v7741_v32, %v1660_v63  ;;  %v8660_v32 = vsel %vm61_vm7, 0.0, %v8066_v30 }
 0xb91   :  { %v7745_v34 = vpop.eup %7744  ;;  %v1738_v42 = vmul.f32 %v7743_v33, %v1652_v52 }
 0xb92   :  { %v7747_v36 = vpop.eup %7746  ;;  %v1741_v28 = vmul.f32 %v7745_v34, %v1663_v1 }
 0xb93   :  { %v1739_v13 = vmul.f32 %v7747_v36, %v1655_v55 }
 0xb94   :  { %v1747_v3 = vpack.c.bf16 %v1741_v28, %v1740_v40 }
 0xb95   :  { %v1746_v44 = vpack.c.bf16 %v1739_v13, %v1738_v42  ;;  %v1901_v42 = vld [vmem:[%s9671_s2 + $0x50] sm:$0xff]  ;;  %v1900_v13 = vld [vmem:[%s9671_s2 + $0x48] sm:$0xff] }
 0xb97   :  { %7123 = vmatprep.mubr.bf16.mxu0 %v1746_v44 }
 0xb98   :  { %7124 = vmatmul.mubr.bf16.vlgmr.msra.gmra.mrb[40].mxu0 %v1747_v3 }
 0xbab   :  { %v7105_v21 = vpop.f32.mrb[44].mxu1 }
 0xbac   :  { %v1676_v45 = vadd.f32 %v7105_v21, %v6542_v56  ;;  %v1667_v47 = vpop.f32.mrb[45].mxu1 }
 0xbad   :  { %v1668_v51 = vadd.f32 %v6542_v56, %v1667_v47  ;;  %v7106_v12 = vpop.f32.mrb[46].mxu1 }
 0xbae   :  { %v6555_v53 = vmul.f32 -1.702, %v1676_v45  ;;  %v1679_v10 = vadd.f32 %v7106_v12, %v6542_v56  ;;  %v1670_v57 = vpop.f32.mrb[47].mxu1 }
 0xbaf   :  { %v6553_v11 = vmul.f32 -1.702, %v1668_v51  ;;  %v1671_v19 = vadd.f32 %v6542_v56, %v1670_v57 }
 0xbb0   :  { %v1710_v27 = vmul.f32 1.442695, %v6555_v53  ;;  %v6556_v54 = vmul.f32 -1.702, %v1679_v10 }
 0xbb1   :  { %v1706_v49 = vmul.f32 1.442695, %v6553_v11  ;;  %v6554_v46 = vmul.f32 -1.702, %v1671_v19 }
 0xbb2   :  { %7748 = vpow2.f32 %v1710_v27  ;;  %v1712_v60 = vmul.f32 1.442695, %v6556_v54 }
 0xbb3   :  { %7750 = vpow2.f32 %v1706_v49  ;;  %v1708_v59 = vmul.f32 1.442695, %v6554_v46 }
 0xbb4   :  { %7752 = vpow2.f32 %v1712_v60 }
 0xbb5   :  { %7754 = vpow2.f32 %v1708_v59 }
 0xbbc   :  { %v7749_v62 = vpop.eup %7748 }
 0xbbd   :  { %v7751_v63 = vpop.eup %7750  ;;  %v1720_v39 = vadd.f32 1.0, %v7749_v62 }
 0xbbe   :  { %v7753_v52 = vpop.eup %7752  ;;  %v1718_v29 = vadd.f32 1.0, %v7751_v63 }
 0xbbf   :  { %v7755_v58 = vpop.eup %7754  ;;  %7756 = vrcp.f32 %v1720_v39  ;;  %v1721_v1 = vadd.f32 1.0, %v7753_v52 }
 0xbc0   :  { %7758 = vrcp.f32 %v1718_v29  ;;  %v1719_v56 = vadd.f32 1.0, %v7755_v58 }
 0xbc1   :  { %7760 = vrcp.f32 %v1721_v1 }
 0xbc2   :  { %7762 = vrcp.f32 %v1719_v56 }
 0xbc9   :  { %v7757_v0 = vpop.eup %7756 }
 0xbca   :  { %v7759_v38 = vpop.eup %7758  ;;  %v1744_v6 = vmul.f32 %v7757_v0, %v1676_v45 }
 0xbcb   :  { %v7761_v55 = vpop.eup %7760  ;;  %v1742_v8 = vmul.f32 %v7759_v38, %v1668_v51 }
 0xbcc   :  { %v7763_v4 = vpop.eup %7762  ;;  %v1745_v5 = vmul.f32 %v7761_v55, %v1679_v10 }
 0xbcd   :  { %v1743_v14 = vmul.f32 %v7763_v4, %v1671_v19 }
 0xbce   :  { %v1749_v50 = vpack.c.bf16 %v1745_v5, %v1744_v6 }
 0xbcf   :  { %v1748_v17 = vpack.c.bf16 %v1743_v14, %v1742_v8 }
 0xbd1   :  { %7127 = vmatprep.mubr.bf16.mxu0 %v1748_v17 }
 0xbd2   :  { %7128 = vmatmul.mubr.bf16.gmra.mrb[44].mxu0 %v1749_v50 }
 0xbd3   :  { %7157 = vmatprep.mubr.msk.bf16.mxu0 %vm8058_vm1, %v8057_v48 }
 0xc6b   :  { %v7125_v15 = vpop.f32.mrb[40].mxu0 }
 0xc6c   :  { %v1862_v23 = vadd.f32 %v7125_v15, %v6557_v18  ;;  %v1853_v24 = vpop.f32.mrb[41].mxu0 }
 0xc6d   :  { %v1854_v61 = vadd.f32 %v6557_v18, %v1853_v24  ;;  %v7126_v20 = vpop.f32.mrb[42].mxu0 }
 0xc6e   :  { %v1886_v33 = vadd.f32 %v1862_v23, %v8505_v9  ;;  %v1865_v34 = vadd.f32 %v7126_v20, %v6557_v18  ;;  %v1856_v36 = vpop.f32.mrb[43].mxu0 }
 0xc6f   :  { %v1884_v40 = vadd.f32 %v1854_v61, %v8500_v7  ;;  %v1857_v28 = vadd.f32 %v6557_v18, %v1856_v36 }
 0xc70   :  { %v1894_v3 = vmul.f32 %v1886_v33, %v8660_v32  ;;  %v1887_v21 = vadd.f32 %v1865_v34, %v8519_v22 }
 0xc71   :  { %v1892_v44 = vmul.f32 %v1884_v40, %v8660_v32  ;;  %v1885_v9 = vadd.f32 %v1857_v28, %v8510_v16  ;;  %v7516_v40 = vld [vmem:[%s9669_s0 + $0x70] sm:$0xff]   ;;  %v7517_v28 = vld [vmem:[%s9669_s0 + $0x78] sm:$0xff]  }
 0xc72   :  { %v8678_v47 = vadd.f32 %v1901_v42, %v1887_v21  ;;  %v8684_v53 = vadd.f32 %v1900_v13, %v1894_v3  ;;  %7131 = vmatprep.subr.bf16.mxu1 %v7516_v40 }
 0xc73   :  { %v8674_v45 = vadd.f32 %v1901_v42, %v1885_v9  ;;  %v8676_v7 = vadd.f32 %v1900_v13, %v1892_v44  ;;  %7132 = vmatpush3.bf16.msra.mxu1 %v7516_v40 }
 0xc74   :  { %v1921_v22 = vsel %vm67_vm0, %v8678_v47, 0.0  ;;  %v1918_v16 = vsel %vm67_vm0, %v8684_v53, 0.0  ;;  %7133 = vmatprep.subr.bf16.mxu1 %v7517_v28 }
 0xc75   :  { %v1915_v51 = vsel %vm67_vm0, %v8674_v45, 0.0  ;;  %v1912_v12 = vsel %vm67_vm0, %v8676_v7, 0.0 }
 0xc76   :  { %1916 = vadd.xlane.f32.xlu1 %v1915_v51  ;;  %1913 = vadd.xlane.f32.xlu0 %v1912_v12 }
 0xc77   :  { %7134 = vmatpush3.bf16.msra.mxu1 %v7517_v28 }
 0xc78   :  { %7143 = vmatprep.subr.bf16.mxu1 %v8057_v48 }
 0xc7a   :  { %1922 = vadd.xlane.f32.xlu1 %v1921_v22  ;;  %1919 = vadd.xlane.f32.xlu0 %v1918_v16 }
 0xca5   :  { %v7129_v10 = vpop.f32.mrb[44].mxu0 }
 0xca6   :  { %v1878_v57 = vadd.f32 %v7129_v10, %v6557_v18  ;;  %v1869_v11 = vpop.f32.mrb[45].mxu0 }
 0xca7   :  { %v1870_v19 = vadd.f32 %v6557_v18, %v1869_v11  ;;  %v7130_v27 = vpop.f32.mrb[46].mxu0 }
 0xca8   :  { %v1890_v54 = vadd.f32 %v1878_v57, %v8533_v41  ;;  %v1881_v49 = vadd.f32 %v7130_v27, %v6557_v18  ;;  %v1872_v46 = vpop.f32.mrb[47].mxu0 }
 0xca9   :  { %v1888_v60 = vadd.f32 %v1870_v19, %v8528_v37  ;;  %v1873_v59 = vadd.f32 %v6557_v18, %v1872_v46 }
 0xcaa   :  { %v1898_v62 = vmul.f32 %v1890_v54, %v8660_v32  ;;  %v1891_v39 = vadd.f32 %v1881_v49, %v8545_v43 }
 0xcab   :  { %v1896_v63 = vmul.f32 %v1888_v60, %v8660_v32  ;;  %v1889_v52 = vadd.f32 %v1873_v59, %v8538_v2 }
 0xcac   :  { %v8700_v1 = vadd.f32 %v1901_v42, %v1891_v39  ;;  %v8706_v56 = vadd.f32 %v1900_v13, %v1898_v62 }
 0xcad   :  { %v8696_v29 = vadd.f32 %v1901_v42, %v1889_v52  ;;  %v8698_v58 = vadd.f32 %v1900_v13, %v1896_v63 }
 0xcae   :  { %v1933_v43 = vsel %vm67_vm0, %v8700_v1, 0.0  ;;  %v1930_v2 = vsel %vm67_vm0, %v8706_v56, 0.0 }
 0xcaf   :  { %v1927_v41 = vsel %vm67_vm0, %v8696_v29, 0.0  ;;  %v1924_v37 = vsel %vm67_vm0, %v8698_v58, 0.0 }
 0xcb0   :  { %1928 = vadd.xlane.f32.xlu1 %v1927_v41  ;;  %1925 = vadd.xlane.f32.xlu0 %v1924_v37 }
 0xcb4   :  { %1934 = vadd.xlane.f32.xlu1 %v1933_v43  ;;  %1931 = vadd.xlane.f32.xlu0 %v1930_v2 }
 0xd03   :  { %v1917_v0 = vpop.xlane.xlu1 %1916  ;;  %v1914_v38 = vpop.xlane.xlu0 %1913 }
 0xd04   :  { %v1937_v55 = vmul.f32 0.03125, %v1917_v0  ;;  %v1936_v4 = vmul.f32 0.03125, %v1914_v38 }
 0xd06   :  { %v8713_v6 = vsub.f32 %v8674_v45, %v1937_v55  ;;  %v8716_v5 = vsub.f32 %v8676_v7, %v1936_v4 }
 0xd07   :  { %v1923_v8 = vpop.xlane.xlu1 %1922  ;;  %v1920_v14 = vpop.xlane.xlu0 %1919 }
 0xd08   :  { %v1939_v50 = vmul.f32 0.03125, %v1923_v8  ;;  %v1938_v17 = vmul.f32 0.03125, %v1920_v14  ;;  %v1953_v18 = vmul.f32 %v8713_v6, %v8713_v6  ;;  %v1952_v15 = vmul.f32 %v8716_v5, %v8716_v5  ;;  %v6566_v14 = vld [vmem:[%s9671_s2 + $0x98] ss:$0 sm:$0xff] }
 0xd0a   :  { %v8723_v23 = vsub.f32 %v8678_v47, %v1939_v50  ;;  %v8726_v24 = vsub.f32 %v8684_v53, %v1938_v17  ;;  %v1963_v61 = vsel %vm67_vm0, %v1953_v18, 0.0  ;;  %v1960_v20 = vsel %vm67_vm0, %v1952_v15, 0.0  ;;  %v6567_v18 = vld [vmem:[%s9671_s2 + $0xa0] ss:$0 sm:$0xff] }
 0xd0b   :  { %1964 = vadd.xlane.f32.xlu1 %v1963_v61  ;;  %1961 = vadd.xlane.f32.xlu0 %v1960_v20 }
 0xd0c   :  { %v1955_v30 = vmul.f32 %v8723_v23, %v8723_v23  ;;  %v1954_v33 = vmul.f32 %v8726_v24, %v8726_v24 }
 0xd0e   :  { %v1969_v34 = vsel %vm67_vm0, %v1955_v30, 0.0  ;;  %v1966_v36 = vsel %vm67_vm0, %v1954_v33, 0.0 }
 0xd0f   :  { %1970 = vadd.xlane.f32.xlu1 %v1969_v34  ;;  %1967 = vadd.xlane.f32.xlu0 %v1966_v36 }
 0xd3d   :  { %v1929_v42 = vpop.xlane.xlu1 %1928  ;;  %v1926_v13 = vpop.xlane.xlu0 %1925 }
 0xd3e   :  { %v1941_v3 = vmul.f32 0.03125, %v1929_v42  ;;  %v1940_v44 = vmul.f32 0.03125, %v1926_v13 }
 0xd40   :  { %v8744_v21 = vsub.f32 %v8696_v29, %v1941_v3  ;;  %v8747_v9 = vsub.f32 %v8698_v58, %v1940_v44 }
 0xd41   :  { %v1935_v51 = vpop.xlane.xlu1 %1934  ;;  %v1932_v12 = vpop.xlane.xlu0 %1931 }
 0xd42   :  { %v1943_v22 = vmul.f32 0.03125, %v1935_v51  ;;  %v1942_v16 = vmul.f32 0.03125, %v1932_v12  ;;  %v1957_v10 = vmul.f32 %v8744_v21, %v8744_v21  ;;  %v1956_v57 = vmul.f32 %v8747_v9, %v8747_v9 }
 0xd44   :  { %v8754_v11 = vsub.f32 %v8700_v1, %v1943_v22  ;;  %v8757_v19 = vsub.f32 %v8706_v56, %v1942_v16  ;;  %v1975_v27 = vsel %vm67_vm0, %v1957_v10, 0.0  ;;  %v1972_v54 = vsel %vm67_vm0, %v1956_v57, 0.0 }
 0xd45   :  { %1976 = vadd.xlane.f32.xlu1 %v1975_v27  ;;  %1973 = vadd.xlane.f32.xlu0 %v1972_v54 }
 0xd46   :  { %v1959_v49 = vmul.f32 %v8754_v11, %v8754_v11  ;;  %v1958_v46 = vmul.f32 %v8757_v19, %v8757_v19 }
 0xd48   :  { %v1981_v60 = vsel %vm67_vm0, %v1959_v49, 0.0  ;;  %v1978_v59 = vsel %vm67_vm0, %v1958_v46, 0.0 }
 0xd49   :  { %1982 = vadd.xlane.f32.xlu1 %v1981_v60  ;;  %1979 = vadd.xlane.f32.xlu0 %v1978_v59 }
 0xd98   :  { %v1965_v62 = vpop.xlane.xlu1 %1964  ;;  %v1962_v63 = vpop.xlane.xlu0 %1961 }
 0xd99   :  { %v1985_v39 = vmul.f32 0.03125, %v1965_v62  ;;  %v1984_v52 = vmul.f32 0.03125, %v1962_v63 }
 0xd9b   :  { %v1993_v41 = vadd.f32 1e-05, %v1985_v39  ;;  %v1992_v37 = vadd.f32 1e-05, %v1984_v52 }
 0xd9c   :  { %v1971_v43 = vpop.xlane.xlu1 %1970  ;;  %v1968_v2 = vpop.xlane.xlu0 %1967 }
 0xd9d   :  { %7764 = vrsqrt.f32 %v1993_v41  ;;  %v1987_v0 = vmul.f32 0.03125, %v1971_v43  ;;  %v1986_v38 = vmul.f32 0.03125, %v1968_v2 }
 0xd9e   :  { %7766 = vrsqrt.f32 %v1992_v37 }
 0xd9f   :  { %v1995_v55 = vadd.f32 1e-05, %v1987_v0  ;;  %v1994_v4 = vadd.f32 1e-05, %v1986_v38 }
 0xda1   :  { %7768 = vrsqrt.f32 %v1995_v55 }
 0xda2   :  { %7770 = vrsqrt.f32 %v1994_v4 }
 0xda7   :  { %v7765_v8 = vpop.eup %7764 }
 0xda8   :  { %v7767_v50 = vpop.eup %7766  ;;  %v2009_v17 = vmul.f32 %v7765_v8, %v8713_v6 }
 0xda9   :  { %v2008_v15 = vmul.f32 %v7767_v50, %v8716_v5 }
 0xdaa   :  { %v2021_v61 = vmul.f32 %v6566_v14, %v2009_v17 }
 0xdab   :  { %v7769_v20 = vpop.eup %7768  ;;  %v2020_v30 = vmul.f32 %v6566_v14, %v2008_v15 }
 0xdac   :  { %v7771_v33 = vpop.eup %7770  ;;  %v2011_v34 = vmul.f32 %v7769_v20, %v8723_v23  ;;  %v2033_v36 = vadd.f32 %v6567_v18, %v2021_v61 }
 0xdad   :  { %v2010_v40 = vmul.f32 %v7771_v33, %v8726_v24  ;;  %v2032_v28 = vadd.f32 %v6567_v18, %v2020_v30 }
 0xdae   :  { %v2023_v42 = vmul.f32 %v6566_v14, %v2011_v34 }
 0xdaf   :  { %v2022_v13 = vmul.f32 %v6566_v14, %v2010_v40  ;;  %v2040_v3 = vpack.c.bf16 %v2033_v36, %v2032_v28 }
 0xdb0   :  { %v2035_v6 = vadd.f32 %v6567_v18, %v2023_v42 }
 0xdb1   :  { %v2034_v44 = vadd.f32 %v6567_v18, %v2022_v13  ;;  %7135 = vmatprep.mubr.msk.bf16.mxu1 %vm67_vm0, %v2040_v3 }
 0xdb3   :  { %v2041_v51 = vpack.c.bf16 %v2035_v6, %v2034_v44 }
 0xdb5   :  { %7136 = vmatmul.mubr.msk.bf16.vlgmr.msra.gmra.mrb[48].mxu1 %vm67_vm0, %v2041_v51 }
 0xdd2   :  { %v1977_v5 = vpop.xlane.xlu1 %1976  ;;  %v1974_v12 = vpop.xlane.xlu0 %1973 }
 0xdd3   :  { %v1989_v22 = vmul.f32 0.03125, %v1977_v5  ;;  %v1988_v16 = vmul.f32 0.03125, %v1974_v12 }
 0xdd5   :  { %v1997_v10 = vadd.f32 1e-05, %v1989_v22  ;;  %v1996_v23 = vadd.f32 1e-05, %v1988_v16 }
 0xdd6   :  { %v1983_v57 = vpop.xlane.xlu1 %1982  ;;  %v1980_v27 = vpop.xlane.xlu0 %1979 }
 0xdd7   :  { %7772 = vrsqrt.f32 %v1997_v10  ;;  %v1991_v24 = vmul.f32 0.03125, %v1983_v57  ;;  %v1990_v54 = vmul.f32 0.03125, %v1980_v27 }
 0xdd8   :  { %7774 = vrsqrt.f32 %v1996_v23 }
 0xdd9   :  { %v1999_v49 = vadd.f32 1e-05, %v1991_v24  ;;  %v1998_v46 = vadd.f32 1e-05, %v1990_v54 }
 0xddb   :  { %7776 = vrsqrt.f32 %v1999_v49 }
 0xddc   :  { %7778 = vrsqrt.f32 %v1998_v46 }
 0xde1   :  { %v7773_v60 = vpop.eup %7772 }
 0xde2   :  { %v7775_v59 = vpop.eup %7774  ;;  %v2013_v62 = vmul.f32 %v7773_v60, %v8744_v21 }
 0xde3   :  { %v2012_v63 = vmul.f32 %v7775_v59, %v8747_v9 }
 0xde4   :  { %v2025_v39 = vmul.f32 %v6566_v14, %v2013_v62 }
 0xde5   :  { %v7777_v52 = vpop.eup %7776  ;;  %v2024_v41 = vmul.f32 %v6566_v14, %v2012_v63 }
 0xde6   :  { %v7779_v37 = vpop.eup %7778  ;;  %v2037_v43 = vadd.f32 %v6567_v18, %v2025_v39  ;;  %v2015_v2 = vmul.f32 %v7777_v52, %v8754_v11  ;;  %v6568_v11 = vld [vmem:[%s9671_s2 + $0xa8] ss:$0 sm:$0xff] }
 0xde7   :  { %v2036_v0 = vadd.f32 %v6567_v18, %v2024_v41  ;;  %v2014_v38 = vmul.f32 %v7779_v37, %v8757_v19 }
 0xde8   :  { %v2027_v55 = vmul.f32 %v6566_v14, %v2015_v2 }
 0xde9   :  { %v2042_v4 = vpack.c.bf16 %v2037_v43, %v2036_v0  ;;  %v2026_v8 = vmul.f32 %v6566_v14, %v2014_v38 }
 0xdea   :  { %v2039_v50 = vadd.f32 %v6567_v18, %v2027_v55 }
 0xdeb   :  { %7139 = vmatprep.mubr.msk.bf16.mxu1 %vm67_vm0, %v2042_v4  ;;  %v2038_v17 = vadd.f32 %v6567_v18, %v2026_v8 }
 0xded   :  { %v2043_v21 = vpack.c.bf16 %v2039_v50, %v2038_v17 }
 0xdef   :  { %7140 = vmatmul.mubr.msk.bf16.gmra.mrb[52].mxu1 %vm67_vm0, %v2043_v21 }
 0xdf0   :  { %7145 = vmatprep.mubr.msk.bf16.mxu1 %vm8058_vm1, %v8057_v48 }
 0xe88   :  { %v7137_v9 = vpop.f32.mrb[48].mxu1 }
 0xe89   :  { %v2111_v15 = vpop.f32.mrb[49].mxu1  ;;  %v2120_v61 = vadd.f32 %v7137_v9, %v6568_v11 }
 0xe8a   :  { %v7138_v19 = vpop.f32.mrb[50].mxu1  ;;  %v2112_v30 = vadd.f32 %v6568_v11, %v2111_v15 }
 0xe8b   :  { %v2123_v20 = vadd.f32 %v7138_v19, %v6568_v11  ;;  %v2114_v14 = vpop.f32.mrb[51].mxu1 }
 0xe8c   :  { %v2115_v33 = vadd.f32 %v6568_v11, %v2114_v14 }
 0xe8d   :  { %v8790_v34 = vpack.c.bf16 %v2123_v20, %v2120_v61 }
 0xe8e   :  { %v8792_v18 = vpack.c.bf16 %v2115_v33, %v2112_v30 }
 0xe8f   :  { %2197 = vrot.lane.b32.xlu1 %v8790_v34, %s8059_s12 }
 0xe90   :  { %2147 = vrot.lane.b32.xlu0 %v8792_v18, %s8059_s12 }
 0xec2   :  { %v7141_v36 = vpop.f32.mrb[52].mxu1 }
 0xec3   :  { %v2127_v40 = vpop.f32.mrb[53].mxu1  ;;  %v2136_v42 = vadd.f32 %v7141_v36, %v6568_v11 }
 0xec4   :  { %v7142_v28 = vpop.f32.mrb[54].mxu1  ;;  %v2128_v6 = vadd.f32 %v6568_v11, %v2127_v40 }
 0xec5   :  { %v2139_v13 = vadd.f32 %v7142_v28, %v6568_v11  ;;  %v2130_v3 = vpop.f32.mrb[55].mxu1 }
 0xec6   :  { %v2131_v44 = vadd.f32 %v6568_v11, %v2130_v3 }
 0xec7   :  { %v8798_v51 = vpack.c.bf16 %v2139_v13, %v2136_v42 }
 0xec8   :  { %v8800_v5 = vpack.c.bf16 %v2131_v44, %v2128_v6 }
 0xeca   :  { %2247 = vrot.lane.b32.xlu1 %v8800_v5, %s8059_s12 }
 0xece   :  { %2297 = vrot.lane.b32.xlu1 %v8798_v51, %s8059_s12 }
 0xf01   :  { %v2198_v16 = vpop.permute.xlu1 %2197 }
 0xf02   :  { %v2148_v12 = vpop.permute.xlu0 %2147  ;;  %v2203_v10 = vsel %vm306_vm2, %v2198_v16, 0 }
 0xf03   :  { %v2153_v22 = vsel %vm306_vm2, %v2148_v12, 0 }
 0xf04   :  { %7144 = vmatpush3.bf16.xpose.msra.mxu1 %v2153_v22 }
 0xf05   :  { %7149 = vmatprep.subr.bf16.mxu1 %v8057_v48 }
 0xf0b   :  { %7146 = vmatmul.mubr.msk.bf16.vlgmr.msra.gmra.mrb[56].mxu1 %vm306_vm2, %v8792_v18 }
 0xf0c   :  { %7150 = vmatpush3.bf16.xpose.msra.mxu1 %v2203_v10  ;;  %7151 = vmatprep.mubr.msk.bf16.mxu1 %vm8058_vm1, %v8057_v48 }
 0xf0d   :  { %7161 = vmatprep.subr.bf16.mxu1 %v8057_v48 }
 0xf13   :  { %7152 = vmatmul.mubr.msk.bf16.vlgmr.msra.gmra.mrb[60].mxu1 %vm306_vm2, %v8790_v34 }
 0xf14   :  { %7163 = vmatprep.mubr.msk.bf16.mxu1 %vm8058_vm1, %v8057_v48 }
 0xf3c   :  { %v2248_v23 = vpop.permute.xlu1 %2247 }
 0xf3d   :  { %v2253_v57 = vsel %vm306_vm2, %v2248_v23, 0 }
 0xf3e   :  { %7156 = vmatpush3.bf16.xpose.msra.mxu0 %v2253_v57 }
 0xf3f   :  { %7167 = vmatprep.subr.bf16.mxu0 %v8057_v48 }
 0xf40   :  { %v2298_v27 = vpop.permute.xlu1 %2297 }
 0xf41   :  { %v2303_v24 = vsel %vm306_vm2, %v2298_v27, 0 }
 0xf42   :  { %7162 = vmatpush3.bf16.xpose.msra.mxu1 %v2303_v24 }
 0xf43   :  { %7173 = vmatprep.subr.bf16.mxu1 %v8057_v48 }
 0xf45   :  { %7158 = vmatmul.mubr.msk.bf16.vlgmr.msra.gmra.mrb[48].mxu0 %vm306_vm2, %v8800_v5 }
 0xf46   :  { %7169 = vmatprep.mubr.msk.bf16.mxu0 %vm8058_vm1, %v8057_v48 }
 0xf49   :  { %7164 = vmatmul.mubr.msk.bf16.vlgmr.msra.gmra.mrb[64].mxu1 %vm306_vm2, %v8798_v51 }
 0xf4a   :  { %7175 = vmatprep.mubr.msk.bf16.mxu1 %vm8058_vm1, %v8057_v48 }
 0xfde   :  { %v2189_v54 = vpop.f32.mrb[56].mxu1 }
 0xfdf   :  { %v2346_v49 = vmul.f32 0.25, %v2189_v54  ;;  %v7147_v46 = vpop.f32.mrb[57].mxu1 }
 0xfe0   :  { %v2192_v60 = vpop.f32.mrb[58].mxu1 }
 0xfe1   :  { %v2354_v59 = vadd.f32 %v2346_v49, %v8270_v31  ;;  %v2347_v62 = vmul.f32 0.25, %v2192_v60  ;;  %v7148_v63 = vpop.f32.mrb[59].mxu1 }
 0xfe3   :  { %v2355_v39 = vadd.f32 %v2347_v62, %v8272_v35  ;;  %v2362_v52 = vsel %vm306_vm2, %v2354_v59, -inf }
 0xfe4   :  { %2363 = vmax.xlane.f32.xlu0 %v2362_v52 }
 0xfe5   :  { %v2365_v41 = vsel %vm306_vm2, %v2355_v39, -inf }
 0xfe6   :  { %2366 = vmax.xlane.f32.xlu1 %v2365_v41  ;;  %v2239_v37 = vpop.f32.mrb[60].mxu1 }
 0xfe7   :  { %v2348_v43 = vmul.f32 0.25, %v2239_v37  ;;  %v7153_v2 = vpop.f32.mrb[61].mxu1 }
 0xfe8   :  { %v2242_v0 = vpop.f32.mrb[62].mxu1 }
 0xfe9   :  { %v2356_v38 = vadd.f32 %v2348_v43, %v8270_v31  ;;  %v2349_v55 = vmul.f32 0.25, %v2242_v0  ;;  %v7154_v4 = vpop.f32.mrb[63].mxu1 }
 0xfeb   :  { %v2357_v8 = vadd.f32 %v2349_v55, %v8272_v35  ;;  %v2368_v50 = vsel %vm306_vm2, %v2356_v38, -inf }
 0xfec   :  { %2369 = vmax.xlane.f32.xlu0 %v2368_v50 }
 0xfed   :  { %v2371_v17 = vsel %vm306_vm2, %v2357_v8, -inf }
 0xff0   :  { %2372 = vmax.xlane.f32.xlu0 %v2371_v17 }
0x1018   :  { %v2289_v21 = vpop.f32.mrb[48].mxu0 }
0x1019   :  { %v2350_v9 = vmul.f32 0.25, %v2289_v21  ;;  %v7159_v11 = vpop.f32.mrb[49].mxu0 }
0x101a   :  { %v2292_v15 = vpop.f32.mrb[50].mxu0 }
0x101b   :  { %v2358_v19 = vadd.f32 %v2350_v9, %v8270_v31  ;;  %v2351_v61 = vmul.f32 0.25, %v2292_v15  ;;  %v7160_v20 = vpop.f32.mrb[51].mxu0 }
0x101c   :  { %v2339_v14 = vpop.f32.mrb[64].mxu1 }
0x101d   :  { %v2359_v30 = vadd.f32 %v2351_v61, %v8272_v35  ;;  %v2352_v33 = vmul.f32 0.25, %v2339_v14  ;;  %v7165_v36 = vpop.f32.mrb[65].mxu1  ;;  %v2374_v40 = vsel %vm306_vm2, %v2358_v19, -inf }
0x101e   :  { %2375 = vmax.xlane.f32.xlu0 %v2374_v40  ;;  %v2342_v28 = vpop.f32.mrb[66].mxu1 }
0x101f   :  { %v2360_v42 = vadd.f32 %v2352_v33, %v8270_v31  ;;  %v7166_v13 = vpop.f32.mrb[67].mxu1  ;;  %v2377_v3 = vsel %vm306_vm2, %v2359_v30, -inf  ;;  %v2353_v44 = vmul.f32 0.25, %v2342_v28 }
0x1020   :  { %2378 = vmax.xlane.f32.xlu1 %v2377_v3 }
0x1021   :  { %v2380_v6 = vsel %vm306_vm2, %v2360_v42, -inf  ;;  %v8851_v12 = vadd.f32 %v2353_v44, %v8272_v35 }
0x1022   :  { %2381 = vmax.xlane.f32.xlu0 %v2380_v6 }
0x1023   :  { %v2383_v22 = vsel %vm306_vm2, %v8851_v12, -inf }
0x1031   :  { %2501 = vrot.lane.b32.xlu1 %v8790_v34, %s8061_s13 }
0x1035   :  { %2548 = vrot.lane.b32.xlu1 %v8800_v5, %s8061_s13 }
0x1038   :  { %2454 = vrot.lane.b32.xlu0 %v8792_v18, %s8061_s13 }
0x1059   :  { %2384 = vmax.xlane.f32.xlu1 %v2383_v22 }
0x106a   :  { %2595 = vrot.lane.b32.xlu1 %v8798_v51, %s8061_s13 }
0x1071   :  { %v2364_v16 = vpop.xlane.xlu0 %2363 }
0x1072   :  { %v2386_v10 = vsub.f32 %v2354_v59, %v2364_v16 }
0x1073   :  { %v2367_v57 = vpop.xlane.xlu1 %2366 }
0x1074   :  { %v2394_v23 = vmul.f32 1.442695, %v2386_v10  ;;  %v2387_v27 = vsub.f32 %v2355_v39, %v2367_v57 }
0x1076   :  { %7780 = vpow2.f32 %v2394_v23  ;;  %v2396_v49 = vmul.f32 1.442695, %v2387_v27 }
0x1079   :  { %v2370_v24 = vpop.xlane.xlu0 %2369 }
0x107a   :  { %v2388_v54 = vsub.f32 %v2356_v38, %v2370_v24 }
0x107c   :  { %v2398_v46 = vmul.f32 1.442695, %v2388_v54 }
0x107d   :  { %v2373_v60 = vpop.xlane.xlu0 %2372 }
0x107e   :  { %7782 = vpow2.f32 %v2398_v46  ;;  %v2389_v62 = vsub.f32 %v2357_v8, %v2373_v60 }
0x107f   :  { %7784 = vpow2.f32 %v2396_v49 }
0x1080   :  { %v8857_v63 = vpop.eup %7780  ;;  %v2400_v52 = vmul.f32 1.442695, %v2389_v62 }
0x1081   :  { %v2410_v41 = vsel %vm306_vm2, %v8857_v63, 0.0 }
0x1082   :  { %2411 = vadd.xlane.f32.xlu0 %v2410_v41  ;;  %7786 = vpow2.f32 %v2400_v52 }
0x1088   :  { %v8861_v59 = vpop.eup %7782 }
0x1089   :  { %v2416_v39 = vsel %vm306_vm2, %v8861_v59, 0.0  ;;  %v7785_v37 = vpop.eup %7784 }
0x108a   :  { %2417 = vadd.xlane.f32.xlu0 %v2416_v39  ;;  %v2413_v43 = vsel %vm306_vm2, %v7785_v37, 0.0 }
0x108c   :  { %v8866_v2 = vpop.eup %7786 }
0x108d   :  { %v2419_v0 = vsel %vm306_vm2, %v8866_v2, 0.0 }
0x108e   :  { %2414 = vadd.xlane.f32.xlu1 %v2413_v43 }
0x1092   :  { %2420 = vadd.xlane.f32.xlu1 %v2419_v0 }
0x10ab   :  { %v2376_v38 = vpop.xlane.xlu0 %2375 }
0x10ac   :  { %v2390_v55 = vsub.f32 %v2358_v19, %v2376_v38 }
0x10ad   :  { %v2379_v4 = vpop.xlane.xlu1 %2378 }
0x10ae   :  { %v2402_v8 = vmul.f32 1.442695, %v2390_v55  ;;  %v2391_v50 = vsub.f32 %v2359_v30, %v2379_v4 }
0x10af   :  { %v2382_v17 = vpop.xlane.xlu0 %2381 }
0x10b0   :  { %7788 = vpow2.f32 %v2402_v8  ;;  %v2404_v21 = vmul.f32 1.442695, %v2391_v50  ;;  %v2392_v9 = vsub.f32 %v2360_v42, %v2382_v17 }
0x10b1   :  { %v2502_v11 = vpop.permute.xlu1 %2501 }
0x10b2   :  { %7790 = vpow2.f32 %v2404_v21  ;;  %v2406_v15 = vmul.f32 1.442695, %v2392_v9  ;;  %7174 = vmatpush3.bf16.msra.mxu1 %v2502_v11 }
0x10b3   :  { %v2455_v61 = vpop.permute.xlu0 %2454  ;;  %7185 = vmatprep.subr.bf16.mxu1 %v8057_v48 }
0x10b4   :  { %7792 = vpow2.f32 %v2406_v15  ;;  %7168 = vmatpush3.bf16.msra.mxu0 %v2455_v61 }
0x10b5   :  { %7179 = vmatprep.subr.bf16.mxu0 %v8057_v48  ;;  %v2549_v40 = vpop.permute.xlu1 %2548 }
0x10ba   :  { %v7789_v20 = vpop.eup %7788 }
0x10bb   :  { %v2422_v19 = vsel %vm306_vm2, %v7789_v20, 0.0 }
0x10bc   :  { %v7791_v14 = vpop.eup %7790  ;;  %2423 = vadd.xlane.f32.xlu0 %v2422_v19 }
0x10bd   :  { %v2425_v30 = vsel %vm306_vm2, %v7791_v14, 0.0 }
0x10be   :  { %v8874_v33 = vpop.eup %7792  ;;  %2426 = vadd.xlane.f32.xlu1 %v2425_v30 }
0x10bf   :  { %v2428_v36 = vsel %vm306_vm2, %v8874_v33, 0.0 }
0x10c0   :  { %2429 = vadd.xlane.f32.xlu0 %v2428_v36 }
0x10cf   :  { %2695 = vrot.lane.b32.xlu1 %v8790_v34, %s8062_s14 }
0x10d6   :  { %2644 = vrot.lane.b32.xlu0 %v8792_v18, %s8062_s14 }
0x10da   :  { %2642 = vrot.lane.b32.xlu0 %v8792_v18, %s8063_s15 }
0x10de   :  { %2693 = vrot.lane.b32.xlu0 %v8790_v34, %s8063_s15 }
0x10e2   :  { %2744 = vrot.lane.b32.xlu0 %v8800_v5, %s8063_s15 }
0x10e6   :  { %v2385_v28 = vpop.xlane.xlu1 %2384 }
0x10e7   :  { %v2393_v42 = vsub.f32 %v8851_v12, %v2385_v28 }
0x10e9   :  { %v2408_v13 = vmul.f32 1.442695, %v2393_v42 }
0x10ea   :  { %v2596_v44 = vpop.permute.xlu1 %2595 }
0x10eb   :  { %7794 = vpow2.f32 %v2408_v13 }
0x10f5   :  { %v8889_v3 = vpop.eup %7794 }
0x10f6   :  { %v2431_v6 = vsel %vm306_vm2, %v8889_v3, 0.0 }
0x10f7   :  { %2432 = vadd.xlane.f32.xlu1 %v2431_v6 }
0x1108   :  { %2746 = vrot.lane.b32.xlu1 %v8800_v5, %s8062_s14 }
0x110c   :  { %2797 = vrot.lane.b32.xlu1 %v8798_v51, %s8062_s14 }
0x110f   :  { %v2412_v22 = vpop.xlane.xlu0 %2411 }
0x1110   :  { %2795 = vrot.lane.b32.xlu1 %v8798_v51, %s8063_s15  ;;  %7796 = vrcp.f32 %v2412_v22 }
0x1117   :  { %v2418_v12 = vpop.xlane.xlu0 %2417 }
0x111a   :  { %v7797_v23 = vpop.eup %7796 }
0x111b   :  { %v2415_v16 = vpop.xlane.xlu1 %2414  ;;  %v2442_v27 = vmul.f32 %v7797_v23, %v8857_v63 }
0x111c   :  { %7798 = vrcp.f32 %v2415_v16 }
0x111d   :  { %7800 = vrcp.f32 %v2418_v12 }
0x111f   :  { %v2421_v10 = vpop.xlane.xlu1 %2420 }
0x1120   :  { %7802 = vrcp.f32 %v2421_v10 }
0x1126   :  { %v7799_v57 = vpop.eup %7798 }
0x1127   :  { %v2443_v24 = vmul.f32 %v7799_v57, %v7785_v37  ;;  %v7801_v54 = vpop.eup %7800 }
0x1128   :  { %v2444_v60 = vmul.f32 %v7801_v54, %v8861_v59 }
0x1129   :  { %v2450_v49 = vpack.c.bf16 %v2443_v24, %v2442_v27 }
0x112a   :  { %v7803_v46 = vpop.eup %7802 }
0x112b   :  { %v2445_v62 = vmul.f32 %v7803_v46, %v8866_v2  ;;  %7170 = vmatmul.mubr.msk.bf16.vlgmr.msra.gmra.mrb[52].mxu0 %vm306_vm2, %v2450_v49 }
0x112c   :  { %7180 = vmatpush3.bf16.msra.mxu0 %v2549_v40  ;;  %7181 = vmatprep.mubr.msk.bf16.mxu0 %vm8058_vm1, %v8057_v48 }
0x112d   :  { %v2451_v52 = vpack.c.bf16 %v2445_v62, %v2444_v60  ;;  %7191 = vmatprep.subr.bf16.mxu0 %v8057_v48 }
0x112f   :  { %7176 = vmatmul.mubr.msk.bf16.vlgmr.msra.gmra.mrb[68].mxu1 %vm306_vm2, %v2451_v52 }
0x1130   :  { %7186 = vmatpush3.bf16.msra.mxu1 %v2596_v44  ;;  %7187 = vmatprep.mubr.msk.bf16.mxu1 %vm8058_vm1, %v8057_v48 }
0x1131   :  { %7197 = vmatprep.subr.bf16.mxu1 %v8057_v48 }
0x1149   :  { %v2424_v63 = vpop.xlane.xlu0 %2423 }
0x114a   :  { %7804 = vrcp.f32 %v2424_v63 }
0x114b   :  { %v2427_v41 = vpop.xlane.xlu1 %2426 }
0x114c   :  { %7806 = vrcp.f32 %v2427_v41 }
0x114d   :  { %v2430_v59 = vpop.xlane.xlu0 %2429 }
0x114e   :  { %7808 = vrcp.f32 %v2430_v59 }
0x114f   :  { %v2696_v8 = vpop.permute.xlu1 %2695 }
0x1150   :  { %v2701_v30 = vsel %vm306_vm2, %v2696_v8, 0 }
0x1151   :  { %v2645_v0 = vpop.permute.xlu0 %2644 }
0x1152   :  { %v2650_v55 = vsel %vm306_vm2, %v2645_v0, 0 }
0x1154   :  { %v7805_v39 = vpop.eup %7804 }
0x1155   :  { %v2446_v43 = vmul.f32 %v7805_v39, %v7789_v20  ;;  %v2643_v4 = vpop.permute.xlu0 %2642 }
0x1156   :  { %v7807_v37 = vpop.eup %7806 }
0x1157   :  { %v2447_v2 = vmul.f32 %v7807_v37, %v7791_v14 }
0x1158   :  { %v7809_v11 = vpop.eup %7808 }
0x1159   :  { %v2452_v38 = vpack.c.bf16 %v2447_v2, %v2446_v43  ;;  %v2694_v9 = vpop.permute.xlu0 %2693  ;;  %v2448_v61 = vmul.f32 %v7809_v11, %v8874_v33 }
0x115b   :  { %7182 = vmatmul.mubr.msk.bf16.vlgmr.msra.gmra.mrb[56].mxu0 %vm306_vm2, %v2452_v38 }
0x115c   :  { %7192 = vmatpush3.bf16.xpose.msra.mxu0 %v2650_v55  ;;  %7193 = vmatprep.mubr.msk.bf16.mxu0 %vm8058_vm1, %v8057_v48 }
0x115d   :  { %7203 = vmatprep.subr.bf16.mxu0 %v8057_v48  ;;  %v2745_v20 = vpop.permute.xlu0 %2744 }
0x1163   :  { %7194 = vmatmul.mubr.msk.bf16.vlgmr.msra.gmra.mrb[60].mxu0 %vm306_vm2, %v2643_v4 }
0x1164   :  { %7205 = vmatprep.mubr.msk.bf16.mxu0 %vm8058_vm1, %v8057_v48 }
0x1184   :  { %v2433_v50 = vpop.xlane.xlu1 %2432 }
0x1185   :  { %7810 = vrcp.f32 %v2433_v50 }
0x1188   :  { %v2747_v17 = vpop.permute.xlu1 %2746 }
0x1189   :  { %v2752_v21 = vsel %vm306_vm2, %v2747_v17, 0 }
0x118a   :  { %7204 = vmatpush3.bf16.xpose.msra.mxu0 %v2752_v21 }
0x118b   :  { %7215 = vmatprep.subr.bf16.mxu0 %v8057_v48 }
0x118c   :  { %v2798_v33 = vpop.permute.xlu1 %2797 }
0x118d   :  { %v2803_v36 = vsel %vm306_vm2, %v2798_v33, 0 }
0x118f   :  { %v7811_v15 = vpop.eup %7810 }
0x1190   :  { %v2449_v19 = vmul.f32 %v7811_v15, %v8889_v3  ;;  %v2796_v40 = vpop.permute.xlu1 %2795 }
0x1191   :  { %7206 = vmatmul.mubr.msk.bf16.vlgmr.msra.gmra.mrb[64].mxu0 %vm306_vm2, %v2745_v20 }
0x1192   :  { %v2453_v14 = vpack.c.bf16 %v2449_v19, %v2448_v61  ;;  %7217 = vmatprep.mubr.msk.bf16.mxu0 %vm8058_vm1, %v8057_v48 }
0x1194   :  { %7188 = vmatmul.mubr.msk.bf16.vlgmr.msra.gmra.mrb[72].mxu1 %vm306_vm2, %v2453_v14 }
0x1195   :  { %7198 = vmatpush3.bf16.xpose.msra.mxu1 %v2701_v30  ;;  %7199 = vmatprep.mubr.msk.bf16.mxu1 %vm8058_vm1, %v8057_v48 }
0x1196   :  { %7209 = vmatprep.subr.bf16.mxu1 %v8057_v48 }
0x119c   :  { %7200 = vmatmul.mubr.msk.bf16.vlgmr.msra.gmra.mrb[76].mxu1 %vm306_vm2, %v2694_v9 }
0x119d   :  { %7210 = vmatpush3.bf16.xpose.msra.mxu1 %v2803_v36  ;;  %7211 = vmatprep.mubr.msk.bf16.mxu1 %vm8058_vm1, %v8057_v48 }
0x119e   :  { %7221 = vmatprep.subr.bf16.mxu1 %v8057_v48 }
0x11a4   :  { %7212 = vmatmul.mubr.msk.bf16.vlgmr.msra.gmra.mrb[80].mxu1 %vm306_vm2, %v2796_v40 }
0x11a5   :  { %7223 = vmatprep.mubr.msk.bf16.mxu1 %vm8058_vm1, %v8057_v48 }
0x11fe   :  { %v8938_v28 = vpop.f32.mrb[52].mxu0 }
0x11ff   :  { %v7171_v42 = vpop.f32.mrb[53].mxu0 }
0x1200   :  { %v8940_v13 = vpop.f32.mrb[54].mxu0 }
0x1201   :  { %v7172_v3 = vpop.f32.mrb[55].mxu0 }
0x1202   :  { %v8942_v6 = vpop.f32.mrb[68].mxu1 }
0x1203   :  { %v7177_v44 = vpop.f32.mrb[69].mxu1 }
0x1204   :  { %v8944_v22 = vpop.f32.mrb[70].mxu1 }
0x1205   :  { %v7178_v12 = vpop.f32.mrb[71].mxu1 }
0x122e   :  { %v8946_v16 = vpop.f32.mrb[56].mxu0 }
0x122f   :  { %v7183_v10 = vpop.f32.mrb[57].mxu0 }
0x1230   :  { %v8948_v23 = vpop.f32.mrb[58].mxu0 }
0x1231   :  { %v7184_v57 = vpop.f32.mrb[59].mxu0 }
0x1236   :  { %v2686_v27 = vpop.f32.mrb[60].mxu0 }
0x1237   :  { %v2846_v24 = vmul.f32 0.25, %v2686_v27  ;;  %v7195_v54 = vpop.f32.mrb[61].mxu0 }
0x1238   :  { %v2689_v49 = vpop.f32.mrb[62].mxu0 }
0x1239   :  { %v2854_v46 = vadd.f32 %v2846_v24, %v8270_v31  ;;  %v2847_v60 = vmul.f32 0.25, %v2689_v49  ;;  %v7196_v62 = vpop.f32.mrb[63].mxu0 }
0x123b   :  { %v2855_v52 = vadd.f32 %v2847_v60, %v8272_v35  ;;  %v2862_v63 = vsel %vm306_vm2, %v2854_v46, -inf }
0x123c   :  { %2863 = vmax.xlane.f32.xlu0 %v2862_v63 }
0x123d   :  { %v2865_v41 = vsel %vm306_vm2, %v2855_v52, -inf }
0x123e   :  { %2866 = vmax.xlane.f32.xlu1 %v2865_v41 }
0x1264   :  { %v2788_v59 = vpop.f32.mrb[64].mxu0 }
0x1265   :  { %v7207_v39 = vpop.f32.mrb[65].mxu0  ;;  %v2850_v19 = vmul.f32 0.25, %v2788_v59 }
0x1266   :  { %v2791_v37 = vpop.f32.mrb[66].mxu0 }
0x1267   :  { %v2851_v43 = vmul.f32 0.25, %v2791_v37  ;;  %v8954_v2 = vpop.f32.mrb[72].mxu1  ;;  %v7208_v0 = vpop.f32.mrb[67].mxu0  ;;  %v2858_v36 = vadd.f32 %v2850_v19, %v8270_v31 }
0x1268   :  { %v7189_v38 = vpop.f32.mrb[73].mxu1 }
0x1269   :  { %v2859_v55 = vadd.f32 %v2851_v43, %v8272_v35  ;;  %v8957_v4 = vpop.f32.mrb[74].mxu1  ;;  %v2874_v24 = vsel %vm306_vm2, %v2858_v36, -inf }
0x126a   :  { %v7190_v8 = vpop.f32.mrb[75].mxu1 }
0x126b   :  { %v2877_v50 = vsel %vm306_vm2, %v2859_v55, -inf }
0x126c   :  { %2878 = vmax.xlane.f32.xlu1 %v2877_v50 }
0x126f   :  { %v2737_v17 = vpop.f32.mrb[76].mxu1 }
0x1270   :  { %v2848_v21 = vmul.f32 0.25, %v2737_v17  ;;  %v7201_v9 = vpop.f32.mrb[77].mxu1 }
0x1271   :  { %v2740_v11 = vpop.f32.mrb[78].mxu1 }
0x1272   :  { %v2856_v15 = vadd.f32 %v2848_v21, %v8270_v31  ;;  %v2849_v61 = vmul.f32 0.25, %v2740_v11  ;;  %v7202_v20 = vpop.f32.mrb[79].mxu1 }
0x1274   :  { %v2857_v14 = vadd.f32 %v2849_v61, %v8272_v35  ;;  %v2868_v30 = vsel %vm306_vm2, %v2856_v15, -inf }
0x1275   :  { %2869 = vmax.xlane.f32.xlu0 %v2868_v30 }
0x1276   :  { %v2871_v3 = vsel %vm306_vm2, %v2857_v14, -inf }
0x1277   :  { %v2839_v33 = vpop.f32.mrb[80].mxu1 }
0x1278   :  { %v2852_v40 = vmul.f32 0.25, %v2839_v33  ;;  %v7213_v42 = vpop.f32.mrb[81].mxu1 }
0x1279   :  { %2872 = vmax.xlane.f32.xlu0 %v2871_v3  ;;  %v2842_v44 = vpop.f32.mrb[82].mxu1 }
0x127a   :  { %v2853_v12 = vmul.f32 0.25, %v2842_v44  ;;  %v7214_v10 = vpop.f32.mrb[83].mxu1  ;;  %v2860_v57 = vadd.f32 %v2852_v40, %v8270_v31 }
0x127c   :  { %v2861_v27 = vadd.f32 %v2853_v12, %v8272_v35  ;;  %v2880_v49 = vsel %vm306_vm2, %v2860_v57, -inf }
0x127d   :  { %2875 = vmax.xlane.f32.xlu0 %v2874_v24 }
0x127e   :  { %v2883_v54 = vsel %vm306_vm2, %v2861_v27, -inf }
0x127f   :  { %2884 = vmax.xlane.f32.xlu1 %v2883_v54 }
0x1281   :  { %2881 = vmax.xlane.f32.xlu0 %v2880_v49 }
0x12c9   :  { %v2864_v60 = vpop.xlane.xlu0 %2863 }
0x12ca   :  { %v2886_v62 = vsub.f32 %v2854_v46, %v2864_v60 }
0x12cb   :  { %v2867_v63 = vpop.xlane.xlu1 %2866 }
0x12cc   :  { %v2894_v41 = vmul.f32 1.442695, %v2886_v62  ;;  %v2887_v59 = vsub.f32 %v2855_v52, %v2867_v63 }
0x12ce   :  { %7812 = vpow2.f32 %v2894_v41  ;;  %v2896_v39 = vmul.f32 1.442695, %v2887_v59 }
0x12d0   :  { %7814 = vpow2.f32 %v2896_v39 }
0x12d8   :  { %v8970_v31 = vpop.eup %7812 }
0x12d9   :  { %v2910_v35 = vsel %vm306_vm2, %v8970_v31, 0.0 }
0x12da   :  { %v8974_v37 = vpop.eup %7814  ;;  %2911 = vadd.xlane.f32.xlu0 %v2910_v35 }
0x12db   :  { %v2913_v43 = vsel %vm306_vm2, %v8974_v37, 0.0 }
0x12dc   :  { %2914 = vadd.xlane.f32.xlu1 %v2913_v43 }
0x12f9   :  { %v2879_v0 = vpop.xlane.xlu1 %2878 }
0x12fa   :  { %v2891_v8 = vsub.f32 %v2859_v55, %v2879_v0 }
0x12fc   :  { %v2904_v21 = vmul.f32 1.442695, %v2891_v8 }
0x1302   :  { %v2870_v46 = vpop.xlane.xlu0 %2869 }
0x1303   :  { %v2888_v38 = vsub.f32 %v2856_v15, %v2870_v46 }
0x1305   :  { %v2898_v52 = vmul.f32 1.442695, %v2888_v38 }
0x1306   :  { %v2873_v50 = vpop.xlane.xlu0 %2872 }
0x1307   :  { %7816 = vpow2.f32 %v2898_v52  ;;  %v2889_v17 = vsub.f32 %v2857_v14, %v2873_v50 }
0x1309   :  { %v2900_v9 = vmul.f32 1.442695, %v2889_v17 }
0x130a   :  { %v2876_v11 = vpop.xlane.xlu0 %2875 }
0x130b   :  { %7818 = vpow2.f32 %v2900_v9  ;;  %v2890_v61 = vsub.f32 %v2858_v36, %v2876_v11 }
0x130c   :  { %7820 = vpow2.f32 %v2904_v21 }
0x130d   :  { %v2902_v20 = vmul.f32 1.442695, %v2890_v61 }
0x130e   :  { %v2882_v19 = vpop.xlane.xlu0 %2881 }
0x130f   :  { %7822 = vpow2.f32 %v2902_v20  ;;  %v2892_v30 = vsub.f32 %v2860_v57, %v2882_v19  ;;  %v2885_v57 = vpop.xlane.xlu1 %2884 }
0x1310   :  { %v2893_v24 = vsub.f32 %v2861_v27, %v2885_v57 }
0x1311   :  { %v7817_v33 = vpop.eup %7816  ;;  %v2906_v40 = vmul.f32 1.442695, %v2892_v30 }
0x1312   :  { %v2916_v42 = vsel %vm306_vm2, %v7817_v33, 0.0  ;;  %v2908_v54 = vmul.f32 1.442695, %v2893_v24 }
0x1313   :  { %7824 = vpow2.f32 %v2906_v40  ;;  %2917 = vadd.xlane.f32.xlu0 %v2916_v42 }
0x1314   :  { %7826 = vpow2.f32 %v2908_v54 }
0x1315   :  { %v7819_v55 = vpop.eup %7818 }
0x1316   :  { %v2919_v15 = vsel %vm306_vm2, %v7819_v55, 0.0  ;;  %v7821_v14 = vpop.eup %7820 }
0x1317   :  { %2920 = vadd.xlane.f32.xlu1 %v2919_v15  ;;  %v2925_v36 = vsel %vm306_vm2, %v7821_v14, 0.0  ;;  %v7518_v15 = vld [vmem:[%s9669_s0 + $0x80] sm:$0xff]  }
0x1319   :  { %v7823_v3 = vpop.eup %7822 }
0x131a   :  { %v2922_v44 = vsel %vm306_vm2, %v7823_v3, 0.0 }
0x131b   :  { %2923 = vadd.xlane.f32.xlu0 %v2922_v44  ;;  %2926 = vadd.xlane.f32.xlu1 %v2925_v36 }
0x131d   :  { %v7825_v12 = vpop.eup %7824 }
0x131e   :  { %v2928_v10 = vsel %vm306_vm2, %v7825_v12, 0.0  ;;  %v7827_v49 = vpop.eup %7826 }
0x131f   :  { %2929 = vadd.xlane.f32.xlu0 %v2928_v10  ;;  %v2931_v60 = vsel %vm306_vm2, %v7827_v49, 0.0 }
0x132c   :  { %3001 = vrot.lane.b32.xlu1 %v8790_v34, %s8064_s16 }
0x1330   :  { %3048 = vrot.lane.b32.xlu1 %v8800_v5, %s8064_s16 }
0x1335   :  { %2954 = vrot.lane.b32.xlu0 %v8792_v18, %s8064_s16 }
0x1354   :  { %2932 = vadd.xlane.f32.xlu1 %v2931_v60 }
0x1365   :  { %3095 = vrot.lane.b32.xlu1 %v8798_v51, %s8064_s16 }
0x1367   :  { %v2912_v62 = vpop.xlane.xlu0 %2911 }
0x1369   :  { %v2915_v63 = vpop.xlane.xlu1 %2914 }
0x136a   :  { %7828 = vrcp.f32 %v2915_v63 }
0x136b   :  { %7830 = vrcp.f32 %v2912_v62 }
0x1374   :  { %v7829_v27 = vpop.eup %7828 }
0x1375   :  { %v7831_v59 = vpop.eup %7830  ;;  %v2943_v51 = vmul.f32 %v7829_v27, %v8974_v37 }
0x1376   :  { %v2942_v46 = vmul.f32 %v7831_v59, %v8970_v31 }
0x1378   :  { %v2950_v50 = vpack.c.bf16 %v2943_v51, %v2942_v46 }
0x13a0   :  { %v2918_v34 = vpop.xlane.xlu0 %2917 }
0x13a1   :  { %7832 = vrcp.f32 %v2918_v34 }
0x13a4   :  { %v2921_v5 = vpop.xlane.xlu1 %2920 }
0x13a5   :  { %7834 = vrcp.f32 %v2921_v5 }
0x13a8   :  { %v2924_v18 = vpop.xlane.xlu0 %2923  ;;  %v2927_v41 = vpop.xlane.xlu1 %2926 }
0x13a9   :  { %7836 = vrcp.f32 %v2924_v18 }
0x13aa   :  { %7838 = vrcp.f32 %v2927_v41 }
0x13ab   :  { %v7833_v43 = vpop.eup %7832 }
0x13ac   :  { %v2930_v39 = vpop.xlane.xlu0 %2929  ;;  %v3002_v35 = vpop.permute.xlu1 %3001  ;;  %v2944_v38 = vmul.f32 %v7833_v43, %v7817_v33 }
0x13ad   :  { %7222 = vmatpush3.bf16.msra.mxu1 %v3002_v35  ;;  %7840 = vrcp.f32 %v2930_v39 }
0x13ae   :  { %7233 = vmatprep.subr.bf16.mxu1 %v8057_v48 }
0x13af   :  { %v7835_v0 = vpop.eup %7834 }
0x13b0   :  { %v2945_v8 = vmul.f32 %v7835_v0, %v7819_v55  ;;  %v2955_v52 = vpop.permute.xlu0 %2954  ;;  %v3049_v11 = vpop.permute.xlu1 %3048 }
0x13b1   :  { %7216 = vmatpush3.bf16.msra.mxu0 %v2955_v52 }
0x13b2   :  { %v2951_v17 = vpack.c.bf16 %v2945_v8, %v2944_v38  ;;  %7227 = vmatprep.subr.bf16.mxu0 %v8057_v48 }
0x13b3   :  { %v7837_v21 = vpop.eup %7836 }
0x13b4   :  { %v7839_v9 = vpop.eup %7838  ;;  %7218 = vmatmul.mubr.msk.bf16.vlgmr.msra.gmra.mrb[68].mxu0 %vm306_vm2, %v2950_v50  ;;  %7224 = vmatmul.mubr.msk.bf16.vlgmr.msra.gmra.mrb[84].mxu1 %vm306_vm2, %v2951_v17  ;;  %v2946_v31 = vmul.f32 %v7837_v21, %v7823_v3 }
0x13b5   :  { %7228 = vmatpush3.bf16.msra.mxu0 %v3049_v11  ;;  %7229 = vmatprep.mubr.msk.bf16.mxu0 %vm8058_vm1, %v8057_v48  ;;  %v2947_v37 = vmul.f32 %v7839_v9, %v7821_v14  ;;  %v7519_v14 = vld [vmem:[%s9669_s0 + $0x88] sm:$0xff]  }
0x13b6   :  { %7235 = vmatprep.mubr.msk.bf16.mxu1 %vm8058_vm1, %v8057_v48  ;;  %7239 = vmatprep.subr.bf16.mxu0 %v7518_v15 }
0x13b7   :  { %v2952_v61 = vpack.c.bf16 %v2947_v37, %v2946_v31  ;;  %v7841_v30 = vpop.eup %7840 }
0x13b8   :  { %v2948_v40 = vmul.f32 %v7841_v30, %v7825_v12 }
0x13bc   :  { %7230 = vmatmul.mubr.msk.bf16.vlgmr.msra.gmra.mrb[72].mxu0 %vm306_vm2, %v2952_v61 }
0x13bd   :  { %7240 = vmatpush3.bf16.msra.mxu0 %v7518_v15 }
0x13be   :  { %7241 = vmatprep.subr.bf16.mxu0 %v7519_v14 }
0x13c1   :  { %7242 = vmatpush3.bf16.msra.mxu0 %v7519_v14 }
0x13e1   :  { %v2933_v20 = vpop.xlane.xlu1 %2932 }
0x13e2   :  { %7842 = vrcp.f32 %v2933_v20 }
0x13e5   :  { %v3096_v19 = vpop.permute.xlu1 %3095 }
0x13e6   :  { %7234 = vmatpush3.bf16.msra.mxu1 %v3096_v19 }
0x13ec   :  { %v7843_v33 = vpop.eup %7842 }
0x13ed   :  { %v2949_v42 = vmul.f32 %v7843_v33, %v7827_v49 }
0x13ef   :  { %v2953_v55 = vpack.c.bf16 %v2949_v42, %v2948_v40 }
0x13f1   :  { %7236 = vmatmul.mubr.msk.bf16.vlgmr.msra.gmra.mrb[88].mxu1 %vm306_vm2, %v2953_v55 }
0x1487   :  { %v2994_v3 = vpop.f32.mrb[68].mxu0  ;;  %v3041_v44 = vpop.f32.mrb[84].mxu1 }
0x1488   :  { %v7219_v36 = vpop.f32.mrb[69].mxu0  ;;  %v7225_v12 = vpop.f32.mrb[85].mxu1 }
0x1489   :  { %v2997_v10 = vpop.f32.mrb[70].mxu0  ;;  %v3044_v57 = vpop.f32.mrb[86].mxu1 }
0x148a   :  { %v7472_v24 = vpack.i.bf16 %v2997_v10, %v2994_v3  ;;  %v7477_v54 = vpack.i.bf16 %v3044_v57, %v3041_v44  ;;  %v7220_v49 = vpop.f32.mrb[71].mxu0  ;;  %v7226_v60 = vpop.f32.mrb[87].mxu1 }
0x148c   :  { %7473 = vrot.lane.b32.xlu0 %v7472_v24, %s8065_s20  ;;  %7478 = vrot.lane.b32.xlu1 %v7477_v54, %s8065_s20 }
0x148f   :  { %v3088_v62 = vpop.f32.mrb[72].mxu0 }
0x1490   :  { %v7231_v63 = vpop.f32.mrb[73].mxu0 }
0x1491   :  { %v3091_v34 = vpop.f32.mrb[74].mxu0 }
0x1492   :  { %v7482_v5 = vpack.i.bf16 %v3091_v34, %v3088_v62  ;;  %v7232_v18 = vpop.f32.mrb[75].mxu0 }
0x1494   :  { %7483 = vrot.lane.b32.xlu0 %v7482_v5, %s8065_s20 }
0x14c4   :  { %v3135_v41 = vpop.f32.mrb[88].mxu1 }
0x14c5   :  { %v7237_v27 = vpop.f32.mrb[89].mxu1 }
0x14c6   :  { %v3138_v59 = vpop.f32.mrb[90].mxu1 }
0x14c7   :  { %v7487_v39 = vpack.i.bf16 %v3138_v59, %v3135_v41  ;;  %v7238_v35 = vpop.f32.mrb[91].mxu1 }
0x14c9   :  { %7488 = vrot.lane.b32.xlu1 %v7487_v39, %s8065_s20 }
0x14fe   :  { %v7474_v43 = vpop.permute.xlu0 %7473  ;;  %v7479_v51 = vpop.permute.xlu1 %7478 }
0x14ff   :  { %v7476_v0 = vunpack.i.h.bf16 %v7474_v43  ;;  %v7475_v46 = vunpack.i.l.bf16 %v7474_v43  ;;  %v7481_v38 = vunpack.i.h.bf16 %v7479_v51  ;;  %v7480_v8 = vunpack.i.l.bf16 %v7479_v51 }
0x1501   :  { %v3175_v52 = vsel %vm306_vm2, %v8940_v13, %v7476_v0  ;;  %v3174_v50 = vsel %vm306_vm2, %v8938_v28, %v7475_v46  ;;  %v3177_v17 = vsel %vm306_vm2, %v8944_v22, %v7481_v38  ;;  %v3176_v21 = vsel %vm306_vm2, %v8942_v6, %v7480_v8 }
0x1502   :  { %v3183_v9 = vpack.c.bf16 %v3177_v17, %v3176_v21  ;;  %v3182_v11 = vpack.c.bf16 %v3175_v52, %v3174_v50 }
0x1504   :  { %7243 = vmatprep.mubr.msk.bf16.mxu0 %vm67_vm0, %v3182_v11 }
0x1505   :  { %7244 = vmatmul.mubr.msk.bf16.vlgmr.msra.gmra.mrb[76].mxu0 %vm67_vm0, %v3183_v9 }
0x1506   :  { %v7484_v31 = vpop.permute.xlu0 %7483 }
0x1507   :  { %v7486_v37 = vunpack.i.h.bf16 %v7484_v31  ;;  %v7485_v61 = vunpack.i.l.bf16 %v7484_v31 }
0x1509   :  { %v3179_v13 = vsel %vm306_vm2, %v8948_v23, %v7486_v37  ;;  %v3178_v28 = vsel %vm306_vm2, %v8946_v16, %v7485_v61  ;;  %v6591_v23 = vld [vmem:[%s9671_s2 + $0xb0] ss:$0 sm:$0xff] }
0x150a   :  { %v3184_v20 = vpack.c.bf16 %v3179_v13, %v3178_v28 }
0x150c   :  { %7247 = vmatprep.mubr.msk.bf16.mxu0 %vm67_vm0, %v3184_v20  ;;  %v7520_v20 = vld [vmem:[%s9669_s0 + $0x90] sm:$0xff]  }
0x150d   :  { %7251 = vmatprep.subr.bf16.mxu1 %v7520_v20 }
0x150e   :  { %7252 = vmatpush3.bf16.msra.mxu1 %v7520_v20 }
0x153b   :  { %v7489_v22 = vpop.permute.xlu1 %7488 }
0x153c   :  { %v7491_v6 = vunpack.i.h.bf16 %v7489_v22  ;;  %v7490_v19 = vunpack.i.l.bf16 %v7489_v22  ;;  %v7521_v22 = vld [vmem:[%s9669_s0 + $0x98] sm:$0xff]  }
0x153d   :  { %7253 = vmatprep.subr.bf16.mxu1 %v7521_v22 }
0x153e   :  { %v3181_v30 = vsel %vm306_vm2, %v8957_v4, %v7491_v6  ;;  %v3180_v33 = vsel %vm306_vm2, %v8954_v2, %v7490_v19  ;;  %7254 = vmatpush3.bf16.msra.mxu1 %v7521_v22  ;;  %vm6406_vm2 = vcmask 257024  }
0x153f   :  { %v3185_v40 = vpack.c.bf16 %v3181_v30, %v3180_v33  ;;  %7287 = vmatprep.subr.bf16.mxu1 %v8057_v48 }
0x1541   :  { %7248 = vmatmul.mubr.msk.bf16.gmra.mrb[80].mxu0 %vm67_vm0, %v3185_v40 }
0x15d8   :  { %v7245_v16 = vpop.f32.mrb[76].mxu0 }
0x15d9   :  { %v3253_v42 = vpop.f32.mrb[77].mxu0  ;;  %v3262_v55 = vadd.f32 %v7245_v16, %v6591_v23 }
0x15da   :  { %v3254_v15 = vadd.f32 %v6591_v23, %v3253_v42  ;;  %v7246_v14 = vpop.f32.mrb[78].mxu0 }
0x15db   :  { %v3256_v3 = vpop.f32.mrb[79].mxu0  ;;  %v9041_v36 = vadd.f32 %v3262_v55, %v8684_v53  ;;  %v3265_v2 = vadd.f32 %v7246_v14, %v6591_v23 }
0x15dc   :  { %v9038_v44 = vadd.f32 %v3254_v15, %v8676_v7  ;;  %v3257_v4 = vadd.f32 %v6591_v23, %v3256_v3 }
0x15dd   :  { %v9051_v24 = vadd.f32 %v3265_v2, %v8678_v47  ;;  %v3300_v7 = vsel %vm67_vm0, %v9041_v36, 0.0 }
0x15de   :  { %v9044_v12 = vadd.f32 %v3257_v4, %v8674_v45  ;;  %v3294_v10 = vsel %vm67_vm0, %v9038_v44, 0.0 }
0x15df   :  { %3295 = vadd.xlane.f32.xlu0 %v3294_v10  ;;  %v3303_v53 = vsel %vm67_vm0, %v9051_v24, 0.0 }
0x15e0   :  { %v3297_v57 = vsel %vm67_vm0, %v9044_v12, 0.0 }
0x15e1   :  { %3298 = vadd.xlane.f32.xlu1 %v3297_v57 }
0x15e3   :  { %3301 = vadd.xlane.f32.xlu0 %v3300_v7 }
0x15e7   :  { %3304 = vadd.xlane.f32.xlu0 %v3303_v53 }
0x1614   :  { %v7249_v45 = vpop.f32.mrb[80].mxu0 }
0x1615   :  { %v3278_v54 = vadd.f32 %v7249_v45, %v6591_v23  ;;  %v3269_v49 = vpop.f32.mrb[81].mxu0 }
0x1616   :  { %v3270_v60 = vadd.f32 %v6591_v23, %v3269_v49  ;;  %v7250_v62 = vpop.f32.mrb[82].mxu0 }
0x1617   :  { %v3281_v63 = vadd.f32 %v7250_v62, %v6591_v23  ;;  %v3272_v34 = vpop.f32.mrb[83].mxu0  ;;  %v9061_v18 = vadd.f32 %v3278_v54, %v8706_v56 }
0x1618   :  { %v9058_v5 = vadd.f32 %v3270_v60, %v8698_v58  ;;  %v3273_v47 = vadd.f32 %v6591_v23, %v3272_v34 }
0x1619   :  { %v9069_v59 = vadd.f32 %v3281_v63, %v8700_v1  ;;  %v3312_v58 = vsel %vm67_vm0, %v9061_v18, 0.0 }
0x161a   :  { %v9064_v41 = vadd.f32 %v3273_v47, %v8696_v29  ;;  %v3306_v27 = vsel %vm67_vm0, %v9058_v5, 0.0 }
0x161b   :  { %3307 = vadd.xlane.f32.xlu0 %v3306_v27  ;;  %v3315_v56 = vsel %vm67_vm0, %v9069_v59, 0.0 }
0x161c   :  { %v3309_v39 = vsel %vm67_vm0, %v9064_v41, 0.0 }
0x161d   :  { %3310 = vadd.xlane.f32.xlu1 %v3309_v39 }
0x161f   :  { %3313 = vadd.xlane.f32.xlu0 %v3312_v58 }
0x1621   :  { %3316 = vadd.xlane.f32.xlu1 %v3315_v56 }
0x166c   :  { %v3296_v29 = vpop.xlane.xlu0 %3295 }
0x166d   :  { %v3318_v35 = vmul.f32 0.03125, %v3296_v29 }
0x166e   :  { %v3299_v43 = vpop.xlane.xlu1 %3298 }
0x166f   :  { %v9078_v51 = vsub.f32 %v9038_v44, %v3318_v35  ;;  %v3319_v1 = vmul.f32 0.03125, %v3299_v43 }
0x1670   :  { %v3302_v0 = vpop.xlane.xlu0 %3301 }
0x1671   :  { %v9081_v46 = vsub.f32 %v9044_v12, %v3319_v1  ;;  %v3320_v38 = vmul.f32 0.03125, %v3302_v0  ;;  %v3334_v8 = vmul.f32 %v9078_v51, %v9078_v51  ;;  %v6598_v1 = vld [vmem:[%s9671_s2 + $0xb8] ss:$0 sm:$0xff] }
0x1673   :  { %v9086_v52 = vsub.f32 %v9041_v36, %v3320_v38  ;;  %v3342_v50 = vsel %vm67_vm0, %v3334_v8, 0.0  ;;  %v3335_v17 = vmul.f32 %v9081_v46, %v9081_v46 }
0x1674   :  { %v3305_v21 = vpop.xlane.xlu0 %3304  ;;  %3343 = vadd.xlane.f32.xlu0 %v3342_v50 }
0x1675   :  { %v3321_v9 = vmul.f32 0.03125, %v3305_v21  ;;  %v3345_v11 = vsel %vm67_vm0, %v3335_v17, 0.0  ;;  %v3336_v31 = vmul.f32 %v9086_v52, %v9086_v52  ;;  %v6599_v21 = vld [vmem:[%s9671_s2 + $0xc0] ss:$0 sm:$0xff] }
0x1676   :  { %3346 = vadd.xlane.f32.xlu1 %v3345_v11 }
0x1677   :  { %v9095_v37 = vsub.f32 %v9051_v24, %v3321_v9  ;;  %v3348_v61 = vsel %vm67_vm0, %v3336_v31, 0.0 }
0x1678   :  { %3349 = vadd.xlane.f32.xlu0 %v3348_v61 }
0x1679   :  { %v3337_v13 = vmul.f32 %v9095_v37, %v9095_v37 }
0x167b   :  { %v3351_v28 = vsel %vm67_vm0, %v3337_v13, 0.0 }
0x167c   :  { %3352 = vadd.xlane.f32.xlu1 %v3351_v28 }
0x16a8   :  { %v3308_v6 = vpop.xlane.xlu0 %3307 }
0x16a9   :  { %v3322_v19 = vmul.f32 0.03125, %v3308_v6 }
0x16aa   :  { %v3311_v30 = vpop.xlane.xlu1 %3310 }
0x16ab   :  { %v9109_v33 = vsub.f32 %v9058_v5, %v3322_v19  ;;  %v3323_v40 = vmul.f32 0.03125, %v3311_v30 }
0x16ac   :  { %v3314_v23 = vpop.xlane.xlu0 %3313 }
0x16ad   :  { %v9112_v16 = vsub.f32 %v9064_v41, %v3323_v40  ;;  %v3324_v42 = vmul.f32 0.03125, %v3314_v23  ;;  %v3338_v55 = vmul.f32 %v9109_v33, %v9109_v33 }
0x16ae   :  { %v3317_v15 = vpop.xlane.xlu1 %3316 }
0x16af   :  { %v9117_v14 = vsub.f32 %v9061_v18, %v3324_v42  ;;  %v3325_v3 = vmul.f32 0.03125, %v3317_v15  ;;  %v3354_v4 = vsel %vm67_vm0, %v3338_v55, 0.0  ;;  %v3339_v2 = vmul.f32 %v9112_v16, %v9112_v16 }
0x16b0   :  { %3355 = vadd.xlane.f32.xlu0 %v3354_v4 }
0x16b1   :  { %v9123_v10 = vsub.f32 %v9069_v59, %v3325_v3  ;;  %v3357_v57 = vsel %vm67_vm0, %v3339_v2, 0.0  ;;  %v3340_v7 = vmul.f32 %v9117_v14, %v9117_v14 }
0x16b2   :  { %3358 = vadd.xlane.f32.xlu1 %v3357_v57 }
0x16b3   :  { %v3360_v53 = vsel %vm67_vm0, %v3340_v7, 0.0  ;;  %v3341_v45 = vmul.f32 %v9123_v10, %v9123_v10 }
0x16b4   :  { %3361 = vadd.xlane.f32.xlu0 %v3360_v53 }
0x16b5   :  { %v3363_v54 = vsel %vm67_vm0, %v3341_v45, 0.0 }
0x16b6   :  { %3364 = vadd.xlane.f32.xlu1 %v3363_v54 }
0x1701   :  { %v3344_v49 = vpop.xlane.xlu0 %3343 }
0x1702   :  { %v3366_v60 = vmul.f32 0.03125, %v3344_v49 }
0x1703   :  { %v3347_v62 = vpop.xlane.xlu1 %3346 }
0x1704   :  { %v3374_v63 = vadd.f32 1e-05, %v3366_v60  ;;  %v3367_v34 = vmul.f32 0.03125, %v3347_v62 }
0x1705   :  { %v3350_v47 = vpop.xlane.xlu0 %3349 }
0x1706   :  { %7844 = vrsqrt.f32 %v3374_v63  ;;  %v3375_v27 = vadd.f32 1e-05, %v3367_v34  ;;  %v3368_v39 = vmul.f32 0.03125, %v3350_v47 }
0x1708   :  { %7846 = vrsqrt.f32 %v3375_v27  ;;  %v3376_v58 = vadd.f32 1e-05, %v3368_v39 }
0x1709   :  { %v3353_v56 = vpop.xlane.xlu1 %3352 }
0x170a   :  { %7848 = vrsqrt.f32 %v3376_v58  ;;  %v3369_v29 = vmul.f32 0.03125, %v3353_v56 }
0x170c   :  { %v3377_v35 = vadd.f32 1e-05, %v3369_v29 }
0x170e   :  { %7850 = vrsqrt.f32 %v3377_v35 }
0x1710   :  { %v7845_v43 = vpop.eup %7844 }
0x1711   :  { %v3390_v0 = vmul.f32 %v7845_v43, %v9078_v51 }
0x1712   :  { %v7847_v38 = vpop.eup %7846 }
0x1713   :  { %v3391_v8 = vmul.f32 %v7847_v38, %v9081_v46  ;;  %v3402_v50 = vmul.f32 %v6598_v1, %v3390_v0  ;;  %v7526_v0 = vld [vmem:[%s9669_s0 + $0xc0] sm:$0xff]   ;;  %v7527_v38 = vld [vmem:[%s9669_s0 + $0xc8] sm:$0xff]  }
0x1714   :  { %v7849_v17 = vpop.eup %7848 }
0x1715   :  { %v3392_v9 = vmul.f32 %v7849_v17, %v9086_v52  ;;  %v3403_v11 = vmul.f32 %v6598_v1, %v3391_v8  ;;  %v3414_v31 = vadd.f32 %v6599_v21, %v3402_v50  ;;  %v7528_v8 = vld [vmem:[%s9669_s0 + $0xd0] sm:$0xff]   ;;  %v7529_v50 = vld [vmem:[%s9669_s0 + $0xd8] sm:$0xff]   ;;  %v6600_v17 = vld [vmem:[%s9671_s2 + $0xc8] ss:$0 sm:$0xff] }
0x1717   :  { %v3415_v61 = vadd.f32 %v6599_v21, %v3403_v11  ;;  %v3404_v28 = vmul.f32 %v6598_v1, %v3392_v9 }
0x1718   :  { %v7851_v13 = vpop.eup %7850 }
0x1719   :  { %v3393_v20 = vmul.f32 %v7851_v13, %v9095_v37  ;;  %v3422_v22 = vpack.c.bf16 %v3415_v61, %v3414_v31  ;;  %v3416_v46 = vadd.f32 %v6599_v21, %v3404_v28 }
0x171b   :  { %v3405_v51 = vmul.f32 %v6598_v1, %v3393_v20  ;;  %7255 = vmatprep.mubr.msk.bf16.mxu1 %vm67_vm0, %v3422_v22 }
0x171d   :  { %v3417_v6 = vadd.f32 %v6599_v21, %v3405_v51 }
0x171f   :  { %v3423_v19 = vpack.c.bf16 %v3417_v6, %v3416_v46 }
0x1721   :  { %7256 = vmatmul.mubr.msk.bf16.vlgmr.msra.gmra.mrb[92].mxu1 %vm67_vm0, %v3423_v19 }
0x173d   :  { %v3356_v30 = vpop.xlane.xlu0 %3355 }
0x173e   :  { %v3370_v40 = vmul.f32 0.03125, %v3356_v30 }
0x173f   :  { %v3359_v23 = vpop.xlane.xlu1 %3358 }
0x1740   :  { %v3378_v52 = vadd.f32 1e-05, %v3370_v40  ;;  %v3371_v42 = vmul.f32 0.03125, %v3359_v23 }
0x1741   :  { %v3362_v55 = vpop.xlane.xlu0 %3361 }
0x1742   :  { %7852 = vrsqrt.f32 %v3378_v52  ;;  %v3379_v15 = vadd.f32 1e-05, %v3371_v42  ;;  %v3372_v3 = vmul.f32 0.03125, %v3362_v55 }
0x1743   :  { %v3365_v4 = vpop.xlane.xlu1 %3364 }
0x1744   :  { %7854 = vrsqrt.f32 %v3379_v15  ;;  %v3380_v37 = vadd.f32 1e-05, %v3372_v3  ;;  %v3373_v2 = vmul.f32 0.03125, %v3365_v4 }
0x1746   :  { %7856 = vrsqrt.f32 %v3380_v37  ;;  %v3381_v57 = vadd.f32 1e-05, %v3373_v2 }
0x1748   :  { %7858 = vrsqrt.f32 %v3381_v57 }
0x174c   :  { %v7853_v7 = vpop.eup %7852 }
0x174d   :  { %v3394_v53 = vmul.f32 %v7853_v7, %v9109_v33 }
0x174e   :  { %v7855_v45 = vpop.eup %7854 }
0x174f   :  { %v3395_v54 = vmul.f32 %v7855_v45, %v9112_v16  ;;  %v3406_v49 = vmul.f32 %v6598_v1, %v3394_v53  ;;  %v7522_v16 = vld [vmem:[%s9669_s0 + $0xa0] sm:$0xff]  }
0x1750   :  { %v7857_v60 = vpop.eup %7856  ;;  %7263 = vmatprep.subr.bf16.mxu0 %v7522_v16 }
0x1751   :  { %v3396_v62 = vmul.f32 %v7857_v60, %v9117_v14  ;;  %v3407_v63 = vmul.f32 %v6598_v1, %v3395_v54  ;;  %v3418_v27 = vadd.f32 %v6599_v21, %v3406_v49  ;;  %7264 = vmatpush3.bf16.msra.mxu0 %v7522_v16  ;;  %v7523_v14 = vld [vmem:[%s9669_s0 + $0xa8] sm:$0xff]  }
0x1752   :  { %v7859_v34 = vpop.eup %7858  ;;  %7265 = vmatprep.subr.bf16.mxu0 %v7523_v14 }
0x1753   :  { %v3397_v47 = vmul.f32 %v7859_v34, %v9123_v10  ;;  %v3419_v39 = vadd.f32 %v6599_v21, %v3407_v63  ;;  %v3408_v58 = vmul.f32 %v6598_v1, %v3396_v62  ;;  %v7524_v10 = vld [vmem:[%s9669_s0 + $0xb0] sm:$0xff]  }
0x1755   :  { %v3424_v56 = vpack.c.bf16 %v3419_v39, %v3418_v27  ;;  %v3409_v29 = vmul.f32 %v6598_v1, %v3397_v47  ;;  %v3420_v35 = vadd.f32 %v6599_v21, %v3408_v58  ;;  %7266 = vmatpush3.bf16.msra.mxu0 %v7523_v14  ;;  %v7525_v1 = vld [vmem:[%s9669_s0 + $0xb8] sm:$0xff]  }
0x1756   :  { %7267 = vmatprep.subr.bf16.mxu0 %v7524_v10 }
0x1757   :  { %7259 = vmatprep.mubr.msk.bf16.mxu1 %vm67_vm0, %v3424_v56  ;;  %v3421_v33 = vadd.f32 %v6599_v21, %v3409_v29 }
0x1759   :  { %v3425_v43 = vpack.c.bf16 %v3421_v33, %v3420_v35  ;;  %7268 = vmatpush3.bf16.msra.mxu0 %v7524_v10 }
0x175a   :  { %7269 = vmatprep.subr.bf16.mxu0 %v7525_v1 }
0x175b   :  { %7260 = vmatmul.mubr.msk.bf16.gmra.mrb[96].mxu1 %vm67_vm0, %v3425_v43 }
0x175c   :  { %7291 = vmatprep.mubr.msk.bf16.mxu1 %vm8058_vm1, %v8057_v48 }
0x175d   :  { %7270 = vmatpush3.bf16.msra.mxu0 %v7525_v1 }
0x175e   :  { %7271 = vmatprep.subr.bf16.mxu0 %v7526_v0 }
0x1761   :  { %7272 = vmatpush3.bf16.msra.mxu0 %v7526_v0 }
0x1762   :  { %7273 = vmatprep.subr.bf16.mxu0 %v7527_v38 }
0x1765   :  { %7274 = vmatpush3.bf16.msra.mxu0 %v7527_v38 }
0x1766   :  { %7275 = vmatprep.subr.bf16.mxu0 %v7528_v8 }
0x1769   :  { %7276 = vmatpush3.bf16.msra.mxu0 %v7528_v8 }
0x176a   :  { %7277 = vmatprep.subr.bf16.mxu0 %v7529_v50 }
0x176d   :  { %7278 = vmatpush3.bf16.msra.mxu0 %v7529_v50 }
0x17f4   :  { %v7257_v21 = vpop.f32.mrb[92].mxu1 }
0x17f5   :  { %v3502_v9 = vadd.f32 %v7257_v21, %v6600_v17  ;;  %v3493_v11 = vpop.f32.mrb[93].mxu1 }
0x17f6   :  { %v3494_v31 = vadd.f32 %v6600_v17, %v3493_v11  ;;  %v7258_v61 = vpop.f32.mrb[94].mxu1 }
0x17f7   :  { %v6609_v13 = vmul.f32 -1.702, %v3502_v9  ;;  %v3505_v28 = vadd.f32 %v7258_v61, %v6600_v17  ;;  %v3496_v20 = vpop.f32.mrb[95].mxu1 }
0x17f8   :  { %v6607_v22 = vmul.f32 -1.702, %v3494_v31  ;;  %v3497_v51 = vadd.f32 %v6600_v17, %v3496_v20 }
0x17f9   :  { %v3544_v46 = vmul.f32 1.442695, %v6609_v13  ;;  %v6610_v6 = vmul.f32 -1.702, %v3505_v28 }
0x17fa   :  { %v3540_v19 = vmul.f32 1.442695, %v6607_v22  ;;  %v6608_v30 = vmul.f32 -1.702, %v3497_v51 }
0x17fb   :  { %7860 = vpow2.f32 %v3544_v46  ;;  %v3546_v40 = vmul.f32 1.442695, %v6610_v6 }
0x17fc   :  { %7862 = vpow2.f32 %v3540_v19  ;;  %v3542_v23 = vmul.f32 1.442695, %v6608_v30 }
0x17fd   :  { %7864 = vpow2.f32 %v3546_v40 }
0x17fe   :  { %7866 = vpow2.f32 %v3542_v23 }
0x1805   :  { %v7861_v52 = vpop.eup %7860 }
0x1806   :  { %v7863_v42 = vpop.eup %7862  ;;  %v3558_v55 = vadd.f32 1.0, %v7861_v52  ;;  %v6615_v52 = vld [vmem:[%s9671_s2 + $0xd0] ss:$0 sm:$0xff] }
0x1807   :  { %v7865_v15 = vpop.eup %7864  ;;  %v3556_v3 = vadd.f32 1.0, %v7863_v42 }
0x1808   :  { %v7867_v4 = vpop.eup %7866  ;;  %7868 = vrcp.f32 %v3558_v55  ;;  %v3559_v37 = vadd.f32 1.0, %v7865_v15 }
0x1809   :  { %7870 = vrcp.f32 %v3556_v3  ;;  %v3557_v2 = vadd.f32 1.0, %v7867_v4 }
0x180a   :  { %7872 = vrcp.f32 %v3559_v37 }
0x180b   :  { %7874 = vrcp.f32 %v3557_v2 }
0x1812   :  { %v7869_v57 = vpop.eup %7868 }
0x1813   :  { %v7871_v7 = vpop.eup %7870  ;;  %v3582_v54 = vmul.f32 %v7869_v57, %v3502_v9 }
0x1814   :  { %v7873_v53 = vpop.eup %7872  ;;  %v3580_v60 = vmul.f32 %v7871_v7, %v3494_v31 }
0x1815   :  { %v7875_v45 = vpop.eup %7874  ;;  %v3583_v49 = vmul.f32 %v7873_v53, %v3505_v28 }
0x1816   :  { %v3581_v62 = vmul.f32 %v7875_v45, %v3497_v51 }
0x1817   :  { %v3589_v63 = vpack.c.bf16 %v3583_v49, %v3582_v54 }
0x1818   :  { %v3588_v34 = vpack.c.bf16 %v3581_v62, %v3580_v60 }
0x181a   :  { %7279 = vmatprep.mubr.bf16.mxu0 %v3588_v34 }
0x181b   :  { %7280 = vmatmul.mubr.bf16.vlgmr.msra.gmra.mrb[84].mxu0 %v3589_v63 }
0x182e   :  { %v7261_v47 = vpop.f32.mrb[96].mxu1 }
0x182f   :  { %v3518_v27 = vadd.f32 %v7261_v47, %v6600_v17  ;;  %v3509_v39 = vpop.f32.mrb[97].mxu1 }
0x1830   :  { %v3510_v58 = vadd.f32 %v6600_v17, %v3509_v39  ;;  %v7262_v56 = vpop.f32.mrb[98].mxu1 }
0x1831   :  { %v6613_v29 = vmul.f32 -1.702, %v3518_v27  ;;  %v3521_v35 = vadd.f32 %v7262_v56, %v6600_v17  ;;  %v3512_v33 = vpop.f32.mrb[99].mxu1 }
0x1832   :  { %v6611_v43 = vmul.f32 -1.702, %v3510_v58  ;;  %v3513_v16 = vadd.f32 %v6600_v17, %v3512_v33 }
0x1833   :  { %v3552_v14 = vmul.f32 1.442695, %v6613_v29  ;;  %v6614_v10 = vmul.f32 -1.702, %v3521_v35 }
0x1834   :  { %v3548_v1 = vmul.f32 1.442695, %v6611_v43  ;;  %v6612_v0 = vmul.f32 -1.702, %v3513_v16 }
0x1835   :  { %7876 = vpow2.f32 %v3552_v14  ;;  %v3554_v38 = vmul.f32 1.442695, %v6614_v10 }
0x1836   :  { %7878 = vpow2.f32 %v3548_v1  ;;  %v3550_v8 = vmul.f32 1.442695, %v6612_v0 }
0x1837   :  { %7880 = vpow2.f32 %v3554_v38 }
0x1838   :  { %7882 = vpow2.f32 %v3550_v8 }
0x183f   :  { %v7877_v50 = vpop.eup %7876 }
0x1840   :  { %v7879_v21 = vpop.eup %7878  ;;  %v3562_v9 = vadd.f32 1.0, %v7877_v50 }
0x1841   :  { %v7881_v11 = vpop.eup %7880  ;;  %v3560_v31 = vadd.f32 1.0, %v7879_v21 }
0x1842   :  { %v7883_v61 = vpop.eup %7882  ;;  %7884 = vrcp.f32 %v3562_v9  ;;  %v3563_v13 = vadd.f32 1.0, %v7881_v11 }
0x1843   :  { %7886 = vrcp.f32 %v3560_v31  ;;  %v3561_v17 = vadd.f32 1.0, %v7883_v61 }
0x1844   :  { %7888 = vrcp.f32 %v3563_v13 }
0x1845   :  { %7890 = vrcp.f32 %v3561_v17 }
0x184c   :  { %v7885_v28 = vpop.eup %7884 }
0x184d   :  { %v7887_v20 = vpop.eup %7886  ;;  %v3586_v46 = vmul.f32 %v7885_v28, %v3518_v27 }
0x184e   :  { %v7889_v22 = vpop.eup %7888  ;;  %v3584_v19 = vmul.f32 %v7887_v20, %v3510_v58 }
0x184f   :  { %v7891_v51 = vpop.eup %7890  ;;  %v3587_v6 = vmul.f32 %v7889_v22, %v3521_v35 }
0x1850   :  { %v3585_v30 = vmul.f32 %v7891_v51, %v3513_v16  ;;  %v9219_v51 = vsub.s32 0, %v8262_v25 }
0x1851   :  { %v3591_v40 = vpack.c.bf16 %v3587_v6, %v3586_v46  ;;  %v3864_v46 = vld [vmem:[%s9671_s2 + $0x40] sm:$0xf] }
0x1852   :  { %v3590_v23 = vpack.c.bf16 %v3585_v30, %v3584_v19  ;;  %v3868_v6 = vrot.slane %v3864_v46, %v9219_v51  ;;  %v9226_v19 = vsub.s32 1, %v8262_v25 }
0x1854   :  { %7283 = vmatprep.mubr.bf16.mxu0 %v3590_v23  ;;  %v3879_v30 = vrot.slane %v3864_v46, %v9226_v19 }
0x1855   :  { %7284 = vmatmul.mubr.bf16.gmra.mrb[88].mxu0 %v3591_v40  ;;  %v3889_v40 = vsub.s32 2, %v8262_v25 }
0x1857   :  { %v3890_v23 = vrot.slane %v3864_v46, %v3889_v40 }
0x18ee   :  { %v7281_v42 = vpop.f32.mrb[84].mxu0 }
0x18ef   :  { %v3704_v55 = vadd.f32 %v7281_v42, %v6615_v52  ;;  %v3695_v15 = vpop.f32.mrb[85].mxu0 }
0x18f0   :  { %v3696_v3 = vadd.f32 %v6615_v52, %v3695_v15  ;;  %v7282_v4 = vpop.f32.mrb[86].mxu0 }
0x18f1   :  { %v3728_v37 = vadd.f32 %v3704_v55, %v9041_v36  ;;  %v3707_v2 = vadd.f32 %v7282_v4, %v6615_v52  ;;  %v3698_v57 = vpop.f32.mrb[87].mxu0 }
0x18f2   :  { %v3699_v7 = vadd.f32 %v6615_v52, %v3698_v57  ;;  %v3726_v53 = vadd.f32 %v3696_v3, %v9038_v44 }
0x18f3   :  { %v3729_v45 = vadd.f32 %v3707_v2, %v9051_v24  ;;  %v3742_v54 = vsel %vm67_vm0, %v3728_v37, 0.0 }
0x18f4   :  { %3743 = vadd.xlane.f32.xlu0 %v3742_v54  ;;  %v3727_v49 = vadd.f32 %v3699_v7, %v9044_v12  ;;  %v3736_v62 = vsel %vm67_vm0, %v3726_v53, 0.0 }
0x18f5   :  { %v3745_v60 = vsel %vm67_vm0, %v3729_v45, 0.0 }
0x18f6   :  { %3746 = vadd.xlane.f32.xlu1 %v3745_v60  ;;  %v3739_v36 = vsel %vm67_vm0, %v3727_v49, 0.0 }
0x18f8   :  { %3737 = vadd.xlane.f32.xlu0 %v3736_v62 }
0x18fa   :  { %3740 = vadd.xlane.f32.xlu1 %v3739_v36 }
0x1928   :  { %v7285_v63 = vpop.f32.mrb[88].mxu0 }
0x1929   :  { %v3711_v34 = vpop.f32.mrb[89].mxu0  ;;  %v3720_v47 = vadd.f32 %v7285_v63, %v6615_v52 }
0x192a   :  { %v3712_v44 = vadd.f32 %v6615_v52, %v3711_v34  ;;  %v7286_v27 = vpop.f32.mrb[90].mxu0 }
0x192b   :  { %v3723_v24 = vadd.f32 %v7286_v27, %v6615_v52  ;;  %v3714_v39 = vpop.f32.mrb[91].mxu0  ;;  %v3732_v12 = vadd.f32 %v3720_v47, %v9061_v18 }
0x192c   :  { %v3730_v58 = vadd.f32 %v3712_v44, %v9058_v5  ;;  %v3715_v56 = vadd.f32 %v6615_v52, %v3714_v39  ;;  %v3900_v44 = vsub.s32 3, %v8262_v25  ;;  %v7531_v39 = vld [vmem:[%s9669_s0 + $0xe8] sm:$0xff]  }
0x192d   :  { %v3733_v33 = vadd.f32 %v3723_v24, %v9069_v59  ;;  %v3754_v16 = vsel %vm67_vm0, %v3732_v12, 0.0  ;;  %v7530_v24 = vld [vmem:[%s9669_s0 + $0xe0] sm:$0xff]  }
0x192e   :  { %v3731_v29 = vadd.f32 %v3715_v56, %v9064_v41  ;;  %v3748_v35 = vsel %vm67_vm0, %v3730_v58, 0.0  ;;  %v3901_v27 = vrot.slane %v3864_v46, %v3900_v44  ;;  %7288 = vmatpush3.bf16.msra.mxu1 %v7530_v24  ;;  %v6624_v46 = vld [vmem:[%s9671_s2 + $0xd8] ss:$0 sm:$0xff] }
0x192f   :  { %3749 = vadd.xlane.f32.xlu0 %v3748_v35  ;;  %v3757_v14 = vsel %vm67_vm0, %v3733_v33, 0.0  ;;  %7289 = vmatprep.subr.bf16.mxu1 %v8057_v48 }
0x1930   :  { %v3751_v43 = vsel %vm67_vm0, %v3731_v29, 0.0 }
0x1931   :  { %3752 = vadd.xlane.f32.xlu1 %v3751_v43 }
0x1932   :  { %7290 = vmatpush3.bf16.msra.mxu1 %v7531_v39 }
0x1933   :  { %3755 = vadd.xlane.f32.xlu0 %v3754_v16 }
0x1935   :  { %3758 = vadd.xlane.f32.xlu1 %v3757_v14 }
0x1981   :  { %v3744_v5 = vpop.xlane.xlu0 %3743 }
0x1982   :  { %v3762_v10 = vmul.f32 0.03125, %v3744_v5 }
0x1983   :  { %v3747_v1 = vpop.xlane.xlu1 %3746 }
0x1984   :  { %v9198_v18 = vsub.f32 %v3728_v37, %v3762_v10  ;;  %v3763_v41 = vmul.f32 0.03125, %v3747_v1 }
0x1985   :  { %v3738_v0 = vpop.xlane.xlu0 %3737 }
0x1986   :  { %v9200_v38 = vsub.f32 %v3729_v45, %v3763_v41  ;;  %v3760_v8 = vmul.f32 0.03125, %v3738_v0  ;;  %v3778_v59 = vmul.f32 %v9198_v18, %v9198_v18 }
0x1987   :  { %v3741_v50 = vpop.xlane.xlu1 %3740 }
0x1988   :  { %v9204_v21 = vsub.f32 %v3726_v53, %v3760_v8  ;;  %v3761_v9 = vmul.f32 0.03125, %v3741_v50  ;;  %v3790_v11 = vsel %vm67_vm0, %v3778_v59, 0.0  ;;  %v3779_v31 = vmul.f32 %v9200_v38, %v9200_v38 }
0x1989   :  { %3791 = vadd.xlane.f32.xlu0 %v3790_v11 }
0x198a   :  { %v9209_v61 = vsub.f32 %v3727_v49, %v3761_v9  ;;  %v3793_v13 = vsel %vm67_vm0, %v3779_v31, 0.0  ;;  %v3776_v17 = vmul.f32 %v9204_v21, %v9204_v21 }
0x198b   :  { %3794 = vadd.xlane.f32.xlu1 %v3793_v13 }
0x198c   :  { %v3784_v28 = vsel %vm67_vm0, %v3776_v17, 0.0  ;;  %v3777_v20 = vmul.f32 %v9209_v61, %v9209_v61 }
0x198d   :  { %3785 = vadd.xlane.f32.xlu0 %v3784_v28 }
0x198e   :  { %v3787_v22 = vsel %vm67_vm0, %v3777_v20, 0.0 }
0x198f   :  { %3788 = vadd.xlane.f32.xlu1 %v3787_v22 }
0x19a0   :  { %3874 = vbcast.lane.b32.xlu1 %v3868_v6, 264 }
0x19a4   :  { %3881 = vbcast.lane.b32.xlu1 %v3879_v30, 256 }
0x19a8   :  { %3885 = vbcast.lane.b32.xlu1 %v3879_v30, 264 }
0x19ac   :  { %3896 = vbcast.lane.b32.xlu1 %v3890_v23, 264 }
0x19bc   :  { %v3750_v52 = vpop.xlane.xlu0 %3749 }
0x19bd   :  { %v3764_v55 = vmul.f32 0.03125, %v3750_v52 }
0x19be   :  { %v3753_v42 = vpop.xlane.xlu1 %3752 }
0x19bf   :  { %v9230_v37 = vsub.f32 %v3730_v58, %v3764_v55  ;;  %v3765_v53 = vmul.f32 0.03125, %v3753_v42  ;;  %v8067_v58 = vmov 0  }
0x19c0   :  { %v3756_v15 = vpop.xlane.xlu0 %3755  ;;  %4137 = vmatprep.subr.bf16.mxu1 %v8067_v58  ;;  %4345 = vmatprep.mubr.bf16.mxu0 %v8067_v58 }
0x19c1   :  { %v3766_v3 = vmul.f32 0.03125, %v3756_v15  ;;  %v3780_v49 = vmul.f32 %v9230_v37, %v9230_v37  ;;  %v9241_v60 = vsub.f32 %v3731_v29, %v3765_v53 }
0x19c2   :  { %v3759_v4 = vpop.xlane.xlu1 %3758 }
0x19c3   :  { %v9232_v2 = vsub.f32 %v3732_v12, %v3766_v3  ;;  %v3767_v57 = vmul.f32 0.03125, %v3759_v4  ;;  %v3796_v62 = vsel %vm67_vm0, %v3780_v49, 0.0  ;;  %v3781_v34 = vmul.f32 %v9241_v60, %v9241_v60 }
0x19c5   :  { %v3782_v7 = vmul.f32 %v9232_v2, %v9232_v2  ;;  %v9236_v45 = vsub.f32 %v3733_v33, %v3767_v57  ;;  %v3799_v47 = vsel %vm67_vm0, %v3781_v34, 0.0 }
0x19c7   :  { %v3802_v54 = vsel %vm67_vm0, %v3782_v7, 0.0  ;;  %v3783_v36 = vmul.f32 %v9236_v45, %v9236_v45 }
0x19c8   :  { %3803 = vadd.xlane.f32.xlu0 %v3802_v54 }
0x19c9   :  { %v3805_v63 = vsel %vm67_vm0, %v3783_v36, 0.0 }
0x19cc   :  { %3797 = vadd.xlane.f32.xlu0 %v3796_v62 }
0x19d0   :  { %3806 = vadd.xlane.f32.xlu1 %v3805_v63 }
0x19d4   :  { %3800 = vadd.xlane.f32.xlu1 %v3799_v47 }
0x19e2   :  { %3870 = vbcast.lane.b32.xlu0 %v3868_v6, 256 }
0x19e5   :  { %3907 = vbcast.lane.b32.xlu1 %v3901_v27, 264 }
0x19e6   :  { %3892 = vbcast.lane.b32.xlu0 %v3890_v23, 256 }
0x19ea   :  { %3903 = vbcast.lane.b32.xlu0 %v3901_v27, 256 }
0x1a16   :  { %v3792_v25 = vpop.xlane.xlu0 %3791 }
0x1a17   :  { %v3810_v16 = vmul.f32 0.03125, %v3792_v25 }
0x1a18   :  { %v3795_v56 = vpop.xlane.xlu1 %3794 }
0x1a19   :  { %v3811_v35 = vmul.f32 0.03125, %v3795_v56  ;;  %v3818_v1 = vadd.f32 1e-05, %v3810_v16 }
0x1a1a   :  { %v3786_v12 = vpop.xlane.xlu0 %3785 }
0x1a1b   :  { %v3808_v33 = vmul.f32 0.03125, %v3786_v12  ;;  %v3819_v14 = vadd.f32 1e-05, %v3811_v35 }
0x1a1c   :  { %v3789_v29 = vpop.xlane.xlu1 %3788 }
0x1a1d   :  { %v3809_v43 = vmul.f32 0.03125, %v3789_v29  ;;  %v3816_v5 = vadd.f32 1e-05, %v3808_v33  ;;  %7892 = vrsqrt.f32 %v3819_v14 }
0x1a1f   :  { %v3817_v10 = vadd.f32 1e-05, %v3809_v43  ;;  %7894 = vrsqrt.f32 %v3816_v5 }
0x1a20   :  { %v3875_v41 = vpop.permute.xlu1 %3874 }
0x1a21   :  { %7896 = vrsqrt.f32 %v3817_v10 }
0x1a22   :  { %7898 = vrsqrt.f32 %v3818_v1 }
0x1a24   :  { %v3882_v0 = vpop.permute.xlu1 %3881 }
0x1a27   :  { %v7893_v8 = vpop.eup %7892 }
0x1a28   :  { %v3886_v9 = vpop.permute.xlu1 %3885  ;;  %v3835_v31 = vmul.f32 %v7893_v8, %v9200_v38 }
0x1a29   :  { %v7895_v59 = vpop.eup %7894 }
0x1a2a   :  { %v3832_v20 = vmul.f32 %v7895_v59, %v9204_v21  ;;  %v3847_v30 = vmul.f32 %v6624_v46, %v3835_v31  ;;  %v6625_v21 = vld [vmem:[%s9671_s2 + $0xe0] ss:$0 sm:$0xff]  ;;  %s8069_s2 = smov [#allocation6]  }
0x1a2b   :  { %v7897_v50 = vpop.eup %7896  ;;  %s6499_s21 = sshll.u32 %s8069_s2, 4  ;;  %s6500_s21 = int_to_ptr.vmem [resolvable:$true] %s6499_s21 }
0x1a2c   :  { %v7899_v11 = vpop.eup %7898  ;;  %v3833_v17 = vmul.f32 %v7897_v50, %v9209_v61  ;;  %v9267_v40 = vpop.permute.xlu1 %3896  ;;  %v3844_v42 = vmul.f32 %v6624_v46, %v3832_v20  ;;  %s8028_s22 = scalar_lea.vmem %s6500_s21, 32  ;;  %p8033_p9 = scmp.lt.s32.totalorder %s6500_s21, %s6500_s21 }
0x1a2d   :  { %v3834_v22 = vmul.f32 %v7899_v11, %v9198_v18  ;;  %v3859_v18 = vadd.f32 %v6625_v21, %v3847_v30  ;;  %p8029_p8 = scmp.ne.s32.totalorder %s6500_s21, %s8028_s22  ;;  %p8034_p10 = scmp.lt.s32.totalorder %s8028_s22, %s8028_s22 }
0x1a2e   :  { %v3845_v52 = vmul.f32 %v6624_v46, %v3833_v17  ;;  %v3856_v7 = vadd.f32 %v6625_v21, %v3844_v42 }
0x1a2f   :  { %v3846_v55 = vmul.f32 %v6624_v46, %v3834_v22  ;;  %v3912_v62 = vmul.f32 %v3886_v9, %v3859_v18  ;;  %p8035_p11 = por %p8034_p10, %p8033_p9 }
0x1a30   :  { %v3857_v4 = vadd.f32 %v6625_v21, %v3845_v52 }
0x1a31   :  { %v3858_v53 = vadd.f32 %v6625_v21, %v3846_v55  ;;  %v3927_v39 = vsel %vm67_vm0, %v3912_v62, 0.0  ;;  %p8036_p12 = pnand %p8035_p11, %p8029_p8 }
0x1a32   :  { %v3910_v63 = vmul.f32 %v3875_v41, %v3857_v4 }
0x1a33   :  { %v3911_v47 = vmul.f32 %v3882_v0, %v3858_v53 }
0x1a34   :  { %v3918_v56 = vsel %vm67_vm0, %v3910_v63, 0.0 }
0x1a35   :  { %v3926_v12 = vsel %vm67_vm0, %v3911_v47, 0.0 }
0x1a36   :  { %v3928_v33 = vadd.f32 %v3927_v39, %v3926_v12 }
0x1a38   :  { %v3929_v1 = vrot.slane %v3928_v33, 4 }
0x1a3a   :  { %v3930_v11 = vadd.f32 %v3929_v1, %v3928_v33  ;;  %v4032_v33 = vld [vmem:[%s9673_s4 + $0x8] sm:$0xff] }
0x1a3b   :  { %v7532_v1 = vld [vmem:[#allocation3] ss:$8 sps:$4 sm:$0xff]  }
0x1a3c   :  { %v3931_v30 = vrot.slane %v3930_v11, 2 }
0x1a55   :  { %v3804_v13 = vpop.xlane.xlu0 %3803 }
0x1a56   :  { %v3814_v28 = vmul.f32 0.03125, %v3804_v13 }
0x1a58   :  { %v3822_v6 = vadd.f32 1e-05, %v3814_v28 }
0x1a59   :  { %v3798_v23 = vpop.xlane.xlu0 %3797 }
0x1a5a   :  { %7900 = vrsqrt.f32 %v3822_v6  ;;  %v3812_v38 = vmul.f32 0.03125, %v3798_v23 }
0x1a5c   :  { %v3820_v61 = vadd.f32 1e-05, %v3812_v38 }
0x1a5d   :  { %v3807_v15 = vpop.xlane.xlu1 %3806  ;;  %v3871_v3 = vpop.permute.xlu0 %3870 }
0x1a5e   :  { %7902 = vrsqrt.f32 %v3820_v61  ;;  %v3815_v57 = vmul.f32 0.03125, %v3807_v15  ;;  %v3909_v49 = vmul.f32 %v3871_v3, %v3856_v7  ;;  %v3932_v15 = vadd.f32 %v3931_v30, %v3930_v11  ;;  %v7538_v11 = vld [vmem:[#allocation3 + $0x60] ss:$8 sps:$4 sm:$0xff]  }
0x1a60   :  { %v3823_v54 = vadd.f32 1e-05, %v3815_v57  ;;  %v3917_v27 = vsel %vm67_vm0, %v3909_v49, 0.0  ;;  %v3933_v53 = vrot.slane %v3932_v15, 1 }
0x1a61   :  { %v3801_v36 = vpop.xlane.xlu1 %3800  ;;  %v3919_v29 = vadd.f32 %v3918_v56, %v3917_v27  ;;  %v3893_v43 = vpop.permute.xlu0 %3892 }
0x1a62   :  { %7904 = vrsqrt.f32 %v3823_v54  ;;  %v3813_v34 = vmul.f32 0.03125, %v3801_v36 }
0x1a63   :  { %v3920_v5 = vrot.slane %v3919_v29, 4 }
0x1a64   :  { %v7901_v44 = vpop.eup %7900  ;;  %v3821_v24 = vadd.f32 1e-05, %v3813_v34  ;;  %v3934_v34 = vadd.f32 %v3933_v53, %v3932_v15 }
0x1a65   :  { %v3838_v25 = vmul.f32 %v7901_v44, %v9232_v2  ;;  %v3904_v2 = vpop.permute.xlu0 %3903  ;;  %v3921_v59 = vadd.f32 %v3920_v5, %v3919_v29  ;;  %v3908_v31 = vpop.permute.xlu1 %3907 }
0x1a66   :  { %7906 = vrsqrt.f32 %v3821_v24  ;;  %v3954_v24 = vpack.c.bf16 %v3934_v34, %v3934_v34 }
0x1a67   :  { %v3850_v14 = vmul.f32 %v6624_v46, %v3838_v25 }
0x1a68   :  { %v7903_v35 = vpop.eup %7902  ;;  %v3966_v29 = vunpack.c.l.b16 %v3954_v24 }
0x1a69   :  { %v3836_v16 = vmul.f32 %v7903_v35, %v9230_v37  ;;  %v3862_v0 = vadd.f32 %v6625_v21, %v3850_v14  ;;  %v3922_v37 = vrot.slane %v3921_v59, 2 }
0x1a6b   :  { %v3848_v41 = vmul.f32 %v6624_v46, %v3836_v16  ;;  %v3915_v28 = vmul.f32 %v3904_v2, %v3862_v0  ;;  %v3923_v55 = vadd.f32 %v3922_v37, %v3921_v59  ;;  %v7534_v2 = vld [vmem:[#allocation3 + $0x20] ss:$8 sps:$4 sm:$0xff]   ;;  %v7535_v59 = vld [vmem:[#allocation3 + $0x30] ss:$8 sps:$4 sm:$0xff]  }
0x1a6c   :  { %v7905_v10 = vpop.eup %7904  ;;  %v4031_v37 = vld [vmem:[%s9673_s4] sm:$0xff] }
0x1a6d   :  { %v3839_v8 = vmul.f32 %v7905_v10, %v9236_v45  ;;  %v3860_v17 = vadd.f32 %v6625_v21, %v3848_v41  ;;  %v3944_v38 = vsel %vm67_vm0, %v3915_v28, 0.0  ;;  %v3924_v57 = vrot.slane %v3923_v55, 1  ;;  %v7542_v28 = vld [vmem:[#allocation3 + $0xa0] ss:$8 sps:$4 sm:$0xff]  }
0x1a6f   :  { %v3851_v50 = vmul.f32 %v6624_v46, %v3839_v8  ;;  %v3913_v52 = vmul.f32 %v3893_v43, %v3860_v17  ;;  %v3925_v62 = vadd.f32 %v3924_v57, %v3923_v55  ;;  %v4034_v43 = vld [vmem:[%s9673_s4 + $0x18] sm:$0xff] }
0x1a70   :  { %v7907_v9 = vpop.eup %7906  ;;  %v4036_v41 = vpack.c.bf16 %v4034_v43, %v4032_v33  ;;  %v7533_v8 = vld [vmem:[#allocation3 + $0x10] ss:$8 sps:$4 sm:$0xff]  }
0x1a71   :  { %v3837_v13 = vmul.f32 %v7907_v9, %v9241_v60  ;;  %v3863_v20 = vadd.f32 %v6625_v21, %v3851_v50  ;;  %v3935_v3 = vsel %vm67_vm0, %v3913_v52, 0.0  ;;  %v7536_v50 = vld [vmem:[#allocation3 + $0x40] ss:$8 sps:$4 sm:$0xff]   ;;  %v7537_v9 = vld [vmem:[#allocation3 + $0x50] ss:$8 sps:$4 sm:$0xff]  }
0x1a72   :  { %v7541_v17 = vld [vmem:[#allocation3 + $0x90] ss:$8 sps:$4 sm:$0xff]  }
0x1a73   :  { %v3849_v22 = vmul.f32 %v6624_v46, %v3837_v13  ;;  %v3916_v6 = vmul.f32 %v3908_v31, %v3863_v20  ;;  %v7539_v31 = vld [vmem:[#allocation3 + $0x70] ss:$8 sps:$4 sm:$0xff]   ;;  %v7540_v13 = vld [vmem:[#allocation3 + $0x80] ss:$8 sps:$4 sm:$0xff]  }
0x1a74   :  { %v7543_v20 = vld [vmem:[#allocation3 + $0xb0] ss:$8 sps:$4 sm:$0xff]  }
0x1a75   :  { %v3861_v23 = vadd.f32 %v6625_v21, %v3849_v22  ;;  %v3945_v45 = vsel %vm67_vm0, %v3916_v6, 0.0  ;;  %v4033_v22 = vld [vmem:[%s9673_s4 + $0x10] sm:$0xff] }
0x1a76   :  { %v3946_v42 = vadd.f32 %v3945_v45, %v3944_v38  ;;  %v4035_v6 = vpack.c.bf16 %v4033_v22, %v4031_v37  ;;  %v4178_v45 = vld [vmem:[%s9672_s3] sm:$0xff] }
0x1a77   :  { %v3914_v61 = vmul.f32 %v9267_v40, %v3861_v23  ;;  %v3953_v40 = vpack.c.bf16 %v3925_v62, %v3925_v62  ;;  %v7552_v37 = vld [vmem:[#allocation3 + $0xe4] ss:$8 sps:$4 sm:$0xff]   ;;  %v7550_v22 = vld [vmem:[#allocation3 + $0xe0] ss:$8 sps:$4 sm:$0xff]  }
0x1a78   :  { %v3947_v18 = vrot.slane %v3946_v42, 4 }
0x1a79   :  { %v3936_v60 = vsel %vm67_vm0, %v3914_v61, 0.0  ;;  %v3965_v25 = vunpack.c.l.b16 %v3953_v40 }
0x1a7a   :  { %v3937_v4 = vadd.f32 %v3936_v60, %v3935_v3  ;;  %v3948_v46 = vadd.f32 %v3947_v18, %v3946_v42 }
0x1a7b   :  { %v3970_v16 = vsel %vm3969_vm8, %v3966_v29, %v3965_v25  ;;  %v4181_v25 = vld [vmem:[%s9672_s3 + $0x20] ss:$0 sm:$0xff] }
0x1a7c   :  { %v3938_v7 = vrot.slane %v3937_v4, 4  ;;  %v3949_v21 = vrot.slane %v3948_v46, 2 }
0x1a7e   :  { %v3939_v54 = vadd.f32 %v3938_v7, %v3937_v4  ;;  %v3950_v49 = vadd.f32 %v3949_v21, %v3948_v46 }
0x1a80   :  { %v3940_v36 = vrot.slane %v3939_v54, 2  ;;  %v3951_v63 = vrot.slane %v3950_v49, 1 }
0x1a82   :  { %v3941_v47 = vadd.f32 %v3940_v36, %v3939_v54  ;;  %v3952_v44 = vadd.f32 %v3951_v63, %v3950_v49 }
0x1a84   :  { %v3942_v27 = vrot.slane %v3941_v47, 1  ;;  %v3956_v56 = vpack.c.bf16 %v3952_v44, %v3952_v44 }
0x1a86   :  { %v3943_v39 = vadd.f32 %v3942_v27, %v3941_v47  ;;  %v3968_v14 = vunpack.c.l.b16 %v3956_v56 }
0x1a88   :  { %v3955_v12 = vpack.c.bf16 %v3943_v39, %v3943_v39 }
0x1a8a   :  { %v3967_v35 = vunpack.c.l.b16 %v3955_v12  ;;  %v4182_v12 = vld [vmem:[%s9672_s3 + $0x30] ss:$0 sm:$0xff] }
0x1a8c   :  { %v3972_v5 = vsel %vm3971_vm9, %v3967_v35, %v3970_v16 }
0x1a8d   :  { %v3974_v10 = vsel %vm3973_vm10, %v3968_v14, %v3972_v5 }
0x1a8e   :  { %v3975_v0 = vpack.c.b16 %v3974_v10, %v3974_v10 }
0x1a90   :  { %7292 = vmatmul.mubr.msk.bf16.vlgmr.msra.gmra.mrb[100].mxu1 %vm67_vm0, %v3975_v0 }
0x1a91   :  { %4138 = vmatpush1.bf16.msra.mxu1 %v7532_v1  ;;  %6641 = vmatprep.mubr.msk.bf16.mxu1 %vm4133_vm11, %v4036_v41 }
0x1a92   :  { %4139 = vmatprep.subr.bf16.mxu1 %v8067_v58 }
0x1a95   :  { %4140 = vmatpush1.bf16.msra.mxu1 %v7533_v8 }
0x1a96   :  { %4141 = vmatprep.subr.bf16.mxu1 %v8067_v58 }
0x1a99   :  { %4142 = vmatpush1.bf16.msra.mxu1 %v7534_v2 }
0x1a9a   :  { %4143 = vmatprep.subr.bf16.mxu1 %v8067_v58 }
0x1a9d   :  { %4144 = vmatpush1.bf16.msra.mxu1 %v7535_v59 }
0x1a9e   :  { %4145 = vmatprep.subr.bf16.mxu1 %v8067_v58 }
0x1aa1   :  { %4146 = vmatpush1.bf16.msra.mxu1 %v7536_v50 }
0x1aa2   :  { %4147 = vmatprep.subr.bf16.mxu1 %v8067_v58 }
0x1aa5   :  { %4148 = vmatpush1.bf16.msra.mxu1 %v7537_v9 }
0x1aa6   :  { %4149 = vmatprep.subr.bf16.mxu1 %v8067_v58 }
0x1aa9   :  { %4150 = vmatpush1.bf16.msra.mxu1 %v7538_v11 }
0x1aaa   :  { %4151 = vmatprep.subr.bf16.mxu1 %v8067_v58 }
0x1aad   :  { %4152 = vmatpush1.bf16.msra.mxu1 %v7539_v31 }
0x1aae   :  { %4153 = vmatprep.subr.bf16.mxu1 %v8067_v58 }
0x1ab1   :  { %4154 = vmatpush1.bf16.msra.mxu1 %v7540_v13  ;;  %v7546_v13 = vld [vmem:[#allocation3 + $0xc4] ss:$8 sps:$4 sm:$0xff]  }
0x1ab2   :  { %4155 = vmatprep.subr.bf16.mxu1 %v8067_v58  ;;  %4313 = vmatprep.subr.bf16.mxu0 %v7546_v13 }
0x1ab5   :  { %4156 = vmatpush1.bf16.msra.mxu1 %v7541_v17  ;;  %v7544_v17 = vld [vmem:[#allocation3 + $0xc0] ss:$8 sps:$4 sm:$0xff]  }
0x1ab6   :  { %4157 = vmatprep.subr.bf16.mxu1 %v8067_v58  ;;  %4314 = vmatpush1.bf16.msra.mxu0 %v7544_v17 }
0x1ab9   :  { %4158 = vmatpush1.bf16.msra.mxu1 %v7542_v28  ;;  %v7549_v28 = vld [vmem:[#allocation3 + $0xd4] ss:$8 sps:$4 sm:$0xff]  }
0x1aba   :  { %4159 = vmatprep.subr.bf16.mxu1 %v8067_v58  ;;  %4315 = vmatprep.subr.bf16.mxu0 %v7549_v28 }
0x1abd   :  { %4160 = vmatpush1.bf16.msra.mxu1 %v7543_v20  ;;  %v7547_v20 = vld [vmem:[#allocation3 + $0xd0] ss:$8 sps:$4 sm:$0xff]  }
0x1abe   :  { %7313 = vmatprep.subr.bf16.mxu1 %v8057_v48  ;;  %4316 = vmatpush1.bf16.msra.mxu0 %v7547_v20 }
0x1abf   :  { %4317 = vmatprep.subr.bf16.mxu0 %v7552_v37 }
0x1ac0   :  { %4170 = vmatmul.mubr.bf16.vlgmr.msra.gmra.mrb[104].mxu1 %v4035_v6  ;;  %v7555_v6 = vld [vmem:[#allocation3 + $0xf4] ss:$8 sps:$4 sm:$0xff]  }
0x1ac1   :  { %7315 = vmatprep.mubr.msk.bf16.mxu1 %vm8058_vm1, %v8057_v48 }
0x1ac2   :  { %4318 = vmatpush1.bf16.msra.mxu0 %v7550_v22 }
0x1ac3   :  { %4319 = vmatprep.subr.bf16.mxu0 %v7555_v6 }
0x1b63   :  { %v9314_v30 = vpop.f32.mrb[100].mxu1 }
0x1b64   :  { %v7293_v23 = vpop.f32.mrb[101].mxu1 }
0x1b65   :  { %v4028_v52 = vpop.f32.mrb[102].mxu1  ;;  %v7553_v23 = vld [vmem:[#allocation3 + $0xf0] ss:$8 sps:$4 sm:$0xff]  }
0x1b66   :  { %v7294_v38 = vpop.f32.mrb[103].mxu1  ;;  %4320 = vmatpush1.bf16.msra.mxu0 %v7553_v23 }
0x1b67   :  { %7295 = vmatprep.subr.bf16.mxu0 %v8057_v48 }
0x1b93   :  { %v4171_v42 = vpop.f32.mrb[104].mxu1 }
0x1b94   :  { %v4179_v55 = vadd.f32 %v4178_v45, %v4171_v42  ;;  %v4173_v61 = vpop.f32.mrb[105].mxu1 }
0x1b95   :  { %v4174_v18 = vpop.f32.mrb[106].mxu1 }
0x1b96   :  { %v4180_v15 = vadd.f32 %v4178_v45, %v4174_v18  ;;  %v4183_v60 = vsel %vm4133_vm11, %v4179_v55, 0.0  ;;  %v4176_v3 = vpop.f32.mrb[107].mxu1 }
0x1b97   :  { %4184 = vadd.xlane.f32.xlu0 %v4183_v60  ;;  %v4216_v60 = vld [vmem:[%s9672_s3 + $0x40] ss:$0 sm:$0xff] }
0x1b98   :  { %v4186_v4 = vsel %vm4133_vm11, %v4180_v15, 0.0 }
0x1b99   :  { %4187 = vadd.xlane.f32.xlu1 %v4186_v4 }
0x1c24   :  { %v4185_v46 = vpop.xlane.xlu0 %4184 }
0x1c25   :  { %v4190_v57 = vmul.f32 0.015625, %v4185_v46 }
0x1c26   :  { %v4188_v7 = vpop.xlane.xlu1 %4187 }
0x1c27   :  { %v4192_v21 = vsub.f32 %v4179_v55, %v4190_v57  ;;  %v4191_v53 = vmul.f32 0.015625, %v4188_v7  ;;  %v4217_v57 = vld [vmem:[%s9672_s3 + $0x50] ss:$0 sm:$0xff] }
0x1c29   :  { %v4193_v54 = vsub.f32 %v4180_v15, %v4191_v53  ;;  %v4194_v49 = vmul.f32 %v4192_v21, %v4192_v21 }
0x1c2b   :  { %v4196_v62 = vsel %vm4133_vm11, %v4194_v49, 0.0  ;;  %v4195_v36 = vmul.f32 %v4193_v54, %v4193_v54  ;;  %v6642_v49 = vld [vmem:[%s9672_s3 + $0x60] ss:$8 sm:$0x3] }
0x1c2c   :  { %4197 = vadd.xlane.f32.xlu0 %v4196_v62  ;;  %v4263_v62 = vrot.slane %v6642_v49, %v9219_v51 }
0x1c2d   :  { %v4199_v63 = vsel %vm4133_vm11, %v4195_v36, 0.0  ;;  %v4267_v36 = vrot.slane %v6642_v49, %v9226_v19 }
0x1c30   :  { %4200 = vadd.xlane.f32.xlu0 %v4199_v63 }
0x1cb9   :  { %v4198_v34 = vpop.xlane.xlu0 %4197 }
0x1cba   :  { %v4202_v47 = vmul.f32 0.015625, %v4198_v34 }
0x1cbc   :  { %v4204_v40 = vadd.f32 1e-05, %v4202_v47 }
0x1cbd   :  { %v4201_v44 = vpop.xlane.xlu0 %4200 }
0x1cbe   :  { %7908 = vrsqrt.f32 %v4204_v40  ;;  %v4203_v27 = vmul.f32 0.015625, %v4201_v44 }
0x1cc0   :  { %v4205_v24 = vadd.f32 1e-05, %v4203_v27 }
0x1cc2   :  { %7910 = vrsqrt.f32 %v4205_v24 }
0x1cc8   :  { %v7909_v39 = vpop.eup %7908 }
0x1cc9   :  { %v4208_v56 = vmul.f32 %v7909_v39, %v4192_v21 }
0x1ccb   :  { %v4210_v29 = vmul.f32 %v4208_v56, %v4181_v25 }
0x1ccc   :  { %v7911_v35 = vpop.eup %7910 }
0x1ccd   :  { %v9329_v33 = vadd.f32 %v4210_v29, %v4182_v12  ;;  %v4209_v43 = vmul.f32 %v7911_v35, %v4193_v54 }
0x1ccf   :  { %v4218_v16 = vsel %vm4133_vm11, %v9329_v33, 0.0  ;;  %v4211_v14 = vmul.f32 %v4209_v43, %v4181_v25 }
0x1cd0   :  { %4219 = vadd.xlane.f32.xlu0 %v4218_v16 }
0x1cd1   :  { %v9333_v5 = vadd.f32 %v4211_v14, %v4182_v12 }
0x1cd3   :  { %v4221_v10 = vsel %vm4133_vm11, %v9333_v5, 0.0 }
0x1cd4   :  { %4222 = vadd.xlane.f32.xlu1 %v4221_v10 }
0x1d5d   :  { %v4220_v1 = vpop.xlane.xlu0 %4219 }
0x1d5e   :  { %v4224_v41 = vmul.f32 0.015625, %v4220_v1 }
0x1d60   :  { %v4226_v0 = vsub.f32 %v9329_v33, %v4224_v41  ;;  %v9384_v41 = vsel %vm4214_vm13, -1e+30, %v8057_v48 }
0x1d61   :  { %v4223_v8 = vpop.xlane.xlu1 %4222 }
0x1d62   :  { %v4225_v2 = vmul.f32 0.015625, %v4223_v8  ;;  %v4228_v59 = vmul.f32 %v4226_v0, %v4226_v0 }
0x1d64   :  { %v4227_v50 = vsub.f32 %v9333_v5, %v4225_v2  ;;  %v4230_v9 = vsel %vm4133_vm11, %v4228_v59, 0.0 }
0x1d65   :  { %4231 = vadd.xlane.f32.xlu0 %v4230_v9 }
0x1d66   :  { %v4229_v11 = vmul.f32 %v4227_v50, %v4227_v50 }
0x1d68   :  { %v4233_v31 = vsel %vm4133_vm11, %v4229_v11, 0.0 }
0x1d69   :  { %4234 = vadd.xlane.f32.xlu1 %v4233_v31 }
0x1df2   :  { %v4232_v52 = vpop.xlane.xlu0 %4231 }
0x1df3   :  { %v4236_v38 = vmul.f32 0.015625, %v4232_v52 }
0x1df5   :  { %v4238_v45 = vadd.f32 1e-05, %v4236_v38 }
0x1df6   :  { %v4235_v42 = vpop.xlane.xlu1 %4234 }
0x1df7   :  { %7912 = vrsqrt.f32 %v4238_v45  ;;  %v4237_v55 = vmul.f32 0.015625, %v4235_v42 }
0x1df9   :  { %v4239_v61 = vadd.f32 1e-05, %v4237_v55 }
0x1dfb   :  { %7914 = vrsqrt.f32 %v4239_v61 }
0x1e01   :  { %v7913_v18 = vpop.eup %7912 }
0x1e02   :  { %v4242_v15 = vmul.f32 %v7913_v18, %v4226_v0 }
0x1e04   :  { %v4244_v4 = vmul.f32 %v4242_v15, %v4216_v60 }
0x1e05   :  { %v7915_v3 = vpop.eup %7914 }
0x1e06   :  { %v4243_v46 = vmul.f32 %v7915_v3, %v4227_v50  ;;  %v4246_v21 = vadd.f32 %v4244_v4, %v4217_v57 }
0x1e08   :  { %v4245_v7 = vmul.f32 %v4243_v46, %v4216_v60 }
0x1e0a   :  { %v4247_v53 = vadd.f32 %v4245_v7, %v4217_v57 }
0x1e0c   :  { %v4248_v54 = vpack.c.bf16 %v4247_v53, %v4246_v21 }
0x1e0e   :  { %6651 = vmatmul.mubr.msk.bf16.vlgmr.msra.gmra.mrb[92].mxu0 %vm4133_vm11, %v4248_v54 }
0x1e0f   :  { %7297 = vmatprep.mubr.msk.bf16.mxu0 %vm8058_vm1, %v8057_v48 }
0x1ee1   :  { %v4347_v63 = vpop.f32.mrb[92].mxu0 }
0x1ee2   :  { %v4348_v34 = vadd.f32 %v4347_v63, %v4263_v62  ;;  %v4349_v47 = vpop.f32.mrb[93].mxu0 }
0x1ee3   :  { %v4350_v40 = vadd.f32 %v4349_v47, %v4267_v36  ;;  %v4351_v44 = vpop.f32.mrb[94].mxu0 }
0x1ee4   :  { %v9356_v27 = vpack.c.bf16 %v4348_v34, %v4348_v34  ;;  %v4352_v24 = vadd.f32 %v4351_v44, %v4263_v62  ;;  %v4353_v39 = vpop.f32.mrb[95].mxu0 }
0x1ee5   :  { %v4354_v25 = vadd.f32 %v4353_v39, %v4267_v36  ;;  %v9374_v10 = vpack.c.bf16 %v4350_v40, %v4350_v40 }
0x1ee6   :  { %v4358_v56 = vpack.c.bf16 %v4352_v24, %v4352_v24  ;;  %4361 = vrot.lane.b32.xlu0 %v9356_v27, %s8061_s13 }
0x1ee7   :  { %v9360_v12 = vpack.c.bf16 %v4354_v25, %v4354_v25  ;;  %v4492_v1 = vsel %vm4490_vm12, %v9374_v10, 0 }
0x1ee8   :  { %4410 = vrot.lane.b32.xlu1 %v4358_v56, %s8061_s13 }
0x1ee9   :  { %v4538_v29 = vsel %vm4490_vm12, %v9360_v12, 0 }
0x1eea   :  { %7314 = vmatpush3.bf16.msra.mxu1 %v4538_v29 }
0x1eeb   :  { %7325 = vmatprep.subr.bf16.mxu1 %v8057_v48 }
0x1f58   :  { %v4362_v35 = vpop.permute.xlu0 %4361 }
0x1f59   :  { %v4367_v43 = vsel %vm67_vm0, %v4362_v35, 0 }
0x1f5a   :  { %7296 = vmatpush3.bf16.xpose.msra.mxu0 %v4367_v43  ;;  %v4411_v16 = vpop.permute.xlu1 %4410 }
0x1f5b   :  { %7301 = vmatprep.subr.bf16.mxu0 %v8057_v48  ;;  %v4416_v14 = vsel %vm67_vm0, %v4411_v16, 0 }
0x1f61   :  { %7298 = vmatmul.mubr.msk.bf16.vlgmr.msra.gmra.mrb[96].mxu0 %vm67_vm0, %v9356_v27 }
0x1f62   :  { %7302 = vmatpush3.bf16.xpose.msra.mxu0 %v4416_v14  ;;  %7303 = vmatprep.mubr.msk.bf16.mxu0 %vm8058_vm1, %v8057_v48 }
0x1f63   :  { %7307 = vmatprep.subr.bf16.mxu0 %v8057_v48 }
0x1f69   :  { %7304 = vmatmul.mubr.msk.bf16.vlgmr.msra.gmra.mrb[100].mxu0 %vm67_vm0, %v4358_v56 }
0x1f6a   :  { %7308 = vmatpush3.bf16.msra.mxu0 %v4492_v1  ;;  %7309 = vmatprep.mubr.msk.bf16.mxu0 %vm8058_vm1, %v8057_v48 }
0x1f6b   :  { %7319 = vmatprep.subr.bf16.mxu0 %v8057_v48 }
0x2034   :  { %v4403_v0 = vpop.f32.mrb[96].mxu0 }
0x2035   :  { %v4458_v8 = vmul.f32 0.17677669, %v4403_v0  ;;  %v7299_v2 = vpop.f32.mrb[97].mxu0 }
0x2036   :  { %v4406_v59 = vpop.f32.mrb[98].mxu0 }
0x2037   :  { %v4460_v50 = vadd.f32 %v4458_v8, %v9384_v41  ;;  %v7300_v9 = vpop.f32.mrb[99].mxu0 }
0x2039   :  { %v4463_v11 = vsel %vm4462_vm14, %v4460_v50, -inf }
0x203a   :  { %4464 = vmax.xlane.f32.xlu1 %v4463_v11 }
0x203c   :  { %v4452_v31 = vpop.f32.mrb[100].mxu0 }
0x203d   :  { %v4459_v13 = vmul.f32 0.17677669, %v4452_v31  ;;  %v7305_v17 = vpop.f32.mrb[101].mxu0 }
0x203e   :  { %v4455_v28 = vpop.f32.mrb[102].mxu0 }
0x203f   :  { %v4461_v26 = vadd.f32 %v4459_v13, %v9384_v41  ;;  %v7306_v20 = vpop.f32.mrb[103].mxu0 }
0x2041   :  { %v4466_v37 = vsel %vm4462_vm14, %v4461_v26, -inf }
0x2042   :  { %4467 = vmax.xlane.f32.xlu0 %v4466_v37 }
0x204b   :  { %4632 = vrot.lane.b32.xlu1 %v4358_v56, %s8068_s11 }
0x20c7   :  { %v4465_v22 = vpop.xlane.xlu1 %4464 }
0x20c8   :  { %v4469_v6 = vsub.f32 %v4460_v50, %v4465_v22 }
0x20ca   :  { %v4471_v23 = vmul.f32 1.442695, %v4469_v6 }
0x20cb   :  { %v4633_v60 = vpop.permute.xlu1 %4632 }
0x20cc   :  { %7916 = vpow2.f32 %v4471_v23  ;;  %v4638_v36 = vsel %vm67_vm0, %v4633_v60, 0 }
0x20cf   :  { %v4468_v52 = vpop.xlane.xlu0 %4467 }
0x20d0   :  { %v4470_v38 = vsub.f32 %v4461_v26, %v4468_v52 }
0x20d2   :  { %v4473_v45 = vmul.f32 1.442695, %v4470_v38 }
0x20d4   :  { %7918 = vpow2.f32 %v4473_v45 }
0x20d6   :  { %v7917_v42 = vpop.eup %7916 }
0x20d7   :  { %v4475_v55 = vsel %vm4462_vm14, %v7917_v42, 0.0 }
0x20d8   :  { %4476 = vadd.xlane.f32.xlu0 %v4475_v55 }
0x20de   :  { %v7919_v61 = vpop.eup %7918 }
0x20df   :  { %v4478_v18 = vsel %vm4462_vm14, %v7919_v61, 0.0 }
0x20e0   :  { %4479 = vadd.xlane.f32.xlu1 %v4478_v18 }
0x20ee   :  { %4582 = vrot.lane.b32.xlu0 %v9356_v27, %s8068_s11 }
0x20f1   :  { %4580 = vrot.lane.b32.xlu1 %v9356_v27, %s8059_s12 }
0x20f5   :  { %4630 = vrot.lane.b32.xlu1 %v4358_v56, %s8059_s12 }
0x2165   :  { %v4477_v15 = vpop.xlane.xlu0 %4476 }
0x2166   :  { %7920 = vrcp.f32 %v4477_v15 }
0x2169   :  { %v4583_v57 = vpop.permute.xlu0 %4582 }
0x216a   :  { %v4588_v21 = vsel %vm67_vm0, %v4583_v57, 0  ;;  %v7558_v57 = vld [vmem:[#allocation3 + $0x120] ss:$8 sps:$4 sm:$0xff]  }
0x216d   :  { %v4480_v3 = vpop.xlane.xlu1 %4479 }
0x216e   :  { %7922 = vrcp.f32 %v4480_v3 }
0x2170   :  { %v7921_v4 = vpop.eup %7920 }
0x2171   :  { %v4483_v46 = vmul.f32 %v7921_v4, %v7917_v42  ;;  %v4581_v62 = vpop.permute.xlu1 %4580  ;;  %v7556_v4 = vld [vmem:[#allocation3 + $0x100] ss:$8 sps:$4 sm:$0xff]  }
0x2173   :  { %v4485_v7 = vpack.c.bf16 %v4483_v46, %v4483_v46  ;;  %v7557_v46 = vld [vmem:[#allocation3 + $0x110] ss:$8 sps:$4 sm:$0xff]  }
0x2175   :  { %7310 = vmatmul.mubr.msk.bf16.vlgmr.msra.gmra.mrb[104].mxu0 %vm4462_vm14, %v4485_v7  ;;  %v4631_v63 = vpop.permute.xlu1 %4630  ;;  %v7559_v7 = vld [vmem:[#allocation3 + $0x130] ss:$8 sps:$4 sm:$0xff]  }
0x2176   :  { %7320 = vmatpush3.bf16.xpose.msra.mxu0 %v4588_v21  ;;  %7321 = vmatprep.mubr.msk.bf16.mxu0 %vm8058_vm1, %v8057_v48 }
0x2177   :  { %7331 = vmatprep.subr.bf16.mxu0 %v8057_v48 }
0x2178   :  { %v7923_v53 = vpop.eup %7922 }
0x2179   :  { %v4484_v54 = vmul.f32 %v7923_v53, %v7919_v61 }
0x217b   :  { %v4486_v49 = vpack.c.bf16 %v4484_v54, %v4484_v54 }
0x217d   :  { %7316 = vmatmul.mubr.msk.bf16.vlgmr.msra.gmra.mrb[108].mxu1 %vm4462_vm14, %v4486_v49  ;;  %7322 = vmatmul.mubr.msk.bf16.vlgmr.msra.gmra.mrb[108].mxu0 %vm67_vm0, %v4581_v62 }
0x217e   :  { %7326 = vmatpush3.bf16.xpose.msra.mxu1 %v4638_v36  ;;  %7327 = vmatprep.mubr.msk.bf16.mxu1 %vm8058_vm1, %v8057_v48 }
0x217f   :  { %7337 = vmatprep.subr.bf16.mxu1 %v8057_v48  ;;  %7333 = vmatprep.mubr.msk.bf16.mxu0 %vm8058_vm1, %v8057_v48 }
0x2185   :  { %7328 = vmatmul.mubr.msk.bf16.vlgmr.msra.gmra.mrb[112].mxu1 %vm67_vm0, %v4631_v63 }
0x2186   :  { %7339 = vmatprep.mubr.msk.bf16.mxu1 %vm8058_vm1, %v8057_v48 }
0x2248   :  { %v9414_v34 = vpop.f32.mrb[104].mxu0 }
0x2249   :  { %v7311_v47 = vpop.f32.mrb[105].mxu0 }
0x224a   :  { %v4531_v40 = vpop.f32.mrb[106].mxu0 }
0x224b   :  { %v7312_v44 = vpop.f32.mrb[107].mxu0 }
0x2250   :  { %v9416_v27 = vpop.f32.mrb[108].mxu1  ;;  %v4624_v24 = vpop.f32.mrb[108].mxu0 }
0x2251   :  { %v4680_v39 = vmul.f32 0.17677669, %v4624_v24  ;;  %v7317_v25 = vpop.f32.mrb[109].mxu1  ;;  %v7323_v56 = vpop.f32.mrb[109].mxu0 }
0x2252   :  { %v4577_v29 = vpop.f32.mrb[110].mxu1  ;;  %v4627_v35 = vpop.f32.mrb[110].mxu0 }
0x2253   :  { %v4682_v43 = vadd.f32 %v4680_v39, %v9384_v41  ;;  %v7318_v16 = vpop.f32.mrb[111].mxu1  ;;  %v7324_v14 = vpop.f32.mrb[111].mxu0  ;;  %v4825_v35 = vld [vmem:[%s9672_s3 + $0x70] ss:$0 sm:$0xff] }
0x2255   :  { %v4684_v1 = vsel %vm4462_vm14, %v4682_v43, -inf }
0x2256   :  { %4685 = vmax.xlane.f32.xlu0 %v4684_v1 }
0x2258   :  { %v4674_v0 = vpop.f32.mrb[112].mxu1 }
0x2259   :  { %v4681_v8 = vmul.f32 0.17677669, %v4674_v0  ;;  %v7329_v2 = vpop.f32.mrb[113].mxu1 }
0x225a   :  { %v4677_v59 = vpop.f32.mrb[114].mxu1 }
0x225b   :  { %v4683_v50 = vadd.f32 %v4681_v8, %v9384_v41  ;;  %v7330_v9 = vpop.f32.mrb[115].mxu1 }
0x225d   :  { %v4687_v11 = vsel %vm4462_vm14, %v4683_v50, -inf }
0x225e   :  { %4688 = vmax.xlane.f32.xlu1 %v4687_v11 }
0x226f   :  { %4758 = vrot.lane.b32.xlu1 %v9360_v12, %s8059_s12 }
0x22e3   :  { %v4686_v31 = vpop.xlane.xlu0 %4685 }
0x22e4   :  { %v4690_v13 = vsub.f32 %v4682_v43, %v4686_v31 }
0x22e6   :  { %v4692_v17 = vmul.f32 1.442695, %v4690_v13 }
0x22e8   :  { %7924 = vpow2.f32 %v4692_v17 }
0x22eb   :  { %v4689_v28 = vpop.xlane.xlu1 %4688 }
0x22ec   :  { %v4691_v26 = vsub.f32 %v4683_v50, %v4689_v28 }
0x22ee   :  { %v4694_v20 = vmul.f32 1.442695, %v4691_v26 }
0x22ef   :  { %v4759_v37 = vpop.permute.xlu1 %4758 }
0x22f0   :  { %7926 = vpow2.f32 %v4694_v20  ;;  %v4764_v22 = vsel %vm4490_vm12, %v4759_v37, 0  ;;  %v7562_v20 = vld [vmem:[#allocation3 + $0x144] ss:$8 sps:$4 sm:$0xff]   ;;  %v7560_v37 = vld [vmem:[#allocation3 + $0x140] ss:$8 sps:$4 sm:$0xff]  }
0x22f1   :  { %7338 = vmatpush3.bf16.msra.mxu1 %v4764_v22  ;;  %v7565_v22 = vld [vmem:[#allocation3 + $0x154] ss:$8 sps:$4 sm:$0xff]  }
0x22f2   :  { %v7925_v6 = vpop.eup %7924  ;;  %4993 = vmatprep.subr.bf16.mxu1 %v7562_v20 }
0x22f3   :  { %v4696_v23 = vsel %vm4462_vm14, %v7925_v6, 0.0 }
0x22f4   :  { %4697 = vadd.xlane.f32.xlu0 %v4696_v23  ;;  %v7568_v23 = vld [vmem:[#allocation3 + $0x164] ss:$8 sps:$4 sm:$0xff]  }
0x22fa   :  { %v7927_v52 = vpop.eup %7926 }
0x22fb   :  { %v4699_v38 = vsel %vm4462_vm14, %v7927_v52, 0.0 }
0x22fc   :  { %4700 = vadd.xlane.f32.xlu0 %v4699_v38  ;;  %v7569_v38 = vld [vmem:[#allocation3 + $0x170] ss:$8 sps:$4 sm:$0xff]  }
0x2312   :  { %4709 = vrot.lane.b32.xlu0 %v9374_v10, %s8059_s12 }
0x2381   :  { %v4698_v12 = vpop.xlane.xlu0 %4697 }
0x2382   :  { %7928 = vrcp.f32 %v4698_v12  ;;  %v7571_v12 = vld [vmem:[#allocation3 + $0x174] ss:$8 sps:$4 sm:$0xff]  }
0x2389   :  { %v4701_v45 = vpop.xlane.xlu0 %4700 }
0x238a   :  { %7930 = vrcp.f32 %v4701_v45 }
0x238c   :  { %v7929_v42 = vpop.eup %7928 }
0x238d   :  { %v4704_v55 = vmul.f32 %v7929_v42, %v7925_v6  ;;  %v4710_v61 = vpop.permute.xlu0 %4709  ;;  %v7563_v6 = vld [vmem:[#allocation3 + $0x150] ss:$8 sps:$4 sm:$0xff]  }
0x238e   :  { %v4715_v18 = vsel %vm4490_vm12, %v4710_v61, 0 }
0x238f   :  { %7332 = vmatpush3.bf16.msra.mxu0 %v4715_v18  ;;  %v4706_v15 = vpack.c.bf16 %v4704_v55, %v4704_v55 }
0x2390   :  { %7343 = vmatprep.subr.bf16.mxu0 %v8057_v48 }
0x2392   :  { %7334 = vmatmul.mubr.msk.bf16.vlgmr.msra.gmra.mrb[112].mxu0 %vm4462_vm14, %v4706_v15 }
0x2393   :  { %7351 = vmatprep.mubr.msk.bf16.mxu0 %vm8058_vm1, %v8057_v48  ;;  %7344 = vmatpush3.bf16.msra.mxu0 %v7556_v4 }
0x2394   :  { %v7931_v60 = vpop.eup %7930  ;;  %7345 = vmatprep.subr.bf16.mxu0 %v8057_v48 }
0x2395   :  { %v4705_v10 = vmul.f32 %v7931_v60, %v7927_v52  ;;  %v7566_v52 = vld [vmem:[#allocation3 + $0x160] ss:$8 sps:$4 sm:$0xff]  }
0x2397   :  { %v4707_v3 = vpack.c.bf16 %v4705_v10, %v4705_v10  ;;  %7346 = vmatpush3.bf16.msra.mxu0 %v7557_v46 }
0x2398   :  { %7347 = vmatprep.subr.bf16.mxu0 %v8057_v48 }
0x2399   :  { %7340 = vmatmul.mubr.msk.bf16.vlgmr.msra.gmra.mrb[116].mxu1 %vm4462_vm14, %v4707_v3  ;;  %v4896_v3 = vld [vmem:[%s9672_s3 + $0x80] ss:$0 sm:$0xff] }
0x239a   :  { %5025 = vmatprep.mubr.bf16.mxu1 %v8067_v58  ;;  %4994 = vmatpush1.bf16.msra.mxu1 %v7560_v37 }
0x239b   :  { %7348 = vmatpush3.bf16.msra.mxu0 %v7558_v57  ;;  %4995 = vmatprep.subr.bf16.mxu1 %v7565_v22 }
0x239c   :  { %7349 = vmatprep.subr.bf16.mxu0 %v8057_v48 }
0x239e   :  { %4996 = vmatpush1.bf16.msra.mxu1 %v7563_v6 }
0x239f   :  { %7350 = vmatpush3.bf16.msra.mxu0 %v7559_v7  ;;  %4997 = vmatprep.subr.bf16.mxu1 %v7568_v23  ;;  %v4897_v7 = vld [vmem:[%s9672_s3 + $0x90] ss:$0 sm:$0xff] }
0x23a2   :  { %4998 = vmatpush1.bf16.msra.mxu1 %v7566_v52 }
0x23a3   :  { %4999 = vmatprep.subr.bf16.mxu1 %v7571_v12 }
0x23a6   :  { %5000 = vmatpush1.bf16.msra.mxu1 %v7569_v38 }
0x2465   :  { %v4751_v21 = vpop.f32.mrb[112].mxu0 }
0x2466   :  { %v7335_v53 = vpop.f32.mrb[113].mxu0 }
0x2467   :  { %v4754_v54 = vpop.f32.mrb[114].mxu0 }
0x2468   :  { %v7336_v49 = vpop.f32.mrb[115].mxu0 }
0x246c   :  { %v4800_v62 = vpop.f32.mrb[116].mxu1 }
0x246d   :  { %v7492_v36 = vpack.i.bf16 %v4800_v62, %v4751_v21  ;;  %v7341_v63 = vpop.f32.mrb[117].mxu1  ;;  %v7572_v62 = vld [vmem:[#allocation3 + $0x200] ss:$8 sps:$4 sm:$0xff]  }
0x246e   :  { %v4803_v47 = vpop.f32.mrb[118].mxu1  ;;  %6903 = vmatprep.subr.bf16.mxu0 %v7572_v62  ;;  %v7574_v63 = vld [vmem:[#allocation3 + $0x210] ss:$8 sps:$4 sm:$0xff]  }
0x246f   :  { %7493 = vrot.lane.b32.xlu1 %v7492_v36, %s8068_s11  ;;  %v7342_v40 = vpop.f32.mrb[119].mxu1  ;;  %v7573_v36 = vld [vmem:[#allocation3 + $0x180] ss:$8 sps:$4 sm:$0xff]   ;;  %v7575_v47 = vld [vmem:[#allocation3 + $0x190] ss:$8 sps:$4 sm:$0xff]  }
0x2470   :  { %v7576_v40 = vld [vmem:[#allocation3 + $0x220] ss:$8 sps:$4 sm:$0xff]  }
0x24e1   :  { %v7494_v44 = vpop.permute.xlu1 %7493 }
0x24e2   :  { %v7496_v24 = vunpack.i.h.bf16 %v7494_v44  ;;  %v7495_v39 = vunpack.i.l.bf16 %v7494_v44  ;;  %v7577_v44 = vld [vmem:[#allocation3 + $0x1a0] ss:$8 sps:$4 sm:$0xff]  }
0x24e4   :  { %v4815_v25 = vsel %vm67_vm0, %v9416_v27, %v7496_v24  ;;  %v4814_v56 = vsel %vm67_vm0, %v9414_v34, %v7495_v39  ;;  %v7578_v24 = vld [vmem:[#allocation3 + $0x230] ss:$8 sps:$4 sm:$0xff]  }
0x24e5   :  { %v4816_v29 = vpack.c.bf16 %v4815_v25, %v4814_v56  ;;  %v7579_v39 = vld [vmem:[#allocation3 + $0x1b0] ss:$8 sps:$4 sm:$0xff]   ;;  %v7580_v25 = vld [vmem:[#allocation3 + $0x240] ss:$8 sps:$4 sm:$0xff]  }
0x24e6   :  { %v7581_v56 = vld [vmem:[#allocation3 + $0x1c0] ss:$8 sps:$4 sm:$0xff]  }
0x24e7   :  { %7352 = vmatmul.mubr.msk.bf16.vlgmr.msra.gmra.mrb[116].mxu0 %vm4133_vm11, %v4816_v29  ;;  %v7582_v29 = vld [vmem:[#allocation3 + $0x250] ss:$8 sps:$4 sm:$0xff]  }
0x24e8   :  { %6904 = vmatpush3.bf16.msra.mxu0 %v7573_v36 }
0x24e9   :  { %6905 = vmatprep.subr.bf16.mxu0 %v7574_v63 }
0x24ec   :  { %6906 = vmatpush3.bf16.msra.mxu0 %v7575_v47 }
0x24ed   :  { %6907 = vmatprep.subr.bf16.mxu0 %v7576_v40 }
0x24f0   :  { %6908 = vmatpush3.bf16.msra.mxu0 %v7577_v44 }
0x24f1   :  { %6909 = vmatprep.subr.bf16.mxu0 %v7578_v24 }
0x24f4   :  { %6910 = vmatpush3.bf16.msra.mxu0 %v7579_v39 }
0x24f5   :  { %6911 = vmatprep.subr.bf16.mxu0 %v7580_v25  ;;  %v5244_v25 = vld [vmem:[%s9672_s3 + $0x10] sm:$0xff] }
0x24f8   :  { %6912 = vmatpush3.bf16.msra.mxu0 %v7581_v56 }
0x24f9   :  { %6913 = vmatprep.subr.bf16.mxu0 %v7582_v29 }
0x25ba   :  { %v4887_v43 = vpop.f32.mrb[116].mxu0 }
0x25bb   :  { %v4888_v16 = vadd.f32 %v4887_v43, %v4825_v35  ;;  %v7353_v14 = vpop.f32.mrb[117].mxu0  ;;  %v7584_v43 = vld [vmem:[#allocation3 + $0x260] ss:$8 sps:$4 sm:$0xff]  }
0x25bc   :  { %v4890_v1 = vpop.f32.mrb[118].mxu0  ;;  %v7586_v14 = vld [vmem:[#allocation3 + $0x270] ss:$8 sps:$4 sm:$0xff]  }
0x25bd   :  { %v9449_v0 = vadd.f32 %v4888_v16, %v9329_v33  ;;  %v4891_v8 = vadd.f32 %v4890_v1, %v4825_v35  ;;  %v7354_v2 = vpop.f32.mrb[119].mxu0  ;;  %v7583_v35 = vld [vmem:[#allocation3 + $0x1d0] ss:$8 sps:$4 sm:$0xff]   ;;  %v7585_v16 = vld [vmem:[#allocation3 + $0x1e0] ss:$8 sps:$4 sm:$0xff]  }
0x25be   :  { %6914 = vmatpush3.bf16.msra.mxu0 %v7583_v35  ;;  %v7587_v1 = vld [vmem:[#allocation3 + $0x1f0] ss:$8 sps:$4 sm:$0xff]  }
0x25bf   :  { %v9452_v27 = vadd.f32 %v4891_v8, %v9333_v5  ;;  %v4898_v34 = vsel %vm4133_vm11, %v9449_v0, 0.0  ;;  %6915 = vmatprep.subr.bf16.mxu0 %v7584_v43  ;;  %v6665_v8 = vld [vmem:[%s9672_s3 + $0xa0] ss:$8 sm:$0x3] }
0x25c0   :  { %4899 = vadd.xlane.f32.xlu1 %v4898_v34  ;;  %v4943_v2 = vrot.slane %v6665_v8, %v9219_v51  ;;  %v4947_v34 = vrot.slane %v6665_v8, %v9226_v19 }
0x25c1   :  { %v4901_v59 = vsel %vm4133_vm11, %v9452_v27, 0.0 }
0x25c2   :  { %4902 = vadd.xlane.f32.xlu0 %v4901_v59  ;;  %6916 = vmatpush3.bf16.msra.mxu0 %v7585_v16 }
0x25c3   :  { %6917 = vmatprep.subr.bf16.mxu0 %v7586_v14 }
0x25c6   :  { %6918 = vmatpush3.bf16.msra.mxu0 %v7587_v1 }
0x25c7   :  { %7367 = vmatprep.subr.bf16.mxu0 %v8057_v48 }
0x264d   :  { %v4900_v50 = vpop.xlane.xlu1 %4899 }
0x264e   :  { %v4904_v9 = vmul.f32 0.015625, %v4900_v50 }
0x264f   :  { %v4903_v11 = vpop.xlane.xlu0 %4902 }
0x2650   :  { %v4906_v31 = vsub.f32 %v9449_v0, %v4904_v9  ;;  %v4905_v33 = vmul.f32 0.015625, %v4903_v11 }
0x2652   :  { %v4907_v13 = vsub.f32 %v9452_v27, %v4905_v33  ;;  %v4908_v17 = vmul.f32 %v4906_v31, %v4906_v31 }
0x2654   :  { %v4910_v5 = vsel %vm4133_vm11, %v4908_v17, 0.0  ;;  %v4909_v28 = vmul.f32 %v4907_v13, %v4907_v13 }
0x2655   :  { %4911 = vadd.xlane.f32.xlu0 %v4910_v5 }
0x2656   :  { %v4913_v26 = vsel %vm4133_vm11, %v4909_v28, 0.0 }
0x2659   :  { %4914 = vadd.xlane.f32.xlu0 %v4913_v26 }
0x26e2   :  { %v4912_v45 = vpop.xlane.xlu0 %4911 }
0x26e3   :  { %v4916_v42 = vmul.f32 0.015625, %v4912_v45 }
0x26e5   :  { %v4918_v55 = vadd.f32 1e-05, %v4916_v42 }
0x26e6   :  { %v4915_v61 = vpop.xlane.xlu0 %4914 }
0x26e7   :  { %7932 = vrsqrt.f32 %v4918_v55  ;;  %v4917_v18 = vmul.f32 0.015625, %v4915_v61 }
0x26e9   :  { %v4919_v15 = vadd.f32 1e-05, %v4917_v18 }
0x26eb   :  { %7934 = vrsqrt.f32 %v4919_v15 }
0x26f1   :  { %v7933_v60 = vpop.eup %7932 }
0x26f2   :  { %v4922_v10 = vmul.f32 %v7933_v60, %v4906_v31 }
0x26f4   :  { %v4924_v46 = vmul.f32 %v4922_v10, %v4896_v3 }
0x26f5   :  { %v7935_v4 = vpop.eup %7934 }
0x26f6   :  { %v4923_v57 = vmul.f32 %v7935_v4, %v4907_v13  ;;  %v4926_v53 = vadd.f32 %v4924_v46, %v4897_v7 }
0x26f8   :  { %v4925_v21 = vmul.f32 %v4923_v57, %v4896_v3 }
0x26fa   :  { %v4927_v54 = vadd.f32 %v4925_v21, %v4897_v7 }
0x26fc   :  { %v4928_v49 = vpack.c.bf16 %v4927_v54, %v4926_v53 }
0x26fe   :  { %6674 = vmatmul.mubr.msk.bf16.vlgmr.msra.gmra.mrb[120].mxu1 %vm4133_vm11, %v4928_v49  ;;  %v5102_v49 = vld [vmem:[%s9672_s3 + $0xb0] ss:$0 sm:$0xff] }
0x26ff   :  { %5376 = vmatprep.mubr.bf16.mxu1 %v8067_v58 }
0x27d1   :  { %v5027_v59 = vpop.f32.mrb[120].mxu1 }
0x27d2   :  { %v5028_v50 = vadd.f32 %v5027_v59, %v4943_v2  ;;  %v5029_v9 = vpop.f32.mrb[121].mxu1 }
0x27d3   :  { %v5030_v11 = vadd.f32 %v5029_v9, %v4947_v34  ;;  %v5031_v31 = vpop.f32.mrb[122].mxu1 }
0x27d4   :  { %v6675_v33 = vmul.f32 -1.702, %v5028_v50  ;;  %v5032_v13 = vadd.f32 %v5031_v31, %v4943_v2  ;;  %v5033_v17 = vpop.f32.mrb[123].mxu1  ;;  %v7590_v31 = vld [vmem:[#allocation3 + $0x284] ss:$8 sps:$4 sm:$0xff]  }
0x27d5   :  { %v6676_v5 = vmul.f32 -1.702, %v5030_v11  ;;  %v5034_v28 = vadd.f32 %v5033_v17, %v4947_v34  ;;  %5344 = vmatprep.subr.bf16.mxu1 %v7590_v31  ;;  %v7591_v17 = vld [vmem:[#allocation3 + $0x290] ss:$8 sps:$4 sm:$0xff]  }
0x27d6   :  { %v5044_v26 = vmul.f32 1.442695, %v6675_v33  ;;  %v6677_v20 = vmul.f32 -1.702, %v5032_v13  ;;  %v7588_v33 = vld [vmem:[#allocation3 + $0x280] ss:$8 sps:$4 sm:$0xff]  }
0x27d7   :  { %v5046_v37 = vmul.f32 1.442695, %v6676_v5  ;;  %v6678_v22 = vmul.f32 -1.702, %v5034_v28  ;;  %5345 = vmatpush1.bf16.msra.mxu1 %v7588_v33  ;;  %v7596_v5 = vld [vmem:[#allocation3 + $0x2a4] ss:$8 sps:$4 sm:$0xff]  }
0x27d8   :  { %7936 = vpow2.f32 %v5044_v26  ;;  %v5048_v6 = vmul.f32 1.442695, %v6677_v20  ;;  %v7597_v26 = vld [vmem:[#allocation3 + $0x2b0] ss:$8 sps:$4 sm:$0xff]   ;;  %v7599_v20 = vld [vmem:[#allocation3 + $0x2b4] ss:$8 sps:$4 sm:$0xff]  }
0x27d9   :  { %7938 = vpow2.f32 %v5046_v37  ;;  %v5050_v23 = vmul.f32 1.442695, %v6678_v22 }
0x27da   :  { %7940 = vpow2.f32 %v5048_v6 }
0x27db   :  { %7942 = vpow2.f32 %v5050_v23 }
0x27e2   :  { %v7937_v52 = vpop.eup %7936 }
0x27e3   :  { %v7939_v38 = vpop.eup %7938  ;;  %v5052_v12 = vadd.f32 1.0, %v7937_v52 }
0x27e4   :  { %v7941_v45 = vpop.eup %7940  ;;  %v5053_v42 = vadd.f32 1.0, %v7939_v38 }
0x27e5   :  { %v7943_v55 = vpop.eup %7942  ;;  %7944 = vrcp.f32 %v5052_v12  ;;  %v5054_v61 = vadd.f32 1.0, %v7941_v45  ;;  %v5247_v45 = vld [vmem:[%s9672_s3 + $0xc0] ss:$0 sm:$0xff] }
0x27e6   :  { %7946 = vrcp.f32 %v5053_v42  ;;  %v5055_v18 = vadd.f32 1.0, %v7943_v55 }
0x27e7   :  { %7948 = vrcp.f32 %v5054_v61 }
0x27e8   :  { %7950 = vrcp.f32 %v5055_v18 }
0x27ef   :  { %v7945_v15 = vpop.eup %7944 }
0x27f0   :  { %v7947_v60 = vpop.eup %7946  ;;  %v5064_v4 = vmul.f32 %v7945_v15, %v5028_v50  ;;  %v5248_v15 = vld [vmem:[%s9672_s3 + $0xd0] ss:$0 sm:$0xff] }
0x27f1   :  { %v7949_v10 = vpop.eup %7948  ;;  %v5065_v57 = vmul.f32 %v7947_v60, %v5030_v11 }
0x27f2   :  { %v7951_v3 = vpop.eup %7950  ;;  %v5066_v46 = vmul.f32 %v7949_v10, %v5032_v13  ;;  %v7593_v13 = vld [vmem:[#allocation3 + $0x294] ss:$8 sps:$4 sm:$0xff]  }
0x27f3   :  { %v5067_v7 = vmul.f32 %v7951_v3, %v5034_v28  ;;  %5346 = vmatprep.subr.bf16.mxu1 %v7593_v13  ;;  %v7594_v28 = vld [vmem:[#allocation3 + $0x2a0] ss:$8 sps:$4 sm:$0xff]  }
0x27f4   :  { %v5068_v21 = vpack.c.bf16 %v5066_v46, %v5064_v4  ;;  %5347 = vmatpush1.bf16.msra.mxu1 %v7591_v17  ;;  %v6695_v46 = vld [vmem:[%s9672_s3 + $0xe0] ss:$8 sm:$0x3] }
0x27f5   :  { %v5069_v53 = vpack.c.bf16 %v5067_v7, %v5065_v57  ;;  %5348 = vmatprep.subr.bf16.mxu1 %v7596_v5  ;;  %v5294_v57 = vrot.slane %v6695_v46, %v9219_v51  ;;  %v5298_v7 = vrot.slane %v6695_v46, %v9226_v19 }
0x27f7   :  { %5231 = vmatprep.mubr.bf16.mxu0 %v5069_v53 }
0x27f8   :  { %5232 = vmatmul.mubr.bf16.vlgmr.msra.gmra.mrb[120].mxu0 %v5068_v21  ;;  %5349 = vmatpush1.bf16.msra.mxu1 %v7594_v28 }
0x27f9   :  { %7369 = vmatprep.mubr.msk.bf16.mxu0 %vm8058_vm1, %v8057_v48  ;;  %5350 = vmatprep.subr.bf16.mxu1 %v7599_v20 }
0x27fc   :  { %5351 = vmatpush1.bf16.msra.mxu1 %v7597_v26 }
0x27fd   :  { %7355 = vmatprep.subr.bf16.mxu1 %v8057_v48 }
0x28cb   :  { %v6919_v54 = vpop.f32.mrb[120].mxu0 }
0x28cc   :  { %v6920_v62 = vpop.f32.mrb[121].mxu0 }
0x28cd   :  { %v6921_v36 = vadd.f32 %v6920_v62, %v6919_v54  ;;  %v6922_v63 = vpop.f32.mrb[122].mxu0 }
0x28ce   :  { %v6923_v47 = vpop.f32.mrb[123].mxu0 }
0x28cf   :  { %v5234_v40 = vadd.f32 %v6921_v36, %v5102_v49  ;;  %v6924_v44 = vadd.f32 %v6923_v47, %v6922_v63 }
0x28d1   :  { %v5240_v24 = vadd.f32 %v5234_v40, %v9449_v0  ;;  %v5237_v39 = vadd.f32 %v6924_v44, %v5102_v49 }
0x28d3   :  { %v5242_v56 = vmul.f32 %v5240_v24, %v8660_v32  ;;  %v5241_v29 = vadd.f32 %v5237_v39, %v9452_v27 }
0x28d5   :  { %v5243_v35 = vmul.f32 %v5241_v29, %v8660_v32  ;;  %v9488_v43 = vadd.f32 %v5244_v25, %v5242_v56 }
0x28d7   :  { %v5249_v16 = vsel %vm4133_vm11, %v9488_v43, 0.0  ;;  %v9492_v14 = vadd.f32 %v5244_v25, %v5243_v35 }
0x28d8   :  { %5250 = vadd.xlane.f32.xlu1 %v5249_v16 }
0x28d9   :  { %v5252_v0 = vsel %vm4133_vm11, %v9492_v14, 0.0 }
0x28da   :  { %5253 = vadd.xlane.f32.xlu0 %v5252_v0 }
0x2965   :  { %v5251_v1 = vpop.xlane.xlu1 %5250 }
0x2966   :  { %v5255_v8 = vmul.f32 0.015625, %v5251_v1 }
0x2967   :  { %v5254_v2 = vpop.xlane.xlu0 %5253 }
0x2968   :  { %v5257_v34 = vsub.f32 %v9488_v43, %v5255_v8  ;;  %v5256_v27 = vmul.f32 0.015625, %v5254_v2 }
0x296a   :  { %v5258_v32 = vsub.f32 %v9492_v14, %v5256_v27  ;;  %v5259_v59 = vmul.f32 %v5257_v34, %v5257_v34 }
0x296c   :  { %v5261_v50 = vsel %vm4133_vm11, %v5259_v59, 0.0  ;;  %v5260_v9 = vmul.f32 %v5258_v32, %v5258_v32 }
0x296d   :  { %5262 = vadd.xlane.f32.xlu1 %v5261_v50 }
0x296e   :  { %v5264_v11 = vsel %vm4133_vm11, %v5260_v9, 0.0 }
0x296f   :  { %5265 = vadd.xlane.f32.xlu0 %v5264_v11 }
0x29fa   :  { %v5263_v37 = vpop.xlane.xlu1 %5262 }
0x29fb   :  { %v5267_v22 = vmul.f32 0.015625, %v5263_v37 }
0x29fc   :  { %v5266_v6 = vpop.xlane.xlu0 %5265 }
0x29fd   :  { %v5269_v23 = vadd.f32 1e-05, %v5267_v22  ;;  %v5268_v52 = vmul.f32 0.015625, %v5266_v6 }
0x29ff   :  { %7952 = vrsqrt.f32 %v5269_v23  ;;  %v5270_v38 = vadd.f32 1e-05, %v5268_v52 }
0x2a01   :  { %7954 = vrsqrt.f32 %v5270_v38 }
0x2a09   :  { %v7953_v12 = vpop.eup %7952 }
0x2a0a   :  { %v5273_v42 = vmul.f32 %v7953_v12, %v5257_v34 }
0x2a0b   :  { %v7955_v55 = vpop.eup %7954 }
0x2a0c   :  { %v5275_v61 = vmul.f32 %v5273_v42, %v5247_v45  ;;  %v5274_v18 = vmul.f32 %v7955_v55, %v5258_v32 }
0x2a0e   :  { %v5276_v60 = vmul.f32 %v5274_v18, %v5247_v45  ;;  %v5277_v10 = vadd.f32 %v5275_v61, %v5248_v15 }
0x2a10   :  { %v5278_v3 = vadd.f32 %v5276_v60, %v5248_v15 }
0x2a12   :  { %v5279_v4 = vpack.c.bf16 %v5278_v3, %v5277_v10 }
0x2a14   :  { %6704 = vmatmul.mubr.msk.bf16.vlgmr.msra.gmra.mrb[124].mxu1 %vm4133_vm11, %v5279_v4 }
0x2a15   :  { %7357 = vmatprep.mubr.msk.bf16.mxu1 %vm8058_vm1, %v8057_v48 }
0x2ae7   :  { %v5378_v21 = vpop.f32.mrb[124].mxu1 }
0x2ae8   :  { %v5379_v53 = vadd.f32 %v5378_v21, %v5294_v57  ;;  %v5380_v54 = vpop.f32.mrb[125].mxu1 }
0x2ae9   :  { %v5381_v49 = vadd.f32 %v5380_v54, %v5298_v7  ;;  %v5382_v62 = vpop.f32.mrb[126].mxu1 }
0x2aea   :  { %v5387_v36 = vpack.c.bf16 %v5379_v53, %v5379_v53  ;;  %v5383_v63 = vadd.f32 %v5382_v62, %v5294_v57  ;;  %v5384_v47 = vpop.f32.mrb[127].mxu1 }
0x2aeb   :  { %v9515_v40 = vpack.c.bf16 %v5381_v49, %v5381_v49  ;;  %v5385_v44 = vadd.f32 %v5384_v47, %v5298_v7 }
0x2aec   :  { %v5389_v24 = vpack.c.bf16 %v5383_v63, %v5383_v63  ;;  %5392 = vrot.lane.b32.xlu1 %v5387_v36, %s8061_s13 }
0x2aed   :  { %v5521_v39 = vsel %vm4490_vm12, %v9515_v40, 0  ;;  %v9529_v16 = vpack.c.bf16 %v5385_v44, %v5385_v44 }
0x2aee   :  { %5441 = vrot.lane.b32.xlu0 %v5389_v24, %s8061_s13  ;;  %7368 = vmatpush3.bf16.msra.mxu0 %v5521_v39 }
0x2aef   :  { %7379 = vmatprep.subr.bf16.mxu0 %v8057_v48  ;;  %v5567_v0 = vsel %vm4490_vm12, %v9529_v16, 0 }
0x2b5e   :  { %v5393_v25 = vpop.permute.xlu1 %5392 }
0x2b5f   :  { %v5398_v56 = vsel %vm67_vm0, %v5393_v25, 0 }
0x2b60   :  { %7356 = vmatpush3.bf16.xpose.msra.mxu1 %v5398_v56  ;;  %v5442_v29 = vpop.permute.xlu0 %5441 }
0x2b61   :  { %7361 = vmatprep.subr.bf16.mxu1 %v8057_v48  ;;  %v5447_v35 = vsel %vm67_vm0, %v5442_v29, 0 }
0x2b67   :  { %7358 = vmatmul.mubr.msk.bf16.vlgmr.msra.gmra.mrb[128].mxu1 %vm67_vm0, %v5387_v36 }
0x2b68   :  { %7362 = vmatpush3.bf16.xpose.msra.mxu1 %v5447_v35  ;;  %7363 = vmatprep.mubr.msk.bf16.mxu1 %vm8058_vm1, %v8057_v48 }
0x2b69   :  { %7373 = vmatprep.subr.bf16.mxu1 %v8057_v48 }
0x2b6f   :  { %7364 = vmatmul.mubr.msk.bf16.vlgmr.msra.gmra.mrb[132].mxu1 %vm67_vm0, %v5389_v24 }
0x2b70   :  { %7374 = vmatpush3.bf16.msra.mxu1 %v5567_v0  ;;  %7375 = vmatprep.mubr.msk.bf16.mxu1 %vm8058_vm1, %v8057_v48 }
0x2b71   :  { %7385 = vmatprep.subr.bf16.mxu1 %v8057_v48 }
0x2c3a   :  { %v5434_v1 = vpop.f32.mrb[128].mxu1 }
0x2c3b   :  { %v5489_v8 = vmul.f32 0.17677669, %v5434_v1  ;;  %v7359_v2 = vpop.f32.mrb[129].mxu1 }
0x2c3c   :  { %v5437_v34 = vpop.f32.mrb[130].mxu1 }
0x2c3d   :  { %v5491_v27 = vadd.f32 %v5489_v8, %v9384_v41  ;;  %v7360_v32 = vpop.f32.mrb[131].mxu1 }
0x2c3f   :  { %v5493_v59 = vsel %vm4462_vm14, %v5491_v27, -inf }
0x2c40   :  { %5494 = vmax.xlane.f32.xlu1 %v5493_v59 }
0x2c42   :  { %v5483_v50 = vpop.f32.mrb[132].mxu1 }
0x2c43   :  { %v5490_v9 = vmul.f32 0.17677669, %v5483_v50  ;;  %v7365_v11 = vpop.f32.mrb[133].mxu1 }
0x2c44   :  { %v5486_v31 = vpop.f32.mrb[134].mxu1 }
0x2c45   :  { %v5492_v33 = vadd.f32 %v5490_v9, %v9384_v41  ;;  %v7366_v13 = vpop.f32.mrb[135].mxu1 }
0x2c47   :  { %v5496_v17 = vsel %vm4462_vm14, %v5492_v33, -inf }
0x2c48   :  { %5497 = vmax.xlane.f32.xlu0 %v5496_v17 }
0x2c51   :  { %5611 = vrot.lane.b32.xlu1 %v5387_v36, %s8068_s11 }
0x2ccd   :  { %v5495_v5 = vpop.xlane.xlu1 %5494 }
0x2cce   :  { %v5499_v28 = vsub.f32 %v5491_v27, %v5495_v5 }
0x2cd0   :  { %v5501_v26 = vmul.f32 1.442695, %v5499_v28 }
0x2cd1   :  { %v5612_v12 = vpop.permute.xlu1 %5611 }
0x2cd2   :  { %7956 = vpow2.f32 %v5501_v26  ;;  %v5617_v15 = vsel %vm67_vm0, %v5612_v12, 0 }
0x2cd5   :  { %v5498_v20 = vpop.xlane.xlu0 %5497 }
0x2cd6   :  { %v5500_v37 = vsub.f32 %v5492_v33, %v5498_v20 }
0x2cd8   :  { %v5503_v22 = vmul.f32 1.442695, %v5500_v37 }
0x2cda   :  { %7958 = vpow2.f32 %v5503_v22 }
0x2cdc   :  { %v7957_v6 = vpop.eup %7956 }
0x2cdd   :  { %v5505_v23 = vsel %vm4462_vm14, %v7957_v6, 0.0 }
0x2cde   :  { %5506 = vadd.xlane.f32.xlu1 %v5505_v23 }
0x2ce4   :  { %v7959_v52 = vpop.eup %7958 }
0x2ce5   :  { %v5508_v38 = vsel %vm4462_vm14, %v7959_v52, 0.0 }
0x2ce6   :  { %5509 = vadd.xlane.f32.xlu0 %v5508_v38 }
0x2cef   :  { %5609 = vrot.lane.b32.xlu1 %v5387_v36, %s8059_s12 }
0x2cf3   :  { %5659 = vrot.lane.b32.xlu1 %v5389_v24, %s8059_s12 }
0x2cfc   :  { %5661 = vrot.lane.b32.xlu0 %v5389_v24, %s8068_s11 }
0x2d6b   :  { %v5507_v45 = vpop.xlane.xlu1 %5506 }
0x2d6c   :  { %7960 = vrcp.f32 %v5507_v45 }
0x2d6f   :  { %v5610_v46 = vpop.permute.xlu1 %5609 }
0x2d73   :  { %v5510_v42 = vpop.xlane.xlu0 %5509  ;;  %v5660_v7 = vpop.permute.xlu1 %5659 }
0x2d74   :  { %7962 = vrcp.f32 %v5510_v42  ;;  %v7601_v42 = vld [vmem:[#allocation3 + $0x2d0] ss:$8 sps:$4 sm:$0xff]  }
0x2d76   :  { %v7961_v55 = vpop.eup %7960 }
0x2d77   :  { %v5513_v61 = vmul.f32 %v7961_v55, %v7957_v6  ;;  %v5662_v3 = vpop.permute.xlu0 %5661  ;;  %v7602_v55 = vld [vmem:[#allocation3 + $0x2e0] ss:$8 sps:$4 sm:$0xff]  }
0x2d78   :  { %v5667_v57 = vsel %vm67_vm0, %v5662_v3, 0 }
0x2d79   :  { %v5515_v18 = vpack.c.bf16 %v5513_v61, %v5513_v61  ;;  %v7603_v61 = vld [vmem:[#allocation3 + $0x2f0] ss:$8 sps:$4 sm:$0xff]  }
0x2d7b   :  { %7370 = vmatmul.mubr.msk.bf16.vlgmr.msra.gmra.mrb[124].mxu0 %vm4462_vm14, %v5515_v18 }
0x2d7c   :  { %7380 = vmatpush3.bf16.xpose.msra.mxu0 %v5617_v15  ;;  %7381 = vmatprep.mubr.msk.bf16.mxu0 %vm8058_vm1, %v8057_v48 }
0x2d7d   :  { %7391 = vmatprep.subr.bf16.mxu0 %v8057_v48 }
0x2d7e   :  { %v7963_v60 = vpop.eup %7962 }
0x2d7f   :  { %v5514_v10 = vmul.f32 %v7963_v60, %v7959_v52 }
0x2d81   :  { %v5516_v4 = vpack.c.bf16 %v5514_v10, %v5514_v10 }
0x2d83   :  { %7376 = vmatmul.mubr.msk.bf16.vlgmr.msra.gmra.mrb[136].mxu1 %vm4462_vm14, %v5516_v4  ;;  %7382 = vmatmul.mubr.msk.bf16.vlgmr.msra.gmra.mrb[128].mxu0 %vm67_vm0, %v5610_v46 }
0x2d84   :  { %7386 = vmatpush3.bf16.xpose.msra.mxu1 %v5667_v57  ;;  %7387 = vmatprep.mubr.msk.bf16.mxu1 %vm8058_vm1, %v8057_v48 }
0x2d85   :  { %7397 = vmatprep.subr.bf16.mxu1 %v8057_v48  ;;  %7393 = vmatprep.mubr.msk.bf16.mxu0 %vm8058_vm1, %v8057_v48 }
0x2d8b   :  { %7388 = vmatmul.mubr.msk.bf16.vlgmr.msra.gmra.mrb[140].mxu1 %vm67_vm0, %v5660_v7 }
0x2d8c   :  { %7399 = vmatprep.mubr.msk.bf16.mxu1 %vm8058_vm1, %v8057_v48 }
0x2e4e   :  { %v9563_v21 = vpop.f32.mrb[124].mxu0 }
0x2e4f   :  { %v7371_v53 = vpop.f32.mrb[125].mxu0 }
0x2e50   :  { %v5560_v54 = vpop.f32.mrb[126].mxu0 }
0x2e51   :  { %v7372_v49 = vpop.f32.mrb[127].mxu0 }
0x2e56   :  { %v9565_v62 = vpop.f32.mrb[136].mxu1  ;;  %v5653_v36 = vpop.f32.mrb[128].mxu0 }
0x2e57   :  { %v5709_v63 = vmul.f32 0.17677669, %v5653_v36  ;;  %v7377_v47 = vpop.f32.mrb[137].mxu1  ;;  %v7383_v44 = vpop.f32.mrb[129].mxu0 }
0x2e58   :  { %v5606_v24 = vpop.f32.mrb[138].mxu1  ;;  %v5656_v39 = vpop.f32.mrb[130].mxu0  ;;  %v5854_v47 = vld [vmem:[%s9672_s3 + $0xf0] ss:$0 sm:$0xff] }
0x2e59   :  { %v5711_v25 = vadd.f32 %v5709_v63, %v9384_v41  ;;  %v7378_v56 = vpop.f32.mrb[139].mxu1  ;;  %v7384_v29 = vpop.f32.mrb[131].mxu0 }
0x2e5b   :  { %v5713_v35 = vsel %vm4462_vm14, %v5711_v25, -inf }
0x2e5c   :  { %5714 = vmax.xlane.f32.xlu1 %v5713_v35 }
0x2e5e   :  { %v5703_v0 = vpop.f32.mrb[140].mxu1 }
0x2e5f   :  { %v5710_v1 = vmul.f32 0.17677669, %v5703_v0  ;;  %v7389_v8 = vpop.f32.mrb[141].mxu1 }
0x2e60   :  { %v5706_v2 = vpop.f32.mrb[142].mxu1 }
0x2e61   :  { %v5712_v34 = vadd.f32 %v5710_v1, %v9384_v41  ;;  %v7390_v27 = vpop.f32.mrb[143].mxu1 }
0x2e63   :  { %v5716_v32 = vsel %vm4462_vm14, %v5712_v34, -inf }
0x2e64   :  { %5717 = vmax.xlane.f32.xlu0 %v5716_v32 }
0x2e6d   :  { %5738 = vrot.lane.b32.xlu1 %v9515_v40, %s8059_s12 }
0x2ee9   :  { %v5715_v59 = vpop.xlane.xlu1 %5714 }
0x2eea   :  { %v5719_v50 = vsub.f32 %v5711_v25, %v5715_v59 }
0x2eec   :  { %v5721_v9 = vmul.f32 1.442695, %v5719_v50 }
0x2eed   :  { %v5739_v11 = vpop.permute.xlu1 %5738 }
0x2eee   :  { %7964 = vpow2.f32 %v5721_v9  ;;  %v5744_v31 = vsel %vm4490_vm12, %v5739_v11, 0  ;;  %v7606_v9 = vld [vmem:[#allocation3 + $0x304] ss:$8 sps:$4 sm:$0xff]   ;;  %v7604_v11 = vld [vmem:[#allocation3 + $0x300] ss:$8 sps:$4 sm:$0xff]  }
0x2eef   :  { %7392 = vmatpush3.bf16.msra.mxu0 %v5744_v31  ;;  %v7609_v31 = vld [vmem:[#allocation3 + $0x314] ss:$8 sps:$4 sm:$0xff]  }
0x2ef0   :  { %7403 = vmatprep.subr.bf16.mxu0 %v8057_v48 }
0x2ef1   :  { %v5718_v33 = vpop.xlane.xlu0 %5717 }
0x2ef2   :  { %v5720_v13 = vsub.f32 %v5712_v34, %v5718_v33  ;;  %v7607_v33 = vld [vmem:[#allocation3 + $0x310] ss:$8 sps:$4 sm:$0xff]  }
0x2ef4   :  { %v5723_v41 = vmul.f32 1.442695, %v5720_v13  ;;  %v7612_v13 = vld [vmem:[#allocation3 + $0x324] ss:$8 sps:$4 sm:$0xff]  }
0x2ef6   :  { %7966 = vpow2.f32 %v5723_v41  ;;  %v7610_v41 = vld [vmem:[#allocation3 + $0x320] ss:$8 sps:$4 sm:$0xff]  }
0x2ef8   :  { %v7965_v17 = vpop.eup %7964 }
0x2ef9   :  { %v5725_v5 = vsel %vm4462_vm14, %v7965_v17, 0.0 }
0x2efa   :  { %5726 = vadd.xlane.f32.xlu0 %v5725_v5  ;;  %v7615_v5 = vld [vmem:[#allocation3 + $0x334] ss:$8 sps:$4 sm:$0xff]  }
0x2f00   :  { %v7967_v28 = vpop.eup %7966 }
0x2f01   :  { %v5728_v40 = vsel %vm4462_vm14, %v7967_v28, 0.0 }
0x2f02   :  { %5729 = vadd.xlane.f32.xlu0 %v5728_v40 }
0x2f18   :  { %5787 = vrot.lane.b32.xlu0 %v9529_v16, %s8059_s12  ;;  %v7600_v16 = vld [vmem:[#allocation3 + $0x2c0] ss:$8 sps:$4 sm:$0xff]  }
0x2f87   :  { %v5727_v26 = vpop.xlane.xlu0 %5726 }
0x2f88   :  { %7968 = vrcp.f32 %v5727_v26 }
0x2f8f   :  { %v5730_v20 = vpop.xlane.xlu0 %5729 }
0x2f90   :  { %7970 = vrcp.f32 %v5730_v20 }
0x2f92   :  { %v7969_v37 = vpop.eup %7968 }
0x2f93   :  { %v5733_v22 = vmul.f32 %v7969_v37, %v7965_v17  ;;  %v5788_v6 = vpop.permute.xlu0 %5787  ;;  %v7613_v17 = vld [vmem:[#allocation3 + $0x330] ss:$8 sps:$4 sm:$0xff]  }
0x2f94   :  { %v5793_v23 = vsel %vm4490_vm12, %v5788_v6, 0 }
0x2f95   :  { %7398 = vmatpush3.bf16.msra.mxu1 %v5793_v23  ;;  %v5735_v52 = vpack.c.bf16 %v5733_v22, %v5733_v22  ;;  %v5925_v23 = vld [vmem:[%s9672_s3 + $0x100] ss:$0 sm:$0xff] }
0x2f96   :  { %6022 = vmatprep.subr.bf16.mxu1 %v7606_v9 }
0x2f97   :  { %7394 = vmatmul.mubr.msk.bf16.vlgmr.msra.gmra.mrb[132].mxu0 %vm4462_vm14, %v5735_v52 }
0x2f98   :  { %7411 = vmatprep.mubr.msk.bf16.mxu0 %vm8058_vm1, %v8057_v48  ;;  %7404 = vmatpush3.bf16.msra.mxu0 %v7600_v16  ;;  %v5926_v16 = vld [vmem:[%s9672_s3 + $0x110] ss:$0 sm:$0xff] }
0x2f99   :  { %7405 = vmatprep.subr.bf16.mxu0 %v8057_v48 }
0x2f9a   :  { %v7971_v38 = vpop.eup %7970 }
0x2f9b   :  { %v5734_v12 = vmul.f32 %v7971_v38, %v7967_v28 }
0x2f9c   :  { %7406 = vmatpush3.bf16.msra.mxu0 %v7601_v42 }
0x2f9d   :  { %v5736_v45 = vpack.c.bf16 %v5734_v12, %v5734_v12  ;;  %7407 = vmatprep.subr.bf16.mxu0 %v8057_v48 }
0x2f9f   :  { %7400 = vmatmul.mubr.msk.bf16.vlgmr.msra.gmra.mrb[144].mxu1 %vm4462_vm14, %v5736_v45 }
0x2fa0   :  { %6054 = vmatprep.mubr.bf16.mxu1 %v8067_v58  ;;  %7408 = vmatpush3.bf16.msra.mxu0 %v7602_v55 }
0x2fa1   :  { %7409 = vmatprep.subr.bf16.mxu0 %v8057_v48  ;;  %6023 = vmatpush1.bf16.msra.mxu1 %v7604_v11 }
0x2fa2   :  { %6024 = vmatprep.subr.bf16.mxu1 %v7609_v31 }
0x2fa4   :  { %7410 = vmatpush3.bf16.msra.mxu0 %v7603_v61 }
0x2fa5   :  { %6025 = vmatpush1.bf16.msra.mxu1 %v7607_v33 }
0x2fa6   :  { %6026 = vmatprep.subr.bf16.mxu1 %v7612_v13 }
0x2fa9   :  { %6027 = vmatpush1.bf16.msra.mxu1 %v7610_v41 }
0x2faa   :  { %6028 = vmatprep.subr.bf16.mxu1 %v7615_v5 }
0x2fad   :  { %6029 = vmatpush1.bf16.msra.mxu1 %v7613_v17 }
0x2fae   :  { %7415 = vmatprep.subr.bf16.mxu1 %v8057_v48 }
0x306a   :  { %v5780_v18 = vpop.f32.mrb[132].mxu0 }
0x306b   :  { %v7395_v15 = vpop.f32.mrb[133].mxu0 }
0x306c   :  { %v5783_v60 = vpop.f32.mrb[134].mxu0  ;;  %v7616_v15 = vld [vmem:[#allocation3 + $0x3c0] ss:$8 sps:$4 sm:$0xff]  }
0x306d   :  { %v7396_v10 = vpop.f32.mrb[135].mxu0  ;;  %v7617_v60 = vld [vmem:[#allocation3 + $0x340] ss:$8 sps:$4 sm:$0xff]   ;;  %6946 = vmatprep.subr.bf16.mxu0 %v7616_v15 }
0x306e   :  { %v7618_v10 = vld [vmem:[#allocation3 + $0x3d0] ss:$8 sps:$4 sm:$0xff]  }
0x3072   :  { %v5829_v3 = vpop.f32.mrb[144].mxu1 }
0x3073   :  { %v7497_v58 = vpack.i.bf16 %v5829_v3, %v5780_v18  ;;  %v7401_v4 = vpop.f32.mrb[145].mxu1  ;;  %v7619_v3 = vld [vmem:[#allocation3 + $0x350] ss:$8 sps:$4 sm:$0xff]  }
0x3074   :  { %v5832_v46 = vpop.f32.mrb[146].mxu1  ;;  %v7621_v4 = vld [vmem:[#allocation3 + $0x360] ss:$8 sps:$4 sm:$0xff]  }
0x3075   :  { %7498 = vrot.lane.b32.xlu1 %v7497_v58, %s8068_s11  ;;  %v7402_v57 = vpop.f32.mrb[147].mxu1  ;;  %v7620_v58 = vld [vmem:[#allocation3 + $0x3e0] ss:$8 sps:$4 sm:$0xff]   ;;  %v7622_v46 = vld [vmem:[#allocation3 + $0x3f0] ss:$8 sps:$4 sm:$0xff]  }
0x3076   :  { %v7623_v57 = vld [vmem:[#allocation3 + $0x370] ss:$8 sps:$4 sm:$0xff]  }
0x30e7   :  { %v7499_v7 = vpop.permute.xlu1 %7498 }
0x30e8   :  { %v7501_v53 = vunpack.i.h.bf16 %v7499_v7  ;;  %v7500_v54 = vunpack.i.l.bf16 %v7499_v7  ;;  %v7624_v7 = vld [vmem:[#allocation3 + $0x400] ss:$8 sps:$4 sm:$0xff]  }
0x30ea   :  { %v5844_v49 = vsel %vm67_vm0, %v9565_v62, %v7501_v53  ;;  %v5843_v36 = vsel %vm67_vm0, %v9563_v21, %v7500_v54  ;;  %v7625_v53 = vld [vmem:[#allocation3 + $0x380] ss:$8 sps:$4 sm:$0xff]   ;;  %v7626_v54 = vld [vmem:[#allocation3 + $0x410] ss:$8 sps:$4 sm:$0xff]  }
0x30eb   :  { %v5845_v63 = vpack.c.bf16 %v5844_v49, %v5843_v36  ;;  %v7627_v49 = vld [vmem:[#allocation3 + $0x390] ss:$8 sps:$4 sm:$0xff]   ;;  %v7628_v36 = vld [vmem:[#allocation3 + $0x420] ss:$8 sps:$4 sm:$0xff]  }
0x30ed   :  { %7412 = vmatmul.mubr.msk.bf16.vlgmr.msra.gmra.mrb[136].mxu0 %vm4133_vm11, %v5845_v63  ;;  %v7629_v63 = vld [vmem:[#allocation3 + $0x3a0] ss:$8 sps:$4 sm:$0xff]  }
0x30ee   :  { %6947 = vmatpush3.bf16.msra.mxu0 %v7617_v60 }
0x30ef   :  { %6948 = vmatprep.subr.bf16.mxu0 %v7618_v10 }
0x30f2   :  { %6949 = vmatpush3.bf16.msra.mxu0 %v7619_v3 }
0x30f3   :  { %6950 = vmatprep.subr.bf16.mxu0 %v7620_v58 }
0x30f6   :  { %6951 = vmatpush3.bf16.msra.mxu0 %v7621_v4 }
0x30f7   :  { %6952 = vmatprep.subr.bf16.mxu0 %v7622_v46  ;;  %v6405_v46 = vmul.f32 %v9314_v30, %v9314_v30 }
0x30fa   :  { %6953 = vmatpush3.bf16.msra.mxu0 %v7623_v57 }
0x30fb   :  { %6954 = vmatprep.subr.bf16.mxu0 %v7624_v7  ;;  %v6407_v7 = vsel %vm6406_vm2, %v6405_v46, 0.0 }
0x30fe   :  { %6955 = vmatpush3.bf16.msra.mxu0 %v7625_v53 }
0x30ff   :  { %6956 = vmatprep.subr.bf16.mxu0 %v7626_v54 }
0x3102   :  { %6957 = vmatpush3.bf16.msra.mxu0 %v7627_v49 }
0x3103   :  { %6958 = vmatprep.subr.bf16.mxu0 %v7628_v36 }
0x3106   :  { %6959 = vmatpush3.bf16.msra.mxu0 %v7629_v63 }
0x31c0   :  { %v5916_v44 = vpop.f32.mrb[136].mxu0 }
0x31c1   :  { %v5917_v24 = vadd.f32 %v5916_v44, %v5854_v47  ;;  %v7413_v39 = vpop.f32.mrb[137].mxu0  ;;  %v7631_v44 = vld [vmem:[#allocation3 + $0x3b0] ss:$8 sps:$4 sm:$0xff]  }
0x31c2   :  { %v5919_v25 = vpop.f32.mrb[138].mxu0 }
0x31c3   :  { %v9598_v56 = vadd.f32 %v5917_v24, %v9488_v43  ;;  %v5920_v29 = vadd.f32 %v5919_v25, %v5854_v47  ;;  %v7414_v35 = vpop.f32.mrb[139].mxu0  ;;  %v7630_v47 = vld [vmem:[#allocation3 + $0x430] ss:$8 sps:$4 sm:$0xff]   ;;  %v6718_v24 = vld [vmem:[%s9672_s3 + $0x120] ss:$8 sm:$0x3] }
0x31c4   :  { %6960 = vmatprep.subr.bf16.mxu0 %v7630_v47  ;;  %v5972_v39 = vrot.slane %v6718_v24, %v9219_v51  ;;  %v5976_v25 = vrot.slane %v6718_v24, %v9226_v19 }
0x31c5   :  { %v9601_v62 = vadd.f32 %v5920_v29, %v9492_v14  ;;  %v5927_v21 = vsel %vm4133_vm11, %v9598_v56, 0.0  ;;  %6961 = vmatpush3.bf16.msra.mxu0 %v7631_v44 }
0x31c6   :  { %5928 = vadd.xlane.f32.xlu1 %v5927_v21 }
0x31c7   :  { %v5930_v0 = vsel %vm4133_vm11, %v9601_v62, 0.0 }
0x31c8   :  { %5931 = vadd.xlane.f32.xlu0 %v5930_v0 }
0x3253   :  { %v5929_v1 = vpop.xlane.xlu1 %5928 }
0x3254   :  { %v5933_v8 = vmul.f32 0.015625, %v5929_v1 }
0x3255   :  { %v5932_v2 = vpop.xlane.xlu0 %5931 }
0x3256   :  { %v5935_v34 = vsub.f32 %v9598_v56, %v5933_v8  ;;  %v5934_v43 = vmul.f32 0.015625, %v5932_v2 }
0x3258   :  { %v5936_v27 = vsub.f32 %v9601_v62, %v5934_v43  ;;  %v5937_v32 = vmul.f32 %v5935_v34, %v5935_v34 }
0x325a   :  { %v5939_v14 = vsel %vm4133_vm11, %v5937_v32, 0.0  ;;  %v5938_v59 = vmul.f32 %v5936_v27, %v5936_v27 }
0x325b   :  { %5940 = vadd.xlane.f32.xlu0 %v5939_v14 }
0x325c   :  { %v5942_v50 = vsel %vm4133_vm11, %v5938_v59, 0.0 }
0x325d   :  { %5943 = vadd.xlane.f32.xlu1 %v5942_v50 }
0x32e8   :  { %v5941_v28 = vpop.xlane.xlu0 %5940 }
0x32e9   :  { %v5945_v40 = vmul.f32 0.015625, %v5941_v28 }
0x32ea   :  { %v5944_v26 = vpop.xlane.xlu1 %5943 }
0x32eb   :  { %v5947_v20 = vadd.f32 1e-05, %v5945_v40  ;;  %v5946_v37 = vmul.f32 0.015625, %v5944_v26 }
0x32ed   :  { %7972 = vrsqrt.f32 %v5947_v20  ;;  %v5948_v22 = vadd.f32 1e-05, %v5946_v37 }
0x32ef   :  { %7974 = vrsqrt.f32 %v5948_v22 }
0x32f7   :  { %v7973_v6 = vpop.eup %7972 }
0x32f8   :  { %v5951_v52 = vmul.f32 %v7973_v6, %v5935_v34 }
0x32f9   :  { %v7975_v38 = vpop.eup %7974 }
0x32fa   :  { %v5953_v12 = vmul.f32 %v5951_v52, %v5925_v23  ;;  %v5952_v45 = vmul.f32 %v7975_v38, %v5936_v27 }
0x32fc   :  { %v5954_v42 = vmul.f32 %v5952_v45, %v5925_v23  ;;  %v5955_v55 = vadd.f32 %v5953_v12, %v5926_v16 }
0x32fe   :  { %v5956_v61 = vadd.f32 %v5954_v42, %v5926_v16 }
0x3300   :  { %v5957_v18 = vpack.c.bf16 %v5956_v61, %v5955_v55  ;;  %v6131_v55 = vld [vmem:[%s9672_s3 + $0x130] ss:$0 sm:$0xff] }
0x3302   :  { %6727 = vmatmul.mubr.msk.bf16.vlgmr.msra.gmra.mrb[148].mxu1 %vm4133_vm11, %v5957_v18 }
0x3303   :  { %7423 = vmatprep.mubr.msk.bf16.mxu1 %vm8058_vm1, %v8057_v48 }
0x33d5   :  { %v6056_v29 = vpop.f32.mrb[148].mxu1 }
0x33d6   :  { %v6057_v35 = vadd.f32 %v6056_v29, %v5972_v39  ;;  %v6058_v21 = vpop.f32.mrb[149].mxu1  ;;  %v7634_v29 = vld [vmem:[#allocation3 + $0x460] ss:$8 sps:$4 sm:$0xff]  }
0x33d7   :  { %v6059_v0 = vadd.f32 %v6058_v21, %v5976_v25  ;;  %v6060_v1 = vpop.f32.mrb[150].mxu1 }
0x33d8   :  { %v6728_v8 = vmul.f32 -1.702, %v6057_v35  ;;  %v6061_v2 = vadd.f32 %v6060_v1, %v5972_v39  ;;  %v6062_v34 = vpop.f32.mrb[151].mxu1  ;;  %v7632_v39 = vld [vmem:[#allocation3 + $0x440] ss:$8 sps:$4 sm:$0xff]  }
0x33d9   :  { %v6729_v43 = vmul.f32 -1.702, %v6059_v0  ;;  %v6063_v27 = vadd.f32 %v6062_v34, %v5976_v25  ;;  %7416 = vmatpush3.bf16.msra.mxu1 %v7632_v39  ;;  %v7633_v25 = vld [vmem:[#allocation3 + $0x450] ss:$8 sps:$4 sm:$0xff]  }
0x33da   :  { %v6073_v32 = vmul.f32 1.442695, %v6728_v8  ;;  %v6730_v14 = vmul.f32 -1.702, %v6061_v2  ;;  %7417 = vmatprep.subr.bf16.mxu1 %v8057_v48 }
0x33db   :  { %v6075_v59 = vmul.f32 1.442695, %v6729_v43  ;;  %v6731_v50 = vmul.f32 -1.702, %v6063_v27  ;;  %v6271_v43 = vld [vmem:[%s9672_s3 + $0x140] ss:$0 sm:$0xff] }
0x33dc   :  { %7976 = vpow2.f32 %v6073_v32  ;;  %v6077_v9 = vmul.f32 1.442695, %v6730_v14  ;;  %v6272_v14 = vld [vmem:[%s9672_s3 + $0x150] ss:$0 sm:$0xff] }
0x33dd   :  { %7978 = vpow2.f32 %v6075_v59  ;;  %v6079_v51 = vmul.f32 1.442695, %v6731_v50  ;;  %7418 = vmatpush3.bf16.msra.mxu1 %v7633_v25 }
0x33de   :  { %7980 = vpow2.f32 %v6077_v9  ;;  %7419 = vmatprep.subr.bf16.mxu1 %v8057_v48 }
0x33df   :  { %7982 = vpow2.f32 %v6079_v51 }
0x33e1   :  { %7420 = vmatpush3.bf16.msra.mxu1 %v7634_v29 }
0x33e2   :  { %7421 = vmatprep.subr.bf16.mxu1 %v8057_v48 }
0x33e6   :  { %v7977_v19 = vpop.eup %7976 }
0x33e7   :  { %v7979_v11 = vpop.eup %7978  ;;  %v6081_v31 = vadd.f32 1.0, %v7977_v19 }
0x33e8   :  { %v7981_v33 = vpop.eup %7980  ;;  %v6082_v13 = vadd.f32 1.0, %v7979_v11 }
0x33e9   :  { %v7983_v41 = vpop.eup %7982  ;;  %7984 = vrcp.f32 %v6081_v31  ;;  %v6083_v17 = vadd.f32 1.0, %v7981_v33 }
0x33ea   :  { %7986 = vrcp.f32 %v6082_v13  ;;  %v6084_v5 = vadd.f32 1.0, %v7983_v41 }
0x33eb   :  { %7988 = vrcp.f32 %v6083_v17 }
0x33ec   :  { %7990 = vrcp.f32 %v6084_v5 }
0x33f3   :  { %v7985_v28 = vpop.eup %7984 }
0x33f4   :  { %v7987_v40 = vpop.eup %7986  ;;  %v6093_v37 = vmul.f32 %v7985_v28, %v6057_v35  ;;  %v7635_v35 = vld [vmem:[#allocation3 + $0x470] ss:$8 sps:$4 sm:$0xff]  }
0x33f5   :  { %v7989_v26 = vpop.eup %7988  ;;  %v6094_v6 = vmul.f32 %v7987_v40, %v6059_v0  ;;  %7422 = vmatpush3.bf16.msra.mxu1 %v7635_v35 }
0x33f6   :  { %v7991_v20 = vpop.eup %7990  ;;  %v6095_v22 = vmul.f32 %v7989_v26, %v6061_v2  ;;  %7427 = vmatprep.subr.mxu1 %v8057_v48 }
0x33f7   :  { %v6096_v23 = vmul.f32 %v7991_v20, %v6063_v27 }
0x33f8   :  { %v6097_v52 = vpack.c.bf16 %v6095_v22, %v6093_v37 }
0x33f9   :  { %v6098_v38 = vpack.c.bf16 %v6096_v23, %v6094_v6 }
0x33fb   :  { %6260 = vmatprep.mubr.bf16.mxu0 %v6098_v38 }
0x33fc   :  { %6261 = vmatmul.mubr.bf16.vlgmr.msra.gmra.mrb[140].mxu0 %v6097_v52 }
0x34cf   :  { %v6962_v12 = vpop.f32.mrb[140].mxu0 }
0x34d0   :  { %v6963_v45 = vpop.f32.mrb[141].mxu0 }
0x34d1   :  { %v6964_v16 = vadd.f32 %v6963_v45, %v6962_v12  ;;  %v6965_v42 = vpop.f32.mrb[142].mxu0  ;;  %v6489_v45 = vstv %s9674_s5 }
0x34d2   :  { %v6966_v61 = vpop.f32.mrb[143].mxu0 }
0x34d3   :  { %v6967_v18 = vadd.f32 %v6966_v61, %v6965_v42  ;;  %v6263_v15 = vadd.f32 %v6964_v16, %v6131_v55 }
0x34d5   :  { %v6266_v60 = vadd.f32 %v6967_v18, %v6131_v55  ;;  %v6269_v3 = vadd.f32 %v6263_v15, %v9598_v56 }
0x34d7   :  { %v6270_v10 = vadd.f32 %v6266_v60, %v9601_v62 }
0x34d9   :  { %v6275_v58 = vrot.slane %v6270_v10, 7 }
0x34db   :  { %v6276_v4 = vsel %vm3969_vm8, %v6275_v58, %v6269_v3 }
0x34dc   :  { %v6279_v57 = vsel %vm6278_vm15, %v6276_v4, 0.0 }
0x34dd   :  { %6280 = vadd.xlane.f32.xlu0 %v6279_v57 }
0x34e1   :  { %6408 = vadd.xlane.f32.xlu0 %v6407_v7 }
0x356a   :  { %v6281_v53 = vpop.xlane.xlu0 %6280 }
0x356b   :  { %v6282_v54 = vmul.f32 0.015625, %v6281_v53 }
0x356d   :  { %v6284_v49 = vrot.slane %v6282_v54, 1  ;;  %v6287_v36 = vsub.f32 %v6269_v3, %v6282_v54 }
0x356e   :  { %v6409_v8 = vpop.xlane.xlu0 %6408 }
0x356f   :  { %v6288_v62 = vsub.f32 %v6270_v10, %v6284_v49  ;;  %v6289_v56 = vmul.f32 %v6287_v36, %v6287_v36  ;;  %v6410_v34 = vadd.f32 1e-12, %v6409_v8 }
0x3571   :  { %v6290_v63 = vmul.f32 %v6288_v62, %v6288_v62 }
0x3573   :  { %v6293_v47 = vrot.slane %v6290_v63, 7 }
0x3575   :  { %v6294_v44 = vsel %vm3969_vm8, %v6293_v47, %v6289_v56 }
0x3576   :  { %v6296_v24 = vsel %vm6278_vm15, %v6294_v44, 0.0 }
0x3577   :  { %6297 = vadd.xlane.f32.xlu1 %v6296_v24 }
0x3604   :  { %v6298_v21 = vpop.xlane.xlu1 %6297 }
0x3605   :  { %v6299_v0 = vmul.f32 0.015625, %v6298_v21 }
0x3607   :  { %v6300_v1 = vadd.f32 1e-05, %v6299_v0 }
0x3609   :  { %7992 = vrsqrt.f32 %v6300_v1 }
0x360a   :  { %7994 = vrsqrt.f32 %v6410_v34 }
0x3613   :  { %v7993_v2 = vpop.eup %7992 }
0x3614   :  { %v6303_v27 = vrot.slane %v7993_v2, 1  ;;  %v6306_v32 = vmul.f32 %v7993_v2, %v6287_v36  ;;  %v7995_v17 = vpop.eup %7994 }
0x3615   :  { %v6412_v40 = vmul.f32 %v7995_v17, %v9314_v30 }
0x3616   :  { %v6307_v59 = vmul.f32 %v6303_v27, %v6288_v62  ;;  %v6308_v50 = vmul.f32 %v6306_v32, %v6271_v43 }
0x3618   :  { %v6309_v9 = vmul.f32 %v6307_v59, %v6271_v43  ;;  %v6310_v51 = vadd.f32 %v6308_v50, %v6272_v14 }
0x361a   :  { %v6311_v19 = vadd.f32 %v6309_v9, %v6272_v14  ;;  %v6312_v11 = vpack.c.bf16 %v6310_v51, %v6310_v51 }
0x361c   :  { %v6313_v31 = vpack.c.bf16 %v6311_v19, %v6311_v19  ;;  %v6324_v13 = vunpack.c.l.b16 %v6312_v11 }
0x361e   :  { %v6325_v33 = vunpack.c.l.b16 %v6313_v31 }
0x3620   :  { %v6326_v41 = vrot.slane %v6325_v33, 7 }
0x3622   :  { %v6327_v5 = vsel %vm3969_vm8, %v6326_v41, %v6324_v13 }
0x3623   :  { %v6328_v28 = vpack.c.b16 %v6327_v5, %v6327_v5 }
0x3625   :  { %7424 = vmatmul.mubr.msk.bf16.vlgmr.msra.gmra.mrb[152].mxu1 %vm4133_vm11, %v6328_v28 }
0x3626   :  { %7428 = vmatpush3.xpose.msk.msra.mxu1 %vm67_vm0, %v6412_v40  ;;  %7429 = vmatprep.mubr.msk.f32.mxu1 %vm8058_vm1, %v8057_v48  ;;  %vm6491_vm1 = vcmask 25600  }
0x36f8   :  { %v6390_v26 = vpop.f32.mrb[152].mxu1 }
0x36f9   :  { %v6397_v20 = vmul.f32 %v6390_v26, %v6390_v26  ;;  %v7425_v37 = vpop.f32.mrb[153].mxu1 }
0x36fa   :  { %v6393_v22 = vpop.f32.mrb[154].mxu1 }
0x36fb   :  { %v7426_v6 = vpop.f32.mrb[155].mxu1  ;;  %v6399_v23 = vsel %vm6398_vm3, %v6397_v20, 0.0 }
0x36fc   :  { %6400 = vadd.xlane.f32.xlu1 %v6399_v23 }
0x3789   :  { %v6401_v52 = vpop.xlane.xlu1 %6400 }
0x378a   :  { %v6402_v38 = vadd.f32 1e-12, %v6401_v52 }
0x378c   :  { %7996 = vrsqrt.f32 %v6402_v38 }
0x3796   :  { %v7997_v12 = vpop.eup %7996 }
0x3797   :  { %v6404_v30 = vmul.f32 %v7997_v12, %v6390_v26 }
0x3799   :  { %7430 = vmatmul.mubr.msk.f32.vlgmr.msra.gmra.mrb[156].mxu1 %vm67_vm0, %v6404_v30 }
0x386c   :  { %v6485_v48 = vpop.f32.mrb[156].mxu1 }
0x386d   :  { %v6490_v16 = vmul.f32 %v6489_v45, %v6485_v48  ;;  %v7431_v42 = vpop.f32.mrb[157].mxu1 }
0x386f   :  { %6492 = vst.msk [vmem:[#allocation6] sm:$0x3] %vm6491_vm1, %v6490_v16 }
0x3870   :  { %8039 = shalt.err (!%p8036_p12)
}
0x3871   :  { %s8040_s15 = scalar_lea.hbm %s9675_s6, 32 }
0x3872   :  { %p8041_p13 = scmp.ne.s32.totalorder %s9675_s6, %s8040_s15  ;;  %p8044_p0 = scmp.lt.u32.totalorder %s8040_s15, %s9675_s6 }
0x3874   :  { %p8046_p1 = pnand %p8044_p0, %p8041_p13 }
0x3876   :  { %8049 = shalt.err (!%p8046_p1)
}
0x3877   :  { %6502 = dma.vmem_to_hbm [thread:$0]  %s6500_s21, 32, %s9675_s6, [#allocation5]  }
0x3878   :  { %8052 = dma.done.wait [#allocation5], 32  }
0x3879   :  { %8053 = vsyncadd [#allocation5], 4294967264 }
0x387a   :  { %6506 = vsyncpa [#allocation4], 1 }
0x387b   :  { %6507 = vsyncpa [#allocation5], 1 }

</bundles_post_ra>
